<compile_context>
chip_gen: v5e
topology: v5e:2x2
jax: 0.10.0
libtpu: 0.0.40
codegen_flags: <defaults>
</compile_context>

<pallas_src>
import functools

import jax
import jax.numpy as jnp
from jax.experimental import pallas as pl
from jax.experimental.pallas import tpu as pltpu

EPS = 1e-5


def _reflect_pad_into(pad_ref, xc, d, H, W):
    """Write ReflectionPad2d(d) of xc (H, W, C) into pad_ref (H+2d, W+2d, C).

    One interior store, d narrow column stores per side (interior rows), then
    d full padded-row copies per side (corners come along for free).
    """
    pad_ref[d:H + d, d:W + d, :] = xc
    # Left / right columns (reflect about the interior edge columns).
    for q in range(d):
        src = d - q
        pad_ref[d:H + d, q:q + 1, :] = xc[:, src:src + 1, :]
    for q in range(W + d, W + 2 * d):
        src = 2 * W - 2 - q + d
        pad_ref[d:H + d, q:q + 1, :] = xc[:, src:src + 1, :]
    # Top / bottom rows: copy already-padded interior rows (includes corners).
    for p in range(d):
        src = 2 * d - p
        pad_ref[p:p + 1, :, :] = pad_ref[src:src + 1, :, :]
    for p in range(H + d, H + 2 * d):
        src = 2 * (H + d - 1) - p
        pad_ref[p:p + 1, :, :] = pad_ref[src:src + 1, :, :]


def _conv3x3_in(pad_ref, w_ref, H, W, C, d):
    """3x3 dilated VALID conv from a padded VMEM scratch + InstanceNorm2d(affine=False).

    Accumulates 9 per-tap (H*W, C) @ (C, C) matmuls (bf16 operands, f32
    accumulation) into a single f32 accumulator — no im2col slab.
    Conv bias is intentionally absent: bias + InstanceNorm(affine=False)
    cancels exactly (mean absorbs it, variance unchanged).
    Returns the (H*W, C) f32 instance-normalized conv output.
    """
    acc = None
    for dy in range(3):
        for dx in range(3):
            oy, ox = dy * d, dx * d
            tap = pad_ref[oy:oy + H, ox:ox + W, :].reshape(H * W, C)
            part = jnp.dot(tap, w_ref[dy * 3 + dx],
                           preferred_element_type=jnp.float32)
            acc = part if acc is None else acc + part
    # One-pass biased stats over the spatial dim (f32, clamped var >= 0).
    inv_n = 1.0 / (H * W)
    mean = jnp.sum(acc, axis=0, keepdims=True) * inv_n
    ex2 = jnp.sum(acc * acc, axis=0, keepdims=True) * inv_n
    var = jnp.maximum(ex2 - mean * mean, 0.0)
    return (acc - mean) * jax.lax.rsqrt(var + EPS)


def resnet_block_kernel(x_ref, w1_ref, w2_ref, o_ref, pad1_ref, pad2_ref, *,
                        dilation, compute_dtype):
    # x_ref/o_ref: (1, H, W, C) in the caller's dtype
    # w*_ref     : (9, C, C) compute_dtype, tap order (dy, dx)
    # pad*_ref   : VMEM scratch for the two reflection pads, compute_dtype
    _, H, W, C = o_ref.shape
    x = x_ref[0]
    x32 = x.astype(jnp.float32)                       # residual path stays f32
    xc = x.astype(compute_dtype)                      # conv path in bf16

    d = dilation
    # stage 1: ReflectionPad(d) -> Conv3x3(dil=d) -> IN -> ReLU  (all in VMEM)
    _reflect_pad_into(pad1_ref, xc, d, H, W)
    h = _conv3x3_in(pad1_ref, w1_ref, H, W, C, d)     # (H*W, C) f32
    h = jnp.maximum(h, 0.0)
    hc = h.reshape(H, W, C).astype(compute_dtype)

    # stage 2: ReflectionPad(1) -> Conv3x3 -> IN -> residual add
    _reflect_pad_into(pad2_ref, hc, 1, H, W)
    y = _conv3x3_in(pad2_ref, w2_ref, H, W, C, 1)     # (H*W, C) f32
    o_ref[0] = (x32 + y.reshape(H, W, C)).astype(o_ref.dtype)


def _vmem_limit_bytes(est):
    """Per-generation VMEM limit: physical capacity minus headroom."""
    try:
        cap = int(getattr(pltpu.get_tpu_info(), "vmem_capacity_bytes", 0))
    except Exception:
        cap = 0
    if cap <= 0:
        cap = 128 * 1024 * 1024
    usable = int(cap * 0.85)
    return max(min(max(est, 32 * 1024 * 1024), usable), 16 * 1024 * 1024)


def resnet_block_forward_nhwc(x, w1, b1, w2, b2, dilation=1,
                              compute_dtype=jnp.bfloat16):
    """x: (B, H, W, C); w*: (3, 3, Cin, Cout) HWIO; b*: (C,) (unused: IN cancels bias)."""
    del b1, b2  # Conv bias followed by InstanceNorm2d(affine=False) cancels exactly.
    B, H, W, C = x.shape
    d = int(dilation)

    # Per-tap weight layout: (kh, kw, cin, cout) -> (9, C, C), tap order (dy, dx).
    w1_t = w1.reshape(9, C, C).astype(compute_dtype)
    w2_t = w2.reshape(9, C, C).astype(compute_dtype)

    in_bytes = jnp.dtype(x.dtype).itemsize
    cbytes = jnp.dtype(compute_dtype).itemsize
    hwc = H * W * C
    est = (hwc * in_bytes * 4                                  # in/out tiles (dbl-buf)
           + (H + 2 * d) * (W + 2 * d) * C * cbytes            # pad scratch 1
           + (H + 2) * (W + 2) * C * cbytes                    # pad scratch 2
           + hwc * 4 * 5                                       # f32 accs / intermediates
           + hwc * cbytes * 3                                  # bf16 tap temporaries
           + 2 * 9 * C * C * cbytes * 2                        # weights (dbl-buf)
           + (2 << 20))                                        # headroom

    kernel = functools.partial(resnet_block_kernel, dilation=d,
                               compute_dtype=compute_dtype)
    return pl.pallas_call(
        kernel,
        out_shape=jax.ShapeDtypeStruct((B, H, W, C), x.dtype),
        grid=(B,),
        in_specs=[
            pl.BlockSpec((1, H, W, C), lambda b: (b, 0, 0, 0)),
            pl.BlockSpec((9, C, C), lambda b: (0, 0, 0)),
            pl.BlockSpec((9, C, C), lambda b: (0, 0, 0)),
        ],
        out_specs=pl.BlockSpec((1, H, W, C), lambda b: (b, 0, 0, 0)),
        scratch_shapes=[
            pltpu.VMEM((H + 2 * d, W + 2 * d, C), compute_dtype),
            pltpu.VMEM((H + 2, W + 2, C), compute_dtype),
        ],
        compiler_params=pltpu.CompilerParams(
            dimension_semantics=("parallel",),
            vmem_limit_bytes=_vmem_limit_bytes(est)),
    )(x, w1_t, w2_t)


def resnet_block_forward(x_nchw, w1, b1, w2, b2, dilation=1,
                         compute_dtype=jnp.bfloat16):
    """NCHW interface matching the PyTorch module. NHWC callers can use
    resnet_block_forward_nhwc directly and skip both transposes."""
    x = jnp.transpose(x_nchw, (0, 2, 3, 1))
    out = resnet_block_forward_nhwc(x, w1, b1, w2, b2, dilation, compute_dtype)
    return jnp.transpose(out, (0, 3, 1, 2))


def resnet_block_reference(x_nchw, w1, b1, w2, b2, dilation=1):
    """Pure-JAX f32 reference (lax conv, including bias) for correctness checking."""
    x = jnp.transpose(x_nchw, (0, 2, 3, 1)).astype(jnp.float32)
    d = dilation

    def conv(xp, w, b, dil):
        y = jax.lax.conv_general_dilated(
            xp, w, window_strides=(1, 1), padding="VALID",
            rhs_dilation=(dil, dil),
            dimension_numbers=("NHWC", "HWIO", "NHWC"))
        return y + b

    def inorm(y):
        m = jnp.mean(y, axis=(1, 2), keepdims=True)
        v = jnp.mean((y - m) ** 2, axis=(1, 2), keepdims=True)
        return (y - m) * jax.lax.rsqrt(v + EPS)

    xp = jnp.pad(x, ((0, 0), (d, d), (d, d), (0, 0)), mode="reflect")
    h = jnp.maximum(inorm(conv(xp, w1, b1, d)), 0.0)
    hp = jnp.pad(h, ((0, 0), (1, 1), (1, 1), (0, 0)), mode="reflect")
    out = x + inorm(conv(hp, w2, b2, 1))
    return jnp.transpose(out, (0, 3, 1, 2))


if __name__ == "__main__":
    B, C, H, W = 2, 4, 16, 16

    key = jax.random.PRNGKey(0)
    kx, kw1, kb1, kw2, kb2 = jax.random.split(key, 5)

    x = jax.random.normal(kx, (B, C, H, W), dtype=jnp.float32)
    # Conv weights in (kh, kw, cin, cout) layout (deterministic synthetic init).
    w1 = jax.random.normal(kw1, (3, 3, C, C), dtype=jnp.float32) * 0.1
    b1 = jax.random.normal(kb1, (C,), dtype=jnp.float32) * 0.1
    w2 = jax.random.normal(kw2, (3, 3, C, C), dtype=jnp.float32) * 0.1
    b2 = jax.random.normal(kb2, (C,), dtype=jnp.float32) * 0.1

    ok = True
    for dilation in (1, 2):
        out = resnet_block_forward(x, w1, b1, w2, b2, dilation)
        out = jax.block_until_ready(out)
        ref = resnet_block_reference(x, w1, b1, w2, b2, dilation)
        assert out.shape == (B, C, H, W)
        # bf16 matmul operands (f32 accumulation) -> loosened tolerance vs f32 ref.
        err = float(jnp.max(jnp.abs(out - ref)))
        assert jnp.allclose(out, ref, rtol=5e-2, atol=5e-2), (dilation, err)
        ok = ok and True

    if ok:
        print("KERNEL_OK")
</pallas_src>

<mosaic_0001>
module attributes {stable_mosaic.version = 11 : i64} {
  func.func @resnet_block_kernel(%arg0: i32, %arg1: memref<1x16x16x4xf32, #tpu.memory_space<vmem>>, %arg2: memref<9x4x4xbf16, #tpu.memory_space<vmem>>, %arg3: memref<9x4x4xbf16, #tpu.memory_space<vmem>>, %arg4: memref<1x16x16x4xf32, #tpu.memory_space<vmem>>, %arg5: memref<18x18x4xbf16, #tpu.memory_space<vmem>>, %arg6: memref<18x18x4xbf16, #tpu.memory_space<vmem>>) attributes {dimension_semantics = [#tpu.dimension_semantics<parallel>], iteration_bounds = array<i64: 2>, scalar_prefetch = 0 : i64, scratch_operands = 2 : i64, tpu.core_type = #tpu.core_type<tc>, window_params = [{transform_indices = @transform_0, window_bounds = array<i64: 1, 16, 16, 4>}, {pipeline_mode = #tpu.pipeline_mode<synchronous>, transform_indices = @transform_1, window_bounds = array<i64: 9, 4, 4>}, {pipeline_mode = #tpu.pipeline_mode<synchronous>, transform_indices = @transform_2, window_bounds = array<i64: 9, 4, 4>}, {transform_indices = @transform_3, window_bounds = array<i64: 1, 16, 16, 4>}]} {
    %c0 = arith.constant 0 : index
    %c0_0 = arith.constant 0 : index
    %c0_1 = arith.constant 0 : index
    %c0_2 = arith.constant 0 : index
    %0 = vector.load %arg1[%c0, %c0_0, %c0_1, %c0_2] : memref<1x16x16x4xf32, #tpu.memory_space<vmem>>, vector<1x16x16x4xf32>
    %1 = vector.shape_cast %0 : vector<1x16x16x4xf32> to vector<16x16x4xf32>
    %2 = arith.truncf %1 : vector<16x16x4xf32> to vector<16x16x4xbf16>
    %c1 = arith.constant 1 : index
    %c1_3 = arith.constant 1 : index
    %c0_4 = arith.constant 0 : index
    %3 = vector.load %arg5[%c1, %c1_3, %c0_4] : memref<18x18x4xbf16, #tpu.memory_space<vmem>>, vector<16x16x4xbf16>
    tpu.vector_store %arg5[%c1, %c1_3, %c0_4], %2 {strides = array<i32>} : memref<18x18x4xbf16, #tpu.memory_space<vmem>>, vector<16x16x4xbf16>,
    %4 = vector.extract_strided_slice %2 {offsets = [0, 1, 0], sizes = [16, 1, 4], strides = [1, 1, 1]} : vector<16x16x4xbf16> to vector<16x1x4xbf16>
    %c1_5 = arith.constant 1 : index
    %c0_6 = arith.constant 0 : index
    %c0_7 = arith.constant 0 : index
    %5 = vector.load %arg5[%c1_5, %c0_6, %c0_7] : memref<18x18x4xbf16, #tpu.memory_space<vmem>>, vector<16x1x4xbf16>
    tpu.vector_store %arg5[%c1_5, %c0_6, %c0_7], %4 {strides = array<i32>} : memref<18x18x4xbf16, #tpu.memory_space<vmem>>, vector<16x1x4xbf16>,
    %6 = vector.extract_strided_slice %2 {offsets = [0, 14, 0], sizes = [16, 1, 4], strides = [1, 1, 1]} : vector<16x16x4xbf16> to vector<16x1x4xbf16>
    %c1_8 = arith.constant 1 : index
    %c17 = arith.constant 17 : index
    %c0_9 = arith.constant 0 : index
    %7 = vector.load %arg5[%c1_8, %c17, %c0_9] : memref<18x18x4xbf16, #tpu.memory_space<vmem>>, vector<16x1x4xbf16>
    tpu.vector_store %arg5[%c1_8, %c17, %c0_9], %6 {strides = array<i32>} : memref<18x18x4xbf16, #tpu.memory_space<vmem>>, vector<16x1x4xbf16>,
    %c2 = arith.constant 2 : index
    %c0_10 = arith.constant 0 : index
    %c0_11 = arith.constant 0 : index
    %8 = vector.load %arg5[%c2, %c0_10, %c0_11] : memref<18x18x4xbf16, #tpu.memory_space<vmem>>, vector<1x18x4xbf16>
    %c0_12 = arith.constant 0 : index
    %c0_13 = arith.constant 0 : index
    %c0_14 = arith.constant 0 : index
    %9 = vector.load %arg5[%c0_12, %c0_13, %c0_14] : memref<18x18x4xbf16, #tpu.memory_space<vmem>>, vector<1x18x4xbf16>
    tpu.vector_store %arg5[%c0_12, %c0_13, %c0_14], %8 {strides = array<i32>} : memref<18x18x4xbf16, #tpu.memory_space<vmem>>, vector<1x18x4xbf16>,
    %c15 = arith.constant 15 : index
    %c0_15 = arith.constant 0 : index
    %c0_16 = arith.constant 0 : index
    %10 = vector.load %arg5[%c15, %c0_15, %c0_16] : memref<18x18x4xbf16, #tpu.memory_space<vmem>>, vector<1x18x4xbf16>
    %c17_17 = arith.constant 17 : index
    %c0_18 = arith.constant 0 : index
    %c0_19 = arith.constant 0 : index
    %11 = vector.load %arg5[%c17_17, %c0_18, %c0_19] : memref<18x18x4xbf16, #tpu.memory_space<vmem>>, vector<1x18x4xbf16>
    tpu.vector_store %arg5[%c17_17, %c0_18, %c0_19], %10 {strides = array<i32>} : memref<18x18x4xbf16, #tpu.memory_space<vmem>>, vector<1x18x4xbf16>,
    %c0_20 = arith.constant 0 : index
    %c0_21 = arith.constant 0 : index
    %c0_22 = arith.constant 0 : index
    %12 = vector.load %arg5[%c0_20, %c0_21, %c0_22] : memref<18x18x4xbf16, #tpu.memory_space<vmem>>, vector<16x16x4xbf16>
    %13 = vector.shape_cast %12 : vector<16x16x4xbf16> to vector<256x4xbf16>
    %c0_23 = arith.constant 0 : index
    %c0_24 = arith.constant 0 : index
    %c0_25 = arith.constant 0 : index
    %14 = vector.load %arg2[%c0_23, %c0_24, %c0_25] : memref<9x4x4xbf16, #tpu.memory_space<vmem>>, vector<1x4x4xbf16>
    %15 = vector.shape_cast %14 : vector<1x4x4xbf16> to vector<4x4xbf16>
    %cst = arith.constant dense<0.000000e+00> : vector<256x4xf32>
    %16 = tpu.matmul %13, %15, %cst {dimension_numbers = #tpu.dot_dimension_numbers<[1], [0], [0], [1], [0, 0, 1, 1], [], []>} : vector<256x4xbf16>, vector<4x4xbf16>, vector<256x4xf32> -> vector<256x4xf32>
    %c0_26 = arith.constant 0 : index
    %c1_27 = arith.constant 1 : index
    %c0_28 = arith.constant 0 : index
    %17 = vector.load %arg5[%c0_26, %c1_27, %c0_28] : memref<18x18x4xbf16, #tpu.memory_space<vmem>>, vector<16x16x4xbf16>
    %18 = vector.shape_cast %17 : vector<16x16x4xbf16> to vector<256x4xbf16>
    %c1_29 = arith.constant 1 : index
    %c0_30 = arith.constant 0 : index
    %c0_31 = arith.constant 0 : index
    %19 = vector.load %arg2[%c1_29, %c0_30, %c0_31] : memref<9x4x4xbf16, #tpu.memory_space<vmem>>, vector<1x4x4xbf16>
    %20 = vector.shape_cast %19 : vector<1x4x4xbf16> to vector<4x4xbf16>
    %cst_32 = arith.constant dense<0.000000e+00> : vector<256x4xf32>
    %21 = tpu.matmul %18, %20, %cst_32 {dimension_numbers = #tpu.dot_dimension_numbers<[1], [0], [0], [1], [0, 0, 1, 1], [], []>} : vector<256x4xbf16>, vector<4x4xbf16>, vector<256x4xf32> -> vector<256x4xf32>
    %22 = arith.addf %16, %21 : vector<256x4xf32>
    %c0_33 = arith.constant 0 : index
    %c2_34 = arith.constant 2 : index
    %c0_35 = arith.constant 0 : index
    %23 = vector.load %arg5[%c0_33, %c2_34, %c0_35] : memref<18x18x4xbf16, #tpu.memory_space<vmem>>, vector<16x16x4xbf16>
    %24 = vector.shape_cast %23 : vector<16x16x4xbf16> to vector<256x4xbf16>
    %c2_36 = arith.constant 2 : index
    %c0_37 = arith.constant 0 : index
    %c0_38 = arith.constant 0 : index
    %25 = vector.load %arg2[%c2_36, %c0_37, %c0_38] : memref<9x4x4xbf16, #tpu.memory_space<vmem>>, vector<1x4x4xbf16>
    %26 = vector.shape_cast %25 : vector<1x4x4xbf16> to vector<4x4xbf16>
    %cst_39 = arith.constant dense<0.000000e+00> : vector<256x4xf32>
    %27 = tpu.matmul %24, %26, %cst_39 {dimension_numbers = #tpu.dot_dimension_numbers<[1], [0], [0], [1], [0, 0, 1, 1], [], []>} : vector<256x4xbf16>, vector<4x4xbf16>, vector<256x4xf32> -> vector<256x4xf32>
    %28 = arith.addf %22, %27 : vector<256x4xf32>
    %c1_40 = arith.constant 1 : index
    %c0_41 = arith.constant 0 : index
    %c0_42 = arith.constant 0 : index
    %29 = vector.load %arg5[%c1_40, %c0_41, %c0_42] : memref<18x18x4xbf16, #tpu.memory_space<vmem>>, vector<16x16x4xbf16>
    %30 = vector.shape_cast %29 : vector<16x16x4xbf16> to vector<256x4xbf16>
    %c3 = arith.constant 3 : index
    %c0_43 = arith.constant 0 : index
    %c0_44 = arith.constant 0 : index
    %31 = vector.load %arg2[%c3, %c0_43, %c0_44] : memref<9x4x4xbf16, #tpu.memory_space<vmem>>, vector<1x4x4xbf16>
    %32 = vector.shape_cast %31 : vector<1x4x4xbf16> to vector<4x4xbf16>
    %cst_45 = arith.constant dense<0.000000e+00> : vector<256x4xf32>
    %33 = tpu.matmul %30, %32, %cst_45 {dimension_numbers = #tpu.dot_dimension_numbers<[1], [0], [0], [1], [0, 0, 1, 1], [], []>} : vector<256x4xbf16>, vector<4x4xbf16>, vector<256x4xf32> -> vector<256x4xf32>
    %34 = arith.addf %28, %33 : vector<256x4xf32>
    %c1_46 = arith.constant 1 : index
    %c1_47 = arith.constant 1 : index
    %c0_48 = arith.constant 0 : index
    %35 = vector.load %arg5[%c1_46, %c1_47, %c0_48] : memref<18x18x4xbf16, #tpu.memory_space<vmem>>, vector<16x16x4xbf16>
    %36 = vector.shape_cast %35 : vector<16x16x4xbf16> to vector<256x4xbf16>
    %c4 = arith.constant 4 : index
    %c0_49 = arith.constant 0 : index
    %c0_50 = arith.constant 0 : index
    %37 = vector.load %arg2[%c4, %c0_49, %c0_50] : memref<9x4x4xbf16, #tpu.memory_space<vmem>>, vector<1x4x4xbf16>
    %38 = vector.shape_cast %37 : vector<1x4x4xbf16> to vector<4x4xbf16>
    %cst_51 = arith.constant dense<0.000000e+00> : vector<256x4xf32>
    %39 = tpu.matmul %36, %38, %cst_51 {dimension_numbers = #tpu.dot_dimension_numbers<[1], [0], [0], [1], [0, 0, 1, 1], [], []>} : vector<256x4xbf16>, vector<4x4xbf16>, vector<256x4xf32> -> vector<256x4xf32>
    %40 = arith.addf %34, %39 : vector<256x4xf32>
    %c1_52 = arith.constant 1 : index
    %c2_53 = arith.constant 2 : index
    %c0_54 = arith.constant 0 : index
    %41 = vector.load %arg5[%c1_52, %c2_53, %c0_54] : memref<18x18x4xbf16, #tpu.memory_space<vmem>>, vector<16x16x4xbf16>
    %42 = vector.shape_cast %41 : vector<16x16x4xbf16> to vector<256x4xbf16>
    %c5 = arith.constant 5 : index
    %c0_55 = arith.constant 0 : index
    %c0_56 = arith.constant 0 : index
    %43 = vector.load %arg2[%c5, %c0_55, %c0_56] : memref<9x4x4xbf16, #tpu.memory_space<vmem>>, vector<1x4x4xbf16>
    %44 = vector.shape_cast %43 : vector<1x4x4xbf16> to vector<4x4xbf16>
    %cst_57 = arith.constant dense<0.000000e+00> : vector<256x4xf32>
    %45 = tpu.matmul %42, %44, %cst_57 {dimension_numbers = #tpu.dot_dimension_numbers<[1], [0], [0], [1], [0, 0, 1, 1], [], []>} : vector<256x4xbf16>, vector<4x4xbf16>, vector<256x4xf32> -> vector<256x4xf32>
    %46 = arith.addf %40, %45 : vector<256x4xf32>
    %c2_58 = arith.constant 2 : index
    %c0_59 = arith.constant 0 : index
    %c0_60 = arith.constant 0 : index
    %47 = vector.load %arg5[%c2_58, %c0_59, %c0_60] : memref<18x18x4xbf16, #tpu.memory_space<vmem>>, vector<16x16x4xbf16>
    %48 = vector.shape_cast %47 : vector<16x16x4xbf16> to vector<256x4xbf16>
    %c6 = arith.constant 6 : index
    %c0_61 = arith.constant 0 : index
    %c0_62 = arith.constant 0 : index
    %49 = vector.load %arg2[%c6, %c0_61, %c0_62] : memref<9x4x4xbf16, #tpu.memory_space<vmem>>, vector<1x4x4xbf16>
    %50 = vector.shape_cast %49 : vector<1x4x4xbf16> to vector<4x4xbf16>
    %cst_63 = arith.constant dense<0.000000e+00> : vector<256x4xf32>
    %51 = tpu.matmul %48, %50, %cst_63 {dimension_numbers = #tpu.dot_dimension_numbers<[1], [0], [0], [1], [0, 0, 1, 1], [], []>} : vector<256x4xbf16>, vector<4x4xbf16>, vector<256x4xf32> -> vector<256x4xf32>
    %52 = arith.addf %46, %51 : vector<256x4xf32>
    %c2_64 = arith.constant 2 : index
    %c1_65 = arith.constant 1 : index
    %c0_66 = arith.constant 0 : index
    %53 = vector.load %arg5[%c2_64, %c1_65, %c0_66] : memref<18x18x4xbf16, #tpu.memory_space<vmem>>, vector<16x16x4xbf16>
    %54 = vector.shape_cast %53 : vector<16x16x4xbf16> to vector<256x4xbf16>
    %c7 = arith.constant 7 : index
    %c0_67 = arith.constant 0 : index
    %c0_68 = arith.constant 0 : index
    %55 = vector.load %arg2[%c7, %c0_67, %c0_68] : memref<9x4x4xbf16, #tpu.memory_space<vmem>>, vector<1x4x4xbf16>
    %56 = vector.shape_cast %55 : vector<1x4x4xbf16> to vector<4x4xbf16>
    %cst_69 = arith.constant dense<0.000000e+00> : vector<256x4xf32>
    %57 = tpu.matmul %54, %56, %cst_69 {dimension_numbers = #tpu.dot_dimension_numbers<[1], [0], [0], [1], [0, 0, 1, 1], [], []>} : vector<256x4xbf16>, vector<4x4xbf16>, vector<256x4xf32> -> vector<256x4xf32>
    %58 = arith.addf %52, %57 : vector<256x4xf32>
    %c2_70 = arith.constant 2 : index
    %c2_71 = arith.constant 2 : index
    %c0_72 = arith.constant 0 : index
    %59 = vector.load %arg5[%c2_70, %c2_71, %c0_72] : memref<18x18x4xbf16, #tpu.memory_space<vmem>>, vector<16x16x4xbf16>
    %60 = vector.shape_cast %59 : vector<16x16x4xbf16> to vector<256x4xbf16>
    %c8 = arith.constant 8 : index
    %c0_73 = arith.constant 0 : index
    %c0_74 = arith.constant 0 : index
    %61 = vector.load %arg2[%c8, %c0_73, %c0_74] : memref<9x4x4xbf16, #tpu.memory_space<vmem>>, vector<1x4x4xbf16>
    %62 = vector.shape_cast %61 : vector<1x4x4xbf16> to vector<4x4xbf16>
    %cst_75 = arith.constant dense<0.000000e+00> : vector<256x4xf32>
    %63 = tpu.matmul %60, %62, %cst_75 {dimension_numbers = #tpu.dot_dimension_numbers<[1], [0], [0], [1], [0, 0, 1, 1], [], []>} : vector<256x4xbf16>, vector<4x4xbf16>, vector<256x4xf32> -> vector<256x4xf32>
    %64 = arith.addf %58, %63 : vector<256x4xf32>
    %cst_76 = arith.constant dense<0.000000e+00> : vector<4xf32>
    %65 = vector.multi_reduction <add>, %64, %cst_76 [0] : vector<256x4xf32> to vector<4xf32>
    %66 = vector.shape_cast %65 : vector<4xf32> to vector<1x4xf32>
    %cst_77 = arith.constant 3.906250e-03 : f32
    %67 = vector.broadcast %cst_77 : f32 to vector<1x4xf32>
    %68 = arith.mulf %66, %67 : vector<1x4xf32>
    %69 = arith.mulf %64, %64 : vector<256x4xf32>
    %cst_78 = arith.constant dense<0.000000e+00> : vector<4xf32>
    %70 = vector.multi_reduction <add>, %69, %cst_78 [0] : vector<256x4xf32> to vector<4xf32>
    %71 = vector.shape_cast %70 : vector<4xf32> to vector<1x4xf32>
    %cst_79 = arith.constant 3.906250e-03 : f32
    %72 = vector.broadcast %cst_79 : f32 to vector<1x4xf32>
    %73 = arith.mulf %71, %72 : vector<1x4xf32>
    %74 = arith.mulf %68, %68 : vector<1x4xf32>
    %75 = arith.subf %73, %74 : vector<1x4xf32>
    %cst_80 = arith.constant 0.000000e+00 : f32
    %76 = vector.broadcast %cst_80 : f32 to vector<1x4xf32>
    %77 = arith.maximumf %75, %76 : vector<1x4xf32>
    %78 = vector.broadcast %68 : vector<1x4xf32> to vector<256x4xf32>
    %79 = arith.subf %64, %78 : vector<256x4xf32>
    %cst_81 = arith.constant 9.99999974E-6 : f32
    %80 = vector.broadcast %cst_81 : f32 to vector<1x4xf32>
    %81 = arith.addf %77, %80 : vector<1x4xf32>
    %82 = math.rsqrt %81 : vector<1x4xf32>
    %83 = vector.broadcast %82 : vector<1x4xf32> to vector<256x4xf32>
    %84 = arith.mulf %79, %83 : vector<256x4xf32>
    %cst_82 = arith.constant 0.000000e+00 : f32
    %85 = vector.broadcast %cst_82 : f32 to vector<256x4xf32>
    %86 = arith.maximumf %84, %85 : vector<256x4xf32>
    %87 = vector.shape_cast %86 : vector<256x4xf32> to vector<16x16x4xf32>
    %88 = arith.truncf %87 : vector<16x16x4xf32> to vector<16x16x4xbf16>
    %c1_83 = arith.constant 1 : index
    %c1_84 = arith.constant 1 : index
    %c0_85 = arith.constant 0 : index
    %89 = vector.load %arg6[%c1_83, %c1_84, %c0_85] : memref<18x18x4xbf16, #tpu.memory_space<vmem>>, vector<16x16x4xbf16>
    tpu.vector_store %arg6[%c1_83, %c1_84, %c0_85], %88 {strides = array<i32>} : memref<18x18x4xbf16, #tpu.memory_space<vmem>>, vector<16x16x4xbf16>,
    %90 = vector.extract_strided_slice %88 {offsets = [0, 1, 0], sizes = [16, 1, 4], strides = [1, 1, 1]} : vector<16x16x4xbf16> to vector<16x1x4xbf16>
    %c1_86 = arith.constant 1 : index
    %c0_87 = arith.constant 0 : index
    %c0_88 = arith.constant 0 : index
    %91 = vector.load %arg6[%c1_86, %c0_87, %c0_88] : memref<18x18x4xbf16, #tpu.memory_space<vmem>>, vector<16x1x4xbf16>
    tpu.vector_store %arg6[%c1_86, %c0_87, %c0_88], %90 {strides = array<i32>} : memref<18x18x4xbf16, #tpu.memory_space<vmem>>, vector<16x1x4xbf16>,
    %92 = vector.extract_strided_slice %88 {offsets = [0, 14, 0], sizes = [16, 1, 4], strides = [1, 1, 1]} : vector<16x16x4xbf16> to vector<16x1x4xbf16>
    %c1_89 = arith.constant 1 : index
    %c17_90 = arith.constant 17 : index
    %c0_91 = arith.constant 0 : index
    %93 = vector.load %arg6[%c1_89, %c17_90, %c0_91] : memref<18x18x4xbf16, #tpu.memory_space<vmem>>, vector<16x1x4xbf16>
    tpu.vector_store %arg6[%c1_89, %c17_90, %c0_91], %92 {strides = array<i32>} : memref<18x18x4xbf16, #tpu.memory_space<vmem>>, vector<16x1x4xbf16>,
    %c2_92 = arith.constant 2 : index
    %c0_93 = arith.constant 0 : index
    %c0_94 = arith.constant 0 : index
    %94 = vector.load %arg6[%c2_92, %c0_93, %c0_94] : memref<18x18x4xbf16, #tpu.memory_space<vmem>>, vector<1x18x4xbf16>
    %c0_95 = arith.constant 0 : index
    %c0_96 = arith.constant 0 : index
    %c0_97 = arith.constant 0 : index
    %95 = vector.load %arg6[%c0_95, %c0_96, %c0_97] : memref<18x18x4xbf16, #tpu.memory_space<vmem>>, vector<1x18x4xbf16>
    tpu.vector_store %arg6[%c0_95, %c0_96, %c0_97], %94 {strides = array<i32>} : memref<18x18x4xbf16, #tpu.memory_space<vmem>>, vector<1x18x4xbf16>,
    %c15_98 = arith.constant 15 : index
    %c0_99 = arith.constant 0 : index
    %c0_100 = arith.constant 0 : index
    %96 = vector.load %arg6[%c15_98, %c0_99, %c0_100] : memref<18x18x4xbf16, #tpu.memory_space<vmem>>, vector<1x18x4xbf16>
    %c17_101 = arith.constant 17 : index
    %c0_102 = arith.constant 0 : index
    %c0_103 = arith.constant 0 : index
    %97 = vector.load %arg6[%c17_101, %c0_102, %c0_103] : memref<18x18x4xbf16, #tpu.memory_space<vmem>>, vector<1x18x4xbf16>
    tpu.vector_store %arg6[%c17_101, %c0_102, %c0_103], %96 {strides = array<i32>} : memref<18x18x4xbf16, #tpu.memory_space<vmem>>, vector<1x18x4xbf16>,
    %c0_104 = arith.constant 0 : index
    %c0_105 = arith.constant 0 : index
    %c0_106 = arith.constant 0 : index
    %98 = vector.load %arg6[%c0_104, %c0_105, %c0_106] : memref<18x18x4xbf16, #tpu.memory_space<vmem>>, vector<16x16x4xbf16>
    %99 = vector.shape_cast %98 : vector<16x16x4xbf16> to vector<256x4xbf16>
    %c0_107 = arith.constant 0 : index
    %c0_108 = arith.constant 0 : index
    %c0_109 = arith.constant 0 : index
    %100 = vector.load %arg3[%c0_107, %c0_108, %c0_109] : memref<9x4x4xbf16, #tpu.memory_space<vmem>>, vector<1x4x4xbf16>
    %101 = vector.shape_cast %100 : vector<1x4x4xbf16> to vector<4x4xbf16>
    %cst_110 = arith.constant dense<0.000000e+00> : vector<256x4xf32>
    %102 = tpu.matmul %99, %101, %cst_110 {dimension_numbers = #tpu.dot_dimension_numbers<[1], [0], [0], [1], [0, 0, 1, 1], [], []>} : vector<256x4xbf16>, vector<4x4xbf16>, vector<256x4xf32> -> vector<256x4xf32>
    %c0_111 = arith.constant 0 : index
    %c1_112 = arith.constant 1 : index
    %c0_113 = arith.constant 0 : index
    %103 = vector.load %arg6[%c0_111, %c1_112, %c0_113] : memref<18x18x4xbf16, #tpu.memory_space<vmem>>, vector<16x16x4xbf16>
    %104 = vector.shape_cast %103 : vector<16x16x4xbf16> to vector<256x4xbf16>
    %c1_114 = arith.constant 1 : index
    %c0_115 = arith.constant 0 : index
    %c0_116 = arith.constant 0 : index
    %105 = vector.load %arg3[%c1_114, %c0_115, %c0_116] : memref<9x4x4xbf16, #tpu.memory_space<vmem>>, vector<1x4x4xbf16>
    %106 = vector.shape_cast %105 : vector<1x4x4xbf16> to vector<4x4xbf16>
    %cst_117 = arith.constant dense<0.000000e+00> : vector<256x4xf32>
    %107 = tpu.matmul %104, %106, %cst_117 {dimension_numbers = #tpu.dot_dimension_numbers<[1], [0], [0], [1], [0, 0, 1, 1], [], []>} : vector<256x4xbf16>, vector<4x4xbf16>, vector<256x4xf32> -> vector<256x4xf32>
    %108 = arith.addf %102, %107 : vector<256x4xf32>
    %c0_118 = arith.constant 0 : index
    %c2_119 = arith.constant 2 : index
    %c0_120 = arith.constant 0 : index
    %109 = vector.load %arg6[%c0_118, %c2_119, %c0_120] : memref<18x18x4xbf16, #tpu.memory_space<vmem>>, vector<16x16x4xbf16>
    %110 = vector.shape_cast %109 : vector<16x16x4xbf16> to vector<256x4xbf16>
    %c2_121 = arith.constant 2 : index
    %c0_122 = arith.constant 0 : index
    %c0_123 = arith.constant 0 : index
    %111 = vector.load %arg3[%c2_121, %c0_122, %c0_123] : memref<9x4x4xbf16, #tpu.memory_space<vmem>>, vector<1x4x4xbf16>
    %112 = vector.shape_cast %111 : vector<1x4x4xbf16> to vector<4x4xbf16>
    %cst_124 = arith.constant dense<0.000000e+00> : vector<256x4xf32>
    %113 = tpu.matmul %110, %112, %cst_124 {dimension_numbers = #tpu.dot_dimension_numbers<[1], [0], [0], [1], [0, 0, 1, 1], [], []>} : vector<256x4xbf16>, vector<4x4xbf16>, vector<256x4xf32> -> vector<256x4xf32>
    %114 = arith.addf %108, %113 : vector<256x4xf32>
    %c1_125 = arith.constant 1 : index
    %c0_126 = arith.constant 0 : index
    %c0_127 = arith.constant 0 : index
    %115 = vector.load %arg6[%c1_125, %c0_126, %c0_127] : memref<18x18x4xbf16, #tpu.memory_space<vmem>>, vector<16x16x4xbf16>
    %116 = vector.shape_cast %115 : vector<16x16x4xbf16> to vector<256x4xbf16>
    %c3_128 = arith.constant 3 : index
    %c0_129 = arith.constant 0 : index
    %c0_130 = arith.constant 0 : index
    %117 = vector.load %arg3[%c3_128, %c0_129, %c0_130] : memref<9x4x4xbf16, #tpu.memory_space<vmem>>, vector<1x4x4xbf16>
    %118 = vector.shape_cast %117 : vector<1x4x4xbf16> to vector<4x4xbf16>
    %cst_131 = arith.constant dense<0.000000e+00> : vector<256x4xf32>
    %119 = tpu.matmul %116, %118, %cst_131 {dimension_numbers = #tpu.dot_dimension_numbers<[1], [0], [0], [1], [0, 0, 1, 1], [], []>} : vector<256x4xbf16>, vector<4x4xbf16>, vector<256x4xf32> -> vector<256x4xf32>
    %120 = arith.addf %114, %119 : vector<256x4xf32>
    %c1_132 = arith.constant 1 : index
    %c1_133 = arith.constant 1 : index
    %c0_134 = arith.constant 0 : index
    %121 = vector.load %arg6[%c1_132, %c1_133, %c0_134] : memref<18x18x4xbf16, #tpu.memory_space<vmem>>, vector<16x16x4xbf16>
    %122 = vector.shape_cast %121 : vector<16x16x4xbf16> to vector<256x4xbf16>
    %c4_135 = arith.constant 4 : index
    %c0_136 = arith.constant 0 : index
    %c0_137 = arith.constant 0 : index
    %123 = vector.load %arg3[%c4_135, %c0_136, %c0_137] : memref<9x4x4xbf16, #tpu.memory_space<vmem>>, vector<1x4x4xbf16>
    %124 = vector.shape_cast %123 : vector<1x4x4xbf16> to vector<4x4xbf16>
    %cst_138 = arith.constant dense<0.000000e+00> : vector<256x4xf32>
    %125 = tpu.matmul %122, %124, %cst_138 {dimension_numbers = #tpu.dot_dimension_numbers<[1], [0], [0], [1], [0, 0, 1, 1], [], []>} : vector<256x4xbf16>, vector<4x4xbf16>, vector<256x4xf32> -> vector<256x4xf32>
    %126 = arith.addf %120, %125 : vector<256x4xf32>
    %c1_139 = arith.constant 1 : index
    %c2_140 = arith.constant 2 : index
    %c0_141 = arith.constant 0 : index
    %127 = vector.load %arg6[%c1_139, %c2_140, %c0_141] : memref<18x18x4xbf16, #tpu.memory_space<vmem>>, vector<16x16x4xbf16>
    %128 = vector.shape_cast %127 : vector<16x16x4xbf16> to vector<256x4xbf16>
    %c5_142 = arith.constant 5 : index
    %c0_143 = arith.constant 0 : index
    %c0_144 = arith.constant 0 : index
    %129 = vector.load %arg3[%c5_142, %c0_143, %c0_144] : memref<9x4x4xbf16, #tpu.memory_space<vmem>>, vector<1x4x4xbf16>
    %130 = vector.shape_cast %129 : vector<1x4x4xbf16> to vector<4x4xbf16>
    %cst_145 = arith.constant dense<0.000000e+00> : vector<256x4xf32>
    %131 = tpu.matmul %128, %130, %cst_145 {dimension_numbers = #tpu.dot_dimension_numbers<[1], [0], [0], [1], [0, 0, 1, 1], [], []>} : vector<256x4xbf16>, vector<4x4xbf16>, vector<256x4xf32> -> vector<256x4xf32>
    %132 = arith.addf %126, %131 : vector<256x4xf32>
    %c2_146 = arith.constant 2 : index
    %c0_147 = arith.constant 0 : index
    %c0_148 = arith.constant 0 : index
    %133 = vector.load %arg6[%c2_146, %c0_147, %c0_148] : memref<18x18x4xbf16, #tpu.memory_space<vmem>>, vector<16x16x4xbf16>
    %134 = vector.shape_cast %133 : vector<16x16x4xbf16> to vector<256x4xbf16>
    %c6_149 = arith.constant 6 : index
    %c0_150 = arith.constant 0 : index
    %c0_151 = arith.constant 0 : index
    %135 = vector.load %arg3[%c6_149, %c0_150, %c0_151] : memref<9x4x4xbf16, #tpu.memory_space<vmem>>, vector<1x4x4xbf16>
    %136 = vector.shape_cast %135 : vector<1x4x4xbf16> to vector<4x4xbf16>
    %cst_152 = arith.constant dense<0.000000e+00> : vector<256x4xf32>
    %137 = tpu.matmul %134, %136, %cst_152 {dimension_numbers = #tpu.dot_dimension_numbers<[1], [0], [0], [1], [0, 0, 1, 1], [], []>} : vector<256x4xbf16>, vector<4x4xbf16>, vector<256x4xf32> -> vector<256x4xf32>
    %138 = arith.addf %132, %137 : vector<256x4xf32>
    %c2_153 = arith.constant 2 : index
    %c1_154 = arith.constant 1 : index
    %c0_155 = arith.constant 0 : index
    %139 = vector.load %arg6[%c2_153, %c1_154, %c0_155] : memref<18x18x4xbf16, #tpu.memory_space<vmem>>, vector<16x16x4xbf16>
    %140 = vector.shape_cast %139 : vector<16x16x4xbf16> to vector<256x4xbf16>
    %c7_156 = arith.constant 7 : index
    %c0_157 = arith.constant 0 : index
    %c0_158 = arith.constant 0 : index
    %141 = vector.load %arg3[%c7_156, %c0_157, %c0_158] : memref<9x4x4xbf16, #tpu.memory_space<vmem>>, vector<1x4x4xbf16>
    %142 = vector.shape_cast %141 : vector<1x4x4xbf16> to vector<4x4xbf16>
    %cst_159 = arith.constant dense<0.000000e+00> : vector<256x4xf32>
    %143 = tpu.matmul %140, %142, %cst_159 {dimension_numbers = #tpu.dot_dimension_numbers<[1], [0], [0], [1], [0, 0, 1, 1], [], []>} : vector<256x4xbf16>, vector<4x4xbf16>, vector<256x4xf32> -> vector<256x4xf32>
    %144 = arith.addf %138, %143 : vector<256x4xf32>
    %c2_160 = arith.constant 2 : index
    %c2_161 = arith.constant 2 : index
    %c0_162 = arith.constant 0 : index
    %145 = vector.load %arg6[%c2_160, %c2_161, %c0_162] : memref<18x18x4xbf16, #tpu.memory_space<vmem>>, vector<16x16x4xbf16>
    %146 = vector.shape_cast %145 : vector<16x16x4xbf16> to vector<256x4xbf16>
    %c8_163 = arith.constant 8 : index
    %c0_164 = arith.constant 0 : index
    %c0_165 = arith.constant 0 : index
    %147 = vector.load %arg3[%c8_163, %c0_164, %c0_165] : memref<9x4x4xbf16, #tpu.memory_space<vmem>>, vector<1x4x4xbf16>
    %148 = vector.shape_cast %147 : vector<1x4x4xbf16> to vector<4x4xbf16>
    %cst_166 = arith.constant dense<0.000000e+00> : vector<256x4xf32>
    %149 = tpu.matmul %146, %148, %cst_166 {dimension_numbers = #tpu.dot_dimension_numbers<[1], [0], [0], [1], [0, 0, 1, 1], [], []>} : vector<256x4xbf16>, vector<4x4xbf16>, vector<256x4xf32> -> vector<256x4xf32>
    %150 = arith.addf %144, %149 : vector<256x4xf32>
    %cst_167 = arith.constant dense<0.000000e+00> : vector<4xf32>
    %151 = vector.multi_reduction <add>, %150, %cst_167 [0] : vector<256x4xf32> to vector<4xf32>
    %152 = vector.shape_cast %151 : vector<4xf32> to vector<1x4xf32>
    %cst_168 = arith.constant 3.906250e-03 : f32
    %153 = vector.broadcast %cst_168 : f32 to vector<1x4xf32>
    %154 = arith.mulf %152, %153 : vector<1x4xf32>
    %155 = arith.mulf %150, %150 : vector<256x4xf32>
    %cst_169 = arith.constant dense<0.000000e+00> : vector<4xf32>
    %156 = vector.multi_reduction <add>, %155, %cst_169 [0] : vector<256x4xf32> to vector<4xf32>
    %157 = vector.shape_cast %156 : vector<4xf32> to vector<1x4xf32>
    %cst_170 = arith.constant 3.906250e-03 : f32
    %158 = vector.broadcast %cst_170 : f32 to vector<1x4xf32>
    %159 = arith.mulf %157, %158 : vector<1x4xf32>
    %160 = arith.mulf %154, %154 : vector<1x4xf32>
    %161 = arith.subf %159, %160 : vector<1x4xf32>
    %cst_171 = arith.constant 0.000000e+00 : f32
    %162 = vector.broadcast %cst_171 : f32 to vector<1x4xf32>
    %163 = arith.maximumf %161, %162 : vector<1x4xf32>
    %164 = vector.broadcast %154 : vector<1x4xf32> to vector<256x4xf32>
    %165 = arith.subf %150, %164 : vector<256x4xf32>
    %cst_172 = arith.constant 9.99999974E-6 : f32
    %166 = vector.broadcast %cst_172 : f32 to vector<1x4xf32>
    %167 = arith.addf %163, %166 : vector<1x4xf32>
    %168 = math.rsqrt %167 : vector<1x4xf32>
    %169 = vector.broadcast %168 : vector<1x4xf32> to vector<256x4xf32>
    %170 = arith.mulf %165, %169 : vector<256x4xf32>
    %171 = vector.shape_cast %170 : vector<256x4xf32> to vector<16x16x4xf32>
    %172 = arith.addf %1, %171 : vector<16x16x4xf32>
    %c0_173 = arith.constant 0 : index
    %c0_174 = arith.constant 0 : index
    %c0_175 = arith.constant 0 : index
    %c0_176 = arith.constant 0 : index
    %173 = vector.load %arg4[%c0_173, %c0_174, %c0_175, %c0_176] : memref<1x16x16x4xf32, #tpu.memory_space<vmem>>, vector<1x16x16x4xf32>
    %174 = vector.shape_cast %173 : vector<1x16x16x4xf32> to vector<16x16x4xf32>
    %175 = vector.shape_cast %172 : vector<16x16x4xf32> to vector<1x16x16x4xf32>
    tpu.vector_store %arg4[%c0_173, %c0_174, %c0_175, %c0_176], %175 {strides = array<i32>} : memref<1x16x16x4xf32, #tpu.memory_space<vmem>>, vector<1x16x16x4xf32>,
    return
  }
  func.func @transform_0(%arg0: i32) -> (i32, i32, i32, i32) {
    %c0_i32 = arith.constant 0 : i32
    %c0_i32_0 = arith.constant 0 : i32
    %c0_i32_1 = arith.constant 0 : i32
    %c0_i32_2 = arith.constant 0 : i32
    return %arg0, %c0_i32, %c0_i32_0, %c0_i32_1 : i32, i32, i32, i32
  }
  func.func @transform_1(%arg0: i32) -> (i32, i32, i32) {
    %c0_i32 = arith.constant 0 : i32
    %c0_i32_0 = arith.constant 0 : i32
    %c0_i32_1 = arith.constant 0 : i32
    %c0_i32_2 = arith.constant 0 : i32
    return %c0_i32, %c0_i32_0, %c0_i32_1 : i32, i32, i32
  }
  func.func @transform_2(%arg0: i32) -> (i32, i32, i32) {
    %c0_i32 = arith.constant 0 : i32
    %c0_i32_0 = arith.constant 0 : i32
    %c0_i32_1 = arith.constant 0 : i32
    %c0_i32_2 = arith.constant 0 : i32
    return %c0_i32, %c0_i32_0, %c0_i32_1 : i32, i32, i32
  }
  func.func @transform_3(%arg0: i32) -> (i32, i32, i32, i32) {
    %c0_i32 = arith.constant 0 : i32
    %c0_i32_0 = arith.constant 0 : i32
    %c0_i32_1 = arith.constant 0 : i32
    %c0_i32_2 = arith.constant 0 : i32
    return %arg0, %c0_i32, %c0_i32_0, %c0_i32_1 : i32, i32, i32, i32
  }
}

</mosaic_0001>

<bundles_post_ra>
// kernel: tpu_custom_call.1
= control target key start
LH: loop header
LB: loop body
LE: loop exit
PB: predicated region body
PF: predicated region fallthrough
CT: control target
= control target key end

     0   :  { %s11107_s12 = smov 0   ;;  %s15573_s0 = inlined_call_operand.vmem [shape: f32[2,16,16,4], index: 0, kind: input, shape index: {}]   ;;  %s15574_s1 = inlined_call_operand.vmem [shape: bf16[9,4,4], index: 1, kind: input, shape index: {}]   ;;  %s15575_s2 = inlined_call_operand.vmem [shape: bf16[9,4,4], index: 2, kind: input, shape index: {}]   ;;  %s15576_s3 = inlined_call_operand.vmem [shape: f32[2,16,16,4], index: 3, kind: output, shape index: {}]  }
   0x1 LB: > { %s10020_s13 = sadd.s32 4294967295, %s11085_s12   ;;  %p10024_p0 = scmp.ge.s32.totalorder %s11085_s12, 1  ;;  %s11085_s12 = sphi %s11107_s12, %s13_s12  }
   0x2   : > { %p137_p1 = scmp.lt.s32.totalorder %s11085_s12, 3 }
   0x4   : > { %p138_p2 = pnand %p10024_p0, %p137_p1 }
   0x6   : > { %141 = sbr.rel (%p138_p2) target bundleno = 1976 (0x7b8), region = 32 }
   0xb   : > { %v919_v0 = vld [vmem:[%s15574_s1] sm:$0x3]  ;;  %vm1422_vm0 = vcmask 1041408   ;;  %p161_p3 = scmp.lt.s32.totalorder %s10020_s13, 1  ;;  %v10061_v2 = vld [vmem:[%s15574_s1 + $0x2] sm:$0x3] }
   0xc   : > { %v1644_v1 = vsel %vm1422_vm0, %v919_v0, 0  ;;  %v1424_v3 = vsel %vm1422_vm0, %v10061_v2, 0  ;;  %vm236_vm1 = vsmask.f32 256  ;;  %vm237_vm2 = vsmask.f32 4368 }
   0xd   : > { %10978 = vmatpush.bf16.msra.mxu3 %v1644_v1  ;;  %s15952_s13 = smov (!%p161_p3, %s10020_s13), 1  ;;  %1653 = vmatpush.bf16.msra.mxu1 %v1644_v1  ;;  %vm560_vm3 = vcmask 27648   ;;  %vm561_vm4 = vsmask.f32 7938  ;;  %vm568_vm5 = vcmask 24576   ;;  %vm11155_vm6 = vmor %vm236_vm1, %vm237_vm2  ;;  %v15650_v19 = vmov 0 }
   0xe   : > { %s10879_s18 = sshll.u32 %s15952_s13, 8  ;;  %10977 = vmatpush.bf16.msra.mxu2 %v1424_v3  ;;  %1433 = vmatpush.bf16.msra.mxu0 %v1424_v3  ;;  %v15651_v19 = vsel %vm11155_vm6, 4294967295, %v15650_v19  ;;  %vm11167_vm7 = vmand %vm560_vm3, %vm561_vm4  ;;  %v15653_v26 = vmov 0  ;;  %v615_v27 = vld [vmem:[#allocation2 + $0x60] sm:$0xf]  ;;  %v15656_v28 = vmov 0 }
   0xf   : > { %s11131_s21 = scalar_lea.vmem %s15573_s0, %s10879_s18  ;;  %15652 = vst [vmem:[#allocation4_spill] sm:$0xff] %v15651_v19  ;;  %v15654_v26 = vsel %vm11167_vm7, 4294967295, %v15653_v26  ;;  %vm11173_vm8 = vmand %vm568_vm5, %vm236_vm1  ;;  %v619_v29 = vld [vmem:[#allocation2 + $0x68] sm:$0x1]  ;;  %v573_v38 = vld [vmem:[#allocation2 + $0x18] sm:$0xf]  ;;  %s15437_s6 = scalar_lea.vmem %s15576_s3, %s10879_s18 }
  0x10   : > { %v186_v4 = vld [vmem:[%s11131_s21 + $0x70] sm:$0xff]  ;;  %v187_v5 = vld [vmem:[%s11131_s21 + $0x78] sm:$0xff]  ;;  %v188_v10 = vld [vmem:[%s11131_s21 + $0x80] sm:$0xff]  ;;  %15655 = vst [vmem:[#allocation5_spill] sm:$0xff] %v15654_v26  ;;  %v15657_v28 = vsel %vm11173_vm8, 4294967295, %v15656_v28  ;;  %vm1373_vm10 = vcmask 31744  }
  0x11   : > { %v11135_v6 = vpack.c.bf16 %v186_v4, %v186_v4  ;;  %v11137_v7 = vpack.c.bf16 %v187_v5, %v187_v5  ;;  %v174_v8 = vld [vmem:[%s11131_s21 + $0x10] sm:$0xff]  ;;  %v175_v9 = vld [vmem:[%s11131_s21 + $0x18] sm:$0xff]  ;;  %v11146_v13 = vpack.c.bf16 %v188_v10, %v188_v10  ;;  %v189_v18 = vld [vmem:[%s11131_s21 + $0x88] sm:$0xff]  ;;  %15658 = vst [vmem:[#allocation6_spill] sm:$0xff] %v15657_v28  ;;  %vm936_vm11 = vsmask.f32 3328 }
  0x12   : > { %v11142_v11 = vpack.c.bf16 %v174_v8, %v174_v8  ;;  %v11144_v12 = vpack.c.bf16 %v175_v9, %v175_v9  ;;  %v221_v32 = vpack.c.bf16 %v189_v18, %v189_v18  ;;  %v10174_v39 = vld [vmem:[%s15574_s1 + $0x4] sm:$0x3]  ;;  %v10191_v40 = vld [vmem:[%s15574_s1 + $0x6] sm:$0x3]  ;;  %v577_v49 = vld [vmem:[#allocation2 + $0x20] sm:$0x1] }
  0x13   : > { %v359_v14 = vshrl.u32 %v11135_v6, 16  ;;  %v362_v15 = vshll.u32 %v11135_v6, 16  ;;  %v367_v16 = vshrl.u32 %v11137_v7, 16  ;;  %v370_v17 = vshll.u32 %v11137_v7, 16  ;;  %v172_v50 = vld [vmem:[%s11131_s21] sm:$0xff]  ;;  %v173_v51 = vld [vmem:[%s11131_s21 + $0x8] sm:$0xff]  ;;  %vm11225_vm9 = vmand %vm568_vm5, %vm561_vm4 }
  0x14   : > { %v257_v20 = vshrl.u32 %v11142_v11, 16  ;;  %v260_v21 = vshll.u32 %v11142_v11, 16  ;;  %v265_v22 = vshrl.u32 %v11144_v12, 16  ;;  %v268_v23 = vshll.u32 %v11144_v12, 16  ;;  %v190_v55 = vld [vmem:[%s11131_s21 + $0x90] sm:$0xff]  ;;  %v191_v56 = vld [vmem:[%s11131_s21 + $0x98] sm:$0xff] }
  0x15   : > { %v361_v24 = vrot.slane %v359_v14, 7  ;;  %v369_v25 = vrot.slane %v367_v16, 7  ;;  %v376_v33 = vshrl.u32 %v11146_v13, 16  ;;  %v1997_v48 = vsel %vm1422_vm0, %v10174_v39, 0  ;;  %v622_v62 = vld [vmem:[#allocation2 + $0x6c] sm:$0xf] }
  0x16   : > { %v259_v30 = vrot.slane %v257_v20, 7  ;;  %v267_v31 = vrot.slane %v265_v22, 7  ;;  %2006 = vmatpush.bf16.msrb.mxu2 %v1997_v48  ;;  %v2283_v52 = vsel %vm1422_vm0, %v10191_v40, 0  ;;  %v379_v58 = vshll.u32 %v11146_v13, 16  ;;  %v626_v4 = vld [vmem:[#allocation2 + $0x74] sm:$0x1] }
  0x17   : > { %v364_v34 = vor.u32 %v362_v15, %v361_v24  ;;  %v365_v35 = vrot.slane %v361_v24, 4  ;;  %v372_v36 = vor.u32 %v370_v17, %v369_v25  ;;  %v374_v37 = vrot.slane %v369_v25, 4  ;;  %2292 = vmatpush.bf16.msrb.mxu3 %v2283_v52  ;;  %v563_v40 = vld [vmem:[#allocation2 + $0xc] sm:$0xf] }
  0x18   : > { %v262_v41 = vor.u32 %v260_v21, %v259_v30  ;;  %v263_v42 = vrot.slane %v259_v30, 4  ;;  %v270_v43 = vor.u32 %v268_v23, %v267_v31  ;;  %v272_v44 = vrot.slane %v267_v31, 4 }
  0x19   : > { %v373_v45 = vsel %vm11155_vm6, %v365_v35, %v372_v36  ;;  %v616_v46 = vsel %vm11167_vm7, %v364_v34, %v615_v27  ;;  %v620_v47 = vsel %vm11173_vm8, %v374_v37, %v619_v29  ;;  %v378_v57 = vrot.slane %v376_v33, 7 }
  0x1a   : > { %617 = vst [vmem:[#allocation2 + $0x60] sm:$0xf] %v616_v46  ;;  %v271_v53 = vsel %vm11155_vm6, %v263_v42, %v270_v43  ;;  %v574_v54 = vsel %vm11167_vm7, %v262_v41, %v573_v38  ;;  %v384_v59 = vshrl.u32 %v221_v32, 16  ;;  %v387_v60 = vshll.u32 %v221_v32, 16 }
  0x1b   : > { %618 = vst.msk [vmem:[#allocation2 + $0x64] sm:$0xf] %vm560_vm3, %v373_v45  ;;  %v578_v61 = vsel %vm11173_vm8, %v272_v44, %v577_v49  ;;  %v11208_v63 = vpack.c.bf16 %v172_v50, %v172_v50  ;;  %v205_v0 = vpack.c.bf16 %v173_v51, %v173_v51  ;;  %v381_v1 = vor.u32 %v379_v58, %v378_v57 }
  0x1c   : > { %621 = vst [vmem:[#allocation2 + $0x68] sm:$0x1] %v620_v47  ;;  %v382_v2 = vrot.slane %v378_v57, 4  ;;  %v386_v3 = vrot.slane %v384_v59, 7  ;;  %v11210_v5 = vpack.c.bf16 %v190_v55, %v190_v55  ;;  %v10052_v7 = vrot.slane %v370_v17, 11 }
  0x1d   : > { %575 = vst [vmem:[#allocation2 + $0x18] sm:$0xf] %v574_v54  ;;  %v240_v8 = vshrl.u32 %v11208_v63, 16  ;;  %v248_v9 = vshrl.u32 %v205_v0, 16  ;;  %v11214_v10 = vpack.c.bf16 %v191_v56, %v191_v56  ;;  %v10046_v12 = vrot.slane %v268_v23, 11 }
  0x1e   : > { %576 = vst.msk [vmem:[#allocation2 + $0x1c] sm:$0xf] %vm560_vm3, %v271_v53  ;;  %v389_v15 = vor.u32 %v387_v60, %v386_v3  ;;  %v391_v16 = vrot.slane %v386_v3, 4  ;;  %v623_v18 = vsel %vm11167_vm7, %v381_v1, %v622_v62  ;;  %v11218_v21 = vrot.slane %v387_v60, 11  ;;  %v570_v57 = vld [vmem:[#allocation2 + $0x14] sm:$0x1] }
  0x1f   : > { %579 = vst [vmem:[#allocation2 + $0x20] sm:$0x1] %v578_v61  ;;  %v242_v17 = vrot.slane %v240_v8, 7  ;;  %v243_v22 = vshll.u32 %v11208_v63, 16  ;;  %v251_v24 = vshll.u32 %v205_v0, 16  ;;  %v15659_v27 = vmov 0 }
  0x20   : > { %624 = vst [vmem:[#allocation2 + $0x6c] sm:$0xf] %v623_v18  ;;  %v15660_v27 = vsel %vm11225_vm9, 4294967295, %v15659_v27  ;;  %v390_v23 = vsel %vm11155_vm6, %v382_v2, %v389_v15  ;;  %v627_v29 = vsel %vm11173_vm8, %v391_v16, %v626_v4  ;;  %v11233_v30 = vrot.slane %v248_v9, 7  ;;  %v192_v61 = vld [vmem:[%s11131_s21 + $0xa0] sm:$0xff] }
  0x21   : > { %v747_v25 = vld [vmem:[#allocation2 + $0x60] sm:$0x1]  ;;  %15661 = vst [vmem:[#allocation7_spill] sm:$0xff] %v15660_v27  ;;  %v393_v31 = vshrl.u32 %v11210_v5, 16  ;;  %v246_v35 = vrot.slane %v242_v17, 4  ;;  %v401_v36 = vshrl.u32 %v11214_v10, 16  ;;  %v245_v42 = vor.u32 %v243_v22, %v242_v17 }
  0x22   : > { %v748_v32 = vsel %vm11173_vm8, %v359_v14, %v747_v25  ;;  %v904_v34 = vld [vmem:[#allocation2 + $0x64] sm:$0xf]  ;;  %625 = vst.msk [vmem:[#allocation2 + $0x70] sm:$0xf] %vm560_vm3, %v390_v23  ;;  %vm937_vm12 = vsmask.f32 7440  ;;  %v253_v47 = vor.u32 %v251_v24, %v11233_v30  ;;  %v11283_v17 = vpack.c.bf16 %v192_v61, %v192_v61 }
  0x23   : > { %749 = vst [vmem:[#allocation2 + $0x60] sm:$0x1] %v748_v32  ;;  %v844_v37 = vld [vmem:[#allocation2 + $0x68] sm:$0x1]  ;;  %v1141_v38 = vshll.u32 %v904_v34, 16  ;;  %v1145_v39 = vshrl.u32 %v904_v34, 16  ;;  %v564_v56 = vsel %vm11167_vm7, %v245_v42, %v563_v40  ;;  %vm11287_vm13 = vmor %vm936_vm11, %vm937_vm12 }
  0x24   : > { %v845_v41 = vsel %vm11225_vm9, %v10052_v7, %v844_v37  ;;  %v729_v6 = vld [vmem:[#allocation2 + $0x18] sm:$0x1]  ;;  %v10272_v14 = vld [vmem:[%s15574_s1 + $0x8] sm:$0x3]  ;;  %628 = vst [vmem:[#allocation2 + $0x74] sm:$0x1] %v627_v29  ;;  %v254_v59 = vsel %vm11155_vm6, %v246_v35, %v253_v47 }
  0x25   : > { %846 = vst [vmem:[#allocation2 + $0x68] sm:$0x1] %v845_v41  ;;  %v11247_v43 = vrot.slane %v1141_v38, 5  ;;  %v1147_v44 = vrot.slane %v1145_v39, 4  ;;  %v730_v45 = vsel %vm11173_vm8, %v257_v20, %v729_v6  ;;  %v873_v46 = vld [vmem:[#allocation2 + $0x1c] sm:$0xf] }
  0x26   : > { %731 = vst [vmem:[#allocation2 + $0x18] sm:$0x1] %v730_v45  ;;  %v826_v48 = vld [vmem:[#allocation2 + $0x20] sm:$0x1]  ;;  %v2937_v49 = vsel %vm1422_vm0, %v10272_v14, 0  ;;  %v11255_v50 = vrot.slane %v251_v24, 11 }
  0x27   : > { %v827_v51 = vsel %vm11225_vm9, %v10046_v12, %v826_v48  ;;  %876 = vst.msk [vmem:[#allocation2 + $0x4] sm:$0xf] %vm560_vm3, %v873_v46  ;;  %v750_v52 = vld [vmem:[#allocation2 + $0x6c] sm:$0x1]  ;;  %2946 = vmatpush.bf16.msrb.mxu0 %v2937_v49  ;;  %v11262_v11 = vrot.slane %v393_v31, 7  ;;  %v396_v20 = vshll.u32 %v11210_v5, 16  ;;  %v1148_v53 = vor.u32 %v1147_v44, %v11247_v43 }
  0x28   : > { %828 = vst [vmem:[#allocation2 + $0x20] sm:$0x1] %v827_v51  ;;  %v751_v54 = vsel %vm11173_vm8, %v376_v33, %v750_v52  ;;  %v255_v55 = vrot.slane %v11233_v30, 4  ;;  %v403_v60 = vrot.slane %v401_v36, 7  ;;  %v404_v33 = vshll.u32 %v11214_v10, 16 }
  0x29   : > { %752 = vst [vmem:[#allocation2 + $0x6c] sm:$0x1] %v751_v54  ;;  %v906_v58 = vld [vmem:[#allocation2 + $0x70] sm:$0xf]  ;;  %v399_v13 = vrot.slane %v11262_v11, 4  ;;  %v398_v7 = vor.u32 %v396_v20, %v11262_v11  ;;  %v1149_v15 = vrot.slane %v1148_v53, 4 }
  0x2a   : > { %v10889_v62 = vld [vmem:[#allocation2 + $0x60] sm:$0xff]  ;;  %v1165_v1 = vshll.u32 %v906_v58, 16  ;;  %565 = vst [vmem:[#allocation2 + $0xc] sm:$0xf] %v564_v56  ;;  %v629_v9 = vld [vmem:[#allocation2 + $0x78] sm:$0xf]  ;;  %v571_v18 = vsel %vm11173_vm8, %v255_v55, %v570_v57  ;;  %v406_v36 = vor.u32 %v404_v33, %v403_v60 }
  0x2b   : > { %v903_v0 = vld [vmem:[#allocation2 + $0x60] sm:$0xf]  ;;  %v847_v4 = vld [vmem:[#allocation2 + $0x74] sm:$0x1]  ;;  %10150 = vmatmul.msk.bf16.vlgmr.msra.gmra.mxu3 %vm1373_vm10, %v10889_v62  ;;  %v1169_v16 = vshrl.u32 %v906_v58, 16  ;;  %v408_v23 = vrot.slane %v403_v60, 4  ;;  %v630_v44 = vsel %vm11167_vm7, %v398_v7, %v629_v9 }
  0x2c   : > { %v1132_v2 = vshrl.u32 %v903_v0, 16  ;;  %v1135_v3 = vshll.u32 %v903_v0, 16  ;;  %v928_v12 = vld [vmem:[#allocation2 + $0x68] sm:$0x1]  ;;  %567 = vst.msk [vmem:[#allocation2 + $0x10] sm:$0xf] %vm560_vm3, %v254_v59  ;;  %v848_v34 = vsel %vm11225_vm9, %v11218_v21, %v847_v4  ;;  %v407_v57 = vsel %vm11155_vm6, %v399_v13, %v406_v36 }
  0x2d   : > { %v1151_v24 = vshll.u32 %v928_v12, 16  ;;  %v872_v25 = vld [vmem:[#allocation2 + $0x18] sm:$0xf]  ;;  %v633_v29 = vld [vmem:[#allocation2 + $0x80] sm:$0x1]  ;;  %v15662_v30 = vmov 0 }
  0x2e   : > { %v1134_v10 = vrot.slane %v1132_v2, 4  ;;  %v1137_v22 = vrot.slane %v1135_v3, 5  ;;  %v15663_v30 = vsel %vm11287_vm13, 4294967295, %v15662_v30  ;;  %875 = vst.msk [vmem:[#allocation2] sm:$0xf] %vm560_vm3, %v872_v25  ;;  %v11295_v35 = vrot.slane %v1165_v1, 5 }
  0x2f   : > { %15664 = vst [vmem:[#allocation8_spill] sm:$0xff] %v15663_v30  ;;  %v888_v32 = vld [vmem:[#allocation2 + $0x4] sm:$0xf]  ;;  %v11297_v37 = vrot.slane %v404_v33, 11  ;;  %v1153_v39 = vrot.slane %v1151_v24, 5  ;;  %v1171_v42 = vrot.slane %v1169_v16, 4  ;;  %v634_v20 = vsel %vm11173_vm8, %v408_v23, %v633_v29 }
  0x30   : > { %v1138_v38 = vor.u32 %v1137_v22, %v1134_v10  ;;  %v874_v40 = vld [vmem:[#allocation2 + $0x20] sm:$0x1]  ;;  %v949_v41 = vshll.u32 %v888_v32, 16  ;;  %v953_v6 = vshrl.u32 %v888_v32, 16  ;;  %v905_v14 = vld [vmem:[#allocation2 + $0x6c] sm:$0xf] }
  0x31   : > { %878 = vst.msk [vmem:[#allocation2 + $0x8] sm:$0x1] %vm568_vm5, %v874_v40  ;;  %v410_v45 = vshrl.u32 %v11283_v17, 16  ;;  %v1154_v46 = vsel %vm11287_vm13, %v1149_v15, %v1153_v39  ;;  %v1156_v51 = vshrl.u32 %v905_v14, 16  ;;  %v1159_v52 = vshll.u32 %v905_v14, 16  ;;  %v193_v62 = vld [vmem:[%s11131_s21 + $0xa8] sm:$0xff] }
  0x32   : > { %v1139_v21 = vrot.slane %v1138_v38, 4  ;;  %v11305_v47 = vrot.slane %v949_v41, 5  ;;  %v955_v48 = vrot.slane %v953_v6, 4  ;;  %849 = vst [vmem:[#allocation2 + $0x74] sm:$0x1] %v848_v34  ;;  %v1342_v49 = vunpack.c.l.b16 %v1154_v46  ;;  %v10890_v4 = vld [vmem:[#allocation2 + $0x6c] sm:$0xff] }
  0x33   : > { %572 = vst [vmem:[#allocation2 + $0x14] sm:$0x1] %v571_v18  ;;  %v726_v11 = vld [vmem:[#allocation2 + $0xc] sm:$0x1]  ;;  %v890_v56 = vld [vmem:[#allocation2 + $0x10] sm:$0xf]  ;;  %v1172_v1 = vor.u32 %v1171_v42, %v11295_v35  ;;  %v11332_v18 = vpack.c.bf16 %v193_v62, %v193_v62 }
  0x34   : > { %v1144_v53 = vsel %vm11287_vm13, %v1139_v21, %v11247_v43  ;;  %v956_v54 = vor.u32 %v955_v48, %v11305_v47  ;;  %v727_v55 = vsel %vm11173_vm8, %v240_v8, %v726_v11  ;;  %631 = vst [vmem:[#allocation2 + $0x78] sm:$0xf] %v630_v44  ;;  %v1158_v59 = vrot.slane %v1156_v51, 4  ;;  %v11327_v9 = vld [vmem:[#allocation2 + $0x18] sm:$0xf] }
  0x35   : > { %v1341_v58 = vunpack.c.l.b16 %v1144_v53  ;;  %v1161_v60 = vrot.slane %v1159_v52, 5  ;;  %728 = vst [vmem:[#allocation2 + $0xc] sm:$0x1] %v727_v55  ;;  %v973_v61 = vshll.u32 %v890_v56, 16  ;;  %v887_v0 = vld [vmem:[#allocation2] sm:$0xf] }
  0x36   : > { %v10881_v43 = vld [vmem:[#allocation2] sm:$0xff]  ;;  %v977_v33 = vshrl.u32 %v890_v56, 16  ;;  %v11323_v63 = vrot.slane %v410_v45, 7  ;;  %v413_v8 = vshll.u32 %v11283_v17, 16  ;;  %v940_v13 = vshrl.u32 %v887_v0, 16 }
  0x37   : > { %v1365_v2 = vpack.c.b16 %v1342_v49, %v1341_v58  ;;  %v943_v3 = vshll.u32 %v887_v0, 16  ;;  %v1162_v7 = vor.u32 %v1161_v60, %v1158_v59  ;;  %632 = vst.msk [vmem:[#allocation2 + $0x7c] sm:$0xf] %vm560_vm3, %v407_v57  ;;  %10142 = vmatmul.msk.bf16.vlgmr.msra.gmra.mxu1 %vm1373_vm10, %v10881_v43  ;;  %v11330_v15 = vrot.slane %v973_v61, 5  ;;  %v922_v0 = vld [vmem:[#allocation2 + $0x20] sm:$0x1] }
  0x38   : > { %v920_v12 = vld [vmem:[#allocation2 + $0x8] sm:$0x1]  ;;  %v979_v16 = vrot.slane %v977_v33, 4  ;;  %635 = vst [vmem:[#allocation2 + $0x80] sm:$0x1] %v634_v20  ;;  %v942_v10 = vrot.slane %v940_v13, 4  ;;  %v11340_v14 = vor.u32 %v413_v8, %v11323_v63 }
  0x39   : > { %10070 = vmatmul.msk.bf16.vlgmr.msra.gmra.mxu2 %vm1373_vm10, %v1365_v2  ;;  %v945_v22 = vrot.slane %v943_v3, 5  ;;  %v957_v24 = vrot.slane %v956_v54, 4  ;;  %v959_v25 = vshll.u32 %v920_v12, 16  ;;  %v929_v23 = vld [vmem:[#allocation2 + $0x74] sm:$0x1]  ;;  %v1163_v29 = vrot.slane %v1162_v7, 4 }
  0x3a   : > { %v1173_v32 = vrot.slane %v1172_v1, 4  ;;  %v1175_v34 = vshll.u32 %v929_v23, 16  ;;  %v823_v36 = vld [vmem:[#allocation2 + $0x14] sm:$0x1]  ;;  %v980_v38 = vor.u32 %v979_v16, %v11330_v15  ;;  %v988_v48 = vshrl.u32 %v11327_v9, 16 }
  0x3b   : > { %v946_v39 = vor.u32 %v945_v22, %v942_v10  ;;  %v961_v40 = vrot.slane %v959_v25, 5  ;;  %v824_v41 = vsel %vm11225_vm9, %v11255_v50, %v823_v36  ;;  %v753_v6 = vld [vmem:[#allocation2 + $0x78] sm:$0x1]  ;;  %v1168_v42 = vsel %vm11287_vm13, %v1163_v29, %v11295_v35  ;;  %10151 = vmatmul.msk.bf16.gmra.mxu3 %vm1373_vm10, %v10890_v4 }
  0x3c   : > { %v1177_v44 = vrot.slane %v1175_v34, 5  ;;  %825 = vst [vmem:[#allocation2 + $0x14] sm:$0x1] %v824_v41  ;;  %v889_v21 = vld [vmem:[#allocation2 + $0xc] sm:$0xf]  ;;  %v754_v46 = vsel %vm11173_vm8, %v393_v31, %v753_v6  ;;  %v11353_v52 = vrot.slane %v980_v38, 4  ;;  %v1343_v5 = vunpack.c.l.b16 %v1168_v42 }
  0x3d   : > { %v947_v49 = vrot.slane %v946_v39, 4  ;;  %v962_v50 = vsel %vm11287_vm13, %v957_v24, %v961_v40  ;;  %v964_v51 = vshrl.u32 %v889_v21, 16  ;;  %755 = vst [vmem:[#allocation2 + $0x78] sm:$0x1] %v754_v46  ;;  %v967_v20 = vshll.u32 %v889_v21, 16  ;;  %v10882_v12 = vld [vmem:[#allocation2 + $0xc] sm:$0xff] }
  0x3e   : > { %v1326_v35 = vunpack.c.l.b16 %v962_v50  ;;  %v1178_v11 = vsel %vm11287_vm13, %v1173_v32, %v1177_v44  ;;  %v908_v53 = vld [vmem:[#allocation2 + $0x7c] sm:$0xf]  ;;  %v990_v1 = vrot.slane %v988_v48, 4  ;;  %v991_v33 = vshll.u32 %v11327_v9, 16  ;;  %v176_v6 = vld [vmem:[%s11131_s21 + $0x20] sm:$0xff]  ;;  %v177_v48 = vld [vmem:[%s11131_s21 + $0x28] sm:$0xff] }
  0x3f   : > { %v892_v31 = vld [vmem:[#allocation2 + $0x1c] sm:$0xf]  ;;  %v952_v54 = vsel %vm11287_vm13, %v947_v49, %v11305_v47  ;;  %v1344_v55 = vunpack.c.l.b16 %v1178_v11  ;;  %v966_v56 = vrot.slane %v964_v51, 4  ;;  %v850_v57 = vld [vmem:[#allocation2 + $0x80] sm:$0x1]  ;;  %v1189_v58 = vshll.u32 %v908_v53, 16 }
  0x40   : > { %v1325_v59 = vunpack.c.l.b16 %v952_v54  ;;  %v969_v60 = vrot.slane %v967_v20, 5  ;;  %v851_v61 = vsel %vm11225_vm9, %v11297_v37, %v850_v57  ;;  %v1193_v62 = vshrl.u32 %v908_v53, 16  ;;  %v194_v11 = vld [vmem:[%s11131_s21 + $0xb0] sm:$0xff] }
  0x41   : > { %852 = vst [vmem:[#allocation2 + $0x80] sm:$0x1] %v851_v61  ;;  %v11363_v43 = vrot.slane %v1189_v58, 5  ;;  %v997_v8 = vshll.u32 %v892_v31, 16  ;;  %v1001_v3 = vshrl.u32 %v892_v31, 16  ;;  %v1366_v4 = vpack.c.b16 %v1344_v55, %v1343_v5 }
  0x42   : > { %v1357_v47 = vpack.c.b16 %v1326_v35, %v1325_v59  ;;  %v970_v2 = vor.u32 %v969_v60, %v966_v56  ;;  %v1195_v13 = vrot.slane %v1193_v62, 4  ;;  %v993_v16 = vrot.slane %v991_v33, 5  ;;  %v636_v31 = vld [vmem:[#allocation2 + $0x84] sm:$0xf]  ;;  %v640_v58 = vld [vmem:[#allocation2 + $0x8c] sm:$0x1] }
  0x43   : > { %v921_v7 = vld [vmem:[#allocation2 + $0x14] sm:$0x1]  ;;  %v11366_v10 = vrot.slane %v997_v8, 5  ;;  %v1007_v37 = vshll.u32 %v922_v0, 16  ;;  %v1003_v9 = vrot.slane %v1001_v3, 4  ;;  %v418_v23 = vshrl.u32 %v11332_v18, 16 }
  0x44   : > { %10062 = vmatmul.msk.bf16.vlgmr.msra.gmra.mxu0 %vm1373_vm10, %v1357_v47  ;;  %v971_v22 = vrot.slane %v970_v2, 4  ;;  %v983_v24 = vshll.u32 %v921_v7, 16  ;;  %v907_v25 = vld [vmem:[#allocation2 + $0x78] sm:$0xf]  ;;  %v1196_v34 = vor.u32 %v1195_v13, %v11363_v43  ;;  %v994_v36 = vor.u32 %v993_v16, %v990_v1 }
  0x45   : > { %v1180_v29 = vshrl.u32 %v907_v25, 16  ;;  %v1183_v32 = vshll.u32 %v907_v25, 16  ;;  %v1004_v39 = vor.u32 %v1003_v9, %v11366_v10  ;;  %v11372_v40 = vrot.slane %v1007_v37, 5  ;;  %v195_v8 = vld [vmem:[%s11131_s21 + $0xb8] sm:$0xff]  ;;  %v580_v25 = vld [vmem:[#allocation2 + $0x24] sm:$0xf] }
  0x46   : > { %v985_v38 = vrot.slane %v983_v24, 5  ;;  %v416_v41 = vrot.slane %v11323_v63, 4  ;;  %v976_v42 = vsel %vm11287_vm13, %v971_v22, %v11330_v15  ;;  %v995_v46 = vrot.slane %v994_v36, 4  ;;  %v10891_v15 = vld [vmem:[#allocation2 + $0x78] sm:$0xff] }
  0x47   : > { %v1182_v44 = vrot.slane %v1180_v29, 4  ;;  %v1185_v21 = vrot.slane %v1183_v32, 5  ;;  %10143 = vmatmul.msk.bf16.gmra.mxu1 %vm1373_vm10, %v10882_v12  ;;  %v11384_v51 = vrot.slane %v1004_v39, 4  ;;  %v420_v35 = vrot.slane %v418_v23, 7  ;;  %v179_v39 = vld [vmem:[%s11131_s21 + $0x38] sm:$0xff] }
  0x48   : > { %v986_v49 = vsel %vm11287_vm13, %v11353_v52, %v985_v38  ;;  %v930_v50 = vld [vmem:[#allocation2 + $0x80] sm:$0x1]  ;;  %v421_v63 = vshll.u32 %v11332_v18, 16  ;;  %v1197_v20 = vrot.slane %v1196_v34, 4  ;;  %v11389_v54 = vpack.c.bf16 %v176_v6, %v176_v6  ;;  %v584_v6 = vld [vmem:[#allocation2 + $0x2c] sm:$0x1] }
  0x49   : > { %10071 = vmatmul.msk.bf16.gmra.mxu2 %vm1373_vm10, %v1366_v4  ;;  %v1186_v5 = vor.u32 %v1185_v21, %v1182_v44  ;;  %v1199_v53 = vshll.u32 %v930_v50, 16  ;;  %v1327_v52 = vunpack.c.l.b16 %v976_v42  ;;  %v1328_v55 = vunpack.c.l.b16 %v986_v49  ;;  %v178_v4 = vld [vmem:[%s11131_s21 + $0x30] sm:$0xff] }
  0x4a   : > { %v423_v56 = vor.u32 %v421_v63, %v420_v35  ;;  %v425_v57 = vrot.slane %v420_v35, 4  ;;  %v11391_v18 = vpack.c.bf16 %v177_v48, %v177_v48  ;;  %v11393_v61 = vpack.c.bf16 %v194_v11, %v194_v11  ;;  %v10883_v48 = vld [vmem:[#allocation2 + $0x18] sm:$0xff] }
  0x4b   : > { %v1187_v59 = vrot.slane %v1186_v5, 4  ;;  %v1201_v60 = vrot.slane %v1199_v53, 5  ;;  %v1000_v62 = vsel %vm11287_vm13, %v995_v46, %v11366_v10  ;;  %v1010_v0 = vsel %vm11287_vm13, %v11384_v51, %v11372_v40  ;;  %10152 = vmatmul.msk.bf16.gmra.mxu3 %vm1373_vm10, %v10891_v15  ;;  %v196_v46 = vld [vmem:[%s11131_s21 + $0xc0] sm:$0xff] }
  0x4c   : > { %v424_v1 = vsel %vm11155_vm6, %v416_v41, %v423_v56  ;;  %v637_v33 = vsel %vm11167_vm7, %v11340_v14, %v636_v31  ;;  %v641_v13 = vsel %vm11173_vm8, %v425_v57, %v640_v58  ;;  %v274_v3 = vshrl.u32 %v11389_v54, 16  ;;  %v647_v58 = vld [vmem:[#allocation2 + $0x98] sm:$0x1] }
  0x4d   : > { %v1192_v47 = vsel %vm11287_vm13, %v1187_v59, %v11363_v43  ;;  %v1202_v2 = vsel %vm11287_vm13, %v1197_v20, %v1201_v60  ;;  %638 = vst [vmem:[#allocation2 + $0x84] sm:$0xf] %v637_v33  ;;  %v1358_v7 = vpack.c.b16 %v1328_v55, %v1327_v52  ;;  %v277_v16 = vshll.u32 %v11389_v54, 16  ;;  %v587_v33 = vld [vmem:[#allocation2 + $0x30] sm:$0xf] }
  0x4e   : > { %v11418_v12 = vunpack.c.l.b16 %v1192_v47  ;;  %v1346_v14 = vunpack.c.l.b16 %v1202_v2  ;;  %639 = vst.msk [vmem:[#allocation2 + $0x88] sm:$0xf] %vm560_vm3, %v424_v1  ;;  %v276_v43 = vrot.slane %v274_v3, 7  ;;  %v282_v10 = vshrl.u32 %v11391_v18, 16 }
  0x4f   : > { %642 = vst [vmem:[#allocation2 + $0x8c] sm:$0x1] %v641_v13  ;;  %v285_v37 = vshll.u32 %v11391_v18, 16  ;;  %v11426_v22 = vpack.c.bf16 %v195_v8, %v195_v8  ;;  %v11428_v24 = vunpack.c.l.b16 %v1000_v62  ;;  %v427_v9 = vshrl.u32 %v11393_v61, 16 }
  0x50   : > { %v430_v23 = vshll.u32 %v11393_v61, 16  ;;  %v11432_v29 = vpack.c.bf16 %v178_v4, %v178_v4  ;;  %v10055_v32 = vrot.slane %v421_v63, 11  ;;  %v279_v34 = vor.u32 %v277_v16, %v276_v43  ;;  %v643_v63 = vld [vmem:[#allocation2 + $0x90] sm:$0xf] }
  0x51   : > { %v280_v36 = vrot.slane %v276_v43, 4  ;;  %v284_v38 = vrot.slane %v282_v10, 7  ;;  %v1367_v41 = vpack.c.b16 %v1346_v14, %v11418_v12  ;;  %v429_v42 = vrot.slane %v427_v9, 7 }
  0x52   : > { %v435_v44 = vshrl.u32 %v11426_v22, 16  ;;  %v438_v21 = vshll.u32 %v11426_v22, 16  ;;  %v581_v35 = vsel %vm11167_vm7, %v279_v34, %v580_v25  ;;  %v291_v11 = vshrl.u32 %v11432_v29, 16  ;;  %v591_v22 = vld [vmem:[#allocation2 + $0x38] sm:$0x1] }
  0x53   : > { %v287_v49 = vor.u32 %v285_v37, %v284_v38  ;;  %v289_v50 = vrot.slane %v284_v38, 4  ;;  %582 = vst [vmem:[#allocation2 + $0x24] sm:$0xf] %v581_v35  ;;  %v432_v5 = vor.u32 %v430_v23, %v429_v42  ;;  %v433_v20 = vrot.slane %v429_v42, 4  ;;  %v197_v42 = vld [vmem:[%s11131_s21 + $0xc8] sm:$0xff] }
  0x54   : > { %10063 = vmatmul.msk.bf16.gmra.mxu0 %vm1373_vm10, %v1358_v7  ;;  %v756_v15 = vld [vmem:[#allocation2 + $0x84] sm:$0x1]  ;;  %v437_v53 = vrot.slane %v435_v44, 7  ;;  %v211_v31 = vpack.c.bf16 %v179_v39, %v179_v39  ;;  %v11453_v59 = vpack.c.bf16 %v196_v46, %v196_v46  ;;  %v293_v47 = vrot.slane %v291_v11, 7  ;;  %v650_v35 = vld [vmem:[#allocation2 + $0x9c] sm:$0xf] }
  0x55   : > { %v757_v52 = vsel %vm11173_vm8, %v410_v45, %v756_v15  ;;  %v910_v55 = vld [vmem:[#allocation2 + $0x88] sm:$0xf]  ;;  %v288_v56 = vsel %vm11155_vm6, %v280_v36, %v287_v49  ;;  %v585_v57 = vsel %vm11173_vm8, %v289_v50, %v584_v6  ;;  %v644_v17 = vsel %vm11167_vm7, %v432_v5, %v643_v63 }
  0x56   : > { %758 = vst [vmem:[#allocation2 + $0x84] sm:$0x1] %v757_v52  ;;  %v853_v60 = vld [vmem:[#allocation2 + $0x8c] sm:$0x1]  ;;  %v1213_v18 = vshll.u32 %v910_v55, 16  ;;  %v1217_v62 = vshrl.u32 %v910_v55, 16  ;;  %v440_v1 = vor.u32 %v438_v21, %v437_v53  ;;  %v11474_v14 = vunpack.c.l.b16 %v1010_v0 }
  0x57   : > { %v854_v45 = vsel %vm11225_vm9, %v10055_v32, %v853_v60  ;;  %583 = vst.msk [vmem:[#allocation2 + $0x28] sm:$0xf] %vm560_vm3, %v288_v56  ;;  %v442_v8 = vrot.slane %v437_v53, 4  ;;  %v294_v2 = vshll.u32 %v11432_v29, 16  ;;  %10144 = vmatmul.msk.bf16.gmra.mxu1 %vm1373_vm10, %v10883_v48  ;;  %v299_v12 = vshrl.u32 %v211_v31, 16 }
  0x58   : > { %855 = vst [vmem:[#allocation2 + $0x8c] sm:$0x1] %v854_v45  ;;  %v11464_v13 = vrot.slane %v1213_v18, 5  ;;  %v1219_v4 = vrot.slane %v1217_v62, 4  ;;  %v441_v7 = vsel %vm11155_vm6, %v433_v20, %v440_v1  ;;  %v302_v10 = vshll.u32 %v211_v31, 16  ;;  %v180_v1 = vld [vmem:[%s11131_s21 + $0x40] sm:$0xff] }
  0x59   : > { %10072 = vmatmul.msk.bf16.gmra.mxu2 %vm1373_vm10, %v1367_v41  ;;  %586 = vst [vmem:[#allocation2 + $0x2c] sm:$0x1] %v585_v57  ;;  %v648_v16 = vsel %vm11173_vm8, %v442_v8, %v647_v58  ;;  %v296_v43 = vor.u32 %v294_v2, %v293_v47  ;;  %v10047_v25 = vrot.slane %v285_v37, 11  ;;  %v297_v23 = vrot.slane %v293_v47, 4 }
  0x5a   : > { %645 = vst [vmem:[#allocation2 + $0x90] sm:$0xf] %v644_v17  ;;  %v301_v32 = vrot.slane %v299_v12, 7  ;;  %v444_v34 = vshrl.u32 %v11453_v59, 16  ;;  %v1220_v36 = vor.u32 %v1219_v4, %v11464_v13  ;;  %v732_v38 = vld [vmem:[#allocation2 + $0x24] sm:$0x1]  ;;  %v1359_v63 = vpack.c.b16 %v11474_v14, %v11428_v24 }
  0x5b   : > { %646 = vst.msk [vmem:[#allocation2 + $0x94] sm:$0xf] %vm560_vm3, %v441_v7  ;;  %v10056_v40 = vrot.slane %v438_v21, 11  ;;  %v588_v51 = vsel %vm11167_vm7, %v296_v43, %v587_v33  ;;  %v447_v0 = vshll.u32 %v11453_v59, 16  ;;  %v733_v37 = vsel %vm11173_vm8, %v274_v3, %v732_v38 }
  0x5c   : > { %649 = vst [vmem:[#allocation2 + $0x98] sm:$0x1] %v648_v16  ;;  %v304_v39 = vor.u32 %v302_v10, %v301_v32  ;;  %v306_v41 = vrot.slane %v301_v32, 4  ;;  %v11488_v6 = vrot.slane %v302_v10, 11  ;;  %v11493_v21 = vrot.slane %v444_v34, 7 }
  0x5d   : > { %v10892_v44 = vld [vmem:[#allocation2 + $0x84] sm:$0xff]  ;;  %734 = vst [vmem:[#allocation2 + $0x24] sm:$0x1] %v733_v37  ;;  %v1221_v55 = vrot.slane %v1220_v36, 4  ;;  %v11508_v62 = vpack.c.bf16 %v197_v42, %v197_v42  ;;  %vm1783_vm14 = vcmask 1042432   ;;  %vm1784_vm15 = vcmask 1046532  }
  0x5e   : > { %v909_v46 = vld [vmem:[#allocation2 + $0x84] sm:$0xf]  ;;  %v894_v50 = vld [vmem:[#allocation2 + $0x28] sm:$0xf]  ;;  %v305_v54 = vsel %vm11155_vm6, %v297_v23, %v304_v39  ;;  %589 = vst [vmem:[#allocation2 + $0x30] sm:$0xf] %v588_v51  ;;  %v592_v3 = vsel %vm11173_vm8, %v306_v41, %v591_v22  ;;  %10153 = vmatmul.msk.bf16.gmra.mxu3 %vm1373_vm10, %v10892_v44  ;;  %v449_v53 = vor.u32 %v447_v0, %v11493_v21  ;;  %vm11800_vm1 = vmor %vm1783_vm14, %vm1784_vm15 }
  0x5f   : > { %v1204_v48 = vshrl.u32 %v909_v46, 16  ;;  %v1207_v49 = vshll.u32 %v909_v46, 16  ;;  %v931_v15 = vld [vmem:[#allocation2 + $0x8c] sm:$0x1]  ;;  %v1021_v5 = vshll.u32 %v894_v50, 16  ;;  %v1025_v20 = vshrl.u32 %v894_v50, 16 }
  0x60   : > { %590 = vst.msk [vmem:[#allocation2 + $0x34] sm:$0xf] %vm560_vm3, %v305_v54  ;;  %v1223_v56 = vshll.u32 %v931_v15, 16  ;;  %v829_v57 = vld [vmem:[#allocation2 + $0x2c] sm:$0x1]  ;;  %v450_v47 = vrot.slane %v11493_v21, 4  ;;  %v651_v12 = vsel %vm11167_vm7, %v449_v53, %v650_v35  ;;  %v11531_v41 = vpack.c.bf16 %v180_v1, %v180_v1 }
  0x61   : > { %v1206_v31 = vrot.slane %v1204_v48, 4  ;;  %v1209_v52 = vrot.slane %v1207_v49, 5  ;;  %v830_v58 = vsel %vm11225_vm9, %v10047_v25, %v829_v57  ;;  %v11506_v60 = vrot.slane %v1021_v5, 5  ;;  %v759_v18 = vld [vmem:[#allocation2 + $0x90] sm:$0x1]  ;;  %v181_v36 = vld [vmem:[%s11131_s21 + $0x48] sm:$0xff] }
  0x62   : > { %v1027_v24 = vrot.slane %v1025_v20, 4  ;;  %593 = vst [vmem:[#allocation2 + $0x38] sm:$0x1] %v592_v3  ;;  %v1225_v33 = vrot.slane %v1223_v56, 5  ;;  %v760_v45 = vsel %vm11173_vm8, %v427_v9, %v759_v18  ;;  %v912_v8 = vld [vmem:[#allocation2 + $0x94] sm:$0xf]  ;;  %v11540_v3 = vpack.c.bf16 %v181_v36, %v181_v36 }
  0x63   : > { %v1210_v17 = vor.u32 %v1209_v52, %v1206_v31  ;;  %831 = vst [vmem:[#allocation2 + $0x2c] sm:$0x1] %v830_v58  ;;  %v856_v2 = vld [vmem:[#allocation2 + $0x98] sm:$0x1]  ;;  %v1237_v4 = vshll.u32 %v912_v8, 16  ;;  %v1241_v7 = vshrl.u32 %v912_v8, 16 }
  0x64   : > { %761 = vst [vmem:[#allocation2 + $0x90] sm:$0x1] %v760_v45  ;;  %10064 = vmatmul.msk.bf16.gmra.mxu0 %vm1373_vm10, %v1359_v63  ;;  %v1226_v61 = vsel %vm11287_vm13, %v1221_v55, %v1225_v33  ;;  %v893_v16 = vld [vmem:[#allocation2 + $0x24] sm:$0xf]  ;;  %v1028_v9 = vor.u32 %v1027_v24, %v11506_v60  ;;  %v857_v10 = vsel %vm11225_vm9, %v10056_v40, %v856_v2  ;;  %v452_v32 = vshrl.u32 %v11508_v62, 16  ;;  %v198_v48 = vld [vmem:[%s11131_s21 + $0xd0] sm:$0xff] }
  0x65   : > { %v1211_v14 = vrot.slane %v1210_v17, 4  ;;  %v10884_v43 = vld [vmem:[#allocation2 + $0x24] sm:$0xff]  ;;  %v1348_v22 = vunpack.c.l.b16 %v1226_v61  ;;  %v1012_v25 = vshrl.u32 %v893_v16, 16  ;;  %v1015_v23 = vshll.u32 %v893_v16, 16  ;;  %858 = vst [vmem:[#allocation2 + $0x98] sm:$0x1] %v857_v10 }
  0x66   : > { %v11529_v51 = vrot.slane %v1237_v4, 5  ;;  %v1243_v0 = vrot.slane %v1241_v7, 4  ;;  %v735_v37 = vld [vmem:[#allocation2 + $0x30] sm:$0x1]  ;;  %652 = vst [vmem:[#allocation2 + $0x9c] sm:$0xf] %v651_v12  ;;  %v11548_v56 = vpack.c.bf16 %v198_v48, %v198_v48 }
  0x67   : > { %v1216_v38 = vsel %vm11287_vm13, %v1211_v14, %v11464_v13  ;;  %v896_v39 = vld [vmem:[#allocation2 + $0x34] sm:$0xf]  ;;  %v1014_v42 = vrot.slane %v1012_v25, 4  ;;  %v1017_v44 = vrot.slane %v1015_v23, 5  ;;  %v736_v46 = vsel %vm11173_vm8, %v291_v11, %v735_v37  ;;  %10145 = vmatmul.msk.bf16.gmra.mxu1 %vm1373_vm10, %v10884_v43  ;;  %v199_v5 = vld [vmem:[%s11131_s21 + $0xd8] sm:$0xff] }
  0x68   : > { %v1347_v40 = vunpack.c.l.b16 %v1216_v38  ;;  %v1244_v13 = vor.u32 %v1243_v0, %v11529_v51  ;;  %737 = vst [vmem:[#allocation2 + $0x30] sm:$0x1] %v736_v46  ;;  %v1045_v50 = vshll.u32 %v896_v39, 16  ;;  %v1049_v54 = vshrl.u32 %v896_v39, 16  ;;  %v182_v23 = vld [vmem:[%s11131_s21 + $0x50] sm:$0xff] }
  0x69   : > { %v832_v49 = vld [vmem:[#allocation2 + $0x38] sm:$0x1]  ;;  %v1018_v15 = vor.u32 %v1017_v44, %v1014_v42  ;;  %v1029_v29 = vrot.slane %v1028_v9, 4  ;;  %v454_v55 = vrot.slane %v452_v32, 7  ;;  %v11552_v45 = vpack.c.bf16 %v199_v5, %v199_v5 }
  0x6a   : > { %v1368_v35 = vpack.c.b16 %v1348_v22, %v1347_v40  ;;  %v923_v63 = vld [vmem:[#allocation2 + $0x2c] sm:$0x1]  ;;  %v833_v11 = vsel %vm11225_vm9, %v11488_v6, %v832_v49  ;;  %v11546_v52 = vrot.slane %v1045_v50, 5  ;;  %v1051_v18 = vrot.slane %v1049_v54, 4 }
  0x6b   : > { %v1031_v20 = vshll.u32 %v923_v63, 16  ;;  %v10893_v53 = vld [vmem:[#allocation2 + $0x90] sm:$0xff]  ;;  %v1019_v57 = vrot.slane %v1018_v15, 4  ;;  %834 = vst [vmem:[#allocation2 + $0x38] sm:$0x1] %v833_v11  ;;  %v1245_v33 = vrot.slane %v1244_v13, 4  ;;  %v11576_v48 = vpack.c.bf16 %v182_v23, %v182_v23 }
  0x6c   : > { %v911_v31 = vld [vmem:[#allocation2 + $0x90] sm:$0xf]  ;;  %10073 = vmatmul.msk.bf16.gmra.mxu2 %vm1373_vm10, %v1368_v35  ;;  %v932_v17 = vld [vmem:[#allocation2 + $0x98] sm:$0x1]  ;;  %v455_v6 = vshll.u32 %v11508_v62, 16  ;;  %v1052_v61 = vor.u32 %v1051_v18, %v11546_v52  ;;  %v459_v16 = vrot.slane %v454_v55, 4 }
  0x6d   : > { %v1228_v58 = vshrl.u32 %v911_v31, 16  ;;  %v1231_v24 = vshll.u32 %v911_v31, 16  ;;  %v1033_v1 = vrot.slane %v1031_v20, 5  ;;  %v1024_v8 = vsel %vm11287_vm13, %v1019_v57, %v11506_v60  ;;  %v762_v9 = vld [vmem:[#allocation2 + $0x9c] sm:$0x1] }
  0x6e   : > { %v1247_v7 = vshll.u32 %v932_v17, 16  ;;  %v1331_v14 = vunpack.c.l.b16 %v1024_v8  ;;  %10154 = vmatmul.msk.bf16.gmra.mxu3 %vm1373_vm10, %v10893_v53  ;;  %v457_v25 = vor.u32 %v455_v6, %v454_v55  ;;  %v654_v60 = vld [vmem:[#allocation2 + $0xa4] sm:$0x1]  ;;  %v763_v38 = vsel %vm11173_vm8, %v444_v34, %v762_v9  ;;  %v594_v20 = vld [vmem:[#allocation2 + $0x3c] sm:$0xf] }
  0x6f   : > { %v1230_v2 = vrot.slane %v1228_v58, 4  ;;  %v1233_v4 = vrot.slane %v1231_v24, 5  ;;  %v1034_v12 = vsel %vm11287_vm13, %v1029_v29, %v1033_v1  ;;  %v895_v22 = vld [vmem:[#allocation2 + $0x30] sm:$0xf]  ;;  %v308_v0 = vshrl.u32 %v11531_v41, 16 }
  0x70   : > { %v1332_v43 = vunpack.c.l.b16 %v1034_v12  ;;  %v1249_v10 = vrot.slane %v1247_v7, 5  ;;  %v1036_v32 = vshrl.u32 %v895_v22, 16  ;;  %v1039_v36 = vshll.u32 %v895_v22, 16  ;;  %764 = vst [vmem:[#allocation2 + $0x9c] sm:$0x1] %v763_v38  ;;  %v10885_v63 = vld [vmem:[#allocation2 + $0x30] sm:$0xff] }
  0x71   : > { %v1234_v62 = vor.u32 %v1233_v4, %v1230_v2  ;;  %v458_v42 = vsel %vm11155_vm6, %v450_v47, %v457_v25  ;;  %v655_v34 = vsel %vm11173_vm8, %v459_v16, %v654_v60  ;;  %v1053_v21 = vrot.slane %v1052_v61, 4  ;;  %v183_v47 = vld [vmem:[%s11131_s21 + $0x58] sm:$0xff]  ;;  %v598_v4 = vld [vmem:[#allocation2 + $0x44] sm:$0x1] }
  0x72   : > { %v1360_v37 = vpack.c.b16 %v1332_v43, %v1331_v14  ;;  %v1250_v40 = vsel %vm11287_vm13, %v1245_v33, %v1249_v10  ;;  %v924_v44 = vld [vmem:[#allocation2 + $0x38] sm:$0x1]  ;;  %v1038_v46 = vrot.slane %v1036_v32, 4  ;;  %v1041_v59 = vrot.slane %v1039_v36, 5  ;;  %653 = vst.msk [vmem:[#allocation2 + $0xa0] sm:$0xf] %vm560_vm3, %v458_v42 }
  0x73   : > { %v1235_v39 = vrot.slane %v1234_v62, 4  ;;  %v1350_v49 = vunpack.c.l.b16 %v1250_v40  ;;  %v1055_v50 = vshll.u32 %v924_v44, 16  ;;  %656 = vst [vmem:[#allocation2 + $0xa4] sm:$0x1] %v655_v34  ;;  %v310_v15 = vrot.slane %v308_v0, 7 }
  0x74   : > { %10065 = vmatmul.msk.bf16.gmra.mxu0 %vm1373_vm10, %v1360_v37  ;;  %v1042_v35 = vor.u32 %v1041_v59, %v1038_v46  ;;  %v311_v29 = vshll.u32 %v11531_v41, 16  ;;  %v316_v5 = vshrl.u32 %v11540_v3, 16  ;;  %v461_v53 = vshrl.u32 %v11548_v56, 16  ;;  %v657_v43 = vld [vmem:[#allocation2 + $0xa8] sm:$0xf] }
  0x75   : > { %v1240_v13 = vsel %vm11287_vm13, %v1235_v39, %v11529_v51  ;;  %v1057_v11 = vrot.slane %v1055_v50, 5  ;;  %v319_v51 = vshll.u32 %v11540_v3, 16  ;;  %v10057_v55 = vrot.slane %v455_v6, 11  ;;  %v605_v3 = vld [vmem:[#allocation2 + $0x50] sm:$0x1] }
  0x76   : > { %v1349_v54 = vunpack.c.l.b16 %v1240_v13  ;;  %v1043_v31 = vrot.slane %v1042_v35, 4  ;;  %v313_v57 = vor.u32 %v311_v29, %v310_v15  ;;  %v11589_v58 = vpack.c.bf16 %v183_v47, %v183_v47  ;;  %v661_v29 = vld [vmem:[#allocation2 + $0xb0] sm:$0x1] }
  0x77   : > { %v1058_v18 = vsel %vm11287_vm13, %v1053_v21, %v1057_v11  ;;  %v318_v1 = vrot.slane %v316_v5, 7  ;;  %v11595_v17 = vrot.slane %v461_v53, 7  ;;  %10146 = vmatmul.msk.bf16.gmra.mxu1 %vm1373_vm10, %v10885_v63  ;;  %v913_v8 = vld [vmem:[#allocation2 + $0x9c] sm:$0xf]  ;;  %v314_v6 = vrot.slane %v310_v15, 4  ;;  %v200_v21 = vld [vmem:[%s11131_s21 + $0xe0] sm:$0xff] }
  0x78   : > { %v1369_v24 = vpack.c.b16 %v1350_v49, %v1349_v54  ;;  %v1048_v33 = vsel %vm11287_vm13, %v1043_v31, %v11546_v52  ;;  %v595_v2 = vsel %vm11167_vm7, %v313_v57, %v594_v20  ;;  %v464_v7 = vshll.u32 %v11548_v56, 16 }
  0x79   : > { %v1334_v12 = vunpack.c.l.b16 %v1058_v18  ;;  %v914_v14 = vld [vmem:[#allocation2 + $0xa0] sm:$0xf]  ;;  %v1252_v61 = vshrl.u32 %v913_v8, 16  ;;  %v1255_v16 = vshll.u32 %v913_v8, 16  ;;  %v321_v9 = vor.u32 %v319_v51, %v318_v1  ;;  %596 = vst [vmem:[#allocation2 + $0x3c] sm:$0xf] %v595_v2 }
  0x7a   : > { %v859_v62 = vld [vmem:[#allocation2 + $0xa4] sm:$0x1]  ;;  %v1261_v52 = vshll.u32 %v914_v14, 16  ;;  %v1265_v10 = vshrl.u32 %v914_v14, 16  ;;  %v323_v22 = vrot.slane %v318_v1, 4  ;;  %v466_v25 = vor.u32 %v464_v7, %v11595_v17  ;;  %v10894_v23 = vld [vmem:[#allocation2 + $0x9c] sm:$0xff] }
  0x7b   : > { %v1333_v60 = vunpack.c.l.b16 %v1048_v33  ;;  %v860_v32 = vsel %vm11225_vm9, %v10057_v55, %v859_v62  ;;  %v1254_v36 = vrot.slane %v1252_v61, 4  ;;  %v1257_v38 = vrot.slane %v1255_v16, 5  ;;  %v601_v8 = vld [vmem:[#allocation2 + $0x48] sm:$0xf] }
  0x7c   : > { %10074 = vmatmul.msk.bf16.gmra.mxu2 %vm1373_vm10, %v1369_v24  ;;  %861 = vst [vmem:[#allocation2 + $0xa4] sm:$0x1] %v860_v32  ;;  %v1263_v37 = vrot.slane %v1261_v52, 5  ;;  %v1267_v39 = vrot.slane %v1265_v10, 4  ;;  %v322_v40 = vsel %vm11155_vm6, %v314_v6, %v321_v9  ;;  %v599_v42 = vsel %vm11173_vm8, %v323_v22, %v598_v4  ;;  %v201_v24 = vld [vmem:[%s11131_s21 + $0xe8] sm:$0xff] }
  0x7d   : > { %v1258_v44 = vor.u32 %v1257_v38, %v1254_v36  ;;  %597 = vst.msk [vmem:[#allocation2 + $0x40] sm:$0xf] %vm560_vm3, %v322_v40  ;;  %v469_v46 = vshrl.u32 %v11552_v45, 16  ;;  %v472_v59 = vshll.u32 %v11552_v45, 16  ;;  %v658_v34 = vsel %vm11167_vm7, %v466_v25, %v657_v43  ;;  %v185_v40 = vld [vmem:[%s11131_s21 + $0x68] sm:$0xff] }
  0x7e   : > { %600 = vst [vmem:[#allocation2 + $0x44] sm:$0x1] %v599_v42  ;;  %v325_v13 = vshrl.u32 %v11576_v48, 16  ;;  %v328_v49 = vshll.u32 %v11576_v48, 16  ;;  %10155 = vmatmul.msk.bf16.gmra.mxu3 %vm1373_vm10, %v10894_v23  ;;  %v467_v47 = vrot.slane %v11595_v17, 4  ;;  %v333_v35 = vshrl.u32 %v11589_v58, 16 }
  0x7f   : > { %v1259_v50 = vrot.slane %v1258_v44, 4  ;;  %v471_v54 = vrot.slane %v469_v46, 7  ;;  %659 = vst [vmem:[#allocation2 + $0xa8] sm:$0xf] %v658_v34  ;;  %v1361_v63 = vpack.c.b16 %v1334_v12, %v1333_v60  ;;  %v1268_v15 = vor.u32 %v1267_v39, %v1263_v37 }
  0x80   : > { %v327_v11 = vrot.slane %v325_v13, 7  ;;  %v336_v5 = vshll.u32 %v11589_v58, 16  ;;  %v335_v57 = vrot.slane %v333_v35, 7  ;;  %v738_v18 = vld [vmem:[#allocation2 + $0x3c] sm:$0x1]  ;;  %v10049_v1 = vrot.slane %v319_v51, 11 }
  0x81   : > { %v1264_v20 = vsel %vm11287_vm13, %v1259_v50, %v1263_v37  ;;  %v474_v31 = vor.u32 %v472_v59, %v471_v54  ;;  %v476_v55 = vrot.slane %v471_v54, 4  ;;  %v11635_v6 = vpack.c.bf16 %v200_v21, %v200_v21  ;;  %v184_v51 = vld [vmem:[%s11131_s21 + $0x60] sm:$0xff]  ;;  %v664_v21 = vld [vmem:[#allocation2 + $0xb4] sm:$0xf] }
  0x82   : > { %v330_v17 = vor.u32 %v328_v49, %v327_v11  ;;  %v331_v33 = vrot.slane %v327_v11, 4  ;;  %v739_v2 = vsel %vm11173_vm8, %v308_v0, %v738_v18  ;;  %v338_v12 = vor.u32 %v336_v5, %v335_v57 }
  0x83   : > { %v933_v58 = vld [vmem:[#allocation2 + $0xa4] sm:$0x1]  ;;  %v475_v4 = vsel %vm11155_vm6, %v467_v47, %v474_v31  ;;  %v662_v7 = vsel %vm11173_vm8, %v476_v55, %v661_v29  ;;  %v1269_v14 = vrot.slane %v1268_v15, 4  ;;  %v1351_v16 = vunpack.c.l.b16 %v1264_v20  ;;  %740 = vst [vmem:[#allocation2 + $0x3c] sm:$0x1] %v739_v2 }
  0x84   : > { %10066 = vmatmul.msk.bf16.gmra.mxu0 %vm1373_vm10, %v1361_v63  ;;  %v1271_v61 = vshll.u32 %v933_v58, 16  ;;  %v11647_v9 = vld [vmem:[#allocation2 + $0x40] sm:$0xf]  ;;  %v11649_v41 = vpack.c.bf16 %v201_v24, %v201_v24  ;;  %660 = vst.msk [vmem:[#allocation2 + $0xac] sm:$0xf] %vm560_vm3, %v475_v4  ;;  %v339_v52 = vsel %vm11155_vm6, %v331_v33, %v338_v12  ;;  %v602_v10 = vsel %vm11167_vm7, %v330_v17, %v601_v8 }
  0x85   : > { %v835_v0 = vld [vmem:[#allocation2 + $0x44] sm:$0x1]  ;;  %v1069_v43 = vshll.u32 %v11647_v9, 16  ;;  %v1073_v62 = vshrl.u32 %v11647_v9, 16  ;;  %663 = vst [vmem:[#allocation2 + $0xb0] sm:$0x1] %v662_v7  ;;  %v11660_v32 = vpack.c.bf16 %v184_v51, %v184_v51  ;;  %v11682_v35 = vpack.c.bf16 %v185_v40, %v185_v40 }
  0x86   : > { %v1273_v22 = vrot.slane %v1271_v61, 5  ;;  %v836_v25 = vsel %vm11225_vm9, %v10049_v1, %v835_v0  ;;  %v765_v60 = vld [vmem:[#allocation2 + $0xa8] sm:$0x1]  ;;  %v340_v23 = vrot.slane %v335_v57, 4  ;;  %v478_v39 = vshrl.u32 %v11635_v6, 16 }
  0x87   : > { %837 = vst [vmem:[#allocation2 + $0x44] sm:$0x1] %v836_v25  ;;  %v11662_v36 = vrot.slane %v1069_v43, 5  ;;  %v1075_v38 = vrot.slane %v1073_v62, 4  ;;  %v766_v37 = vsel %vm11173_vm8, %v461_v53, %v765_v60  ;;  %v481_v46 = vshll.u32 %v11635_v6, 16 }
  0x88   : > { %v1274_v42 = vsel %vm11287_vm13, %v1269_v14, %v1273_v22  ;;  %767 = vst [vmem:[#allocation2 + $0xa8] sm:$0x1] %v766_v37  ;;  %v606_v44 = vsel %vm11173_vm8, %v340_v23, %v605_v3  ;;  %v486_v34 = vshrl.u32 %v11649_v41, 16  ;;  %v480_v56 = vrot.slane %v478_v39, 7  ;;  %v668_v8 = vld [vmem:[#allocation2 + $0xbc] sm:$0x1] }
  0x89   : > { %v1352_v49 = vunpack.c.l.b16 %v1274_v42  ;;  %603 = vst [vmem:[#allocation2 + $0x48] sm:$0xf] %v602_v10  ;;  %v489_v53 = vshll.u32 %v11649_v41, 16  ;;  %v10058_v50 = vrot.slane %v472_v59, 11  ;;  %v10050_v47 = vrot.slane %v336_v5, 11 }
  0x8a   : > { %604 = vst.msk [vmem:[#allocation2 + $0x4c] sm:$0xf] %vm560_vm3, %v339_v52  ;;  %v488_v54 = vrot.slane %v486_v34, 7  ;;  %v897_v15 = vld [vmem:[#allocation2 + $0x3c] sm:$0xf]  ;;  %v1076_v29 = vor.u32 %v1075_v38, %v11662_v36  ;;  %v483_v20 = vor.u32 %v481_v46, %v480_v56  ;;  %v342_v31 = vshrl.u32 %v11660_v32, 16 }
  0x8b   : > { %v1370_v63 = vpack.c.b16 %v1352_v49, %v1351_v16  ;;  %v10886_v11 = vld [vmem:[#allocation2 + $0x3c] sm:$0xff]  ;;  %607 = vst [vmem:[#allocation2 + $0x50] sm:$0x1] %v606_v44  ;;  %v1060_v55 = vshrl.u32 %v897_v15, 16  ;;  %v1063_v57 = vshll.u32 %v897_v15, 16  ;;  %v484_v45 = vrot.slane %v480_v56, 4 }
  0x8c   : > { %v916_v24 = vld [vmem:[#allocation2 + $0xac] sm:$0xf]  ;;  %v491_v59 = vor.u32 %v489_v53, %v488_v54  ;;  %10147 = vmatmul.msk.bf16.gmra.mxu1 %vm1373_vm10, %v10886_v11  ;;  %v862_v5 = vld [vmem:[#allocation2 + $0xb0] sm:$0x1]  ;;  %v493_v17 = vrot.slane %v488_v54, 4  ;;  %v665_v33 = vsel %vm11167_vm7, %v483_v20, %v664_v21  ;;  %v1077_v12 = vrot.slane %v1076_v29, 4 }
  0x8d   : > { %10075 = vmatmul.msk.bf16.gmra.mxu2 %vm1373_vm10, %v1370_v63  ;;  %v1285_v18 = vshll.u32 %v916_v24, 16  ;;  %v1289_v1 = vshrl.u32 %v916_v24, 16  ;;  %v1062_v2 = vrot.slane %v1060_v55, 4  ;;  %v1065_v4 = vrot.slane %v1063_v57, 5  ;;  %666 = vst [vmem:[#allocation2 + $0xb4] sm:$0xf] %v665_v33 }
  0x8e   : > { %v11692_v58 = vld [vmem:[#allocation2 + $0x44] sm:$0x1]  ;;  %v863_v7 = vsel %vm11225_vm9, %v10058_v50, %v862_v5  ;;  %v492_v62 = vsel %vm11155_vm6, %v484_v45, %v491_v59  ;;  %v350_v52 = vshrl.u32 %v11682_v35, 16  ;;  %v669_v44 = vsel %vm11173_vm8, %v493_v17, %v668_v8 }
  0x8f   : > { %v1079_v3 = vshll.u32 %v11692_v58, 16  ;;  %v10895_v51 = vld [vmem:[#allocation2 + $0xa8] sm:$0xff]  ;;  %864 = vst [vmem:[#allocation2 + $0xb0] sm:$0x1] %v863_v7  ;;  %v1287_v14 = vrot.slane %v1285_v18, 5  ;;  %v1066_v61 = vor.u32 %v1065_v4, %v1062_v2  ;;  %v1291_v0 = vrot.slane %v1289_v1, 4 }
  0x90   : > { %v915_v16 = vld [vmem:[#allocation2 + $0xa8] sm:$0xf]  ;;  %10156 = vmatmul.msk.bf16.gmra.mxu3 %vm1373_vm10, %v10895_v51  ;;  %667 = vst.msk [vmem:[#allocation2 + $0xb8] sm:$0xf] %vm560_vm3, %v492_v62  ;;  %v345_v21 = vshll.u32 %v11660_v32, 16  ;;  %v344_v29 = vrot.slane %v342_v31, 7 }
  0x91   : > { %v741_v43 = vld [vmem:[#allocation2 + $0x48] sm:$0x1]  ;;  %v1081_v10 = vrot.slane %v1079_v3, 5  ;;  %v1276_v22 = vshrl.u32 %v915_v16, 16  ;;  %v1279_v25 = vshll.u32 %v915_v16, 16  ;;  %v1067_v38 = vrot.slane %v1066_v61, 4 }
  0x92   : > { %v742_v60 = vsel %vm11173_vm8, %v325_v13, %v741_v43  ;;  %v11705_v23 = vld [vmem:[#allocation2 + $0x4c] sm:$0xf]  ;;  %v1292_v37 = vor.u32 %v1291_v0, %v1287_v14  ;;  %v838_v40 = vld [vmem:[#allocation2 + $0x50] sm:$0x1]  ;;  %670 = vst [vmem:[#allocation2 + $0xbc] sm:$0x1] %v669_v44  ;;  %v347_v2 = vor.u32 %v345_v21, %v344_v29 }
  0x93   : > { %743 = vst [vmem:[#allocation2 + $0x48] sm:$0x1] %v742_v60  ;;  %v1093_v42 = vshll.u32 %v11705_v23, 16  ;;  %v1082_v46 = vsel %vm11287_vm13, %v1077_v12, %v1081_v10  ;;  %v1278_v34 = vrot.slane %v1276_v22, 4  ;;  %v1281_v49 = vrot.slane %v1279_v25, 5 }
  0x94   : > { %v839_v48 = vsel %vm11225_vm9, %v10050_v47, %v838_v40  ;;  %v1072_v13 = vsel %vm11287_vm13, %v1067_v38, %v11662_v36  ;;  %v1336_v56 = vunpack.c.l.b16 %v1082_v46  ;;  %v1097_v63 = vshrl.u32 %v11705_v23, 16  ;;  %v768_v15 = vld [vmem:[#allocation2 + $0xb4] sm:$0x1]  ;;  %v612_v25 = vld [vmem:[#allocation2 + $0x5c] sm:$0x1] }
  0x95   : > { %840 = vst [vmem:[#allocation2 + $0x50] sm:$0x1] %v839_v48  ;;  %v1335_v50 = vunpack.c.l.b16 %v1072_v13  ;;  %v1282_v54 = vor.u32 %v1281_v49, %v1278_v34  ;;  %v11722_v11 = vrot.slane %v1093_v42, 5  ;;  %v769_v36 = vsel %vm11173_vm8, %v478_v39, %v768_v15  ;;  %v608_v43 = vld [vmem:[#allocation2 + $0x54] sm:$0xf] }
  0x96   : > { %v934_v47 = vld [vmem:[#allocation2 + $0xb0] sm:$0x1]  ;;  %v352_v20 = vrot.slane %v350_v52, 7  ;;  %v353_v55 = vshll.u32 %v11682_v35, 16  ;;  %v1293_v45 = vrot.slane %v1292_v37, 4  ;;  %v1099_v5 = vrot.slane %v1097_v63, 4 }
  0x97   : > { %v1362_v57 = vpack.c.b16 %v1336_v56, %v1335_v50  ;;  %v1283_v24 = vrot.slane %v1282_v54, 4  ;;  %v1295_v59 = vshll.u32 %v934_v47, 16  ;;  %770 = vst [vmem:[#allocation2 + $0xb4] sm:$0x1] %v769_v36  ;;  %v10059_v18 = vrot.slane %v489_v53, 11 }
  0x98   : > { %v348_v1 = vrot.slane %v344_v29, 4  ;;  %v355_v17 = vor.u32 %v353_v55, %v352_v20  ;;  %v357_v4 = vrot.slane %v352_v20, 4  ;;  %v1100_v41 = vor.u32 %v1099_v5, %v11722_v11  ;;  %v918_v53 = vld [vmem:[#allocation2 + $0xb8] sm:$0xf]  ;;  %v10322_v47 = vld [vmem:[%s15574_s1 + $0xc] sm:$0x3] }
  0x99   : > { %10067 = vmatmul.msk.bf16.gmra.mxu0 %vm1373_vm10, %v1362_v57  ;;  %v1288_v6 = vsel %vm11287_vm13, %v1283_v24, %v1287_v14  ;;  %v1297_v39 = vrot.slane %v1295_v59, 5  ;;  %v1309_v16 = vshll.u32 %v918_v53, 16  ;;  %v1313_v0 = vshrl.u32 %v918_v53, 16  ;;  %v865_v22 = vld [vmem:[#allocation2 + $0xbc] sm:$0x1] }
  0x9a   : > { %v899_v33 = vld [vmem:[#allocation2 + $0x48] sm:$0xf]  ;;  %v1353_v7 = vunpack.c.l.b16 %v1288_v6  ;;  %v356_v14 = vsel %vm11155_vm6, %v348_v1, %v355_v17  ;;  %v1101_v60 = vrot.slane %v1100_v41, 4  ;;  %v866_v37 = vsel %vm11225_vm9, %v10059_v18, %v865_v22  ;;  %v10403_v24 = vld [vmem:[%s15574_s1 + $0xe] sm:$0x3] }
  0x9b   : > { %v10887_v8 = vld [vmem:[#allocation2 + $0x48] sm:$0xff]  ;;  %v1084_v12 = vshrl.u32 %v899_v33, 16  ;;  %v1087_v3 = vshll.u32 %v899_v33, 16  ;;  %v1298_v51 = vsel %vm11287_vm13, %v1293_v45, %v1297_v39  ;;  %v1311_v40 = vrot.slane %v1309_v16, 5  ;;  %611 = vst.msk [vmem:[#allocation2 + $0x58] sm:$0xf] %vm560_vm3, %v356_v14 }
  0x9c   : > { %v11739_v61 = vld [vmem:[#allocation2 + $0x50] sm:$0x1]  ;;  %v1354_v62 = vunpack.c.l.b16 %v1298_v51  ;;  %10148 = vmatmul.msk.bf16.gmra.mxu1 %vm1373_vm10, %v10887_v8  ;;  %867 = vst [vmem:[#allocation2 + $0xbc] sm:$0x1] %v866_v37  ;;  %v1315_v49 = vrot.slane %v1313_v0, 4  ;;  %v609_v48 = vsel %vm11167_vm7, %v347_v2, %v608_v43  ;;  %v613_v50 = vsel %vm11173_vm8, %v357_v4, %v612_v25 }
  0x9d   : > { %v1086_v52 = vrot.slane %v1084_v12, 4  ;;  %v1089_v10 = vrot.slane %v1087_v3, 5  ;;  %v1103_v38 = vshll.u32 %v11739_v61, 16  ;;  %610 = vst [vmem:[#allocation2 + $0x54] sm:$0xf] %v609_v48  ;;  %v3621_v5 = vsel %vm1422_vm0, %v10322_v47, 0 }
  0x9e   : > { %v1371_v42 = vpack.c.b16 %v1354_v62, %v1353_v7  ;;  %v10896_v46 = vld [vmem:[#allocation2 + $0xb4] sm:$0xff]  ;;  %614 = vst [vmem:[#allocation2 + $0x5c] sm:$0x1] %v613_v50  ;;  %v1316_v57 = vor.u32 %v1315_v49, %v1311_v40  ;;  %v10051_v18 = vrot.slane %v353_v55, 11  ;;  %3630 = vmatpush.bf16.msra.mxu2 %v3621_v5  ;;  %v4275_v17 = vsel %vm1422_vm0, %v10403_v24, 0  ;;  %v10897_v62 = vld [vmem:[#allocation2 + $0xc] sm:$0xff] }
  0x9f   : > { %v1090_v44 = vor.u32 %v1089_v10, %v1086_v52  ;;  %v917_v34 = vld [vmem:[#allocation2 + $0xb4] sm:$0xf]  ;;  %v1105_v13 = vrot.slane %v1103_v38, 5  ;;  %4284 = vmatpush.bf16.msra.mxu3 %v4275_v17  ;;  %v1735_v14 = vld [vmem:[#allocation2] sm:$0xe]  ;;  %v15665_v47 = vmov 0 }
  0xa0   : > { %v1300_v56 = vshrl.u32 %v917_v34, 16  ;;  %v1303_v21 = vshll.u32 %v917_v34, 16  ;;  %10076 = vmatmul.msk.bf16.gmra.mxu2 %vm1373_vm10, %v1371_v42  ;;  %10157 = vmatmul.msk.bf16.gmra.mxu3 %vm1373_vm10, %v10896_v46  ;;  %v1317_v2 = vrot.slane %v1316_v57, 4  ;;  %v10991_v43 = vld [vmem:[#allocation2 + $0x4] sm:$0xf]  ;;  %v15666_v47 = vsel %vm11800_vm1, 4294967295, %v15665_v47 }
  0xa1   : > { %v1091_v54 = vrot.slane %v1090_v44, 4  ;;  %v1106_v63 = vsel %vm11287_vm13, %v1101_v60, %v1105_v13  ;;  %v2406_v52 = vld [vmem:[#allocation2 + $0xc] sm:$0xf]  ;;  %v10305_v10 = vld [vmem:[%s15574_s1 + $0xa] sm:$0x3]  ;;  %v10158_v44 = vrot.slane %v1735_v14, 9 }
  0xa2   : > { %v1302_v15 = vrot.slane %v1300_v56, 4  ;;  %v1305_v29 = vrot.slane %v1303_v21, 5  ;;  %v1338_v20 = vunpack.c.l.b16 %v1106_v63  ;;  %v11768_v1 = vld [vmem:[#allocation2 + $0x58] sm:$0xf]  ;;  %v2407_v60 = vld [vmem:[#allocation2 + $0x10] sm:$0xf] }
  0xa3   : > { %v1096_v36 = vsel %vm11287_vm13, %v1091_v54, %v11722_v11  ;;  %v935_v11 = vld [vmem:[#allocation2 + $0xbc] sm:$0x1]  ;;  %v1117_v33 = vshll.u32 %v11768_v1, 16  ;;  %v1121_v8 = vshrl.u32 %v11768_v1, 16  ;;  %v3335_v38 = vsel %vm1422_vm0, %v10305_v10, 0  ;;  %15667 = vst [vmem:[#allocation9_spill] sm:$0xff] %v15666_v47 }
  0xa4   : > { %v1337_v45 = vunpack.c.l.b16 %v1096_v36  ;;  %v1306_v59 = vor.u32 %v1305_v29, %v1302_v15  ;;  %v1319_v4 = vshll.u32 %v935_v11, 16  ;;  %v744_v7 = vld [vmem:[#allocation2 + $0x54] sm:$0x1]  ;;  %v10436_v37 = vld [vmem:[%s15574_s1 + $0x10] sm:$0x3]  ;;  %3344 = vmatpush.bf16.msrb.mxu1 %v3335_v38  ;;  %v3126_v49 = vrot.slane %v2407_v60, 5 }
  0xa5   : > { %v745_v55 = vsel %vm11173_vm8, %v342_v31, %v744_v7  ;;  %v841_v12 = vld [vmem:[#allocation2 + $0x5c] sm:$0x1]  ;;  %v11782_v51 = vrot.slane %v1117_v33, 5  ;;  %v1123_v16 = vrot.slane %v1121_v8, 4  ;;  %v1788_v31 = vrot.slane %v10991_v43, 5 }
  0xa6   : > { %v1363_v6 = vpack.c.b16 %v1338_v20, %v1337_v45  ;;  %v1307_v39 = vrot.slane %v1306_v59, 4  ;;  %v1321_v3 = vrot.slane %v1319_v4, 5  ;;  %746 = vst [vmem:[#allocation2 + $0x54] sm:$0x1] %v745_v55  ;;  %v842_v41 = vsel %vm11225_vm9, %v10051_v18, %v841_v12  ;;  %v3060_v34 = vld [vmem:[#allocation2 + $0xc] sm:$0xe] }
  0xa7   : > { %843 = vst [vmem:[#allocation2 + $0x5c] sm:$0x1] %v842_v41  ;;  %v1124_v25 = vor.u32 %v1123_v16, %v11782_v51  ;;  %v4673_v46 = vsel %vm1422_vm0, %v10436_v37, 0  ;;  %v1790_v56 = vrot.slane %v1788_v31, 4  ;;  %v2455_v21 = vshrl.u32 %v2406_v52, 16 }
  0xa8   : > { %v1312_v35 = vsel %vm11287_vm13, %v1307_v39, %v1311_v40  ;;  %v1322_v0 = vsel %vm11287_vm13, %v1317_v2, %v1321_v3  ;;  %v10992_v40 = vld [vmem:[#allocation2 + $0x8] sm:$0x1]  ;;  %v2458_v50 = vshll.u32 %v2406_v52, 16  ;;  %4682 = vmatpush.bf16.msra.mxu0 %v4673_v46  ;;  %v2464_v36 = vshll.u32 %v2407_v60, 16  ;;  %v2408_v45 = vld [vmem:[#allocation2 + $0x14] sm:$0x1] }
  0xa9   : > { %10068 = vmatmul.msk.bf16.gmra.mxu0 %vm1373_vm10, %v1363_v6  ;;  %v1355_v53 = vunpack.c.l.b16 %v1312_v35  ;;  %v1356_v32 = vunpack.c.l.b16 %v1322_v0  ;;  %v1791_v42 = vrot.slane %v10992_v40, 5  ;;  %v2468_v20 = vshrl.u32 %v2407_v60, 16  ;;  %v1736_v46 = vld [vmem:[#allocation2 + $0xc] sm:$0xe] }
  0xaa   : > { %v1125_v57 = vrot.slane %v1124_v25, 4  ;;  %v10289_v59 = vrot.slane %v3060_v34, 9  ;;  %v3128_v17 = vrot.slane %v3126_v49, 4  ;;  %v3129_v6 = vrot.slane %v2408_v45, 5 }
  0xab   : > { %v1372_v22 = vpack.c.b16 %v1356_v32, %v1355_v53  ;;  %v1789_v39 = vsel %vm11800_vm1, %v10158_v44, %v1788_v31  ;;  %v1792_v33 = vsel %vm11800_vm1, %v1790_v56, %v1791_v42  ;;  %v2457_v8 = vrot.slane %v2455_v21, 4  ;;  %v2409_v21 = vld [vmem:[#allocation2 + $0x18] sm:$0xf] }
  0xac   : > { %v2460_v4 = vrot.slane %v2458_v50, 5  ;;  %v2466_v7 = vrot.slane %v2464_v36, 5  ;;  %v2470_v35 = vrot.slane %v2468_v20, 4  ;;  %v3127_v41 = vsel %vm11800_vm1, %v10289_v59, %v3126_v49  ;;  %v10898_v49 = vld [vmem:[#allocation2 + $0x18] sm:$0xff] }
  0xad   : > { %v901_v48 = vld [vmem:[#allocation2 + $0x54] sm:$0xf]  ;;  %v3130_v53 = vsel %vm11800_vm1, %v3128_v17, %v3129_v6  ;;  %v1900_v0 = vunpack.c.l.b16 %v1789_v39  ;;  %v1901_v32 = vunpack.c.l.b16 %v1792_v33  ;;  %v2474_v52 = vshll.u32 %v2408_v45, 16  ;;  %v2410_v50 = vld [vmem:[#allocation2 + $0x1c] sm:$0xf] }
  0xae   : > { %v10888_v13 = vld [vmem:[#allocation2 + $0x54] sm:$0xff]  ;;  %v11796_v54 = vld [vmem:[#allocation2 + $0x5c] sm:$0x1]  ;;  %v1108_v63 = vshrl.u32 %v901_v48, 16  ;;  %v1111_v15 = vshll.u32 %v901_v48, 16  ;;  %v1695_v29 = vpop.f32.mrf.mxu3  ;;  %v2461_v31 = vor.u32 %v2460_v4, %v2457_v8  ;;  %v3239_v25 = vunpack.c.l.b16 %v3130_v53 }
  0xaf   : > { %v1127_v24 = vshll.u32 %v11796_v54, 16  ;;  %10149 = vmatmul.msk.bf16.gmra.mxu1 %vm1373_vm10, %v10888_v13  ;;  %v1932_v38 = vpack.c.b16 %v1901_v32, %v1900_v0  ;;  %v2476_v44 = vrot.slane %v2474_v52, 5  ;;  %v10993_v13 = vld [vmem:[#allocation2 + $0x10] sm:$0xf]  ;;  %v3061_v36 = vld [vmem:[#allocation2 + $0x18] sm:$0xe] }
  0xb0   : > { %10077 = vmatmul.msk.bf16.gmra.mxu2 %vm1373_vm10, %v1372_v22  ;;  %10256 = vmatmul.msk.bf16.vlgmr.msrb.gmra.mxu3 %vm1373_vm10, %v10897_v62  ;;  %v1110_v5 = vrot.slane %v1108_v63, 4  ;;  %v1113_v18 = vrot.slane %v1111_v15, 5  ;;  %v2471_v62 = vor.u32 %v2470_v35, %v2466_v7  ;;  %v3238_v22 = vunpack.c.l.b16 %v3127_v41  ;;  %v2411_v6 = vld [vmem:[#allocation2 + $0x20] sm:$0x1] }
  0xb1   : > { %v1129_v11 = vrot.slane %v1127_v24, 5  ;;  %v2462_v40 = vrot.slane %v2461_v31, 4  ;;  %v1795_v56 = vrot.slane %v10993_v13, 5  ;;  %v3133_v63 = vrot.slane %v2410_v50, 5  ;;  %v1737_v13 = vld [vmem:[#allocation2 + $0x18] sm:$0xe] }
  0xb2   : > { %v1114_v2 = vor.u32 %v1113_v18, %v1110_v5  ;;  %v2472_v42 = vrot.slane %v2471_v62, 4  ;;  %v10159_v15 = vrot.slane %v1736_v46, 9  ;;  %v2479_v24 = vshrl.u32 %v2409_v21, 16  ;;  %v10994_v18 = vld [vmem:[#allocation2 + $0x14] sm:$0x1] }
  0xb3   : > { %v1130_v55 = vsel %vm11287_vm13, %v1125_v57, %v1129_v11  ;;  %v2467_v20 = vsel %vm11287_vm13, %v2462_v40, %v2466_v7  ;;  %v2482_v45 = vshll.u32 %v2409_v21, 16  ;;  %v1797_v5 = vrot.slane %v1795_v56, 4 }
  0xb4   : > { %v1655_v12 = vpop.f32.mrf.mxu1  ;;  %v1115_v3 = vrot.slane %v1114_v2, 4  ;;  %v1340_v16 = vunpack.c.l.b16 %v1130_v55  ;;  %v1798_v17 = vrot.slane %v10994_v18, 5  ;;  %v2488_v11 = vshll.u32 %v2410_v50, 16 }
  0xb5   : > { %v2492_v39 = vshrl.u32 %v2410_v50, 16  ;;  %v10290_v8 = vrot.slane %v3061_v36, 9  ;;  %v3135_v2 = vrot.slane %v3133_v63, 4  ;;  %v3136_v4 = vrot.slane %v2411_v6, 5 }
  0xb6   : > { %v1120_v14 = vsel %vm11287_vm13, %v1115_v3, %v11782_v51  ;;  %v1697_v43 = vpop.f32.mrf.mxu3  ;;  %v3270_v51 = vpack.c.b16 %v3239_v25, %v3238_v22  ;;  %v2840_v7 = vunpack.c.l.b16 %v2467_v20  ;;  %v1796_v3 = vsel %vm11800_vm1, %v10159_v15, %v1795_v56  ;;  %v10995_v56 = vld [vmem:[#allocation2 + $0x1c] sm:$0xf]  ;;  %v10899_v15 = vld [vmem:[#allocation2 + $0x24] sm:$0xff] }
  0xb7   : > { %v1339_v10 = vunpack.c.l.b16 %v1120_v14  ;;  %v2481_v41 = vrot.slane %v2479_v24, 4  ;;  %v2484_v53 = vrot.slane %v2482_v45, 5  ;;  %v1799_v0 = vsel %vm11800_vm1, %v1797_v5, %v1798_v17  ;;  %v2413_v24 = vld [vmem:[#allocation2 + $0x28] sm:$0xf]  ;;  %v3062_v5 = vld [vmem:[#allocation2 + $0x24] sm:$0xe] }
  0xb8   : > { %v2490_v14 = vrot.slane %v2488_v11, 5  ;;  %v3134_v31 = vsel %vm11800_vm1, %v10290_v8, %v3133_v63  ;;  %v3137_v62 = vsel %vm11800_vm1, %v3135_v2, %v3136_v4  ;;  %v1902_v52 = vunpack.c.l.b16 %v1796_v3 }
  0xb9   : > { %v1364_v60 = vpack.c.b16 %v1340_v16, %v1339_v10  ;;  %v1903_v10 = vunpack.c.l.b16 %v1799_v0  ;;  %v2485_v25 = vor.u32 %v2484_v53, %v2481_v41  ;;  %v3240_v40 = vunpack.c.l.b16 %v3134_v31 }
  0xba   : > { %v1802_v21 = vrot.slane %v10995_v56, 5  ;;  %v3140_v45 = vrot.slane %v2413_v24, 5  ;;  %v2512_v11 = vshll.u32 %v2413_v24, 16  ;;  %v10291_v41 = vrot.slane %v3062_v5, 9 }
  0xbb   : > { %10069 = vmatmul.msk.bf16.gmra.mxu0 %vm1373_vm10, %v1364_v60  ;;  %v2498_v60 = vshll.u32 %v2411_v6, 16 }
  0xbc   : > { %v1475_v37 = vpop.f32.mrf.mxu2  ;;  %v11823_v48 = vpop.f32.mrf.mxu1  ;;  %v1804_v4 = vrot.slane %v1802_v21, 4  ;;  %v3142_v53 = vrot.slane %v3140_v45, 4 }
  0xbd   : > { %v11821_v34 = vadd.f32 %v1695_v29, %v1475_v37  ;;  %v2477_v29 = vsel %vm11287_vm13, %v2472_v42, %v2476_v44  ;;  %v3241_v42 = vunpack.c.l.b16 %v3137_v62  ;;  %v1933_v44 = vpack.c.b16 %v1903_v10, %v1902_v52 }
  0xbe   : > { %v1700_v57 = vpop.f32.mrf.mxu3  ;;  %v2841_v35 = vunpack.c.l.b16 %v2477_v29  ;;  %v2412_v29 = vld [vmem:[#allocation2 + $0x24] sm:$0xf]  ;;  %v2514_v52 = vrot.slane %v2512_v11, 5 }
  0xbf   : > { %10306 = vmatmul.msk.bf16.vlgmr.msrb.gmra.mxu1 %vm1373_vm10, %v3270_v51  ;;  %v2500_v51 = vrot.slane %v2498_v60, 5  ;;  %v3271_v36 = vpack.c.b16 %v3241_v42, %v3240_v40  ;;  %v2503_v17 = vshrl.u32 %v2412_v29, 16  ;;  %v2506_v6 = vshll.u32 %v2412_v29, 16 }
  0xc0   : > { %10175 = vmatmul.msk.bf16.vlgmr.msrb.gmra.mxu2 %vm1373_vm10, %v1932_v38  ;;  %10257 = vmatmul.msk.bf16.gmra.mxu3 %vm1373_vm10, %v10898_v49  ;;  %v2872_v38 = vpack.c.b16 %v2841_v35, %v2840_v7  ;;  %v2486_v49 = vrot.slane %v2485_v25, 4  ;;  %v10996_v7 = vld [vmem:[#allocation2 + $0x20] sm:$0x1]  ;;  %v3141_v40 = vsel %vm11800_vm1, %v10291_v41, %v3140_v45  ;;  %v1738_v45 = vld [vmem:[#allocation2 + $0x24] sm:$0xe] }
  0xc1   : > { %v1435_v59 = vpop.f32.mrf.mxu0  ;;  %v1805_v35 = vrot.slane %v10996_v7, 5  ;;  %v2505_v31 = vrot.slane %v2503_v17, 4  ;;  %v2508_v62 = vrot.slane %v2506_v6, 5  ;;  %v10900_v6 = vld [vmem:[#allocation2 + $0x30] sm:$0xff] }
  0xc2   : > { %v11832_v33 = vadd.f32 %v1655_v12, %v1435_v59  ;;  %v2494_v12 = vrot.slane %v2492_v39, 4  ;;  %v10160_v59 = vrot.slane %v1737_v13, 9  ;;  %v2516_v39 = vshrl.u32 %v2413_v24, 16 }
  0xc4   : > { %v1477_v55 = vpop.f32.mrf.mxu2  ;;  %v1660_v32 = vpop.f32.mrf.mxu1  ;;  %v2495_v37 = vor.u32 %v2494_v12, %v2490_v14  ;;  %v1803_v12 = vsel %vm11800_vm1, %v10160_v59, %v1802_v21  ;;  %v2518_v10 = vrot.slane %v2516_v39, 4 }
  0xc5   : > { %v11836_v16 = vadd.f32 %v1697_v43, %v1477_v55  ;;  %v2414_v55 = vld [vmem:[#allocation2 + $0x2c] sm:$0x1] }
  0xc6   : > { %v1702_v22 = vpop.f32.mrf.mxu3  ;;  %v2496_v63 = vrot.slane %v2495_v37, 4  ;;  %v3143_v0 = vrot.slane %v2414_v55, 5  ;;  %v1806_v37 = vsel %vm11800_vm1, %v1804_v4, %v1805_v35  ;;  %v2519_v13 = vor.u32 %v2518_v10, %v2514_v52  ;;  %v2416_v4 = vld [vmem:[#allocation2 + $0x34] sm:$0xf]  ;;  %v10998_v10 = vld [vmem:[#allocation2 + $0x2c] sm:$0x1] }
  0xc7   : > { %v2522_v56 = vshll.u32 %v2414_v55, 16  ;;  %v3147_v7 = vrot.slane %v2416_v4, 5  ;;  %v10161_v35 = vrot.slane %v1738_v45, 9  ;;  %v3063_v55 = vld [vmem:[#allocation2 + $0x30] sm:$0xe] }
  0xc8   : > { %v2501_v2 = vsel %vm11287_vm13, %v2496_v63, %v2500_v51  ;;  %v3144_v42 = vsel %vm11800_vm1, %v3142_v53, %v3143_v0  ;;  %v2509_v51 = vor.u32 %v2508_v62, %v2505_v31  ;;  %v2520_v59 = vrot.slane %v2519_v13, 4 }
  0xc9   : > { %v11844_v43 = vpop.f32.mrf.mxu0  ;;  %v2843_v60 = vunpack.c.l.b16 %v2501_v2  ;;  %v2524_v5 = vrot.slane %v2522_v56, 5  ;;  %v2415_v2 = vld [vmem:[#allocation2 + $0x30] sm:$0xf]  ;;  %v2536_v0 = vshll.u32 %v2416_v4, 16 }
  0xca   : > { %v2510_v24 = vrot.slane %v2509_v51, 4  ;;  %v2527_v41 = vshrl.u32 %v2415_v2, 16  ;;  %v2530_v53 = vshll.u32 %v2415_v2, 16 }
  0xcb   : > { %10273 = vmatmul.msk.bf16.vlgmr.msrb.gmra.mxu0 %vm1373_vm10, %v2872_v38  ;;  %v2525_v31 = vsel %vm11287_vm13, %v2520_v59, %v2524_v5 }
  0xcc   : > { %v1480_v46 = vpop.f32.mrf.mxu2  ;;  %v11849_v20 = vpop.f32.mrf.mxu1  ;;  %v2529_v13 = vrot.slane %v2527_v41, 4  ;;  %v2532_v56 = vrot.slane %v2530_v53, 5 }
  0xcd   : > { %v11847_v50 = vadd.f32 %v1700_v57, %v1480_v46  ;;  %v2491_v57 = vsel %vm11287_vm13, %v2486_v49, %v2490_v14  ;;  %v1905_v46 = vunpack.c.l.b16 %v1806_v37 }
  0xce   : > { %v1705_v18 = vpop.f32.mrf.mxu3  ;;  %v2842_v25 = vunpack.c.l.b16 %v2491_v57 }
  0xcf   : > { %10307 = vmatmul.msk.bf16.gmra.mxu1 %vm1373_vm10, %v3271_v36 }
  0xd0   : > { %10176 = vmatmul.msk.bf16.gmra.mxu2 %vm1373_vm10, %v1933_v44  ;;  %10258 = vmatmul.msk.bf16.gmra.mxu3 %vm1373_vm10, %v10899_v15  ;;  %v1904_v44 = vunpack.c.l.b16 %v1803_v12  ;;  %v2873_v21 = vpack.c.b16 %v2843_v60, %v2842_v25  ;;  %v3243_v15 = vunpack.c.l.b16 %v3144_v42  ;;  %v2540_v12 = vshrl.u32 %v2416_v4, 16  ;;  %v2417_v60 = vld [vmem:[#allocation2 + $0x38] sm:$0x1] }
  0xd1   : > { %v1440_v8 = vpop.f32.mrf.mxu0  ;;  %v1812_v25 = vrot.slane %v10998_v10, 5  ;;  %v10292_v42 = vrot.slane %v3063_v55, 9 }
  0xd2   : > { %v11858_v3 = vadd.f32 %v1660_v32, %v1440_v8  ;;  %v1934_v36 = vpack.c.b16 %v1905_v46, %v1904_v44  ;;  %v10997_v8 = vld [vmem:[#allocation2 + $0x28] sm:$0xf]  ;;  %v3149_v44 = vrot.slane %v3147_v7, 4  ;;  %v3150_v46 = vrot.slane %v2417_v60, 5 }
  0xd3   : > { %v1809_v57 = vrot.slane %v10997_v8, 5  ;;  %v3148_v59 = vsel %vm11800_vm1, %v10292_v42, %v3147_v7  ;;  %v10901_v7 = vld [vmem:[#allocation2 + $0x3c] sm:$0xff] }
  0xd4   : > { %v1482_v14 = vpop.f32.mrf.mxu2  ;;  %v1665_v32 = vpop.f32.mrf.mxu1  ;;  %v3151_v5 = vsel %vm11800_vm1, %v3149_v44, %v3150_v46 }
  0xd5   : > { %v11862_v38 = vadd.f32 %v1702_v22, %v1482_v14  ;;  %v3242_v22 = vunpack.c.l.b16 %v3141_v40  ;;  %v1811_v62 = vrot.slane %v1809_v57, 4 }
  0xd6   : > { %v1707_v49 = vpop.f32.mrf.mxu3 }
  0xd7   : > { %v3272_v11 = vpack.c.b16 %v3243_v15, %v3242_v22  ;;  %v2542_v22 = vrot.slane %v2540_v12, 4 }
  0xd9   : > { %v11870_v63 = vpop.f32.mrf.mxu0 }
  0xdb   : > { %10274 = vmatmul.msk.bf16.gmra.mxu0 %vm1373_vm10, %v2873_v21  ;;  %v2538_v21 = vrot.slane %v2536_v0, 5 }
  0xdc   : > { %v1485_v29 = vpop.f32.mrf.mxu2  ;;  %v11875_v39 = vpop.f32.mrf.mxu1 }
  0xdd   : > { %v11873_v17 = vadd.f32 %v1705_v18, %v1485_v29  ;;  %v2515_v18 = vsel %vm11287_vm13, %v2510_v24, %v2514_v52  ;;  %v1810_v52 = vsel %vm11800_vm1, %v10161_v35, %v1809_v57  ;;  %v2543_v8 = vor.u32 %v2542_v22, %v2538_v21 }
  0xde   : > { %v2844_v15 = vunpack.c.l.b16 %v2515_v18  ;;  %v1906_v45 = vunpack.c.l.b16 %v1810_v52  ;;  %v2546_v57 = vshll.u32 %v2417_v60, 16  ;;  %v3245_v35 = vunpack.c.l.b16 %v3151_v5  ;;  %v2419_v60 = vld [vmem:[#allocation2 + $0x40] sm:$0xf] }
  0xdf   : > { %10308 = vmatmul.msk.bf16.gmra.mxu1 %vm1373_vm10, %v3272_v11  ;;  %v2533_v11 = vor.u32 %v2532_v56, %v2529_v13  ;;  %v2544_v0 = vrot.slane %v2543_v8, 4  ;;  %v3154_v44 = vrot.slane %v2419_v60, 5  ;;  %v2560_v22 = vshll.u32 %v2419_v60, 16 }
  0xe0   : > { %10177 = vmatmul.msk.bf16.gmra.mxu2 %vm1373_vm10, %v1934_v36  ;;  %10259 = vmatmul.msk.bf16.gmra.mxu3 %vm1373_vm10, %v10900_v6  ;;  %v2845_v36 = vunpack.c.l.b16 %v2525_v31  ;;  %v2548_v12 = vrot.slane %v2546_v57, 5 }
  0xe1   : > { %v1445_v14 = vpop.f32.mrf.mxu0  ;;  %v1710_v40 = vpop.f32.mrf.mxu3  ;;  %v2534_v53 = vrot.slane %v2533_v11, 4 }
  0xe2   : > { %v11884_v37 = vadd.f32 %v1665_v32, %v1445_v14  ;;  %v1813_v32 = vsel %vm11800_vm1, %v1811_v62, %v1812_v25  ;;  %v2874_v2 = vpack.c.b16 %v2845_v36, %v2844_v15  ;;  %v1739_v14 = vld [vmem:[#allocation2 + $0x30] sm:$0xe]  ;;  %v10999_v62 = vld [vmem:[#allocation2 + $0x34] sm:$0xf]  ;;  %v2418_v25 = vld [vmem:[#allocation2 + $0x3c] sm:$0xf] }
  0xe3   : > { %v1907_v6 = vunpack.c.l.b16 %v1813_v32  ;;  %v1816_v10 = vrot.slane %v10999_v62, 5  ;;  %v10162_v52 = vrot.slane %v1739_v14, 9  ;;  %v2551_v13 = vshrl.u32 %v2418_v25, 16  ;;  %v11000_v36 = vld [vmem:[#allocation2 + $0x38] sm:$0x1] }
  0xe4   : > { %v1487_v51 = vpop.f32.mrf.mxu2  ;;  %v1670_v24 = vpop.f32.mrf.mxu1  ;;  %v2554_v56 = vshll.u32 %v2418_v25, 16  ;;  %v2564_v15 = vshrl.u32 %v2419_v60, 16  ;;  %v1819_v32 = vrot.slane %v11000_v36, 5  ;;  %v2539_v5 = vsel %vm11287_vm13, %v2534_v53, %v2538_v21 }
  0xe5   : > { %v11888_v29 = vadd.f32 %v1707_v49, %v1487_v51  ;;  %v3244_v49 = vunpack.c.l.b16 %v3148_v59  ;;  %v1935_v41 = vpack.c.b16 %v1907_v6, %v1906_v45  ;;  %v3064_v51 = vld [vmem:[#allocation2 + $0x3c] sm:$0xe]  ;;  %v2549_v45 = vsel %vm11287_vm13, %v2544_v0, %v2548_v12  ;;  %v2420_v6 = vld [vmem:[#allocation2 + $0x44] sm:$0x1] }
  0xe6   : > { %v10293_v57 = vrot.slane %v3064_v51, 9  ;;  %v2556_v21 = vrot.slane %v2554_v56, 5  ;;  %v2562_v53 = vrot.slane %v2560_v22, 5  ;;  %v2566_v14 = vrot.slane %v2564_v15, 4 }
  0xe7   : > { %15668 = vst [vmem:[#allocation10_spill] sm:$0xff] %v11888_v29  ;;  %v3273_v18 = vpack.c.b16 %v3245_v35, %v3244_v49  ;;  %v3157_v49 = vrot.slane %v2420_v6, 5  ;;  %v1817_v35 = vsel %vm11800_vm1, %v10162_v52, %v1816_v10  ;;  %v2846_v0 = vunpack.c.l.b16 %v2539_v5 }
  0xe8   : > { %v2847_v12 = vunpack.c.l.b16 %v2549_v45  ;;  %v2567_v51 = vor.u32 %v2566_v14, %v2562_v53 }
  0xe9   : > { %v11896_v4 = vpop.f32.mrf.mxu0  ;;  %v1712_v55 = vpop.f32.mrf.mxu3 }
  0xea   : > { %v2875_v56 = vpack.c.b16 %v2847_v12, %v2846_v0  ;;  %v2568_v45 = vrot.slane %v2567_v51, 4  ;;  %v3065_v0 = vld [vmem:[#allocation2 + $0x48] sm:$0xe] }
  0xeb   : > { %10275 = vmatmul.msk.bf16.gmra.mxu0 %vm1373_vm10, %v2874_v2  ;;  %v3156_v2 = vrot.slane %v3154_v44, 4 }
  0xec   : > { %v11899_v31 = vpop.f32.mrf.mxu1 }
  0xed   : > { %v3158_v25 = vsel %vm11800_vm1, %v3156_v2, %v3157_v49  ;;  %v2421_v2 = vld [vmem:[#allocation2 + $0x48] sm:$0xf]  ;;  %v2422_v49 = vld [vmem:[#allocation2 + $0x4c] sm:$0xf] }
  0xee   : > { %v3247_v36 = vunpack.c.l.b16 %v3158_v25 }
  0xef   : > { %v1490_v42 = vpop.f32.mrf.mxu2  ;;  %10309 = vmatmul.msk.bf16.gmra.mxu1 %vm1373_vm10, %v3273_v18 }
  0xf0   : > { %v11901_v46 = vadd.f32 %v1710_v40, %v1490_v42  ;;  %10178 = vmatmul.msk.bf16.gmra.mxu2 %vm1373_vm10, %v1935_v41  ;;  %10260 = vmatmul.msk.bf16.gmra.mxu3 %vm1373_vm10, %v10901_v7  ;;  %v1818_v40 = vrot.slane %v1816_v10, 4  ;;  %v2553_v41 = vrot.slane %v2551_v13, 4  ;;  %v1908_v10 = vunpack.c.l.b16 %v1817_v35 }
  0xf1   : > { %v1450_v59 = vpop.f32.mrf.mxu0  ;;  %v1715_v8 = vpop.f32.mrf.mxu3  ;;  %v2570_v13 = vshll.u32 %v2420_v6, 16  ;;  %v1740_v6 = vld [vmem:[#allocation2 + $0x3c] sm:$0xe] }
  0xf2   : > { %15669 = vst [vmem:[#allocation11_spill] sm:$0xff] %v11901_v46  ;;  %v11910_v11 = vadd.f32 %v1670_v24, %v1450_v59  ;;  %v1820_v7 = vsel %vm11800_vm1, %v1818_v40, %v1819_v32  ;;  %v3155_v24 = vsel %vm11800_vm1, %v10293_v57, %v3154_v44  ;;  %v2557_v52 = vor.u32 %v2556_v21, %v2553_v41  ;;  %v10902_v40 = vld [vmem:[#allocation2 + $0x48] sm:$0xff] }
  0xf3   : > { %v1909_v42 = vunpack.c.l.b16 %v1820_v7  ;;  %v3246_v15 = vunpack.c.l.b16 %v3155_v24  ;;  %v2572_v44 = vrot.slane %v2570_v13, 5  ;;  %v1823_v57 = vrot.slane %v11647_v9, 5 }
  0xf4   : > { %v1675_v62 = vpop.f32.mrf.mxu1  ;;  %v2558_v5 = vrot.slane %v2557_v52, 4  ;;  %v3161_v41 = vrot.slane %v2422_v49, 5  ;;  %v1826_v21 = vrot.slane %v11692_v58, 5  ;;  %v2575_v9 = vshrl.u32 %v2421_v2, 16 }
  0xf5   : > { %v1936_v59 = vpack.c.b16 %v1909_v42, %v1908_v10  ;;  %v2573_v7 = vsel %vm11287_vm13, %v2568_v45, %v2572_v44  ;;  %v2578_v24 = vshll.u32 %v2421_v2, 16  ;;  %v10163_v58 = vrot.slane %v1740_v6, 9  ;;  %v2423_v10 = vld [vmem:[#allocation2 + $0x50] sm:$0x1] }
  0xf6   : > { %v2563_v12 = vsel %vm11287_vm13, %v2558_v5, %v2562_v53  ;;  %v2584_v42 = vshll.u32 %v2422_v49, 16  ;;  %v2588_v52 = vshrl.u32 %v2422_v49, 16  ;;  %v10294_v13 = vrot.slane %v3065_v0, 9 }
  0xf7   : > { %v1492_v18 = vpop.f32.mrf.mxu2  ;;  %v2848_v5 = vunpack.c.l.b16 %v2563_v12  ;;  %v2849_v45 = vunpack.c.l.b16 %v2573_v7  ;;  %v1824_v44 = vsel %vm11800_vm1, %v10163_v58, %v1823_v57 }
  0xf8   : > { %v11920_v60 = vadd.f32 %v1712_v55, %v1492_v18  ;;  %v3274_v55 = vpack.c.b16 %v3247_v36, %v3246_v15  ;;  %v3164_v15 = vrot.slane %v2423_v10, 5  ;;  %v2577_v36 = vrot.slane %v2575_v9, 4 }
  0xf9   : > { %v11922_v22 = vpop.f32.mrf.mxu0  ;;  %v1717_v32 = vpop.f32.mrf.mxu3  ;;  %v2586_v2 = vrot.slane %v2584_v42, 5  ;;  %v1910_v0 = vunpack.c.l.b16 %v1824_v44  ;;  %v2876_v9 = vpack.c.b16 %v2849_v45, %v2848_v5 }
  0xfa   : > { %15670 = vst [vmem:[#allocation12_spill] sm:$0xff] %v11920_v60 }
  0xfb   : > { %10276 = vmatmul.msk.bf16.gmra.mxu0 %vm1373_vm10, %v2875_v56  ;;  %v3163_v56 = vrot.slane %v3161_v41, 4 }
  0xfc   : > { %v11934_v18 = vpop.f32.mrf.mxu1 }
  0xfd   : > { %v3165_v49 = vsel %vm11800_vm1, %v3163_v56, %v3164_v15  ;;  %v1830_v56 = vrot.slane %v11705_v23, 5  ;;  %v2424_v15 = vld [vmem:[#allocation2 + $0x54] sm:$0xf] }
  0xff   : > { %v1495_v35 = vpop.f32.mrf.mxu2  ;;  %10310 = vmatmul.msk.bf16.gmra.mxu1 %vm1373_vm10, %v3274_v55 }
 0x100   : > { %v11927_v14 = vadd.f32 %v1715_v8, %v1495_v35  ;;  %10179 = vmatmul.msk.bf16.gmra.mxu2 %vm1373_vm10, %v1936_v59  ;;  %10261 = vmatmul.msk.bf16.gmra.mxu3 %vm1373_vm10, %v10902_v40  ;;  %v1825_v8 = vrot.slane %v1823_v57, 4  ;;  %v2580_v59 = vrot.slane %v2578_v24, 5  ;;  %v2590_v35 = vrot.slane %v2588_v52, 4 }
 0x101   : > { %v1455_v25 = vpop.f32.mrf.mxu0  ;;  %v1720_v53 = vpop.f32.mrf.mxu3  ;;  %v3249_v57 = vunpack.c.l.b16 %v3165_v49 }
 0x102   : > { %15671 = vst [vmem:[#allocation13_spill] sm:$0xff] %v11927_v14  ;;  %v11938_v51 = vadd.f32 %v1675_v62, %v1455_v25  ;;  %v1827_v40 = vsel %vm11800_vm1, %v1825_v8, %v1826_v21  ;;  %v3162_v62 = vsel %vm11800_vm1, %v10294_v13, %v3161_v41  ;;  %v2581_v7 = vor.u32 %v2580_v59, %v2577_v36  ;;  %v1741_v41 = vld [vmem:[#allocation2 + $0x48] sm:$0xe]  ;;  %v10903_v13 = vld [vmem:[#allocation2 + $0x54] sm:$0xff] }
 0x103   : > { %v1911_v12 = vunpack.c.l.b16 %v1827_v40  ;;  %v3248_v24 = vunpack.c.l.b16 %v3162_v62  ;;  %v2591_v21 = vor.u32 %v2590_v35, %v2586_v2  ;;  %v2594_v8 = vshll.u32 %v2423_v10, 16  ;;  %v2425_v36 = vld [vmem:[#allocation2 + $0x58] sm:$0xf]  ;;  %v3066_v40 = vld [vmem:[#allocation2 + $0x54] sm:$0xe] }
 0x104   : > { %v2582_v14 = vrot.slane %v2581_v7, 4  ;;  %v3168_v45 = vrot.slane %v2425_v36, 5  ;;  %v10164_v44 = vrot.slane %v1741_v41, 9  ;;  %v2602_v35 = vshll.u32 %v2424_v15, 16 }
 0x105   : > { %v1937_v52 = vpack.c.b16 %v1911_v12, %v1910_v0  ;;  %v2592_v59 = vrot.slane %v2591_v21, 4  ;;  %v2596_v5 = vrot.slane %v2594_v8, 5  ;;  %v2608_v62 = vshll.u32 %v2425_v36, 16 }
 0x106   : > { %v2612_v49 = vshrl.u32 %v2425_v36, 16  ;;  %v1833_v0 = vrot.slane %v11739_v61, 5  ;;  %v2587_v23 = vsel %vm11287_vm13, %v2582_v14, %v2586_v2  ;;  %v1832_v7 = vrot.slane %v1830_v56, 4 }
 0x107   : > { %v1497_v55 = vpop.f32.mrf.mxu2  ;;  %v10295_v21 = vrot.slane %v3066_v40, 9  ;;  %v3170_v8 = vrot.slane %v3168_v45, 4  ;;  %v1831_v61 = vsel %vm11800_vm1, %v10164_v44, %v1830_v56  ;;  %v2610_v14 = vrot.slane %v2608_v62, 5 }
 0x108   : > { %v11948_v6 = vadd.f32 %v1717_v32, %v1497_v55  ;;  %v3275_v32 = vpack.c.b16 %v3249_v57, %v3248_v24  ;;  %v2599_v55 = vshrl.u32 %v2424_v15, 16  ;;  %v2597_v24 = vsel %vm11287_vm13, %v2592_v59, %v2596_v5 }
 0x109   : > { %v1680_v25 = vpop.f32.mrf.mxu1  ;;  %v1722_v58 = vpop.f32.mrf.mxu3  ;;  %v2604_v15 = vrot.slane %v2602_v35, 5  ;;  %v2614_v2 = vrot.slane %v2612_v49, 4  ;;  %v2851_v36 = vunpack.c.l.b16 %v2597_v24  ;;  %v3169_v59 = vsel %vm11800_vm1, %v10295_v21, %v3168_v45 }
 0x10a   : > { %15672 = vst [vmem:[#allocation14_spill] sm:$0xff] %v11948_v6  ;;  %v11950_v42 = vpop.f32.mrf.mxu0  ;;  %v2601_v41 = vrot.slane %v2599_v55, 4  ;;  %v1912_v56 = vunpack.c.l.b16 %v1831_v61  ;;  %v1837_v61 = vrot.slane %v11768_v1, 5 }
 0x10b   : > { %10277 = vmatmul.msk.bf16.gmra.mxu0 %vm1373_vm10, %v2876_v9  ;;  %v2426_v9 = vld [vmem:[#allocation2 + $0x5c] sm:$0x1]  ;;  %v2615_v62 = vor.u32 %v2614_v2, %v2610_v14 }
 0x10c   : > { %v2605_v35 = vor.u32 %v2604_v15, %v2601_v41  ;;  %v2618_v49 = vshll.u32 %v2426_v9, 16  ;;  %v2428_v41 = vld [vmem:[#allocation2 + $0x64] sm:$0xf]  ;;  %v2427_v15 = vld [vmem:[#allocation2 + $0x60] sm:$0xf]  ;;  %v1839_v1 = vrot.slane %v1837_v61, 4 }
 0x10d   : > { %v2616_v21 = vrot.slane %v2615_v62, 4 }
 0x10e   : > { %v2606_v45 = vrot.slane %v2605_v35, 4  ;;  %v2620_v46 = vrot.slane %v2618_v49, 5 }
 0x10f   : > { %10311 = vmatmul.msk.bf16.gmra.mxu1 %vm1373_vm10, %v3275_v32  ;;  %v1834_v32 = vsel %vm11800_vm1, %v1832_v7, %v1833_v0 }
 0x110   : > { %10180 = vmatmul.msk.bf16.gmra.mxu2 %vm1373_vm10, %v1937_v52  ;;  %v1500_v10 = vpop.f32.mrf.mxu2  ;;  %10262 = vmatmul.msk.bf16.gmra.mxu3 %vm1373_vm10, %v10903_v13  ;;  %v3171_v52 = vrot.slane %v2426_v9, 5  ;;  %v2850_v13 = vunpack.c.l.b16 %v2587_v23  ;;  %v1913_v55 = vunpack.c.l.b16 %v1834_v32  ;;  %v2611_v32 = vsel %vm11287_vm13, %v2606_v45, %v2610_v14 }
 0x111   : > { %v11956_v12 = vadd.f32 %v1720_v53, %v1500_v10  ;;  %v1682_v57 = vpop.f32.mrf.mxu1  ;;  %v2852_v14 = vunpack.c.l.b16 %v2611_v32 }
 0x112   : > { %v3172_v5 = vsel %vm11800_vm1, %v3170_v8, %v3171_v52  ;;  %v2877_v23 = vpack.c.b16 %v2851_v36, %v2850_v13  ;;  %v1938_v6 = vpack.c.b16 %v1913_v55, %v1912_v56  ;;  %v1742_v52 = vld [vmem:[#allocation2 + $0x54] sm:$0xe]  ;;  %v3067_v13 = vld [vmem:[#allocation2 + $0x60] sm:$0xe]  ;;  %v1840_v36 = vrot.slane %v11796_v54, 5 }
 0x113   : > { %15673 = vst [vmem:[#allocation15_spill] sm:$0xff] %v11956_v12  ;;  %v1725_v53 = vpop.f32.mrf.mxu3  ;;  %v3250_v12 = vunpack.c.l.b16 %v3169_v59  ;;  %v3251_v0 = vunpack.c.l.b16 %v3172_v5  ;;  %v2429_v59 = vld [vmem:[#allocation2 + $0x68] sm:$0x1]  ;;  %v2626_v5 = vshll.u32 %v2427_v15, 16  ;;  %v2632_v56 = vshll.u32 %v2428_v41, 16 }
 0x114   : > { %v10296_v54 = vrot.slane %v3067_v13, 9  ;;  %v1841_v45 = vsel %vm11800_vm1, %v1839_v1, %v1840_v36  ;;  %v2642_v1 = vshll.u32 %v2429_v59, 16 }
 0x115   : > { %v3276_v8 = vpack.c.b16 %v3251_v0, %v3250_v12  ;;  %v2621_v12 = vsel %vm11287_vm13, %v2616_v21, %v2620_v46  ;;  %v1915_v32 = vunpack.c.l.b16 %v1841_v45 }
 0x116   : > { %v1460_v10 = vpop.f32.mrf.mxu0  ;;  %v2853_v49 = vunpack.c.l.b16 %v2621_v12 }
 0x117   : > { %v11972_v40 = vadd.f32 %v1680_v25, %v1460_v10  ;;  %v10904_v25 = vld [vmem:[#allocation2 + $0x60] sm:$0xff]  ;;  %v10165_v10 = vrot.slane %v1742_v52, 9  ;;  %v2634_v52 = vrot.slane %v2632_v56, 5 }
 0x118   : > { %v1502_v44 = vpop.f32.mrf.mxu2  ;;  %v2878_v12 = vpack.c.b16 %v2853_v49, %v2852_v14  ;;  %v2431_v14 = vld [vmem:[#allocation2 + $0x70] sm:$0xf]  ;;  %v11002_v49 = vld [vmem:[#allocation2 + $0x68] sm:$0x1] }
 0x119   : > { %v11974_v24 = vadd.f32 %v1722_v58, %v1502_v44  ;;  %v1685_v7 = vpop.f32.mrf.mxu1  ;;  %v3175_v58 = vrot.slane %v2428_v41, 5  ;;  %v2636_v44 = vshrl.u32 %v2428_v41, 16  ;;  %v1838_v0 = vsel %vm11800_vm1, %v10165_v10, %v1837_v61 }
 0x11a   : > { %v1914_v13 = vunpack.c.l.b16 %v1838_v0  ;;  %v1847_v0 = vrot.slane %v11002_v49, 5 }
 0x11b   : > { %15674 = vst [vmem:[#allocation16_spill] sm:$0xff] %v11974_v24  ;;  %v1727_v60 = vpop.f32.mrf.mxu3  ;;  %10278 = vmatmul.msk.bf16.gmra.mxu0 %vm1373_vm10, %v2877_v23  ;;  %v3177_v55 = vrot.slane %v3175_v58, 4  ;;  %v2638_v41 = vrot.slane %v2636_v44, 4  ;;  %v2430_v24 = vld [vmem:[#allocation2 + $0x6c] sm:$0xf] }
 0x11d   : > { %v2639_v36 = vor.u32 %v2638_v41, %v2634_v52 }
 0x11e   : > { %v1462_v9 = vpop.f32.mrf.mxu0 }
 0x11f   : > { %v11978_v2 = vadd.f32 %v1682_v57, %v1462_v9  ;;  %10312 = vmatmul.msk.bf16.gmra.mxu1 %vm1373_vm10, %v3276_v8  ;;  %v2623_v57 = vshrl.u32 %v2427_v15, 16  ;;  %v3176_v9 = vsel %vm11800_vm1, %v10296_v54, %v3175_v58  ;;  %v1743_v54 = vld [vmem:[#allocation2 + $0x60] sm:$0xe] }
 0x120   : > { %10181 = vmatmul.msk.bf16.gmra.mxu2 %vm1373_vm10, %v1938_v6  ;;  %10263 = vmatmul.msk.bf16.gmra.mxu3 %vm1373_vm10, %v10904_v25  ;;  %v3178_v6 = vrot.slane %v2429_v59, 5  ;;  %v2628_v25 = vrot.slane %v2626_v5, 5  ;;  %v3252_v10 = vunpack.c.l.b16 %v3176_v9  ;;  %v11001_v5 = vld [vmem:[#allocation2 + $0x64] sm:$0xf]  ;;  %v2640_v59 = vrot.slane %v2639_v36, 4 }
 0x121   : > { %v1687_v46 = vpop.f32.mrf.mxu1  ;;  %v2625_v21 = vrot.slane %v2623_v57, 4  ;;  %v1844_v56 = vrot.slane %v11001_v5, 5 }
 0x123   : > { %v1505_v35 = vpop.f32.mrf.mxu2  ;;  %v1730_v23 = vpop.f32.mrf.mxu3  ;;  %v2629_v61 = vor.u32 %v2628_v25, %v2625_v21  ;;  %v2644_v25 = vrot.slane %v2642_v1, 5  ;;  %v1846_v9 = vrot.slane %v1844_v56, 4 }
 0x124   : > { %v11988_v62 = vadd.f32 %v1725_v53, %v1505_v35  ;;  %v3179_v53 = vsel %vm11800_vm1, %v3177_v55, %v3178_v6  ;;  %v10905_v55 = vld [vmem:[#allocation2 + $0x6c] sm:$0xff] }
 0x125   : > { %v3253_v35 = vunpack.c.l.b16 %v3179_v53  ;;  %v2647_v53 = vshrl.u32 %v2430_v24, 16 }
 0x126   : > { %15675 = vst [vmem:[#allocation17_spill] sm:$0xff] %v11988_v62  ;;  %v1465_v8 = vpop.f32.mrf.mxu0  ;;  %v1939_v62 = vpack.c.b16 %v1915_v32, %v1914_v13  ;;  %v3068_v13 = vld [vmem:[#allocation2 + $0x6c] sm:$0xe]  ;;  %v2650_v32 = vshll.u32 %v2430_v24, 16 }
 0x127   : > { %v11998_v15 = vadd.f32 %v1685_v7, %v1465_v8  ;;  %v2630_v7 = vrot.slane %v2629_v61, 4  ;;  %v3277_v6 = vpack.c.b16 %v3253_v35, %v3252_v10  ;;  %v3182_v8 = vrot.slane %v2431_v14, 5  ;;  %v2432_v35 = vld [vmem:[#allocation2 + $0x74] sm:$0x1] }
 0x128   : > { %v2660_v61 = vshrl.u32 %v2431_v14, 16  ;;  %v10297_v36 = vrot.slane %v3068_v13, 9 }
 0x129   : > { %v2635_v10 = vsel %vm11287_vm13, %v2630_v7, %v2634_v52  ;;  %v3184_v1 = vrot.slane %v3182_v8, 4 }
 0x12a   : > { %v2854_v49 = vunpack.c.l.b16 %v2635_v10 }
 0x12b   : > { %v1507_v57 = vpop.f32.mrf.mxu2  ;;  %v1732_v58 = vpop.f32.mrf.mxu3  ;;  %10279 = vmatmul.msk.bf16.gmra.mxu0 %vm1373_vm10, %v2878_v12  ;;  %v2656_v12 = vshll.u32 %v2431_v14, 16  ;;  %v2662_v14 = vrot.slane %v2660_v61, 4 }
 0x12c   : > { %v12000_v44 = vadd.f32 %v1727_v60, %v1507_v57  ;;  %v1690_v21 = vpop.f32.mrf.mxu1  ;;  %v10166_v60 = vrot.slane %v1743_v54, 9  ;;  %v3185_v57 = vrot.slane %v2432_v35, 5  ;;  %v2649_v54 = vrot.slane %v2647_v53, 4 }
 0x12e   : > { %15676 = vst [vmem:[#allocation18_spill] sm:$0xff] %v12000_v44  ;;  %v1467_v45 = vpop.f32.mrf.mxu0  ;;  %v1845_v24 = vsel %vm11800_vm1, %v10166_v60, %v1844_v56  ;;  %v3186_v56 = vsel %vm11800_vm1, %v3184_v1, %v3185_v57  ;;  %v10906_v57 = vld [vmem:[#allocation2 + $0x78] sm:$0xff] }
 0x12f   : > { %v12003_v41 = vadd.f32 %v1687_v46, %v1467_v45  ;;  %10313 = vmatmul.msk.bf16.gmra.mxu1 %vm1373_vm10, %v3277_v6  ;;  %v2645_v46 = vsel %vm11287_vm13, %v2640_v59, %v2644_v25  ;;  %v2658_v6 = vrot.slane %v2656_v12, 5  ;;  %v3183_v25 = vsel %vm11800_vm1, %v10297_v36, %v3182_v8 }
 0x130   : > { %10182 = vmatmul.msk.bf16.gmra.mxu2 %vm1373_vm10, %v1939_v62  ;;  %10264 = vmatmul.msk.bf16.gmra.mxu3 %vm1373_vm10, %v10905_v55  ;;  %v1848_v62 = vsel %vm11800_vm1, %v1846_v9, %v1847_v0  ;;  %v2652_v55 = vrot.slane %v2650_v32, 5  ;;  %v2855_v45 = vunpack.c.l.b16 %v2645_v46  ;;  %v1916_v60 = vunpack.c.l.b16 %v1845_v24 }
 0x131   : > { %v1917_v13 = vunpack.c.l.b16 %v1848_v62  ;;  %v2663_v9 = vor.u32 %v2662_v14, %v2658_v6  ;;  %v11003_v62 = vld [vmem:[#allocation2 + $0x70] sm:$0xf] }
 0x132   : > { %v2653_v0 = vor.u32 %v2652_v55, %v2649_v54  ;;  %v2879_v53 = vpack.c.b16 %v2855_v45, %v2854_v49  ;;  %v1851_v54 = vrot.slane %v11003_v62, 5  ;;  %v2434_v55 = vld [vmem:[#allocation2 + $0x7c] sm:$0xf]  ;;  %v3069_v45 = vld [vmem:[#allocation2 + $0x78] sm:$0xe] }
 0x133   : > { %v1510_v5 = vpop.f32.mrf.mxu2  ;;  %v12018_v7 = vpop.f32.mrf.mxu3  ;;  %v1940_v10 = vpack.c.b16 %v1917_v13, %v1916_v60  ;;  %v2664_v36 = vrot.slane %v2663_v9, 4  ;;  %v3189_v49 = vrot.slane %v2434_v55, 5 }
 0x134   : > { %v12016_v52 = vadd.f32 %v1730_v23, %v1510_v5  ;;  %v1692_v59 = vpop.f32.mrf.mxu1  ;;  %v2666_v23 = vshll.u32 %v2432_v35, 16  ;;  %v3254_v5 = vunpack.c.l.b16 %v3183_v25  ;;  %v2654_v8 = vrot.slane %v2653_v0, 4  ;;  %v1744_v35 = vld [vmem:[#allocation2 + $0x6c] sm:$0xe]  ;;  %v11004_v25 = vld [vmem:[#allocation2 + $0x74] sm:$0x1] }
 0x135   : > { %v10167_v13 = vrot.slane %v1744_v35, 9  ;;  %v2435_v0 = vld [vmem:[#allocation2 + $0x80] sm:$0x1] }
 0x136   : > { %15677 = vst [vmem:[#allocation19_spill] sm:$0xff] %v12016_v52  ;;  %v3255_v52 = vunpack.c.l.b16 %v3186_v56  ;;  %v2668_v1 = vrot.slane %v2666_v23, 5  ;;  %v2659_v56 = vsel %vm11287_vm13, %v2654_v8, %v2658_v6  ;;  %v3192_v62 = vrot.slane %v2435_v0, 5 }
 0x138   : > { %v1470_v32 = vpop.f32.mrf.mxu0  ;;  %v3278_v24 = vpack.c.b16 %v3255_v52, %v3254_v5  ;;  %v2669_v60 = vsel %vm11287_vm13, %v2664_v36, %v2668_v1  ;;  %v1853_v52 = vrot.slane %v1851_v54, 4  ;;  %v2856_v36 = vunpack.c.l.b16 %v2659_v56 }
 0x139   : > { %v12024_v12 = vadd.f32 %v1690_v21, %v1470_v32  ;;  %v2433_v21 = vld [vmem:[#allocation2 + $0x78] sm:$0xf]  ;;  %v2684_v32 = vshrl.u32 %v2434_v55, 16  ;;  %v2857_v1 = vunpack.c.l.b16 %v2669_v60 }
 0x13a   : > { %v2671_v9 = vshrl.u32 %v2433_v21, 16  ;;  %v2674_v23 = vshll.u32 %v2433_v21, 16 }
 0x13b   : > { %v1512_v61 = vpop.f32.mrf.mxu2  ;;  %v12028_v44 = vpop.f32.mrf.mxu3  ;;  %10280 = vmatmul.msk.bf16.gmra.mxu0 %vm1373_vm10, %v2879_v53  ;;  %v2680_v53 = vshll.u32 %v2434_v55, 16 }
 0x13c   : > { %v12026_v46 = vadd.f32 %v1732_v58, %v1512_v61  ;;  %v3346_v14 = vpop.f32.mrf.mxu1  ;;  %v1854_v58 = vrot.slane %v11004_v25, 5  ;;  %v10298_v61 = vrot.slane %v3069_v45, 9  ;;  %v2673_v21 = vrot.slane %v2671_v9, 4 }
 0x13d   : > { %v2676_v55 = vrot.slane %v2674_v23, 5  ;;  %v12047_v45 = vrot.slane %v2680_v53, 5  ;;  %v1658_v9 = vadd.f32 %v11823_v48, %v11844_v43  ;;  %v2690_v53 = vshll.u32 %v2435_v0, 16  ;;  %v10907_v48 = vld [vmem:[#allocation2 + $0x84] sm:$0xff] }
 0x13e   : > { %15678 = vst [vmem:[#allocation20_spill] sm:$0xff] %v12026_v46  ;;  %v1855_v35 = vsel %vm11800_vm1, %v1853_v52, %v1854_v58  ;;  %v2686_v46 = vrot.slane %v2684_v32, 4 }
 0x13f   : > { %10314 = vmatmul.msk.bf16.gmra.mxu1 %vm1373_vm10, %v3278_v24  ;;  %v1852_v24 = vsel %vm11800_vm1, %v10167_v13, %v1851_v54  ;;  %v1919_v54 = vunpack.c.l.b16 %v1855_v35  ;;  %v2880_v13 = vpack.c.b16 %v2857_v1, %v2856_v36  ;;  %v2436_v36 = vld [vmem:[#allocation2 + $0x84] sm:$0xf] }
 0x140   : > { %10183 = vmatmul.msk.bf16.gmra.mxu2 %vm1373_vm10, %v1940_v10  ;;  %10265 = vmatmul.msk.bf16.gmra.mxu3 %vm1373_vm10, %v10906_v57  ;;  %v1472_v5 = vpop.f32.mrf.mxu0  ;;  %v3191_v10 = vrot.slane %v3189_v49, 4  ;;  %v1918_v60 = vunpack.c.l.b16 %v1852_v24 }
 0x141   : > { %v12038_v25 = vadd.f32 %v1692_v59, %v1472_v5 }
 0x142   : > { %v3193_v56 = vsel %vm11800_vm1, %v3191_v10, %v3192_v62  ;;  %v1745_v10 = vld [vmem:[#allocation2 + $0x78] sm:$0xe]  ;;  %v11005_v62 = vld [vmem:[#allocation2 + $0x7c] sm:$0xf] }
 0x143   : > { %v2008_v6 = vpop.f32.mrf.mxu2  ;;  %v12041_v57 = vpop.f32.mrf.mxu3  ;;  %v3257_v52 = vunpack.c.l.b16 %v3193_v56  ;;  %v1858_v24 = vrot.slane %v11005_v62, 5  ;;  %v10168_v56 = vrot.slane %v1745_v10, 9 }
 0x144   : > { %v2088_v8 = vadd.f32 %v2008_v6, %v11832_v33  ;;  %v12050_v5 = vpop.f32.mrf.mxu1  ;;  %v3190_v33 = vsel %vm11800_vm1, %v10298_v61, %v3189_v49  ;;  %v2677_v6 = vor.u32 %v2676_v55, %v2673_v21  ;;  %v1941_v49 = vpack.c.b16 %v1919_v54, %v1918_v60  ;;  %v2437_v21 = vld [vmem:[#allocation2 + $0x88] sm:$0xf] }
 0x145   : > { %v3256_v58 = vunpack.c.l.b16 %v3190_v33  ;;  %v2692_v55 = vrot.slane %v2690_v53, 5  ;;  %v3196_v33 = vrot.slane %v2437_v21, 5  ;;  %v2695_v60 = vshrl.u32 %v2436_v36, 16 }
 0x146   : > { %v2374_v59 = vadd.f32 %v12018_v7, %v2088_v8  ;;  %v2687_v7 = vor.u32 %v2686_v46, %v12047_v45  ;;  %v2678_v35 = vrot.slane %v2677_v6, 4  ;;  %v2698_v54 = vshll.u32 %v2436_v36, 16 }
 0x147   : > { %v3279_v43 = vpack.c.b16 %v3257_v52, %v3256_v58  ;;  %v2708_v6 = vshrl.u32 %v2437_v21, 16  ;;  %v3198_v53 = vrot.slane %v3196_v33, 4  ;;  %v1859_v62 = vsel %vm11800_vm1, %v10168_v56, %v1858_v24 }
 0x148   : > { %v2948_v23 = vpop.f32.mrf.mxu0  ;;  %v2688_v0 = vrot.slane %v2687_v7, 4  ;;  %v2683_v58 = vsel %vm11287_vm13, %v2678_v35, %v12047_v45  ;;  %v2697_v36 = vrot.slane %v2695_v60, 4  ;;  %v1920_v56 = vunpack.c.l.b16 %v1859_v62  ;;  %v10908_v62 = vld [vmem:[#allocation2 + $0x90] sm:$0xff] }
 0x149   : > { %v3028_v32 = vadd.f32 %v2948_v23, %v2374_v59  ;;  %v11006_v23 = vld [vmem:[#allocation2 + $0x80] sm:$0x1] }
 0x14a   : > { %v2693_v52 = vsel %vm11287_vm13, %v2688_v0, %v2692_v55  ;;  %v2858_v55 = vunpack.c.l.b16 %v2683_v58  ;;  %v1663_v58 = vadd.f32 %v11849_v20, %v11870_v63  ;;  %v2439_v20 = vld [vmem:[#allocation2 + $0x90] sm:$0xf]  ;;  %v2440_v63 = vld [vmem:[#allocation2 + $0x94] sm:$0xf] }
 0x14b   : > { %v2010_v8 = vpop.f32.mrf.mxu2  ;;  %v12059_v61 = vpop.f32.mrf.mxu3  ;;  %10281 = vmatmul.msk.bf16.gmra.mxu0 %vm1373_vm10, %v2880_v13  ;;  %v12062_v1 = vadd.f32 %v3346_v14, %v3028_v32  ;;  %v1860_v14 = vrot.slane %v1858_v24, 4  ;;  %v2704_v13 = vshll.u32 %v2437_v21, 16  ;;  %v2700_v21 = vrot.slane %v2698_v54, 5 }
 0x14c   : > { %v2089_v29 = vadd.f32 %v2010_v8, %v1658_v9  ;;  %v3351_v59 = vpop.f32.mrf.mxu1  ;;  %v3070_v9 = vld [vmem:[#allocation2 + $0x84] sm:$0xe]  ;;  %v1861_v8 = vrot.slane %v11006_v23, 5  ;;  %v2710_v23 = vrot.slane %v2708_v6, 4 }
 0x14d   : > { %v10299_v7 = vrot.slane %v3070_v9, 9  ;;  %v2701_v54 = vor.u32 %v2700_v21, %v2697_v36  ;;  %v11007_v36 = vld [vmem:[#allocation2 + $0x88] sm:$0xf] }
 0x14e   : > { %v2375_v46 = vadd.f32 %v12028_v44, %v2089_v29  ;;  %v2438_v29 = vld [vmem:[#allocation2 + $0x8c] sm:$0x1]  ;;  %v1865_v21 = vrot.slane %v11007_v36, 5 }
 0x14f   : > { %10315 = vmatmul.msk.bf16.gmra.mxu1 %vm1373_vm10, %v3279_v43  ;;  %v3199_v32 = vrot.slane %v2438_v29, 5  ;;  %v2706_v43 = vrot.slane %v2704_v13, 5  ;;  %v3197_v24 = vsel %vm11800_vm1, %v10299_v7, %v3196_v33 }
 0x150   : > { %10184 = vmatmul.msk.bf16.gmra.mxu2 %vm1373_vm10, %v1941_v49  ;;  %10266 = vmatmul.msk.bf16.gmra.mxu3 %vm1373_vm10, %v10907_v48  ;;  %v2950_v44 = vpop.f32.mrf.mxu0  ;;  %v1862_v48 = vsel %vm11800_vm1, %v1860_v14, %v1861_v8  ;;  %v2714_v14 = vshll.u32 %v2438_v29, 16  ;;  %v3258_v6 = vunpack.c.l.b16 %v3197_v24 }
 0x151   : > { %v3029_v49 = vadd.f32 %v2950_v44, %v2375_v46  ;;  %v2859_v46 = vunpack.c.l.b16 %v2693_v52  ;;  %v1921_v60 = vunpack.c.l.b16 %v1862_v48  ;;  %v2711_v8 = vor.u32 %v2710_v23, %v2706_v43  ;;  %v1746_v23 = vld [vmem:[#allocation2 + $0x84] sm:$0xe] }
 0x153   : > { %v2013_v10 = vpop.f32.mrf.mxu2  ;;  %v12076_v35 = vpop.f32.mrf.mxu3  ;;  %v12081_v0 = vadd.f32 %v12050_v5, %v3029_v49  ;;  %v2881_v13 = vpack.c.b16 %v2859_v46, %v2858_v55 }
 0x154   : > { %v2090_v45 = vadd.f32 %v2013_v10, %v11858_v3  ;;  %v3353_v44 = vpop.f32.mrf.mxu1  ;;  %v3200_v3 = vsel %vm11800_vm1, %v3198_v53, %v3199_v32  ;;  %v1942_v10 = vpack.c.b16 %v1921_v60, %v1920_v56  ;;  %v2712_v53 = vrot.slane %v2711_v8, 4  ;;  %v11008_v8 = vld [vmem:[#allocation2 + $0x8c] sm:$0x1] }
 0x155   : > { %v3259_v5 = vunpack.c.l.b16 %v3200_v3  ;;  %v2716_v32 = vrot.slane %v2714_v14, 5  ;;  %v3071_v3 = vld [vmem:[#allocation2 + $0x90] sm:$0xe]  ;;  %v10169_v60 = vrot.slane %v1746_v23, 9  ;;  %v1868_v14 = vrot.slane %v11008_v8, 5 }
 0x156   : > { %v2376_v9 = vadd.f32 %v12041_v57, %v2090_v45  ;;  %v2702_v45 = vrot.slane %v2701_v54, 4  ;;  %v2722_v54 = vshll.u32 %v2439_v20, 16 }
 0x157   : > { %v3280_v48 = vpack.c.b16 %v3259_v5, %v3258_v6  ;;  %v2717_v56 = vsel %vm11287_vm13, %v2712_v53, %v2716_v32  ;;  %v2728_v6 = vshll.u32 %v2440_v63, 16  ;;  %v2732_v5 = vshrl.u32 %v2440_v63, 16 }
 0x158   : > { %v2953_v52 = vpop.f32.mrf.mxu0  ;;  %v2707_v24 = vsel %vm11287_vm13, %v2702_v45, %v2706_v43 }
 0x159   : > { %v3030_v57 = vadd.f32 %v2953_v52, %v2376_v9  ;;  %v3203_v9 = vrot.slane %v2440_v63, 5  ;;  %v2860_v45 = vunpack.c.l.b16 %v2707_v24  ;;  %v2730_v63 = vrot.slane %v2728_v6, 5  ;;  %v1747_v6 = vld [vmem:[#allocation2 + $0x90] sm:$0xe] }
 0x15b   : > { %v2015_v49 = vpop.f32.mrf.mxu2  ;;  %v12090_v7 = vpop.f32.mrf.mxu3  ;;  %10282 = vmatmul.msk.bf16.gmra.mxu0 %vm1373_vm10, %v2881_v13  ;;  %v12093_v29 = vadd.f32 %v3351_v59, %v3030_v57  ;;  %v2719_v59 = vshrl.u32 %v2439_v20, 16  ;;  %v2441_v13 = vld [vmem:[#allocation2 + $0x98] sm:$0x1]  ;;  %v3205_v52 = vrot.slane %v3203_v9, 4 }
 0x15c   : > { %v2091_v33 = vadd.f32 %v2015_v49, %v1663_v58  ;;  %v3356_v46 = vpop.f32.mrf.mxu1  ;;  %v10300_v58 = vrot.slane %v3071_v3, 9  ;;  %v3206_v57 = vrot.slane %v2441_v13, 5  ;;  %v2734_v3 = vrot.slane %v2732_v5, 4  ;;  %v11009_v5 = vld [vmem:[#allocation2 + $0x94] sm:$0xf] }
 0x15d   : > { %v2721_v36 = vrot.slane %v2719_v59, 4 }
 0x15e   : > { %v2377_v55 = vadd.f32 %v12059_v61, %v2091_v33  ;;  %v1867_v61 = vrot.slane %v1865_v21, 4  ;;  %v2861_v33 = vunpack.c.l.b16 %v2717_v56  ;;  %v3207_v56 = vsel %vm11800_vm1, %v3205_v52, %v3206_v57 }
 0x15f   : > { %10316 = vmatmul.msk.bf16.gmra.mxu1 %vm1373_vm10, %v3280_v48  ;;  %v2724_v48 = vrot.slane %v2722_v54, 5  ;;  %v2735_v8 = vor.u32 %v2734_v3, %v2730_v63 }
 0x160   : > { %10185 = vmatmul.msk.bf16.gmra.mxu2 %vm1373_vm10, %v1942_v10  ;;  %10267 = vmatmul.msk.bf16.gmra.mxu3 %vm1373_vm10, %v10908_v62  ;;  %v2955_v43 = vpop.f32.mrf.mxu0  ;;  %v1866_v62 = vsel %vm11800_vm1, %v10169_v60, %v1865_v21  ;;  %v1869_v20 = vsel %vm11800_vm1, %v1867_v61, %v1868_v14  ;;  %v2882_v54 = vpack.c.b16 %v2861_v33, %v2860_v45  ;;  %v3261_v14 = vunpack.c.l.b16 %v3207_v56 }
 0x161   : > { %v3031_v49 = vadd.f32 %v2955_v43, %v2377_v55  ;;  %v1922_v21 = vunpack.c.l.b16 %v1866_v62  ;;  %v1923_v60 = vunpack.c.l.b16 %v1869_v20  ;;  %v2725_v59 = vor.u32 %v2724_v48, %v2721_v36  ;;  %v10909_v36 = vld [vmem:[#allocation2 + $0x9c] sm:$0xff]  ;;  %v11010_v20 = vld [vmem:[#allocation2 + $0x98] sm:$0x1] }
 0x162   : > { %v1668_v61 = vadd.f32 %v11875_v39, %v11896_v4  ;;  %v2736_v33 = vrot.slane %v2735_v8, 4  ;;  %v10170_v4 = vrot.slane %v1747_v6, 9  ;;  %v2443_v48 = vld [vmem:[#allocation2 + $0xa0] sm:$0xf]  ;;  %v1875_v3 = vrot.slane %v11010_v20, 5 }
 0x163   : > { %v2018_v10 = vpop.f32.mrf.mxu2  ;;  %v12104_v32 = vpop.f32.mrf.mxu3  ;;  %v12108_v23 = vadd.f32 %v3353_v44, %v3031_v49  ;;  %v2738_v44 = vshll.u32 %v2441_v13, 16  ;;  %v1872_v49 = vrot.slane %v11009_v5, 5  ;;  %v2726_v57 = vrot.slane %v2725_v59, 4  ;;  %v2442_v13 = vld [vmem:[#allocation2 + $0x9c] sm:$0xf] }
 0x164   : > { %v2092_v53 = vadd.f32 %v2018_v10, %v11884_v37  ;;  %v12113_v24 = vpop.f32.mrf.mxu1  ;;  %v3204_v37 = vsel %vm11800_vm1, %v10300_v58, %v3203_v9  ;;  %v2746_v59 = vshll.u32 %v2442_v13, 16  ;;  %v2756_v8 = vshrl.u32 %v2443_v48, 16 }
 0x165   : > { %v3260_v43 = vunpack.c.l.b16 %v3204_v37  ;;  %v2740_v62 = vrot.slane %v2738_v44, 5  ;;  %v1874_v56 = vrot.slane %v1872_v49, 4  ;;  %v3072_v44 = vld [vmem:[#allocation2 + $0x9c] sm:$0xe] }
 0x166   : > { %v2378_v55 = vadd.f32 %v12076_v35, %v2092_v53  ;;  %v1943_v53 = vpack.c.b16 %v1923_v60, %v1922_v21  ;;  %v3210_v21 = vrot.slane %v2443_v48, 5  ;;  %v2743_v60 = vshrl.u32 %v2442_v13, 16 }
 0x167   : > { %v3281_v39 = vpack.c.b16 %v3261_v14, %v3260_v43  ;;  %v2741_v43 = vsel %vm11287_vm13, %v2736_v33, %v2740_v62  ;;  %v2444_v14 = vld [vmem:[#allocation2 + $0xa4] sm:$0x1]  ;;  %v10301_v6 = vrot.slane %v3072_v44, 9  ;;  %v202_v62 = vld [vmem:[%s11131_s21 + $0xf0] sm:$0xff] }
 0x168   : > { %v2958_v35 = vpop.f32.mrf.mxu0  ;;  %v3213_v5 = vrot.slane %v2444_v14, 5  ;;  %v2762_v44 = vshll.u32 %v2444_v14, 16 }
 0x169   : > { %v3032_v10 = vadd.f32 %v2958_v35, %v2378_v55  ;;  %v1876_v35 = vsel %vm11800_vm1, %v1874_v56, %v1875_v3 }
 0x16a   : > { %v1925_v3 = vunpack.c.l.b16 %v1876_v35 }
 0x16b   : > { %v2020_v9 = vpop.f32.mrf.mxu2  ;;  %v12121_v52 = vpop.f32.mrf.mxu3  ;;  %10283 = vmatmul.msk.bf16.gmra.mxu0 %vm1373_vm10, %v2882_v54  ;;  %v12124_v45 = vadd.f32 %v3356_v46, %v3032_v10  ;;  %v2731_v46 = vsel %vm11287_vm13, %v2726_v57, %v2730_v63  ;;  %v2752_v54 = vshll.u32 %v2443_v48, 16  ;;  %v3212_v63 = vrot.slane %v3210_v21, 4 }
 0x16c   : > { %v2093_v58 = vadd.f32 %v2020_v9, %v1668_v61  ;;  %v12127_v37 = vpop.f32.mrf.mxu1  ;;  %v2748_v57 = vrot.slane %v2746_v59, 5  ;;  %v2863_v48 = vunpack.c.l.b16 %v2741_v43 }
 0x16e   : > { %v2379_v55 = vadd.f32 %v12090_v7, %v2093_v58  ;;  %v1873_v7 = vsel %vm11800_vm1, %v10170_v4, %v1872_v49  ;;  %v2862_v58 = vunpack.c.l.b16 %v2731_v46  ;;  %v2758_v49 = vrot.slane %v2756_v8, 4 }
 0x16f   : > { %10317 = vmatmul.msk.bf16.gmra.mxu1 %vm1373_vm10, %v3281_v39  ;;  %v12146_v39 = vpack.c.bf16 %v202_v62, %v202_v62  ;;  %v1924_v20 = vunpack.c.l.b16 %v1873_v7 }
 0x170   : > { %10186 = vmatmul.msk.bf16.gmra.mxu2 %vm1373_vm10, %v1943_v53  ;;  %10268 = vmatmul.msk.bf16.gmra.mxu3 %vm1373_vm10, %v10909_v36  ;;  %v2960_v61 = vpop.f32.mrf.mxu0  ;;  %v2745_v53 = vrot.slane %v2743_v60, 4  ;;  %v12144_v36 = vrot.slane %v2752_v54, 5  ;;  %v3214_v60 = vsel %vm11800_vm1, %v3212_v63, %v3213_v5  ;;  %v2883_v8 = vpack.c.b16 %v2863_v48, %v2862_v58  ;;  %v2445_v63 = vld [vmem:[#allocation2 + $0xa8] sm:$0xf]  ;;  %v1748_v48 = vld [vmem:[#allocation2 + $0x9c] sm:$0xe] }
 0x171   : > { %v3033_v10 = vadd.f32 %v2960_v61, %v2379_v55  ;;  %v15577_v59 = vshrl.u32 %v12146_v39, 16  ;;  %v3263_v7 = vunpack.c.l.b16 %v3214_v60  ;;  %v203_v61 = vld [vmem:[%s11131_s21 + $0xf8] sm:$0xff]  ;;  %v671_v60 = vld [vmem:[#allocation2 + $0xc0] sm:$0xf] }
 0x172   : > { %v2749_v46 = vor.u32 %v2748_v57, %v2745_v53  ;;  %v12168_v57 = vpack.c.bf16 %v203_v61, %v203_v61  ;;  %v11012_v61 = vld [vmem:[#allocation2 + $0xa4] sm:$0x1] }
 0x173   : > { %v2023_v9 = vpop.f32.mrf.mxu2  ;;  %v12142_v33 = vpop.f32.mrf.mxu3  ;;  %v12149_v4 = vadd.f32 %v12113_v24, %v3033_v10  ;;  %v2759_v24 = vor.u32 %v2758_v49, %v12144_v36  ;;  %v12162_v54 = vrot.slane %v15577_v59, 7  ;;  %v2764_v10 = vrot.slane %v2762_v44, 5 }
 0x174   : > { %v2094_v13 = vadd.f32 %v2023_v9, %v11910_v11  ;;  %v12152_v56 = vpop.f32.mrf.mxu1  ;;  %v3211_v11 = vsel %vm11800_vm1, %v10301_v6, %v3210_v21  ;;  %v1673_v21 = vadd.f32 %v11899_v31, %v11922_v22  ;;  %v1944_v6 = vpack.c.b16 %v1925_v3, %v1924_v20  ;;  %v11011_v9 = vld [vmem:[#allocation2 + $0xa0] sm:$0xf]  ;;  %v10910_v22 = vld [vmem:[#allocation2 + $0xa8] sm:$0xff] }
 0x175   : > { %v3262_v43 = vunpack.c.l.b16 %v3211_v11  ;;  %v1879_v53 = vrot.slane %v11011_v9, 5  ;;  %v2750_v58 = vrot.slane %v2749_v46, 4  ;;  %v2760_v49 = vrot.slane %v2759_v24, 4  ;;  %v2446_v3 = vld [vmem:[#allocation2 + $0xac] sm:$0xf] }
 0x176   : > { %v2380_v55 = vadd.f32 %v12104_v32, %v2094_v13  ;;  %v498_v32 = vshll.u32 %v12146_v39, 16  ;;  %v2770_v44 = vshll.u32 %v2445_v63, 16  ;;  %v3073_v24 = vld [vmem:[#allocation2 + $0xa8] sm:$0xe] }
 0x177   : > { %v3282_v20 = vpack.c.b16 %v3263_v7, %v3262_v43  ;;  %v1881_v9 = vrot.slane %v1879_v53, 4  ;;  %v2755_v43 = vsel %vm11287_vm13, %v2750_v58, %v12144_v36  ;;  %v2776_v7 = vshll.u32 %v2446_v3, 16 }
 0x178   : > { %v2963_v35 = vpop.f32.mrf.mxu0  ;;  %v500_v11 = vor.u32 %v498_v32, %v12162_v54  ;;  %v10171_v32 = vrot.slane %v1748_v48, 9  ;;  %v2772_v48 = vrot.slane %v2770_v44, 5  ;;  %v506_v36 = vshll.u32 %v12168_v57, 16 }
 0x179   : > { %v3034_v14 = vadd.f32 %v2963_v35, %v2380_v55  ;;  %v2767_v55 = vshrl.u32 %v2445_v63, 16  ;;  %v2780_v63 = vshrl.u32 %v2446_v3, 16 }
 0x17b   : > { %v2025_v5 = vpop.f32.mrf.mxu2  ;;  %v12170_v13 = vpop.f32.mrf.mxu3  ;;  %10284 = vmatmul.msk.bf16.gmra.mxu0 %vm1373_vm10, %v2883_v8  ;;  %v12175_v31 = vadd.f32 %v12127_v37, %v3034_v14  ;;  %v503_v8 = vshrl.u32 %v12168_v57, 16  ;;  %v672_v37 = vsel %vm11167_vm7, %v500_v11, %v671_v60  ;;  %v2447_v14 = vld [vmem:[#allocation2 + $0xb0] sm:$0x1]  ;;  %v10302_v11 = vrot.slane %v3073_v24, 9 }
 0x17c   : > { %v2095_v62 = vadd.f32 %v2025_v5, %v1673_v21  ;;  %v1882_v21 = vrot.slane %v11012_v61, 5  ;;  %v12178_v46 = vpop.f32.mrf.mxu1  ;;  %v3217_v5 = vrot.slane %v2446_v3, 5  ;;  %673 = vst [vmem:[#allocation2 + $0xc0] sm:$0xf] %v672_v37  ;;  %v3220_v61 = vrot.slane %v2447_v14, 5 }
 0x17d   : > { %v505_v59 = vrot.slane %v503_v8, 7  ;;  %v2864_v37 = vunpack.c.l.b16 %v2755_v43  ;;  %v2782_v44 = vrot.slane %v2780_v63, 4  ;;  %v501_v24 = vrot.slane %v12162_v54, 4  ;;  %v675_v8 = vld [vmem:[#allocation2 + $0xc8] sm:$0x1] }
 0x17e   : > { %v2381_v35 = vadd.f32 %v12121_v52, %v2095_v62  ;;  %v2765_v52 = vsel %vm11287_vm13, %v2760_v49, %v2764_v10  ;;  %v2769_v62 = vrot.slane %v2767_v55, 4  ;;  %v1880_v10 = vsel %vm11800_vm1, %v10171_v32, %v1879_v53 }
 0x17f   : > { %10318 = vmatmul.msk.bf16.gmra.mxu1 %vm1373_vm10, %v3282_v20  ;;  %v1883_v49 = vsel %vm11800_vm1, %v1881_v9, %v1882_v21  ;;  %v12199_v55 = vrot.slane %v2776_v7, 5  ;;  %v508_v43 = vor.u32 %v506_v36, %v505_v59  ;;  %v1926_v7 = vunpack.c.l.b16 %v1880_v10  ;;  %v2448_v10 = vld [vmem:[#allocation2 + $0xb4] sm:$0xf] }
 0x180   : > { %10187 = vmatmul.msk.bf16.gmra.mxu2 %vm1373_vm10, %v1944_v6  ;;  %10269 = vmatmul.msk.bf16.gmra.mxu3 %vm1373_vm10, %v10910_v22  ;;  %v2965_v60 = vpop.f32.mrf.mxu0  ;;  %v3219_v6 = vrot.slane %v3217_v5, 4  ;;  %v2773_v21 = vor.u32 %v2772_v48, %v2769_v62  ;;  %v1927_v54 = vunpack.c.l.b16 %v1883_v49  ;;  %v15679_v62 = vshrl.u32 %v12146_v39, 16 }
 0x181   : > { %v3035_v58 = vadd.f32 %v2965_v60, %v2381_v35  ;;  %v2865_v35 = vunpack.c.l.b16 %v2765_v52  ;;  %v510_v60 = vrot.slane %v505_v59, 4  ;;  %v2786_v52 = vshll.u32 %v2447_v14, 16 }
 0x182   : > { %v3221_v9 = vsel %vm11800_vm1, %v3219_v6, %v3220_v61  ;;  %v1678_v61 = vadd.f32 %v11934_v18, %v11950_v42  ;;  %v10911_v18 = vld [vmem:[#allocation2 + $0xb4] sm:$0xff] }
 0x183   : > { %v2028_v3 = vpop.f32.mrf.mxu2  ;;  %v12197_v20 = vpop.f32.mrf.mxu3  ;;  %v12203_v57 = vadd.f32 %v12152_v56, %v3035_v58  ;;  %v509_v56 = vsel %vm11155_vm6, %v501_v24, %v508_v43  ;;  %v771_v63 = vld [vmem:[#allocation2 + $0xc0] sm:$0x1]  ;;  %v676_v59 = vsel %vm11173_vm8, %v510_v60, %v675_v8  ;;  %v2884_v48 = vpack.c.b16 %v2865_v35, %v2864_v37  ;;  %v11013_v43 = vld [vmem:[#allocation2 + $0xac] sm:$0xf]  ;;  %v2449_v35 = vld [vmem:[#allocation2 + $0xb8] sm:$0xf] }
 0x184   : > { %v2096_v22 = vadd.f32 %v2028_v3, %v11938_v51  ;;  %v12206_v32 = vpop.f32.mrf.mxu1  ;;  %v3218_v51 = vsel %vm11800_vm1, %v10302_v11, %v3217_v5  ;;  %674 = vst.msk [vmem:[#allocation2 + $0xc4] sm:$0xf] %vm560_vm3, %v509_v56  ;;  %v772_v5 = vsel %vm11173_vm8, %v15679_v62, %v771_v63  ;;  %v3265_v6 = vunpack.c.l.b16 %v3221_v9 }
 0x185   : > { %v3264_v11 = vunpack.c.l.b16 %v3218_v51  ;;  %773 = vst [vmem:[#allocation2 + $0xc0] sm:$0x1] %v772_v5  ;;  %v2774_v3 = vrot.slane %v2773_v21, 4  ;;  %v2788_v8 = vrot.slane %v2786_v52, 5  ;;  %v1886_v37 = vrot.slane %v11013_v43, 5 }
 0x186   : > { %v2382_v53 = vadd.f32 %v12142_v33, %v2096_v22  ;;  %v2783_v33 = vor.u32 %v2782_v44, %v12199_v55  ;;  %677 = vst [vmem:[#allocation2 + $0xc8] sm:$0x1] %v676_v59  ;;  %v1945_v22 = vpack.c.b16 %v1927_v54, %v1926_v7  ;;  %v1749_v21 = vld [vmem:[#allocation2 + $0xa8] sm:$0xe]  ;;  %v2791_v51 = vshrl.u32 %v2448_v10, 16 }
 0x187   : > { %v3283_v42 = vpack.c.b16 %v3265_v6, %v3264_v11  ;;  %v2779_v7 = vsel %vm11287_vm13, %v2774_v3, %v12199_v55  ;;  %v10060_v56 = vrot.slane %v506_v36, 11  ;;  %v3224_v63 = vrot.slane %v2449_v35, 5  ;;  %v3074_v52 = vld [vmem:[#allocation2 + $0xb4] sm:$0xe]  ;;  %v2450_v11 = vld [vmem:[#allocation2 + $0xbc] sm:$0x1] }
 0x188   : > { %v2968_v58 = vpop.f32.mrf.mxu0  ;;  %v2784_v39 = vrot.slane %v2783_v33, 4  ;;  %v2800_v59 = vshll.u32 %v2449_v35, 16  ;;  %v2804_v33 = vshrl.u32 %v2449_v35, 16  ;;  %v2866_v6 = vunpack.c.l.b16 %v2779_v7 }
 0x189   : > { %v3036_v49 = vadd.f32 %v2968_v58, %v2382_v53  ;;  %v2794_v53 = vshll.u32 %v2448_v10, 16  ;;  %v2793_v36 = vrot.slane %v2791_v51, 4  ;;  %v3744_v58 = vld [vmem:[#allocation2 + $0x18] sm:$0xf]  ;;  %v10303_v10 = vrot.slane %v3074_v52, 9 }
 0x18a   : > { %v2789_v5 = vsel %vm11287_vm13, %v2784_v39, %v2788_v8  ;;  %v12247_v35 = vrot.slane %v2800_v59, 5  ;;  %v3793_v51 = vshrl.u32 %v3744_v58, 16 }
 0x18b   : > { %v2030_v14 = vpop.f32.mrf.mxu2  ;;  %v12224_v24 = vpop.f32.mrf.mxu3  ;;  %10285 = vmatmul.msk.bf16.gmra.mxu0 %vm1373_vm10, %v2884_v48  ;;  %v12228_v60 = vadd.f32 %v12178_v46, %v3036_v49  ;;  %v11014_v46 = vld [vmem:[#allocation2 + $0xb0] sm:$0x1]  ;;  %v10172_v48 = vrot.slane %v1749_v21, 9  ;;  %v2796_v55 = vrot.slane %v2794_v53, 5  ;;  %v3226_v49 = vrot.slane %v3224_v63, 4 }
 0x18c   : > { %v2097_v44 = vadd.f32 %v2030_v14, %v1678_v61  ;;  %v12234_v54 = vpop.f32.mrf.mxu1  ;;  %v1889_v62 = vrot.slane %v11014_v46, 5  ;;  %v3227_v14 = vrot.slane %v2450_v11, 5  ;;  %v2867_v43 = vunpack.c.l.b16 %v2789_v5 }
 0x18d   : > { %v868_v61 = vld [vmem:[#allocation2 + $0xc8] sm:$0x1]  ;;  %v3796_v53 = vshll.u32 %v3744_v58, 16  ;;  %v1887_v7 = vsel %vm11800_vm1, %v10172_v48, %v1886_v37  ;;  %v2797_v46 = vor.u32 %v2796_v55, %v2793_v36  ;;  %v2810_v48 = vshll.u32 %v2450_v11, 16 }
 0x18e   : > { %v2383_v9 = vadd.f32 %v12170_v13, %v2097_v44  ;;  %v1888_v13 = vrot.slane %v1886_v37, 4  ;;  %v12243_v44 = vld [vmem:[#allocation2 + $0x1c] sm:$0xf]  ;;  %v3228_v5 = vsel %vm11800_vm1, %v3226_v49, %v3227_v14  ;;  %v3795_v58 = vrot.slane %v3793_v51, 4  ;;  %v1750_v14 = vld [vmem:[#allocation2 + $0xb4] sm:$0xe] }
 0x18f   : > { %10319 = vmatmul.msk.bf16.gmra.mxu1 %vm1373_vm10, %v3283_v42  ;;  %v3806_v52 = vshrl.u32 %v12243_v44, 16 }
 0x190   : > { %10188 = vmatmul.msk.bf16.gmra.mxu2 %vm1373_vm10, %v1945_v22  ;;  %10270 = vmatmul.msk.bf16.gmra.mxu3 %vm1373_vm10, %v10911_v18  ;;  %v2970_v3 = vpop.f32.mrf.mxu0  ;;  %v869_v22 = vsel %vm11225_vm9, %v10060_v56, %v868_v61  ;;  %v2806_v18 = vrot.slane %v2804_v33, 4  ;;  %v1890_v56 = vsel %vm11800_vm1, %v1888_v13, %v1889_v62  ;;  %v2885_v61 = vpack.c.b16 %v2867_v43, %v2866_v6  ;;  %v11015_v43 = vld [vmem:[#allocation2 + $0xb8] sm:$0xf] }
 0x191   : > { %v12245_v39 = vadd.f32 %v2970_v3, %v2383_v9  ;;  %870 = vst [vmem:[#allocation2 + $0xc8] sm:$0x1] %v869_v22  ;;  %v3802_v9 = vshll.u32 %v12243_v44, 16  ;;  %v1928_v62 = vunpack.c.l.b16 %v1887_v7  ;;  %v1929_v13 = vunpack.c.l.b16 %v1890_v56  ;;  %v2451_v7 = vld [vmem:[#allocation2 + $0xc0] sm:$0xf] }
 0x192   : > { %v2807_v37 = vor.u32 %v2806_v18, %v12247_v35  ;;  %v3798_v3 = vrot.slane %v3796_v53, 5  ;;  %v3808_v36 = vrot.slane %v3806_v52, 4  ;;  %v2812_v6 = vrot.slane %v2810_v48, 5  ;;  %v2452_v56 = vld [vmem:[#allocation2 + $0xc4] sm:$0xf] }
 0x193   : > { %v2033_v8 = vpop.f32.mrf.mxu2  ;;  %v12250_v21 = vpop.f32.mrf.mxu3  ;;  %v1893_v11 = vrot.slane %v11015_v43, 5  ;;  %v1946_v51 = vpack.c.b16 %v1929_v13, %v1928_v62  ;;  %v11016_v48 = vld [vmem:[#allocation2 + $0xbc] sm:$0x1] }
 0x194   : > { %v2098_v42 = vadd.f32 %v2033_v8, %v11972_v40  ;;  %v12259_v33 = vpop.f32.mrf.mxu1  ;;  %v3225_v40 = vsel %vm11800_vm1, %v10303_v10, %v3224_v63  ;;  %v3267_v8 = vunpack.c.l.b16 %v3228_v5  ;;  %v2798_v63 = vrot.slane %v2797_v46, 4 }
 0x195   : > { %15680 = vst [vmem:[#allocation21_spill] sm:$0xff] %v12259_v33  ;;  %v3266_v22 = vunpack.c.l.b16 %v3225_v40  ;;  %v2808_v49 = vrot.slane %v2807_v37, 4  ;;  %v3799_v40 = vor.u32 %v3798_v3, %v3795_v58  ;;  %v3231_v37 = vrot.slane %v2452_v56, 5 }
 0x196   : > { %v2384_v59 = vadd.f32 %v12197_v20, %v2098_v42  ;;  %v12266_v20 = vld [vmem:[#allocation2 + $0x20] sm:$0x1]  ;;  %v12268_v42 = vrot.slane %v3802_v9, 5  ;;  %v2803_v62 = vsel %vm11287_vm13, %v2798_v63, %v12247_v35  ;;  %v10173_v58 = vrot.slane %v1750_v14, 9 }
 0x197   : > { %v3812_v9 = vshll.u32 %v12266_v20, 16  ;;  %v3284_v46 = vpack.c.b16 %v3267_v8, %v3266_v22  ;;  %v1895_v3 = vrot.slane %v1893_v11, 4  ;;  %v2815_v22 = vshrl.u32 %v2451_v7, 16 }
 0x198   : > { %v2973_v55 = vpop.f32.mrf.mxu0  ;;  %v3809_v5 = vor.u32 %v3808_v36, %v12268_v42  ;;  %v2824_v8 = vshll.u32 %v2452_v56, 16  ;;  %v2453_v36 = vld [vmem:[#allocation2 + $0xc8] sm:$0x1]  ;;  %v3233_v14 = vrot.slane %v3231_v37, 4  ;;  %v1894_v26 = vsel %vm11800_vm1, %v10173_v58, %v1893_v11 }
 0x199   : > { %v3038_v10 = vadd.f32 %v2973_v55, %v2384_v59  ;;  %v10912_v59 = vld [vmem:[#allocation2 + $0xc0] sm:$0xff]  ;;  %v2818_v55 = vshll.u32 %v2451_v7, 16  ;;  %v3814_v43 = vrot.slane %v3812_v9, 5 }
 0x19a   : > { %v3810_v35 = vrot.slane %v3809_v5, 4  ;;  %v12296_v9 = vrot.slane %v2824_v8, 5 }
 0x19b   : > { %v2035_v27 = vpop.f32.mrf.mxu2  ;;  %v12271_v53 = vpop.f32.mrf.mxu3  ;;  %10286 = vmatmul.msk.bf16.gmra.mxu0 %vm1373_vm10, %v2885_v61  ;;  %v12276_v52 = vadd.f32 %v12234_v54, %v3038_v10  ;;  %v3075_v61 = vld [vmem:[#allocation2 + $0xc0] sm:$0xe]  ;;  %v2813_v54 = vsel %vm11287_vm13, %v2808_v49, %v2812_v6  ;;  %v2828_v10 = vshrl.u32 %v2452_v56, 16  ;;  %v2868_v49 = vunpack.c.l.b16 %v2803_v62 }
 0x19c   : > { %v2099_v18 = vadd.f32 %v2035_v27, %v11978_v2  ;;  %v1896_v27 = vrot.slane %v11016_v48, 5  ;;  %v12283_v13 = vpop.f32.mrf.mxu1  ;;  %v10304_v63 = vrot.slane %v3075_v61, 9  ;;  %v2869_v6 = vunpack.c.l.b16 %v2813_v54 }
 0x19d   : > { %v2820_v62 = vrot.slane %v2818_v55, 5  ;;  %v2830_v61 = vrot.slane %v2828_v10, 4  ;;  %v1930_v10 = vunpack.c.l.b16 %v1894_v26 }
 0x19e   : > { %v2385_v2 = vadd.f32 %v12224_v24, %v2099_v18  ;;  %v3800_v24 = vrot.slane %v3799_v40, 4  ;;  %v3234_v18 = vrot.slane %v2453_v36, 5  ;;  %v1897_v56 = vsel %vm11800_vm1, %v1895_v3, %v1896_v27 }
 0x19f   : > { %10320 = vmatmul.msk.bf16.gmra.mxu1 %vm1373_vm10, %v3284_v46  ;;  %v2817_v40 = vrot.slane %v2815_v22, 4  ;;  %v3232_v27 = vsel %vm11800_vm1, %v10304_v63, %v3231_v37  ;;  %v2834_v37 = vshll.u32 %v2453_v36, 16 }
 0x1a0   : > { %10189 = vmatmul.msk.bf16.gmra.mxu2 %vm1373_vm10, %v1946_v51  ;;  %10271 = vmatmul.msk.bf16.gmra.mxu3 %vm1373_vm10, %v10912_v59  ;;  %v2975_v48 = vpop.f32.mrf.mxu0  ;;  %v3747_v51 = vld [vmem:[#allocation2 + $0x24] sm:$0xf]  ;;  %v12298_v59 = vld [vmem:[#allocation2 + $0x28] sm:$0xf]  ;;  %v3805_v11 = vsel %vm11287_vm13, %v3800_v24, %v12268_v42  ;;  %v3235_v58 = vsel %vm11800_vm1, %v3233_v14, %v3234_v18  ;;  %v2886_v42 = vpack.c.b16 %v2869_v6, %v2868_v49  ;;  %v1931_v24 = vunpack.c.l.b16 %v1897_v56 }
 0x1a1   : > { %v12292_v28 = vadd.f32 %v2975_v48, %v2385_v2  ;;  %v3815_v2 = vsel %vm11287_vm13, %v3810_v35, %v3814_v43  ;;  %v3817_v54 = vshrl.u32 %v3747_v51, 16  ;;  %v3820_v22 = vshll.u32 %v3747_v51, 16 }
 0x1a2   : > { %v3826_v8 = vshll.u32 %v12298_v59, 16  ;;  %v3830_v55 = vshrl.u32 %v12298_v59, 16  ;;  %v2821_v43 = vor.u32 %v2820_v62, %v2817_v40  ;;  %v2831_v35 = vor.u32 %v2830_v61, %v12296_v9 }
 0x1a3   : > { %15681 = vst [vmem:[#allocation22_spill] sm:$0xff] %v12292_v28  ;;  %v2038_v7 = vpop.f32.mrf.mxu2  ;;  %v12301_v5 = vpop.f32.mrf.mxu3  ;;  %v4178_v63 = vunpack.c.l.b16 %v3805_v11  ;;  %v4179_v48 = vunpack.c.l.b16 %v3815_v2  ;;  %v3268_v14 = vunpack.c.l.b16 %v3232_v27  ;;  %v3269_v18 = vunpack.c.l.b16 %v3235_v58  ;;  %v12318_v28 = vld [vmem:[#allocation2 + $0x2c] sm:$0x1] }
 0x1a4   : > { %v2100_v46 = vadd.f32 %v2038_v7, %v11998_v15  ;;  %v12313_v3 = vpop.f32.mrf.mxu1  ;;  %v3828_v19 = vrot.slane %v3826_v8, 5  ;;  %v3832_v51 = vrot.slane %v3830_v55, 4  ;;  %v1947_v49 = vpack.c.b16 %v1931_v24, %v1930_v10 }
 0x1a5   : > { %15682 = vst [vmem:[#allocation23_spill] sm:$0xff] %v12313_v3  ;;  %v2822_v56 = vrot.slane %v2821_v43, 4  ;;  %v2832_v36 = vrot.slane %v2831_v35, 4  ;;  %v2836_v62 = vrot.slane %v2834_v37, 5  ;;  %v4210_v61 = vpack.c.b16 %v4179_v48, %v4178_v63 }
 0x1a6   : > { %v2386_v15 = vadd.f32 %v12250_v21, %v2100_v46  ;;  %v3819_v21 = vrot.slane %v3817_v54, 4  ;;  %v3822_v46 = vrot.slane %v3820_v22, 5  ;;  %v3285_v11 = vpack.c.b16 %v3269_v18, %v3268_v14 }
 0x1a7   : > { %v3833_v54 = vor.u32 %v3832_v51, %v3828_v19  ;;  %v4398_v51 = vld [vmem:[#allocation2 + $0x18] sm:$0xe] }
 0x1a8   : > { %v2978_v7 = vpop.f32.mrf.mxu0  ;;  %v3823_v58 = vor.u32 %v3822_v46, %v3819_v21 }
 0x1a9   : > { %v3040_v3 = vadd.f32 %v2978_v7, %v2386_v15  ;;  %v12335_v15 = vld [vmem:[#allocation2 + $0x34] sm:$0xf]  ;;  %v3834_v8 = vrot.slane %v3833_v54, 4  ;;  %v10420_v54 = vrot.slane %v4398_v51, 9 }
 0x1aa   : > { %v3824_v22 = vrot.slane %v3823_v58, 4  ;;  %v3850_v37 = vshll.u32 %v12335_v15, 16  ;;  %v3854_v63 = vshrl.u32 %v12335_v15, 16 }
 0x1ab   : > { %v2040_v33 = vpop.f32.mrf.mxu2  ;;  %v12321_v6 = vpop.f32.mrf.mxu3  ;;  %10287 = vmatmul.msk.bf16.gmra.mxu0 %vm1373_vm10, %v2886_v42  ;;  %v12325_v40 = vadd.f32 %v12283_v13, %v3040_v3  ;;  %v3750_v13 = vld [vmem:[#allocation2 + $0x30] sm:$0xf] }
 0x1ac   : > { %v2101_v26 = vadd.f32 %v2040_v33, %v12003_v41  ;;  %v3381_v27 = vpop.f32.mrf.mxu1  ;;  %v3836_v41 = vshll.u32 %v12318_v28, 16  ;;  %v2827_v33 = vsel %vm11287_vm13, %v2822_v56, %v12296_v9  ;;  %v3841_v24 = vshrl.u32 %v3750_v13, 16 }
 0x1ad   : > { %v3844_v35 = vshll.u32 %v3750_v13, 16  ;;  %v2870_v48 = vunpack.c.l.b16 %v2827_v33  ;;  %v3829_v7 = vsel %vm11287_vm13, %v3824_v22, %v3828_v19  ;;  %v3856_v56 = vrot.slane %v3854_v63, 4  ;;  %v10913_v33 = vld [vmem:[#allocation2 + $0x18] sm:$0xff] }
 0x1ae   : > { %v2387_v2 = vadd.f32 %v12271_v53, %v2101_v26  ;;  %v2837_v53 = vsel %vm11287_vm13, %v2832_v36, %v2836_v62  ;;  %v3838_v55 = vrot.slane %v3836_v41, 5  ;;  %v4464_v62 = vrot.slane %v12243_v44, 5 }
 0x1af   : > { %10321 = vmatmul.msk.bf16.gmra.mxu1 %vm1373_vm10, %v3285_v11  ;;  %v2871_v14 = vunpack.c.l.b16 %v2837_v53  ;;  %v3846_v26 = vrot.slane %v3844_v35, 5 }
 0x1b0   : > { %10190 = vmatmul.msk.bf16.gmra.mxu2 %vm1373_vm10, %v1947_v49  ;;  %10404 = vmatmul.msk.bf16.vlgmr.msra.gmra.mxu3 %vm1373_vm10, %v4210_v61  ;;  %v2980_v3 = vpop.f32.mrf.mxu0  ;;  %v3839_v21 = vsel %vm11287_vm13, %v3834_v8, %v3838_v55  ;;  %v3852_v49 = vrot.slane %v3850_v37, 5  ;;  %v4180_v61 = vunpack.c.l.b16 %v3829_v7  ;;  %v4466_v44 = vrot.slane %v4464_v62, 4 }
 0x1b1   : > { %v12339_v42 = vadd.f32 %v2980_v3, %v2387_v2  ;;  %v2887_v36 = vpack.c.b16 %v2871_v14, %v2870_v48  ;;  %v4181_v11 = vunpack.c.l.b16 %v3839_v21  ;;  %v12352_v2 = vld [vmem:[#allocation2 + $0x38] sm:$0x1]  ;;  %v4467_v55 = vrot.slane %v12266_v20, 5  ;;  %v3753_v14 = vld [vmem:[#allocation2 + $0x3c] sm:$0xf] }
 0x1b2   : > { %v3857_v53 = vor.u32 %v3856_v56, %v3852_v49  ;;  %v3860_v22 = vshll.u32 %v12352_v2, 16  ;;  %v12367_v20 = vld [vmem:[#allocation2 + $0x40] sm:$0xf] }
 0x1b3   : > { %v2043_v10 = vpop.f32.mrf.mxu2  ;;  %v2334_v43 = vpop.f32.mrf.mxu3  ;;  %v4468_v63 = vsel %vm11800_vm1, %v4466_v44, %v4467_v55  ;;  %v12379_v44 = vld [vmem:[#allocation2 + $0x44] sm:$0x1] }
 0x1b4   : > { %v2102_v9 = vadd.f32 %v2043_v10, %v12024_v12  ;;  %v12349_v46 = vpop.f32.mrf.mxu1  ;;  %v3843_v12 = vrot.slane %v3841_v24, 4  ;;  %v4211_v10 = vpack.c.b16 %v4181_v11, %v4180_v61  ;;  %v3858_v35 = vrot.slane %v3857_v53, 4 }
 0x1b5   : > { %v3862_v37 = vrot.slane %v3860_v22, 5  ;;  %v4577_v51 = vunpack.c.l.b16 %v4468_v63  ;;  %v3874_v61 = vshll.u32 %v12367_v20, 16  ;;  %v3878_v11 = vshrl.u32 %v12367_v20, 16 }
 0x1b6   : > { %v2388_v18 = vadd.f32 %v12301_v5, %v2102_v9  ;;  %v3847_v3 = vor.u32 %v3846_v26, %v3843_v12 }
 0x1b7   : > { %v3863_v56 = vsel %vm11287_vm13, %v3858_v35, %v3862_v37  ;;  %v3880_v53 = vrot.slane %v3878_v11, 4  ;;  %v12397_v11 = vld [vmem:[#allocation2 + $0x4c] sm:$0xf] }
 0x1b8   : > { %v2983_v5 = vpop.f32.mrf.mxu0  ;;  %v3848_v9 = vrot.slane %v3847_v3, 4  ;;  %v3876_v3 = vrot.slane %v3874_v61, 5 }
 0x1b9   : > { %v3042_v58 = vadd.f32 %v2983_v5, %v2388_v18 }
 0x1ba   : > { %v3853_v26 = vsel %vm11287_vm13, %v3848_v9, %v3852_v49  ;;  %v4471_v49 = vrot.slane %v12298_v59, 5  ;;  %v3884_v59 = vshll.u32 %v12379_v44, 16 }
 0x1bb   : > { %v2045_v19 = vpop.f32.mrf.mxu2  ;;  %v2336_v13 = vpop.f32.mrf.mxu3  ;;  %10288 = vmatmul.msk.bf16.gmra.mxu0 %vm1373_vm10, %v2887_v36  ;;  %v12357_v8 = vadd.f32 %v3381_v27, %v3042_v58  ;;  %v3865_v36 = vshrl.u32 %v3753_v14, 16 }
 0x1bc   : > { %v2103_v41 = vadd.f32 %v2045_v19, %v12038_v25  ;;  %v4465_v25 = vsel %vm11800_vm1, %v10420_v54, %v4464_v62  ;;  %v3386_v48 = vpop.f32.mrf.mxu1  ;;  %v3868_v62 = vshll.u32 %v3753_v14, 16  ;;  %v4182_v19 = vunpack.c.l.b16 %v3853_v26 }
 0x1bd   : > { %v4576_v7 = vunpack.c.l.b16 %v4465_v25  ;;  %v4183_v54 = vunpack.c.l.b16 %v3863_v56  ;;  %v10914_v25 = vld [vmem:[#allocation2 + $0x24] sm:$0xff]  ;;  %v3881_v14 = vor.u32 %v3880_v53, %v3876_v3  ;;  %v3886_v56 = vrot.slane %v3884_v59, 5 }
 0x1be   : > { %v2389_v24 = vadd.f32 %v12321_v6, %v2103_v41  ;;  %v4399_v41 = vld [vmem:[#allocation2 + $0x24] sm:$0xe] }
 0x1bf   : > { %v4608_v58 = vpack.c.b16 %v4577_v51, %v4576_v7  ;;  %v10421_v35 = vrot.slane %v4399_v41, 9  ;;  %v4212_v37 = vpack.c.b16 %v4183_v54, %v4182_v19  ;;  %v4473_v7 = vrot.slane %v4471_v49, 4 }
 0x1c0   : > { %10387 = vmatmul.msk.bf16.vlgmr.msra.gmra.mxu2 %vm1373_vm10, %v10913_v33  ;;  %10405 = vmatmul.msk.bf16.gmra.mxu3 %vm1373_vm10, %v4211_v10  ;;  %v2985_v27 = vpop.f32.mrf.mxu0  ;;  %v3870_v33 = vrot.slane %v3868_v62, 5  ;;  %v3882_v26 = vrot.slane %v3881_v14, 4  ;;  %v3756_v62 = vld [vmem:[#allocation2 + $0x48] sm:$0xf] }
 0x1c1   : > { %v12369_v18 = vadd.f32 %v2985_v27, %v2389_v24 }
 0x1c2   : > { %v3887_v41 = vsel %vm11287_vm13, %v3882_v26, %v3886_v56 }
 0x1c3   : > { %v2048_v6 = vpop.f32.mrf.mxu2  ;;  %v2339_v12 = vpop.f32.mrf.mxu3 }
 0x1c4   : > { %v2104_v21 = vadd.f32 %v2048_v6, %v11821_v34  ;;  %v3867_v34 = vrot.slane %v3865_v36, 4  ;;  %v12382_v9 = vpop.f32.mrf.mxu1 }
 0x1c6   : > { %v2390_v5 = vadd.f32 %v2334_v43, %v2104_v21  ;;  %v3871_v27 = vor.u32 %v3870_v33, %v3867_v34  ;;  %v4474_v21 = vrot.slane %v12318_v28, 5  ;;  %v3889_v34 = vshrl.u32 %v3756_v62, 16 }
 0x1c8   : > { %v2988_v22 = vpop.f32.mrf.mxu0  ;;  %v3872_v51 = vrot.slane %v3871_v27, 4  ;;  %v4475_v36 = vsel %vm11800_vm1, %v4473_v7, %v4474_v21  ;;  %v3891_v27 = vrot.slane %v3889_v34, 4 }
 0x1c9   : > { %v3044_v55 = vadd.f32 %v2988_v22, %v2390_v5  ;;  %v4579_v19 = vunpack.c.l.b16 %v4475_v36  ;;  %v3892_v22 = vshll.u32 %v3756_v62, 16 }
 0x1ca   : > { %v3877_v54 = vsel %vm11287_vm13, %v3872_v51, %v3876_v3 }
 0x1cb   : > { %v2050_v10 = vpop.f32.mrf.mxu2  ;;  %v2341_v43 = vpop.f32.mrf.mxu3  ;;  %10437 = vmatmul.msk.bf16.vlgmr.msra.gmra.mxu0 %vm1373_vm10, %v4608_v58  ;;  %v12385_v63 = vadd.f32 %v3386_v48, %v3044_v55  ;;  %v3902_v55 = vshrl.u32 %v12397_v11, 16  ;;  %v3894_v3 = vrot.slane %v3892_v22, 5 }
 0x1cc   : > { %v2105_v24 = vadd.f32 %v2050_v10, %v11836_v16  ;;  %v4472_v16 = vsel %vm11800_vm1, %v10421_v35, %v4471_v49  ;;  %v3391_v53 = vpop.f32.mrf.mxu1  ;;  %v3898_v49 = vshll.u32 %v12397_v11, 16  ;;  %v4185_v35 = vunpack.c.l.b16 %v3887_v41  ;;  %v12421_v41 = vld [vmem:[#allocation2 + $0x58] sm:$0xf] }
 0x1cd   : > { %v4578_v5 = vunpack.c.l.b16 %v4472_v16  ;;  %v3904_v59 = vrot.slane %v3902_v55, 4  ;;  %v10915_v16 = vld [vmem:[#allocation2 + $0x30] sm:$0xff] }
 0x1ce   : > { %v2391_v6 = vadd.f32 %v2336_v13, %v2105_v24  ;;  %v4400_v24 = vld [vmem:[#allocation2 + $0x30] sm:$0xe]  ;;  %v3900_v14 = vrot.slane %v3898_v49, 5 }
 0x1cf   : > { %v4609_v10 = vpack.c.b16 %v4579_v19, %v4578_v5  ;;  %v10422_v26 = vrot.slane %v4400_v24, 9 }
 0x1d0   : > { %10388 = vmatmul.msk.bf16.gmra.mxu2 %vm1373_vm10, %v10914_v25  ;;  %10406 = vmatmul.msk.bf16.gmra.mxu3 %vm1373_vm10, %v4212_v37  ;;  %v2990_v48 = vpop.f32.mrf.mxu0  ;;  %v4184_v25 = vunpack.c.l.b16 %v3877_v54  ;;  %v3759_v54 = vld [vmem:[#allocation2 + $0x54] sm:$0xf] }
 0x1d1   : > { %v12395_v61 = vadd.f32 %v2990_v48, %v2391_v6  ;;  %v4481_v48 = vrot.slane %v12352_v2, 5  ;;  %v3913_v55 = vshrl.u32 %v3759_v54, 16 }
 0x1d2   : > { %v4213_v36 = vpack.c.b16 %v4185_v35, %v4184_v25  ;;  %v3922_v25 = vshll.u32 %v12421_v41, 16  ;;  %v3926_v35 = vshrl.u32 %v12421_v41, 16 }
 0x1d3   : > { %v2053_v13 = vpop.f32.mrf.mxu2  ;;  %v2344_v58 = vpop.f32.mrf.mxu3 }
 0x1d4   : > { %v2106_v28 = vadd.f32 %v2053_v13, %v11847_v50  ;;  %v4478_v50 = vrot.slane %v12335_v15, 5  ;;  %v3895_v13 = vor.u32 %v3894_v3, %v3891_v27  ;;  %v12416_v19 = vpop.f32.mrf.mxu1 }
 0x1d6   : > { %v2392_v33 = vadd.f32 %v2339_v12, %v2106_v28  ;;  %v12407_v12 = vld [vmem:[#allocation2 + $0x50] sm:$0x1]  ;;  %v4480_v15 = vrot.slane %v4478_v50, 4  ;;  %v3905_v28 = vor.u32 %v3904_v59, %v3900_v14 }
 0x1d7   : > { %v3908_v5 = vshll.u32 %v12407_v12, 16 }
 0x1d8   : > { %v2993_v37 = vpop.f32.mrf.mxu0  ;;  %v4482_v2 = vsel %vm11800_vm1, %v4480_v15, %v4481_v48  ;;  %v4485_v48 = vrot.slane %v12367_v20, 5 }
 0x1d9   : > { %v3046_v6 = vadd.f32 %v2993_v37, %v2392_v33  ;;  %v3906_v33 = vrot.slane %v3905_v28, 4  ;;  %v4581_v27 = vunpack.c.l.b16 %v4482_v2  ;;  %v10916_v2 = vld [vmem:[#allocation2 + $0x3c] sm:$0xff] }
 0x1db   : > { %v2055_v7 = vpop.f32.mrf.mxu2  ;;  %v2346_v51 = vpop.f32.mrf.mxu3  ;;  %10438 = vmatmul.msk.bf16.gmra.mxu0 %vm1373_vm10, %v4609_v10  ;;  %v12411_v56 = vadd.f32 %v3391_v53, %v3046_v6  ;;  %v3910_v53 = vrot.slane %v3908_v5, 5 }
 0x1dc   : > { %v2107_v21 = vadd.f32 %v2055_v7, %v11862_v38  ;;  %v4479_v38 = vsel %vm11800_vm1, %v10422_v26, %v4478_v50  ;;  %v3916_v50 = vshll.u32 %v3759_v54, 16  ;;  %v4401_v7 = vld [vmem:[#allocation2 + $0x3c] sm:$0xe]  ;;  %v3924_v26 = vrot.slane %v3922_v25, 5  ;;  %v15683_v54 = vld [vmem:[#allocation10_spill] sm:$0xff] }
 0x1dd   : > { %v4580_v37 = vunpack.c.l.b16 %v4479_v38  ;;  %v3911_v6 = vsel %vm11287_vm13, %v3906_v33, %v3910_v53 }
 0x1de   : > { %v2393_v62 = vadd.f32 %v2341_v43, %v2107_v21  ;;  %v3896_v43 = vrot.slane %v3895_v13, 4  ;;  %v3915_v21 = vrot.slane %v3913_v55, 4  ;;  %v12435_v13 = vld [vmem:[#allocation2 + $0x5c] sm:$0x1]  ;;  %v4487_v55 = vrot.slane %v4485_v48, 4 }
 0x1df   : > { %v4610_v15 = vpack.c.b16 %v4581_v27, %v4580_v37 }
 0x1e0   : > { %10389 = vmatmul.msk.bf16.gmra.mxu2 %vm1373_vm10, %v10915_v16  ;;  %10407 = vmatmul.msk.bf16.gmra.mxu3 %vm1373_vm10, %v4213_v36  ;;  %v2995_v34 = vpop.f32.mrf.mxu0  ;;  %v3901_v59 = vsel %vm11287_vm13, %v3896_v43, %v3900_v14  ;;  %v3918_v16 = vrot.slane %v3916_v50, 5  ;;  %v10423_v14 = vrot.slane %v4401_v7, 9  ;;  %v3762_v7 = vld [vmem:[#allocation2 + $0x60] sm:$0xf] }
 0x1e1   : > { %v12425_v22 = vadd.f32 %v2995_v34, %v2393_v62  ;;  %v4186_v36 = vunpack.c.l.b16 %v3901_v59  ;;  %v4187_v62 = vunpack.c.l.b16 %v3911_v6 }
 0x1e2   : > { %v3919_v33 = vor.u32 %v3918_v16, %v3915_v21  ;;  %v12449_v21 = vld [vmem:[#allocation2 + $0x64] sm:$0xf] }
 0x1e3   : > { %v2058_v49 = vpop.f32.mrf.mxu2  ;;  %v2349_v24 = vpop.f32.mrf.mxu3  ;;  %v4214_v50 = vpack.c.b16 %v4187_v62, %v4186_v36 }
 0x1e4   : > { %v2108_v10 = vadd.f32 %v2058_v49, %v11873_v17  ;;  %v3928_v17 = vrot.slane %v3926_v35, 4  ;;  %v3932_v49 = vshll.u32 %v12435_v13, 16  ;;  %v4486_v35 = vsel %vm11800_vm1, %v10423_v14, %v4485_v48 }
 0x1e5   : > { %v3920_v37 = vrot.slane %v3919_v33, 4  ;;  %v4582_v16 = vunpack.c.l.b16 %v4486_v35  ;;  %v3950_v14 = vshrl.u32 %v12449_v21, 16  ;;  %v12461_v35 = vld [vmem:[#allocation2 + $0x68] sm:$0x1] }
 0x1e6   : > { %v2394_v3 = vadd.f32 %v2344_v58, %v2108_v10  ;;  %v3396_v58 = vpop.f32.mrf.mxu1  ;;  %v3929_v53 = vor.u32 %v3928_v17, %v3924_v26  ;;  %v4488_v10 = vrot.slane %v12379_v44, 5  ;;  %v15684_v17 = vld [vmem:[#allocation11_spill] sm:$0xff] }
 0x1e7   : > { %v3925_v62 = vsel %vm11287_vm13, %v3920_v37, %v3924_v26  ;;  %v4492_v26 = vrot.slane %v12397_v11, 5  ;;  %v4495_v11 = vrot.slane %v12407_v12, 5  ;;  %v15686_v12 = vld [vmem:[#allocation13_spill] sm:$0xff] }
 0x1e8   : > { %v2998_v28 = vpop.f32.mrf.mxu0  ;;  %v3930_v27 = vrot.slane %v3929_v53, 4  ;;  %v4489_v59 = vsel %vm11800_vm1, %v4487_v55, %v4488_v10  ;;  %v4402_v53 = vld [vmem:[#allocation2 + $0x48] sm:$0xe] }
 0x1e9   : > { %v3048_v5 = vadd.f32 %v2998_v28, %v2394_v3  ;;  %v3934_v3 = vrot.slane %v3932_v49, 5  ;;  %v4583_v36 = vunpack.c.l.b16 %v4489_v59 }
 0x1eb   : > { %v2060_v38 = vpop.f32.mrf.mxu2  ;;  %v2351_v43 = vpop.f32.mrf.mxu3  ;;  %10439 = vmatmul.msk.bf16.gmra.mxu0 %vm1373_vm10, %v4610_v15  ;;  %v12440_v20 = vadd.f32 %v3396_v58, %v3048_v5  ;;  %v3935_v28 = vsel %vm11287_vm13, %v3930_v27, %v3934_v3  ;;  %v3937_v58 = vshrl.u32 %v3762_v7, 16  ;;  %v3940_v5 = vshll.u32 %v3762_v7, 16  ;;  %v15685_v3 = vld [vmem:[#allocation12_spill] sm:$0xff] }
 0x1ec   : > { %v2109_v34 = vadd.f32 %v2060_v38, %v15683_v54  ;;  %v3946_v38 = vshll.u32 %v12449_v21, 16  ;;  %v4189_v33 = vunpack.c.l.b16 %v3935_v28  ;;  %v10424_v7 = vrot.slane %v4402_v53, 9 }
 0x1ed   : > { %v3939_v49 = vrot.slane %v3937_v58, 4  ;;  %v3942_v55 = vrot.slane %v3940_v5, 5 }
 0x1ee   : > { %v2395_v25 = vadd.f32 %v2346_v51, %v2109_v34  ;;  %v4611_v34 = vpack.c.b16 %v4583_v36, %v4582_v16  ;;  %v3948_v10 = vrot.slane %v3946_v38, 5  ;;  %v4493_v28 = vsel %vm11800_vm1, %v10424_v7, %v4492_v26 }
 0x1ef   : > { %v3943_v16 = vor.u32 %v3942_v55, %v3939_v49  ;;  %v4584_v49 = vunpack.c.l.b16 %v4493_v28 }
 0x1f0   : > { %10390 = vmatmul.msk.bf16.gmra.mxu2 %vm1373_vm10, %v10916_v2  ;;  %10408 = vmatmul.msk.bf16.gmra.mxu3 %vm1373_vm10, %v4214_v50  ;;  %v3000_v6 = vpop.f32.mrf.mxu0  ;;  %v4188_v2 = vunpack.c.l.b16 %v3925_v62  ;;  %v3952_v50 = vrot.slane %v3950_v14, 4  ;;  %v4494_v62 = vrot.slane %v4492_v26, 4 }
 0x1f1   : > { %v12451_v44 = vadd.f32 %v3000_v6, %v2395_v25  ;;  %v10917_v6 = vld [vmem:[#allocation2 + $0x48] sm:$0xff]  ;;  %v3944_v58 = vrot.slane %v3943_v16, 4  ;;  %v4499_v16 = vrot.slane %v12421_v41, 5 }
 0x1f3   : > { %v2063_v51 = vpop.f32.mrf.mxu2  ;;  %v2354_v48 = vpop.f32.mrf.mxu3 }
 0x1f4   : > { %v2110_v15 = vadd.f32 %v2063_v51, %v15684_v17  ;;  %v4215_v51 = vpack.c.b16 %v4189_v33, %v4188_v2  ;;  %v3953_v17 = vor.u32 %v3952_v50, %v3948_v10  ;;  %v12477_v33 = vld [vmem:[#allocation2 + $0x70] sm:$0xf] }
 0x1f5   : > { %v3974_v7 = vshrl.u32 %v12477_v33, 16 }
 0x1f6   : > { %v2396_v54 = vadd.f32 %v2349_v24, %v2110_v15  ;;  %v3956_v15 = vshll.u32 %v12461_v35, 16  ;;  %v3954_v5 = vrot.slane %v3953_v17, 4 }
 0x1f8   : > { %v3003_v25 = vpop.f32.mrf.mxu0  ;;  %v3958_v38 = vrot.slane %v3956_v15, 5 }
 0x1f9   : > { %v12463_v37 = vadd.f32 %v3003_v25, %v2396_v54  ;;  %v4496_v54 = vsel %vm11800_vm1, %v4494_v62, %v4495_v11  ;;  %v3949_v25 = vsel %vm11287_vm13, %v3944_v58, %v3948_v10  ;;  %v4403_v62 = vld [vmem:[#allocation2 + $0x54] sm:$0xe]  ;;  %v3976_v58 = vrot.slane %v3974_v7, 4 }
 0x1fa   : > { %v4585_v50 = vunpack.c.l.b16 %v4496_v54  ;;  %v3959_v26 = vsel %vm11287_vm13, %v3954_v5, %v3958_v38  ;;  %v4190_v17 = vunpack.c.l.b16 %v3949_v25  ;;  %v15687_v38 = vld [vmem:[#allocation14_spill] sm:$0xff]  ;;  %v10425_v41 = vrot.slane %v4403_v62, 9 }
 0x1fb   : > { %v2065_v27 = vpop.f32.mrf.mxu2  ;;  %v2356_v24 = vpop.f32.mrf.mxu3  ;;  %10440 = vmatmul.msk.bf16.gmra.mxu0 %vm1373_vm10, %v4611_v34  ;;  %v3765_v34 = vld [vmem:[#allocation2 + $0x6c] sm:$0xf]  ;;  %v4191_v15 = vunpack.c.l.b16 %v3959_v26 }
 0x1fc   : > { %v2111_v59 = vadd.f32 %v2065_v27, %v15685_v3  ;;  %v3961_v27 = vshrl.u32 %v3765_v34, 16 }
 0x1fe   : > { %v2397_v36 = vadd.f32 %v2351_v43, %v2111_v59  ;;  %v3964_v59 = vshll.u32 %v3765_v34, 16  ;;  %v3963_v11 = vrot.slane %v3961_v27, 4  ;;  %v10918_v34 = vld [vmem:[#allocation2 + $0x54] sm:$0xff] }
 0x200   : > { %10391 = vmatmul.msk.bf16.gmra.mxu2 %vm1373_vm10, %v10917_v6  ;;  %10409 = vmatmul.msk.bf16.gmra.mxu3 %vm1373_vm10, %v4215_v51  ;;  %v3005_v14 = vpop.f32.mrf.mxu0  ;;  %v3970_v6 = vshll.u32 %v12477_v33, 16  ;;  %v4612_v51 = vpack.c.b16 %v4585_v50, %v4584_v49  ;;  %v3966_v28 = vrot.slane %v3964_v59, 5  ;;  %v4216_v49 = vpack.c.b16 %v4191_v15, %v4190_v17  ;;  %v3768_v59 = vld [vmem:[#allocation2 + $0x78] sm:$0xf] }
 0x201   : > { %v12475_v2 = vadd.f32 %v3005_v14, %v2397_v36  ;;  %v3985_v62 = vshrl.u32 %v3768_v59, 16 }
 0x202   : > { %v3972_v10 = vrot.slane %v3970_v6, 5  ;;  %v3967_v25 = vor.u32 %v3966_v28, %v3963_v11  ;;  %v12499_v6 = vld [vmem:[#allocation2 + $0x7c] sm:$0xf]  ;;  %v15689_v11 = vld [vmem:[#allocation15_spill] sm:$0xff] }
 0x203   : > { %v2068_v43 = vpop.f32.mrf.mxu2  ;;  %v2359_v55 = vpop.f32.mrf.mxu3 }
 0x204   : > { %v2112_v53 = vadd.f32 %v2068_v43, %v15686_v12  ;;  %v4501_v12 = vrot.slane %v4499_v16, 4  ;;  %v3977_v26 = vor.u32 %v3976_v58, %v3972_v10 }
 0x206   : > { %v2398_v3 = vadd.f32 %v2354_v48, %v2112_v53  ;;  %v12489_v48 = vld [vmem:[#allocation2 + $0x74] sm:$0x1]  ;;  %v4502_v53 = vrot.slane %v12435_v13, 5 }
 0x207   : > { %v3980_v27 = vshll.u32 %v12489_v48, 16 }
 0x208   : > { %v3008_v36 = vpop.f32.mrf.mxu0  ;;  %v4503_v13 = vsel %vm11800_vm1, %v4501_v12, %v4502_v53 }
 0x209   : > { %v12487_v14 = vadd.f32 %v3008_v36, %v2398_v3  ;;  %v4500_v3 = vsel %vm11800_vm1, %v10425_v41, %v4499_v16  ;;  %v3982_v17 = vrot.slane %v3980_v27, 5  ;;  %v3988_v16 = vshll.u32 %v3768_v59, 16 }
 0x20a   : > { %v4506_v59 = vrot.slane %v12449_v21, 5 }
 0x20b   : > { %v2070_v5 = vpop.f32.mrf.mxu2  ;;  %v2361_v43 = vpop.f32.mrf.mxu3  ;;  %10441 = vmatmul.msk.bf16.gmra.mxu0 %vm1373_vm10, %v4612_v51  ;;  %v3968_v51 = vrot.slane %v3967_v25, 4  ;;  %v3990_v25 = vrot.slane %v3988_v16, 5 }
 0x20c   : > { %v2113_v54 = vadd.f32 %v2070_v5, %v15687_v38  ;;  %v3994_v5 = vshll.u32 %v12499_v6, 16  ;;  %v3998_v38 = vshrl.u32 %v12499_v6, 16  ;;  %v4508_v21 = vrot.slane %v4506_v59, 4 }
 0x20d   : > { %v3973_v12 = vsel %vm11287_vm13, %v3968_v51, %v3972_v10  ;;  %v15691_v51 = vld [vmem:[#allocation16_spill] sm:$0xff] }
 0x20e   : > { %v2399_v50 = vadd.f32 %v2356_v24, %v2113_v54  ;;  %v3978_v24 = vrot.slane %v3977_v26, 4  ;;  %v4586_v54 = vunpack.c.l.b16 %v4500_v3  ;;  %v3996_v26 = vrot.slane %v3994_v5, 5 }
 0x20f   : > { %v4000_v27 = vrot.slane %v3998_v38, 4  ;;  %v4509_v38 = vrot.slane %v12461_v35, 5 }
 0x210   : > { %10392 = vmatmul.msk.bf16.gmra.mxu2 %vm1373_vm10, %v10918_v34  ;;  %10410 = vmatmul.msk.bf16.gmra.mxu3 %vm1373_vm10, %v4216_v49  ;;  %v3010_v7 = vpop.f32.mrf.mxu0  ;;  %v4587_v34 = vunpack.c.l.b16 %v4503_v13  ;;  %v3983_v53 = vsel %vm11287_vm13, %v3978_v24, %v3982_v17  ;;  %v4404_v49 = vld [vmem:[#allocation2 + $0x60] sm:$0xe] }
 0x211   : > { %v12503_v15 = vadd.f32 %v3010_v7, %v2399_v50  ;;  %v3987_v50 = vrot.slane %v3985_v62, 4  ;;  %v10426_v10 = vrot.slane %v4404_v49, 9  ;;  %v10919_v24 = vld [vmem:[#allocation2 + $0x60] sm:$0xff]  ;;  %v4001_v16 = vor.u32 %v4000_v27, %v3996_v26 }
 0x212   : > { %v4613_v7 = vpack.c.b16 %v4587_v34, %v4586_v54  ;;  %v3771_v27 = vld [vmem:[#allocation2 + $0x84] sm:$0xf] }
 0x213   : > { %15688 = vst [vmem:[#allocation10_spill] sm:$0xff] %v12503_v15  ;;  %v2073_v36 = vpop.f32.mrf.mxu2  ;;  %v2364_v58 = vpop.f32.mrf.mxu3  ;;  %v12513_v15 = vld [vmem:[#allocation2 + $0x80] sm:$0x1]  ;;  %v3991_v62 = vor.u32 %v3990_v25, %v3987_v50  ;;  %v4510_v50 = vsel %vm11800_vm1, %v4508_v21, %v4509_v38 }
 0x214   : > { %v2114_v28 = vadd.f32 %v2073_v36, %v15689_v11  ;;  %v4192_v36 = vunpack.c.l.b16 %v3973_v12  ;;  %v4193_v11 = vunpack.c.l.b16 %v3983_v53  ;;  %v4004_v5 = vshll.u32 %v12513_v15, 16 }
 0x215   : > { %v3992_v12 = vrot.slane %v3991_v62, 4  ;;  %v4002_v53 = vrot.slane %v4001_v16, 4 }
 0x216   : > { %v2400_v41 = vadd.f32 %v2359_v55, %v2114_v28  ;;  %v4217_v54 = vpack.c.b16 %v4193_v11, %v4192_v36  ;;  %v4006_v49 = vrot.slane %v4004_v5, 5  ;;  %v15693_v11 = vld [vmem:[#allocation17_spill] sm:$0xff] }
 0x218   : > { %v3013_v3 = vpop.f32.mrf.mxu0 }
 0x219   : > { %v12515_v55 = vadd.f32 %v3013_v3, %v2400_v41  ;;  %v4507_v41 = vsel %vm11800_vm1, %v10426_v10, %v4506_v59  ;;  %v3997_v10 = vsel %vm11287_vm13, %v3992_v12, %v3996_v26  ;;  %v4513_v26 = vrot.slane %v12477_v33, 5  ;;  %v12539_v12 = vld [vmem:[#allocation2 + $0x8c] sm:$0x1] }
 0x21a   : > { %v4588_v36 = vunpack.c.l.b16 %v4507_v41  ;;  %v4194_v38 = vunpack.c.l.b16 %v3997_v10  ;;  %v4516_v33 = vrot.slane %v12489_v48, 5  ;;  %v15697_v48 = vld [vmem:[#allocation19_spill] sm:$0xff] }
 0x21b   : > { %15690 = vst [vmem:[#allocation11_spill] sm:$0xff] %v12515_v55  ;;  %v2075_v13 = vpop.f32.mrf.mxu2  ;;  %v2366_v17 = vpop.f32.mrf.mxu3  ;;  %10442 = vmatmul.msk.bf16.gmra.mxu0 %vm1373_vm10, %v4613_v7  ;;  %v12527_v7 = vld [vmem:[#allocation2 + $0x88] sm:$0xf]  ;;  %v10920_v55 = vld [vmem:[#allocation2 + $0x6c] sm:$0xff] }
 0x21c   : > { %v2115_v28 = vadd.f32 %v2075_v13, %v15691_v51  ;;  %v4589_v13 = vunpack.c.l.b16 %v4510_v50  ;;  %v4007_v51 = vsel %vm11287_vm13, %v4002_v53, %v4006_v49  ;;  %v4018_v62 = vshll.u32 %v12527_v7, 16 }
 0x21d   : > { %v4022_v16 = vshrl.u32 %v12527_v7, 16 }
 0x21e   : > { %v2401_v34 = vadd.f32 %v2361_v43, %v2115_v28  ;;  %v4009_v28 = vshrl.u32 %v3771_v27, 16  ;;  %v4614_v21 = vpack.c.b16 %v4589_v13, %v4588_v36 }
 0x220   : > { %10393 = vmatmul.msk.bf16.gmra.mxu2 %vm1373_vm10, %v10919_v24  ;;  %10411 = vmatmul.msk.bf16.gmra.mxu3 %vm1373_vm10, %v4217_v54  ;;  %v3015_v25 = vpop.f32.mrf.mxu0  ;;  %v4012_v24 = vshll.u32 %v3771_v27, 16  ;;  %v4195_v54 = vunpack.c.l.b16 %v4007_v51  ;;  %v4011_v41 = vrot.slane %v4009_v28, 4  ;;  %v15695_v27 = vld [vmem:[#allocation18_spill] sm:$0xff]  ;;  %v4028_v51 = vshll.u32 %v12539_v12, 16 }
 0x221   : > { %v12529_v35 = vadd.f32 %v3015_v25, %v2401_v34  ;;  %v4405_v34 = vld [vmem:[#allocation2 + $0x6c] sm:$0xe]  ;;  %v4020_v25 = vrot.slane %v4018_v62, 5 }
 0x222   : > { %v4014_v50 = vrot.slane %v4012_v24, 5  ;;  %v10427_v36 = vrot.slane %v4405_v34, 9  ;;  %v4515_v24 = vrot.slane %v4513_v26, 4  ;;  %v4030_v34 = vrot.slane %v4028_v51, 5 }
 0x223   : > { %15692 = vst [vmem:[#allocation12_spill] sm:$0xff] %v12529_v35  ;;  %v2078_v43 = vpop.f32.mrf.mxu2  ;;  %v2369_v59 = vpop.f32.mrf.mxu3 }
 0x224   : > { %v2116_v3 = vadd.f32 %v2078_v43, %v15693_v11  ;;  %v4024_v43 = vrot.slane %v4022_v16, 4  ;;  %v4015_v13 = vor.u32 %v4014_v50, %v4011_v41  ;;  %v4514_v62 = vsel %vm11800_vm1, %v10427_v36, %v4513_v26 }
 0x225   : > { %v4590_v50 = vunpack.c.l.b16 %v4514_v62 }
 0x226   : > { %v2402_v5 = vadd.f32 %v2364_v58, %v2116_v3  ;;  %v4218_v3 = vpack.c.b16 %v4195_v54, %v4194_v38  ;;  %v4025_v10 = vor.u32 %v4024_v43, %v4020_v25  ;;  %v4016_v16 = vrot.slane %v4015_v13, 4  ;;  %v3774_v54 = vld [vmem:[#allocation2 + $0x90] sm:$0xf] }
 0x227   : > { %v4517_v38 = vsel %vm11800_vm1, %v4515_v24, %v4516_v33 }
 0x228   : > { %v3018_v11 = vpop.f32.mrf.mxu0  ;;  %v4021_v26 = vsel %vm11287_vm13, %v4016_v16, %v4020_v25 }
 0x229   : > { %v12541_v53 = vadd.f32 %v3018_v11, %v2402_v5  ;;  %v4026_v5 = vrot.slane %v4025_v10, 4  ;;  %v4591_v11 = vunpack.c.l.b16 %v4517_v38  ;;  %v4196_v24 = vunpack.c.l.b16 %v4021_v26 }
 0x22b   : > { %15694 = vst [vmem:[#allocation13_spill] sm:$0xff] %v12541_v53  ;;  %v2080_v49 = vpop.f32.mrf.mxu2  ;;  %v2371_v58 = vpop.f32.mrf.mxu3  ;;  %10443 = vmatmul.msk.bf16.gmra.mxu0 %vm1373_vm10, %v4614_v21  ;;  %v4615_v51 = vpack.c.b16 %v4591_v11, %v4590_v50  ;;  %v4523_v11 = vrot.slane %v12513_v15, 5 }
 0x22c   : > { %v2117_v35 = vadd.f32 %v2080_v49, %v15695_v27  ;;  %v4031_v49 = vsel %vm11287_vm13, %v4026_v5, %v4030_v34  ;;  %v4033_v27 = vshrl.u32 %v3774_v54, 16  ;;  %v15699_v34 = vld [vmem:[#allocation20_spill] sm:$0xff] }
 0x22d   : > { %v4197_v33 = vunpack.c.l.b16 %v4031_v49 }
 0x22e   : > { %v2403_v28 = vadd.f32 %v2366_v17, %v2117_v35  ;;  %v12555_v35 = vld [vmem:[#allocation2 + $0x94] sm:$0xf]  ;;  %v4035_v38 = vrot.slane %v4033_v27, 4 }
 0x22f   : > { %v4042_v13 = vshll.u32 %v12555_v35, 16  ;;  %v4046_v10 = vshrl.u32 %v12555_v35, 16  ;;  %v4219_v26 = vpack.c.b16 %v4197_v33, %v4196_v24 }
 0x230   : > { %10394 = vmatmul.msk.bf16.gmra.mxu2 %vm1373_vm10, %v10920_v55  ;;  %10412 = vmatmul.msk.bf16.gmra.mxu3 %vm1373_vm10, %v4218_v3  ;;  %v3020_v21 = vpop.f32.mrf.mxu0  ;;  %v4036_v3 = vshll.u32 %v3774_v54, 16 }
 0x231   : > { %v12553_v41 = vadd.f32 %v3020_v21, %v2403_v28  ;;  %v4520_v28 = vrot.slane %v12499_v6, 5  ;;  %v4406_v21 = vld [vmem:[#allocation2 + $0x78] sm:$0xe]  ;;  %v4044_v25 = vrot.slane %v4042_v13, 5  ;;  %v4048_v16 = vrot.slane %v4046_v10, 4 }
 0x232   : > { %v10428_v6 = vrot.slane %v4406_v21, 9  ;;  %v3777_v10 = vld [vmem:[#allocation2 + $0x9c] sm:$0xf] }
 0x233   : > { %15696 = vst [vmem:[#allocation14_spill] sm:$0xff] %v12553_v41  ;;  %v2083_v17 = vpop.f32.mrf.mxu2  ;;  %v4286_v43 = vpop.f32.mrf.mxu3  ;;  %v4522_v50 = vrot.slane %v4520_v28, 4 }
 0x234   : > { %v2118_v55 = vadd.f32 %v2083_v17, %v15697_v48  ;;  %v4038_v17 = vrot.slane %v4036_v3, 5  ;;  %v4049_v3 = vor.u32 %v4048_v16, %v4044_v25  ;;  %v4521_v13 = vsel %vm11800_vm1, %v10428_v6, %v4520_v28 }
 0x235   : > { %v4524_v15 = vsel %vm11800_vm1, %v4522_v50, %v4523_v11  ;;  %v4060_v28 = vshll.u32 %v3777_v10, 16 }
 0x236   : > { %v2404_v36 = vadd.f32 %v2369_v59, %v2118_v55  ;;  %v12567_v59 = vld [vmem:[#allocation2 + $0x98] sm:$0x1]  ;;  %v4039_v27 = vor.u32 %v4038_v17, %v4035_v38  ;;  %v4057_v17 = vshrl.u32 %v3777_v10, 16  ;;  %v4593_v6 = vunpack.c.l.b16 %v4524_v15 }
 0x237   : > { %v10921_v55 = vld [vmem:[#allocation2 + $0x78] sm:$0xff]  ;;  %v4527_v10 = vrot.slane %v12527_v7, 5 }
 0x238   : > { %v3023_v62 = vpop.f32.mrf.mxu0  ;;  %v4040_v24 = vrot.slane %v4039_v27, 4  ;;  %v4059_v27 = vrot.slane %v4057_v17, 4 }
 0x239   : > { %v12565_v48 = vadd.f32 %v3023_v62, %v2404_v36  ;;  %v4052_v36 = vshll.u32 %v12567_v59, 16  ;;  %v12577_v62 = vld [vmem:[#allocation2 + $0xa0] sm:$0xf]  ;;  %v4529_v7 = vrot.slane %v4527_v10, 4 }
 0x23a   : > { %v4045_v50 = vsel %vm11287_vm13, %v4040_v24, %v4044_v25 }
 0x23b   : > { %15698 = vst [vmem:[#allocation15_spill] sm:$0xff] %v12565_v48  ;;  %v2085_v5 = vpop.f32.mrf.mxu2  ;;  %v4288_v41 = vpop.f32.mrf.mxu3  ;;  %10444 = vmatmul.msk.bf16.gmra.mxu0 %vm1373_vm10, %v4615_v51  ;;  %v4054_v33 = vrot.slane %v4052_v36, 5  ;;  %v12591_v48 = vld [vmem:[#allocation2 + $0xa4] sm:$0x1] }
 0x23c   : > { %v2119_v54 = vadd.f32 %v2085_v5, %v15699_v34  ;;  %v4066_v34 = vshll.u32 %v12577_v62, 16 }
 0x23e   : > { %v2405_v49 = vadd.f32 %v2371_v58, %v2119_v54  ;;  %v4050_v58 = vrot.slane %v4049_v3, 4  ;;  %v4070_v54 = vshrl.u32 %v12577_v62, 16  ;;  %v4062_v3 = vrot.slane %v4060_v28, 5 }
 0x23f   : > { %v4068_v36 = vrot.slane %v4066_v34, 5  ;;  %v4076_v28 = vshll.u32 %v12591_v48, 16  ;;  %v4530_v34 = vrot.slane %v12539_v12, 5 }
 0x240   : > { %10395 = vmatmul.msk.bf16.gmra.mxu2 %vm1373_vm10, %v10921_v55  ;;  %10413 = vmatmul.msk.bf16.gmra.mxu3 %vm1373_vm10, %v4219_v26  ;;  %v3025_v51 = vpop.f32.mrf.mxu0  ;;  %v4592_v55 = vunpack.c.l.b16 %v4521_v13  ;;  %v4055_v11 = vsel %vm11287_vm13, %v4050_v58, %v4054_v33  ;;  %v10922_v58 = vld [vmem:[#allocation2 + $0x84] sm:$0xff]  ;;  %v4063_v17 = vor.u32 %v4062_v3, %v4059_v27  ;;  %v12605_v3 = vld [vmem:[#allocation2 + $0xac] sm:$0xf] }
 0x241   : > { %v12581_v21 = vadd.f32 %v3025_v51, %v2405_v49  ;;  %v4407_v49 = vld [vmem:[#allocation2 + $0x84] sm:$0xe]  ;;  %v3780_v27 = vld [vmem:[#allocation2 + $0xa8] sm:$0xf] }
 0x242   : > { %v4616_v51 = vpack.c.b16 %v4593_v6, %v4592_v55  ;;  %v10429_v25 = vrot.slane %v4407_v49, 9 }
 0x243   : > { %15700 = vst [vmem:[#allocation16_spill] sm:$0xff] %v12581_v21  ;;  %v3632_v38 = vpop.f32.mrf.mxu2  ;;  %v4291_v5 = vpop.f32.mrf.mxu3  ;;  %v4199_v21 = vunpack.c.l.b16 %v4055_v11  ;;  %v4531_v11 = vsel %vm11800_vm1, %v4529_v7, %v4530_v34  ;;  %v4408_v34 = vld [vmem:[#allocation2 + $0x90] sm:$0xe] }
 0x244   : > { %v3712_v16 = vadd.f32 %v3632_v38, %v12062_v1  ;;  %v4072_v1 = vrot.slane %v4070_v54, 4  ;;  %v4198_v38 = vunpack.c.l.b16 %v4045_v50  ;;  %v4528_v6 = vsel %vm11800_vm1, %v10429_v25, %v4527_v10 }
 0x245   : > { %v4078_v50 = vrot.slane %v4076_v28, 5  ;;  %v4084_v25 = vshll.u32 %v3780_v27, 16 }
 0x246   : > { %v4366_v26 = vadd.f32 %v4286_v43, %v3712_v16  ;;  %v4073_v16 = vor.u32 %v4072_v1, %v4068_v36  ;;  %v4220_v54 = vpack.c.b16 %v4199_v21, %v4198_v38  ;;  %v4594_v21 = vunpack.c.l.b16 %v4528_v6 }
 0x248   : > { %v4684_v13 = vpop.f32.mrf.mxu0 }
 0x249   : > { %v12593_v43 = vadd.f32 %v4684_v13, %v4366_v26  ;;  %v4064_v26 = vrot.slane %v4063_v17, 4 }
 0x24b   : > { %15701 = vst [vmem:[#allocation17_spill] sm:$0xff] %v12593_v43  ;;  %v3634_v15 = vpop.f32.mrf.mxu2  ;;  %v4293_v33 = vpop.f32.mrf.mxu3  ;;  %10445 = vmatmul.msk.bf16.gmra.mxu0 %vm1373_vm10, %v4616_v51  ;;  %v4595_v51 = vunpack.c.l.b16 %v4531_v11  ;;  %v4069_v38 = vsel %vm11287_vm13, %v4064_v26, %v4068_v36  ;;  %v4534_v36 = vrot.slane %v12555_v35, 5  ;;  %v12617_v26 = vld [vmem:[#allocation2 + $0xb0] sm:$0x1]  ;;  %v4537_v35 = vrot.slane %v12567_v59, 5 }
 0x24c   : > { %v3713_v24 = vadd.f32 %v3634_v15, %v12081_v0  ;;  %v4074_v0 = vrot.slane %v4073_v16, 4  ;;  %v4081_v15 = vshrl.u32 %v3780_v27, 16  ;;  %v4200_v28 = vunpack.c.l.b16 %v4069_v38  ;;  %v10923_v27 = vld [vmem:[#allocation2 + $0x90] sm:$0xff] }
 0x24d   : > { %v4617_v16 = vpack.c.b16 %v4595_v51, %v4594_v21  ;;  %v4100_v38 = vshll.u32 %v12617_v26, 16 }
 0x24e   : > { %v4367_v55 = vadd.f32 %v4288_v41, %v3713_v24  ;;  %v4079_v13 = vsel %vm11287_vm13, %v4074_v0, %v4078_v50  ;;  %v4090_v24 = vshll.u32 %v12605_v3, 16 }
 0x24f   : > { %v4201_v7 = vunpack.c.l.b16 %v4079_v13 }
 0x250   : > { %10396 = vmatmul.msk.bf16.gmra.mxu2 %vm1373_vm10, %v10922_v58  ;;  %10414 = vmatmul.msk.bf16.gmra.mxu3 %vm1373_vm10, %v4220_v54  ;;  %v4686_v49 = vpop.f32.mrf.mxu0  ;;  %v4094_v58 = vshrl.u32 %v12605_v3, 16  ;;  %v4086_v54 = vrot.slane %v4084_v25, 5 }
 0x251   : > { %v12607_v12 = vadd.f32 %v4686_v49, %v4367_v55  ;;  %v4092_v55 = vrot.slane %v4090_v24, 5  ;;  %v4221_v21 = vpack.c.b16 %v4201_v7, %v4200_v28  ;;  %v3783_v28 = vld [vmem:[#allocation2 + $0xb4] sm:$0xf] }
 0x252   : > { %v4096_v6 = vrot.slane %v4094_v58, 4  ;;  %v4102_v58 = vrot.slane %v4100_v38, 5 }
 0x253   : > { %15702 = vst [vmem:[#allocation18_spill] sm:$0xff] %v12607_v12  ;;  %v3637_v41 = vpop.f32.mrf.mxu2  ;;  %v4296_v10 = vpop.f32.mrf.mxu3  ;;  %v4867_v30 = vmul.f32 %v12607_v12, %v12607_v12 }
 0x254   : > { %v3714_v1 = vadd.f32 %v3637_v41, %v12093_v29  ;;  %v4083_v29 = vrot.slane %v4081_v15, 4  ;;  %v10430_v41 = vrot.slane %v4408_v34, 9  ;;  %v4097_v51 = vor.u32 %v4096_v6, %v4092_v55  ;;  %v12633_v34 = vld [vmem:[#allocation2 + $0xb8] sm:$0xf] }
 0x255   : > { %v4536_v15 = vrot.slane %v4534_v36, 4  ;;  %v4899_v47 = vsel %vm1373_vm10, %v4867_v30, 0.0 }
 0x256   : > { %v4368_v17 = vadd.f32 %v4291_v5, %v3714_v1  ;;  %v4087_v1 = vor.u32 %v4086_v54, %v4083_v29  ;;  %v4535_v25 = vsel %vm11800_vm1, %v10430_v41, %v4534_v36  ;;  %v4098_v24 = vrot.slane %v4097_v51, 4  ;;  %v4409_v51 = vld [vmem:[#allocation2 + $0x9c] sm:$0xe] }
 0x257   : > { %v4596_v29 = vunpack.c.l.b16 %v4535_v25  ;;  %v4114_v41 = vshll.u32 %v12633_v34, 16 }
 0x258   : > { %v4689_v11 = vpop.f32.mrf.mxu0  ;;  %v4103_v36 = vsel %vm11287_vm13, %v4098_v24, %v4102_v58 }
 0x259   : > { %v12619_v0 = vadd.f32 %v4689_v11, %v4368_v17 }
 0x25b   : > { %15703 = vst [vmem:[#allocation19_spill] sm:$0xff] %v12619_v0  ;;  %v3639_v50 = vpop.f32.mrf.mxu2  ;;  %v4298_v5 = vpop.f32.mrf.mxu3  ;;  %10446 = vmatmul.msk.bf16.gmra.mxu0 %vm1373_vm10, %v4617_v16  ;;  %v4538_v16 = vsel %vm11800_vm1, %v4536_v15, %v4537_v35  ;;  %v4799_v53 = vsel %vm1373_vm10, %v12619_v0, 0.0 }
 0x25c   : > { %v3715_v49 = vadd.f32 %v3639_v50, %v12108_v23  ;;  %v4088_v23 = vrot.slane %v4087_v1, 4  ;;  %v4597_v6 = vunpack.c.l.b16 %v4538_v16  ;;  %v4105_v50 = vshrl.u32 %v3783_v28, 16  ;;  %v10924_v16 = vld [vmem:[#allocation2 + $0x9c] sm:$0xff] }
 0x25e   : > { %v4369_v13 = vadd.f32 %v4293_v33, %v3715_v49  ;;  %v4093_v11 = vsel %vm11287_vm13, %v4088_v23, %v4092_v55  ;;  %v4618_v1 = vpack.c.b16 %v4597_v6, %v4596_v29  ;;  %v4107_v35 = vrot.slane %v4105_v50, 4 }
 0x25f   : > { %v4202_v38 = vunpack.c.l.b16 %v4093_v11  ;;  %v4116_v55 = vrot.slane %v4114_v41, 5 }
 0x260   : > { %10397 = vmatmul.msk.bf16.gmra.mxu2 %vm1373_vm10, %v10923_v27  ;;  %10415 = vmatmul.msk.bf16.gmra.mxu3 %vm1373_vm10, %v4221_v21  ;;  %v4691_v17 = vpop.f32.mrf.mxu0  ;;  %v4108_v27 = vshll.u32 %v3783_v28, 16  ;;  %v4118_v21 = vshrl.u32 %v12633_v34, 16 }
 0x261   : > { %v12631_v7 = vadd.f32 %v4691_v17, %v4369_v13  ;;  %v4203_v13 = vunpack.c.l.b16 %v4103_v36 }
 0x262   : > { %v4110_v25 = vrot.slane %v4108_v27, 5  ;;  %v4120_v23 = vrot.slane %v4118_v21, 4  ;;  %v3786_v27 = vld [vmem:[#allocation2 + $0xc0] sm:$0xf] }
 0x263   : > { %15704 = vst [vmem:[#allocation20_spill] sm:$0xff] %v12631_v7  ;;  %v3642_v33 = vpop.f32.mrf.mxu2  ;;  %v4301_v54 = vpop.f32.mrf.mxu3  ;;  %v4222_v29 = vpack.c.b16 %v4203_v13, %v4202_v38  ;;  %v4801_v30 = vsel %vm1373_vm10, %v12631_v7, 0.0 }
 0x264   : > { %v3716_v59 = vadd.f32 %v3642_v33, %v12124_v45  ;;  %v4541_v45 = vrot.slane %v12577_v62, 5  ;;  %v10431_v33 = vrot.slane %v4409_v51, 9  ;;  %v4111_v11 = vor.u32 %v4110_v25, %v4107_v35 }
 0x265   : > { %v4121_v36 = vor.u32 %v4120_v23, %v4116_v55  ;;  %v4129_v25 = vshrl.u32 %v3786_v27, 16  ;;  %v4132_v23 = vshll.u32 %v3786_v27, 16  ;;  %v880_v27 = vld [vmem:[#allocation2 + $0xb4] sm:$0xf] }
 0x266   : > { %v4370_v49 = vadd.f32 %v4296_v10, %v3716_v59  ;;  %v12645_v10 = vld [vmem:[#allocation2 + $0xbc] sm:$0x1]  ;;  %v4543_v62 = vrot.slane %v4541_v45, 4  ;;  %v4544_v59 = vrot.slane %v12591_v48, 5  ;;  %v4112_v21 = vrot.slane %v4111_v11, 4 }
 0x267   : > { %v4124_v50 = vshll.u32 %v12645_v10, 16  ;;  %v4122_v48 = vrot.slane %v4121_v36, 4  ;;  %v4134_v11 = vrot.slane %v4132_v23, 5  ;;  %884 = vst.msk [vmem:[#allocation2 + $0xcc] sm:$0xf] %vm560_vm3, %v880_v27 }
 0x268   : > { %v4694_v15 = vpop.f32.mrf.mxu0 }
 0x269   : > { %v12643_v17 = vadd.f32 %v4694_v15, %v4370_v49  ;;  %v4542_v49 = vsel %vm11800_vm1, %v10431_v33, %v4541_v45  ;;  %v4117_v33 = vsel %vm11287_vm13, %v4112_v21, %v4116_v55 }
 0x26a   : > { %v4598_v13 = vunpack.c.l.b16 %v4542_v49  ;;  %v4204_v36 = vunpack.c.l.b16 %v4117_v33 }
 0x26b   : > { %15705 = vst [vmem:[#allocation24_spill] sm:$0xff] %v12643_v17  ;;  %v3644_v24 = vpop.f32.mrf.mxu2  ;;  %v4303_v28 = vpop.f32.mrf.mxu3  ;;  %10447 = vmatmul.msk.bf16.gmra.mxu0 %vm1373_vm10, %v4618_v1  ;;  %v4126_v1 = vrot.slane %v4124_v50, 5 }
 0x26c   : > { %v3717_v58 = vadd.f32 %v3644_v24, %v12149_v4  ;;  %v4545_v4 = vsel %vm11800_vm1, %v4543_v62, %v4544_v59 }
 0x26d   : > { %v4599_v35 = vunpack.c.l.b16 %v4545_v4  ;;  %v4127_v62 = vsel %vm11287_vm13, %v4122_v48, %v4126_v1  ;;  %v10925_v48 = vld [vmem:[#allocation2 + $0xa8] sm:$0xff] }
 0x26e   : > { %v4371_v6 = vadd.f32 %v4298_v5, %v3717_v58  ;;  %v12657_v5 = vld [vmem:[#allocation2 + $0xc4] sm:$0xf]  ;;  %v4205_v50 = vunpack.c.l.b16 %v4127_v62 }
 0x26f   : > { %v4138_v24 = vshll.u32 %v12657_v5, 16  ;;  %v4142_v58 = vshrl.u32 %v12657_v5, 16  ;;  %v4619_v59 = vpack.c.b16 %v4599_v35, %v4598_v13  ;;  %v4551_v35 = vrot.slane %v12617_v26, 5 }
 0x270   : > { %10398 = vmatmul.msk.bf16.gmra.mxu2 %vm1373_vm10, %v10924_v16  ;;  %10416 = vmatmul.msk.bf16.gmra.mxu3 %vm1373_vm10, %v4222_v29  ;;  %v4696_v41 = vpop.f32.mrf.mxu0  ;;  %v4410_v29 = vld [vmem:[#allocation2 + $0xa8] sm:$0xe] }
 0x271   : > { %v12659_v51 = vadd.f32 %v4696_v41, %v4371_v6  ;;  %v4548_v6 = vrot.slane %v12605_v3, 5  ;;  %v4140_v49 = vrot.slane %v4138_v24, 5  ;;  %v4144_v4 = vrot.slane %v4142_v58, 4  ;;  %v881_v41 = vld [vmem:[#allocation2 + $0xb8] sm:$0xf] }
 0x272   : > { %885 = vst.msk [vmem:[#allocation2 + $0xd0] sm:$0xf] %vm560_vm3, %v881_v41  ;;  %v10432_v13 = vrot.slane %v4410_v29, 9 }
 0x273   : > { %v3647_v38 = vpop.f32.mrf.mxu2  ;;  %v4306_v45 = vpop.f32.mrf.mxu3  ;;  %v4145_v24 = vor.u32 %v4144_v4, %v4140_v49 }
 0x274   : > { %v3718_v15 = vadd.f32 %v3647_v38, %v12175_v31  ;;  %v4131_v31 = vrot.slane %v4129_v25, 4  ;;  %v4223_v25 = vpack.c.b16 %v4205_v50, %v4204_v36 }
 0x276   : > { %v4372_v16 = vadd.f32 %v4301_v54, %v3718_v15  ;;  %v12669_v54 = vld [vmem:[#allocation2 + $0xc8] sm:$0x1]  ;;  %v4550_v15 = vrot.slane %v4548_v6, 4  ;;  %v4135_v23 = vor.u32 %v4134_v11, %v4131_v31  ;;  %v3789_v11 = vld [vmem:[#allocation2 + $0xcc] sm:$0xf] }
 0x277   : > { %v4148_v58 = vshll.u32 %v12669_v54, 16 }
 0x278   : > { %v4699_v38 = vpop.f32.mrf.mxu0  ;;  %v4552_v62 = vsel %vm11800_vm1, %v4550_v15, %v4551_v35  ;;  %v4136_v26 = vrot.slane %v4135_v23, 4  ;;  %v4555_v23 = vrot.slane %v12633_v34, 5 }
 0x279   : > { %v12672_v55 = vadd.f32 %v4699_v38, %v4372_v16  ;;  %v882_v16 = vld [vmem:[#allocation2 + $0xbc] sm:$0x1]  ;;  %v4150_v29 = vrot.slane %v4148_v58, 5  ;;  %v12690_v50 = vld [vmem:[#allocation2 + $0xd0] sm:$0xf]  ;;  %v4601_v41 = vunpack.c.l.b16 %v4552_v62 }
 0x27a   : > { %886 = vst.msk [vmem:[#allocation2 + $0xd4] sm:$0x1] %vm568_vm5, %v882_v16  ;;  %v4141_v38 = vsel %vm11287_vm13, %v4136_v26, %v4140_v49  ;;  %v4162_v15 = vshll.u32 %v12690_v50, 16  ;;  %v4166_v35 = vshrl.u32 %v12690_v50, 16 }
 0x27b   : > { %v3649_v21 = vpop.f32.mrf.mxu2  ;;  %v12676_v1 = vpop.f32.mrf.mxu3  ;;  %10448 = vmatmul.msk.bf16.gmra.mxu0 %vm1373_vm10, %v4619_v59  ;;  %v4146_v59 = vrot.slane %v4145_v24, 4  ;;  %v4206_v24 = vunpack.c.l.b16 %v4141_v38 }
 0x27c   : > { %v3719_v3 = vadd.f32 %v3649_v21, %v12203_v57  ;;  %v4549_v57 = vsel %vm11800_vm1, %v10432_v13, %v4548_v6  ;;  %v4156_v13 = vshll.u32 %v3789_v11, 16  ;;  %v4164_v62 = vrot.slane %v4162_v15, 5 }
 0x27d   : > { %v4600_v27 = vunpack.c.l.b16 %v4549_v57  ;;  %v4151_v21 = vsel %vm11287_vm13, %v4146_v59, %v4150_v29  ;;  %v4168_v26 = vrot.slane %v4166_v35, 4 }
 0x27e   : > { %v4373_v33 = vadd.f32 %v4303_v28, %v3719_v3  ;;  %v4153_v3 = vshrl.u32 %v3789_v11, 16  ;;  %v4207_v58 = vunpack.c.l.b16 %v4151_v21  ;;  %v4158_v57 = vrot.slane %v4156_v13, 5  ;;  %v10926_v11 = vld [vmem:[#allocation2 + $0xb4] sm:$0xff] }
 0x27f   : > { %v4169_v21 = vor.u32 %v4168_v26, %v4164_v62 }
 0x280   : > { %10399 = vmatmul.msk.bf16.gmra.mxu2 %vm1373_vm10, %v10925_v48  ;;  %10417 = vmatmul.msk.bf16.gmra.mxu3 %vm1373_vm10, %v4223_v25  ;;  %v4701_v31 = vpop.f32.mrf.mxu0  ;;  %v4620_v25 = vpack.c.b16 %v4601_v41, %v4600_v27  ;;  %v4224_v27 = vpack.c.b16 %v4207_v58, %v4206_v24  ;;  %v4558_v41 = vrot.slane %v12645_v10, 5 }
 0x281   : > { %v12688_v36 = vadd.f32 %v4701_v31, %v4373_v33  ;;  %v4411_v33 = vld [vmem:[#allocation2 + $0xb4] sm:$0xe]  ;;  %v12708_v31 = vld [vmem:[#allocation2 + $0xd4] sm:$0x1] }
 0x282   : > { %v10433_v34 = vrot.slane %v4411_v33, 9 }
 0x283   : > { %v3652_v28 = vpop.f32.mrf.mxu2  ;;  %v4311_v6 = vpop.f32.mrf.mxu3 }
 0x284   : > { %v3720_v4 = vadd.f32 %v3652_v28, %v12228_v60  ;;  %v10485_v60 = vld [vmem:[%s15575_s2 + $0x2] sm:$0x3] }
 0x285   : > { %v6282_v49 = vsel %vm1422_vm0, %v10485_v60, 0 }
 0x286   : > { %v4374_v48 = vadd.f32 %v4306_v45, %v3720_v4  ;;  %6291 = vmatpush.bf16.msra.mxu1 %v6282_v49  ;;  %v4155_v45 = vrot.slane %v4153_v3, 4  ;;  %v4557_v4 = vrot.slane %v4555_v23, 4  ;;  %v4172_v3 = vshll.u32 %v12708_v31, 16 }
 0x288   : > { %v4704_v16 = vpop.f32.mrf.mxu0  ;;  %v4159_v38 = vor.u32 %v4158_v57, %v4155_v45  ;;  %v4559_v15 = vsel %vm11800_vm1, %v4557_v4, %v4558_v41  ;;  %v4174_v60 = vrot.slane %v4172_v3, 5  ;;  %v4562_v4 = vrot.slane %v12657_v5, 5 }
 0x289   : > { %v12704_v59 = vadd.f32 %v4704_v16, %v4374_v48  ;;  %v4556_v48 = vsel %vm11800_vm1, %v10433_v34, %v4555_v23  ;;  %v4603_v16 = vunpack.c.l.b16 %v4559_v15 }
 0x28a   : > { %v4160_v35 = vrot.slane %v4159_v38, 4  ;;  %v4602_v49 = vunpack.c.l.b16 %v4556_v48  ;;  %v10927_v38 = vld [vmem:[#allocation2 + $0xc0] sm:$0xff]  ;;  %v4564_v3 = vrot.slane %v4562_v4, 4  ;;  %v4565_v48 = vrot.slane %v12669_v54, 5 }
 0x28b   : > { %v12706_v29 = vpop.f32.mrf.mxu2  ;;  %v12710_v28 = vpop.f32.mrf.mxu3  ;;  %10449 = vmatmul.msk.bf16.gmra.mxu0 %vm1373_vm10, %v4620_v25  ;;  %v4170_v25 = vrot.slane %v4169_v21, 4 }
 0x28c   : > { %v4165_v23 = vsel %vm11287_vm13, %v4160_v35, %v4164_v62  ;;  %v4621_v57 = vpack.c.b16 %v4603_v16, %v4602_v49  ;;  %v4566_v35 = vsel %vm11800_vm1, %v4564_v3, %v4565_v48 }
 0x28d   : > { %v4175_v45 = vsel %vm11287_vm13, %v4170_v25, %v4174_v60  ;;  %v4208_v26 = vunpack.c.l.b16 %v4165_v23  ;;  %v4605_v49 = vunpack.c.l.b16 %v4566_v35  ;;  %v4569_v23 = vrot.slane %v12690_v50, 5 }
 0x290   : > { %10400 = vmatmul.msk.bf16.gmra.mxu2 %vm1373_vm10, %v10926_v11  ;;  %10418 = vmatmul.msk.bf16.gmra.mxu3 %vm1373_vm10, %v4224_v27  ;;  %v12719_v13 = vpop.f32.mrf.mxu0  ;;  %v4209_v11 = vunpack.c.l.b16 %v4175_v45 }
 0x293   : > { %v3657_v10 = vpop.f32.mrf.mxu2  ;;  %v4316_v58 = vpop.f32.mrf.mxu3 }
 0x294   : > { %v3722_v24 = vadd.f32 %v3657_v10, %v12276_v52  ;;  %v4412_v52 = vld [vmem:[#allocation2 + $0xc0] sm:$0xe] }
 0x295   : > { %v10434_v62 = vrot.slane %v4412_v52, 9  ;;  %v4572_v52 = vrot.slane %v12708_v31, 5 }
 0x296   : > { %v4376_v33 = vadd.f32 %v4311_v6, %v3722_v24  ;;  %v4225_v6 = vpack.c.b16 %v4209_v11, %v4208_v26  ;;  %v4413_v26 = vld [vmem:[#allocation2 + $0xcc] sm:$0xe] }
 0x297   : > { %v4563_v15 = vsel %vm11800_vm1, %v10434_v62, %v4562_v4  ;;  %v10928_v11 = vld [vmem:[#allocation2 + $0xcc] sm:$0xff]  ;;  %v10435_v4 = vrot.slane %v4413_v26, 9 }
 0x298   : > { %v4709_v34 = vpop.f32.mrf.mxu0  ;;  %v4604_v24 = vunpack.c.l.b16 %v4563_v15 }
 0x299   : > { %v12729_v27 = vadd.f32 %v4709_v34, %v4376_v33  ;;  %v4570_v50 = vsel %vm11800_vm1, %v10435_v4, %v4569_v23 }
 0x29a   : > { %v4622_v54 = vpack.c.b16 %v4605_v49, %v4604_v24  ;;  %v4606_v48 = vunpack.c.l.b16 %v4570_v50 }
 0x29b   : > { %v12731_v41 = vpop.f32.mrf.mxu2  ;;  %v12733_v21 = vpop.f32.mrf.mxu3  ;;  %10450 = vmatmul.msk.bf16.gmra.mxu0 %vm1373_vm10, %v4621_v57 }
 0x2a0   : > { %10401 = vmatmul.msk.bf16.gmra.mxu2 %vm1373_vm10, %v10927_v38  ;;  %10419 = vmatmul.msk.bf16.gmra.mxu3 %vm1373_vm10, %v4225_v6  ;;  %v12739_v5 = vpop.f32.mrf.mxu0 }
 0x2a3   : > { %v3662_v25 = vpop.f32.mrf.mxu2  ;;  %v4321_v10 = vpop.f32.mrf.mxu3 }
 0x2a4   : > { %v3724_v60 = vadd.f32 %v3662_v25, %v12325_v40  ;;  %v4571_v40 = vrot.slane %v4569_v23, 4 }
 0x2a6   : > { %v4378_v16 = vadd.f32 %v4316_v58, %v3724_v60  ;;  %v4573_v38 = vsel %vm11800_vm1, %v4571_v40, %v4572_v52  ;;  %v12781_v52 = vpop.f32.mrf.mxu1 }
 0x2a7   : > { %v4607_v15 = vunpack.c.l.b16 %v4573_v38 }
 0x2a8   : > { %v4714_v33 = vpop.f32.mrf.mxu0 }
 0x2a9   : > { %v12747_v45 = vadd.f32 %v4714_v33, %v4378_v16  ;;  %v4623_v25 = vpack.c.b16 %v4607_v15, %v4606_v48 }
 0x2ab   : > { %v12749_v57 = vpop.f32.mrf.mxu2  ;;  %v12751_v34 = vpop.f32.mrf.mxu3  ;;  %10451 = vmatmul.msk.bf16.gmra.mxu0 %vm1373_vm10, %v4622_v54 }
 0x2b0   : > { %10402 = vmatmul.msk.bf16.gmra.mxu2 %vm1373_vm10, %v10928_v11  ;;  %v12756_v58 = vpop.f32.mrf.mxu0 }
 0x2b3   : > { %v3667_v6 = vpop.f32.mrf.mxu2  ;;  %v4326_v3 = vpop.f32.mrf.mxu3 }
 0x2b4   : > { %v3726_v62 = vadd.f32 %v3667_v6, %v12357_v8 }
 0x2b6   : > { %v4380_v35 = vadd.f32 %v4321_v10, %v3726_v62 }
 0x2b8   : > { %v4719_v60 = vpop.f32.mrf.mxu0 }
 0x2b9   : > { %v12763_v31 = vadd.f32 %v4719_v60, %v4380_v35  ;;  %v12790_v35 = vpop.f32.mrf.mxu1 }
 0x2bb   : > { %v12765_v24 = vpop.f32.mrf.mxu2  ;;  %v12767_v49 = vpop.f32.mrf.mxu3  ;;  %10452 = vmatmul.msk.bf16.gmra.mxu0 %vm1373_vm10, %v4623_v25 }
 0x2c0   : > { %v12770_v16 = vpop.f32.mrf.mxu0 }
 0x2c3   : > { %v3672_v54 = vpop.f32.mrf.mxu2  ;;  %v4331_v8 = vpop.f32.mrf.mxu3 }
 0x2c4   : > { %v3728_v33 = vadd.f32 %v3672_v54, %v12385_v63 }
 0x2c6   : > { %v4382_v23 = vadd.f32 %v4326_v3, %v3728_v33 }
 0x2c8   : > { %v4724_v26 = vpop.f32.mrf.mxu0 }
 0x2c9   : > { %v12773_v11 = vadd.f32 %v4724_v26, %v4382_v23 }
 0x2cb   : > { %v12775_v10 = vpop.f32.mrf.mxu2  ;;  %v12777_v4 = vpop.f32.mrf.mxu3 }
 0x2d0   : > { %v12779_v40 = vpop.f32.mrf.mxu0 }
 0x2d3   : > { %v3677_v50 = vpop.f32.mrf.mxu2  ;;  %v4336_v6 = vpop.f32.mrf.mxu3 }
 0x2d4   : > { %v3730_v38 = vadd.f32 %v3677_v50, %v12411_v56  ;;  %v12797_v56 = vpop.f32.mrf.mxu1 }
 0x2d6   : > { %v4384_v62 = vadd.f32 %v4331_v8, %v3730_v38 }
 0x2d8   : > { %v4729_v48 = vpop.f32.mrf.mxu0 }
 0x2d9   : > { %v12784_v63 = vadd.f32 %v4729_v48, %v4384_v62 }
 0x2db   : > { %15706 = vst [vmem:[#allocation25_spill] sm:$0xff] %v12784_v63  ;;  %v12786_v3 = vpop.f32.mrf.mxu2  ;;  %v12788_v15 = vpop.f32.mrf.mxu3 }
 0x2dc   : > { %15707 = vst [vmem:[#allocation26_spill] sm:$0xff] %v12788_v15  ;;  %v12805_v62 = vpop.f32.mrf.mxu1 }
 0x2e0   : > { %v12792_v25 = vpop.f32.mrf.mxu0 }
 0x2e1   : > { %15708 = vst [vmem:[#allocation27_spill] sm:$0xff] %v12792_v25 }
 0x2e3   : > { %v3682_v60 = vpop.f32.mrf.mxu2  ;;  %v12795_v33 = vpop.f32.mrf.mxu3 }
 0x2e4   : > { %v3732_v54 = vadd.f32 %v3682_v60, %v12440_v20  ;;  %15709 = vst [vmem:[#allocation28_spill] sm:$0xff] %v12795_v33  ;;  %v4866_v60 = vmul.f32 %v12593_v43, %v12593_v43 }
 0x2e6   : > { %v4386_v23 = vadd.f32 %v4336_v6, %v3732_v54  ;;  %v3435_v6 = vadd.f32 %v12206_v32, %v12245_v39  ;;  %v4797_v54 = vsel %vm1373_vm10, %v12607_v12, 0.0  ;;  %v4869_v32 = vmul.f32 %v12631_v7, %v12631_v7 }
 0x2e7   : > { %v4898_v63 = vsel %vm1373_vm10, %v4866_v60, 0.0  ;;  %v4803_v60 = vsel %vm1373_vm10, %v12643_v17, 0.0 }
 0x2e8   : > { %v4734_v8 = vpop.f32.mrf.mxu0  ;;  %v3721_v39 = vadd.f32 %v12706_v29, %v3435_v6  ;;  %v4900_v25 = vadd.f32 %v4899_v47, %v4898_v63 }
 0x2e9   : > { %v12799_v26 = vadd.f32 %v4734_v8, %v4386_v23  ;;  %v4868_v23 = vmul.f32 %v12619_v0, %v12619_v0  ;;  %v4796_v8 = vsel %vm1373_vm10, %v12593_v43, 0.0  ;;  %v4870_v0 = vmul.f32 %v12643_v17, %v12643_v17 }
 0x2ea   : > { %v4798_v12 = vadd.f32 %v4797_v54, %v4796_v8  ;;  %v4871_v54 = vmul.f32 %v12659_v51, %v12659_v51 }
 0x2eb   : > { %15710 = vst [vmem:[#allocation29_spill] sm:$0xff] %v12799_v26  ;;  %v12801_v50 = vpop.f32.mrf.mxu2  ;;  %v12803_v38 = vpop.f32.mrf.mxu3  ;;  %v15713_v26 = vld [vmem:[#allocation22_spill] sm:$0xff]  ;;  %v4901_v43 = vsel %vm1373_vm10, %v4868_v23, 0.0  ;;  %v4375_v23 = vadd.f32 %v12676_v1, %v3721_v39  ;;  %v4905_v63 = vsel %vm1373_vm10, %v4870_v0, 0.0  ;;  %v4873_v1 = vmul.f32 %v12688_v36, %v12688_v36 }
 0x2ec   : > { %15711 = vst [vmem:[#allocation30_spill] sm:$0xff] %v12803_v38  ;;  %v15714_v38 = vld [vmem:[#allocation21_spill] sm:$0xff]  ;;  %v4800_v15 = vadd.f32 %v4799_v53, %v4798_v12  ;;  %v4902_v47 = vadd.f32 %v4901_v43, %v4900_v25  ;;  %v15715_v12 = vld [vmem:[#allocation23_spill] sm:$0xff]  ;;  %v4907_v43 = vsel %vm1373_vm10, %v4871_v54, 0.0 }
 0x2ed   : > { %v12866_v0 = vadd.f32 %v12719_v13, %v4375_v23  ;;  %v4911_v13 = vsel %vm1373_vm10, %v4873_v1, 0.0 }
 0x2ee   : > { %v4802_v53 = vadd.f32 %v4801_v30, %v4800_v15 }
 0x2ef   : > { %v4813_v1 = vsel %vm1373_vm10, %v12866_v0, 0.0 }
 0x2f0   : > { %v12807_v48 = vpop.f32.mrf.mxu0  ;;  %v4804_v7 = vadd.f32 %v4803_v60, %v4802_v53 }
 0x2f1   : > { %15712 = vst [vmem:[#allocation31_spill] sm:$0xff] %v12807_v48  ;;  %v3437_v48 = vadd.f32 %v15714_v38, %v15713_v26  ;;  %v12842_v26 = vpop.f32.mrf.mxu1  ;;  %v4903_v38 = vsel %vm1373_vm10, %v4869_v32, 0.0  ;;  %v4872_v32 = vmul.f32 %v12672_v55, %v12672_v55 }
 0x2f2   : > { %v4904_v17 = vadd.f32 %v4903_v38, %v4902_v47  ;;  %v3441_v38 = vadd.f32 %v12349_v46, %v12369_v18  ;;  %v4811_v46 = vsel %vm1373_vm10, %v12704_v59, 0.0  ;;  %v4875_v18 = vmul.f32 %v12866_v0, %v12866_v0 }
 0x2f3   : > { %v12811_v20 = vpop.f32.mrf.mxu2  ;;  %v12831_v33 = vpop.f32.mrf.mxu3  ;;  %v3723_v29 = vadd.f32 %v12731_v41, %v3437_v48  ;;  %v3439_v41 = vadd.f32 %v15715_v12, %v12339_v42  ;;  %v4805_v48 = vsel %vm1373_vm10, %v12659_v51, 0.0  ;;  %v4807_v42 = vsel %vm1373_vm10, %v12672_v55, 0.0 }
 0x2f4   : > { %v4906_v25 = vadd.f32 %v4905_v63, %v4904_v17  ;;  %v4806_v30 = vadd.f32 %v4805_v48, %v4804_v7  ;;  %v4909_v60 = vsel %vm1373_vm10, %v4872_v32, 0.0  ;;  %v3727_v53 = vadd.f32 %v12765_v24, %v3441_v38 }
 0x2f5   : > { %v4377_v39 = vadd.f32 %v12710_v28, %v3723_v29  ;;  %v3725_v15 = vadd.f32 %v12749_v57, %v3439_v41  ;;  %v4809_v28 = vsel %vm1373_vm10, %v12688_v36, 0.0  ;;  %v4874_v29 = vmul.f32 %v12704_v59, %v12704_v59 }
 0x2f6   : > { %v4908_v54 = vadd.f32 %v4907_v43, %v4906_v25  ;;  %v4808_v47 = vadd.f32 %v4807_v42, %v4806_v30  ;;  %v4381_v25 = vadd.f32 %v12751_v34, %v3727_v53  ;;  %v3447_v53 = vadd.f32 %v12781_v52, %v12451_v44 }
 0x2f7   : > { %v12878_v23 = vadd.f32 %v12739_v5, %v4377_v39  ;;  %v4379_v57 = vadd.f32 %v12733_v21, %v3725_v15  ;;  %v3443_v5 = vadd.f32 %v12382_v9, %v12395_v61  ;;  %v4913_v32 = vsel %vm1373_vm10, %v4874_v29, 0.0 }
 0x2f8   : > { %v12840_v6 = vpop.f32.mrf.mxu0  ;;  %v4910_v41 = vadd.f32 %v4909_v60, %v4908_v54  ;;  %v4810_v63 = vadd.f32 %v4809_v28, %v4808_v47  ;;  %v4876_v39 = vmul.f32 %v12729_v27, %v12729_v27  ;;  %v4915_v9 = vsel %vm1373_vm10, %v4875_v18, 0.0 }
 0x2f9   : > { %v12894_v48 = vpop.f32.mrf.mxu1  ;;  %v4877_v24 = vmul.f32 %v12878_v23, %v12878_v23  ;;  %v3729_v42 = vadd.f32 %v12775_v10, %v3443_v5  ;;  %v4815_v61 = vsel %vm1373_vm10, %v12729_v27, 0.0  ;;  %v12908_v15 = vadd.f32 %v12756_v58, %v4379_v57 }
 0x2fa   : > { %v4912_v21 = vadd.f32 %v4911_v13, %v4910_v41  ;;  %v4812_v43 = vadd.f32 %v4811_v46, %v4810_v63  ;;  %v3445_v60 = vadd.f32 %v12416_v19, %v12425_v22  ;;  %v4917_v28 = vsel %vm1373_vm10, %v4876_v39, 0.0 }
 0x2fb   : > { %v12850_v8 = vpop.f32.mrf.mxu2  ;;  %v12882_v7 = vpop.f32.mrf.mxu3  ;;  %v4817_v10 = vsel %vm1373_vm10, %v12878_v23, 0.0  ;;  %v4878_v29 = vmul.f32 %v12747_v45, %v12747_v45  ;;  %v4919_v58 = vsel %vm1373_vm10, %v4877_v24, 0.0  ;;  %v4383_v13 = vadd.f32 %v12767_v49, %v3729_v42  ;;  %v15716_v42 = vld [vmem:[#allocation10_spill] sm:$0xff] }
 0x2fc   : > { %v4914_v30 = vadd.f32 %v4913_v32, %v4912_v21  ;;  %v4814_v38 = vadd.f32 %v4813_v1, %v4812_v43  ;;  %v4819_v46 = vsel %vm1373_vm10, %v12747_v45, 0.0  ;;  %v4879_v19 = vmul.f32 %v12908_v15, %v12908_v15 }
 0x2fd   : > { %v12927_v22 = vadd.f32 %v12770_v16, %v4381_v25  ;;  %v3731_v18 = vadd.f32 %v12786_v3, %v3445_v60  ;;  %v3448_v49 = vadd.f32 %v12790_v35, %v12463_v37  ;;  %v3449_v32 = vadd.f32 %v12797_v56, %v12475_v2 }
 0x2fe   : > { %v4916_v54 = vadd.f32 %v4915_v9, %v4914_v30  ;;  %v4816_v47 = vadd.f32 %v4815_v61, %v4814_v38  ;;  %v4921_v1 = vsel %vm1373_vm10, %v4878_v29, 0.0  ;;  %v4821_v16 = vsel %vm1373_vm10, %v12908_v15, 0.0 }
 0x2ff   : > { %v4880_v3 = vmul.f32 %v12763_v31, %v12763_v31  ;;  %v12944_v52 = vadd.f32 %v12779_v40, %v4383_v13  ;;  %v3733_v37 = vadd.f32 %v12801_v50, %v3447_v53  ;;  %v4923_v21 = vsel %vm1373_vm10, %v4879_v19, 0.0  ;;  %v15720_v53 = vld [vmem:[#allocation25_spill] sm:$0xff] }
 0x300   : > { %v12880_v17 = vpop.f32.mrf.mxu0  ;;  %v4918_v5 = vadd.f32 %v4917_v28, %v4916_v54  ;;  %v4818_v41 = vadd.f32 %v4817_v10, %v4816_v47  ;;  %v4823_v2 = vsel %vm1373_vm10, %v12763_v31, 0.0  ;;  %v4881_v56 = vmul.f32 %v12927_v22, %v12927_v22  ;;  %v15718_v54 = vld [vmem:[#allocation27_spill] sm:$0xff] }
 0x301   : > { %v3413_v35 = vpop.f32.mrf.mxu1  ;;  %v4385_v43 = vadd.f32 %v12777_v4, %v3731_v18  ;;  %v3450_v24 = vadd.f32 %v12805_v62, %v12487_v14  ;;  %v3451_v40 = vadd.f32 %v12842_v26, %v15716_v42  ;;  %v4925_v50 = vsel %vm1373_vm10, %v4880_v3, 0.0  ;;  %v15717_v62 = vld [vmem:[#allocation26_spill] sm:$0xff] }
 0x302   : > { %v4920_v39 = vadd.f32 %v4919_v58, %v4918_v5  ;;  %v4820_v44 = vadd.f32 %v4819_v46, %v4818_v41  ;;  %v4825_v25 = vsel %vm1373_vm10, %v12927_v22, 0.0  ;;  %v4882_v30 = vmul.f32 %v12773_v11, %v12773_v11 }
 0x303   : > { %v12890_v12 = vpop.f32.mrf.mxu2  ;;  %v12934_v63 = vpop.f32.mrf.mxu3  ;;  %v3734_v38 = vadd.f32 %v12811_v20, %v3448_v49  ;;  %v4883_v14 = vmul.f32 %v12944_v52, %v12944_v52  ;;  %v4387_v28 = vadd.f32 %v15717_v62, %v3733_v37  ;;  %v4927_v10 = vsel %vm1373_vm10, %v4881_v56, 0.0  ;;  %v15719_v20 = vld [vmem:[#allocation11_spill] sm:$0xff]  ;;  %v15723_v56 = vld [vmem:[#allocation30_spill] sm:$0xff] }
 0x304   : > { %v4922_v9 = vadd.f32 %v4921_v1, %v4920_v39  ;;  %v4822_v61 = vadd.f32 %v4821_v16, %v4820_v44  ;;  %v4827_v29 = vsel %vm1373_vm10, %v12773_v11, 0.0  ;;  %v12970_v47 = vadd.f32 %v15718_v54, %v4385_v43  ;;  %v15721_v1 = vld [vmem:[#allocation28_spill] sm:$0xff]  ;;  %v15722_v44 = vld [vmem:[#allocation31_spill] sm:$0xff] }
 0x305   : > { %v3735_v58 = vadd.f32 %v12850_v8, %v3449_v32  ;;  %v3452_v46 = vadd.f32 %v12894_v48, %v15719_v20  ;;  %v4884_v49 = vmul.f32 %v15720_v53, %v15720_v53  ;;  %v4929_v5 = vsel %vm1373_vm10, %v4882_v30, 0.0 }
 0x306   : > { %v4924_v60 = vadd.f32 %v4923_v21, %v4922_v9  ;;  %v4824_v4 = vadd.f32 %v4823_v2, %v4822_v61  ;;  %v4829_v41 = vsel %vm1373_vm10, %v12944_v52, 0.0  ;;  %v4388_v16 = vadd.f32 %v15721_v1, %v3734_v38 }
 0x307   : > { %v3736_v3 = vadd.f32 %v12890_v12, %v3450_v24  ;;  %v4931_v32 = vsel %vm1373_vm10, %v4883_v14, 0.0  ;;  %v12984_v48 = vadd.f32 %v15722_v44, %v4387_v28  ;;  %v4831_v21 = vsel %vm1373_vm10, %v15720_v53, 0.0  ;;  %v15724_v24 = vld [vmem:[#allocation29_spill] sm:$0xff]  ;;  %v15725_v14 = vld [vmem:[#allocation12_spill] sm:$0xff] }
 0x308   : > { %v12920_v34 = vpop.f32.mrf.mxu0  ;;  %v4926_v19 = vadd.f32 %v4925_v50, %v4924_v60  ;;  %v4826_v18 = vadd.f32 %v4825_v25, %v4824_v4  ;;  %v4885_v2 = vmul.f32 %v12970_v47, %v12970_v47  ;;  %v4389_v43 = vadd.f32 %v15723_v56, %v3735_v58  ;;  %v15726_v56 = vld [vmem:[#allocation13_spill] sm:$0xff] }
 0x309   : > { %v4933_v12 = vsel %vm1373_vm10, %v4884_v49, 0.0  ;;  %v4886_v50 = vmul.f32 %v15724_v24, %v15724_v24  ;;  %v3416_v25 = vpop.f32.mrf.mxu1  ;;  %v4833_v30 = vsel %vm1373_vm10, %v12970_v47, 0.0  ;;  %v12997_v38 = vadd.f32 %v12840_v6, %v4388_v16 }
 0x30a   : > { %v4928_v39 = vadd.f32 %v4927_v10, %v4926_v19  ;;  %v4828_v8 = vadd.f32 %v4827_v29, %v4826_v18  ;;  %v4390_v60 = vadd.f32 %v12831_v33, %v3736_v3  ;;  %v3453_v62 = vadd.f32 %v3413_v35, %v15725_v14 }
 0x30b   : > { %v3694_v57 = vpop.f32.mrf.mxu2  ;;  %v4353_v37 = vpop.f32.mrf.mxu3  ;;  %v4887_v28 = vmul.f32 %v12984_v48, %v12984_v48  ;;  %v4935_v29 = vsel %vm1373_vm10, %v4885_v2, 0.0  ;;  %v4835_v54 = vsel %vm1373_vm10, %v15724_v24, 0.0  ;;  %v13007_v58 = vadd.f32 %v12880_v17, %v4389_v43 }
 0x30c   : > { %v3737_v42 = vadd.f32 %v3694_v57, %v3451_v40  ;;  %v4930_v9 = vadd.f32 %v4929_v5, %v4928_v39  ;;  %v4830_v61 = vadd.f32 %v4829_v41, %v4828_v8  ;;  %v4937_v35 = vsel %vm1373_vm10, %v4886_v50, 0.0 }
 0x30d   : > { %v4837_v19 = vsel %vm1373_vm10, %v12984_v48, 0.0  ;;  %v4888_v18 = vmul.f32 %v12997_v38, %v12997_v38  ;;  %v13016_v49 = vadd.f32 %v12920_v34, %v4390_v60  ;;  %v4839_v1 = vsel %vm1373_vm10, %v12997_v38, 0.0 }
 0x30e   : > { %v4932_v57 = vadd.f32 %v4931_v32, %v4930_v9  ;;  %v4832_v40 = vadd.f32 %v4831_v21, %v4830_v61  ;;  %v4391_v6 = vadd.f32 %v12882_v7, %v3737_v42  ;;  %v4939_v7 = vsel %vm1373_vm10, %v4887_v28, 0.0 }
 0x30f   : > { %v4889_v16 = vmul.f32 %v13007_v58, %v13007_v58  ;;  %v4941_v34 = vsel %vm1373_vm10, %v4888_v18, 0.0  ;;  %v4890_v21 = vmul.f32 %v13016_v49, %v13016_v49  ;;  %v3454_v43 = vadd.f32 %v3416_v25, %v15726_v56 }
 0x310   : > { %v4746_v26 = vpop.f32.mrf.mxu0  ;;  %v4834_v20 = vadd.f32 %v4833_v30, %v4832_v40 }
 0x311   : > { %v13024_v3 = vadd.f32 %v4746_v26, %v4391_v6  ;;  %v3418_v61 = vpop.f32.mrf.mxu1  ;;  %v4945_v25 = vsel %vm1373_vm10, %v4890_v21, 0.0 }
 0x312   : > { %v4836_v41 = vadd.f32 %v4835_v54, %v4834_v20 }
 0x313   : > { %v3697_v13 = vpop.f32.mrf.mxu2  ;;  %v4356_v44 = vpop.f32.mrf.mxu3  ;;  %v4891_v50 = vmul.f32 %v13024_v3, %v13024_v3 }
 0x314   : > { %v3738_v4 = vadd.f32 %v3697_v13, %v3452_v46  ;;  %v4934_v13 = vadd.f32 %v4933_v12, %v4932_v57  ;;  %v4838_v32 = vadd.f32 %v4837_v19, %v4836_v41  ;;  %v4843_v12 = vsel %vm1373_vm10, %v13016_v49, 0.0  ;;  %v15727_v19 = vld [vmem:[#allocation14_spill] sm:$0xff] }
 0x315   : > { %v4845_v57 = vsel %vm1373_vm10, %v13024_v3, 0.0  ;;  %v3455_v18 = vadd.f32 %v3418_v61, %v15727_v19  ;;  %v15728_v61 = vld [vmem:[#allocation15_spill] sm:$0xff] }
 0x316   : > { %v4392_v17 = vadd.f32 %v12934_v63, %v3738_v4  ;;  %v4936_v5 = vadd.f32 %v4935_v29, %v4934_v13  ;;  %v4841_v63 = vsel %vm1373_vm10, %v13007_v58, 0.0  ;;  %v4840_v9 = vadd.f32 %v4839_v1, %v4838_v32 }
 0x317   : > { %v4947_v29 = vsel %vm1373_vm10, %v4891_v50, 0.0 }
 0x318   : > { %v4749_v10 = vpop.f32.mrf.mxu0  ;;  %v4938_v8 = vadd.f32 %v4937_v35, %v4936_v5  ;;  %v4842_v14 = vadd.f32 %v4841_v63, %v4840_v9 }
 0x319   : > { %v13031_v2 = vadd.f32 %v4749_v10, %v4392_v17 }
 0x31a   : > { %v4940_v42 = vadd.f32 %v4939_v7, %v4938_v8  ;;  %v4844_v10 = vadd.f32 %v4843_v12, %v4842_v14 }
 0x31b   : > { %v3699_v33 = vpop.f32.mrf.mxu2  ;;  %v4892_v40 = vmul.f32 %v13031_v2, %v13031_v2  ;;  %v4847_v54 = vsel %vm1373_vm10, %v13031_v2, 0.0  ;;  %v4358_v41 = vpop.f32.mrf.mxu3 }
 0x31c   : > { %v3739_v46 = vadd.f32 %v3699_v33, %v3453_v62  ;;  %v4942_v4 = vadd.f32 %v4941_v34, %v4940_v42  ;;  %v4846_v20 = vadd.f32 %v4845_v57, %v4844_v10  ;;  %v3421_v34 = vpop.f32.mrf.mxu1 }
 0x31d   : > { %v4949_v35 = vsel %vm1373_vm10, %v4892_v40, 0.0 }
 0x31e   : > { %v4393_v39 = vadd.f32 %v4353_v37, %v3739_v46  ;;  %v4943_v37 = vsel %vm1373_vm10, %v4889_v16, 0.0  ;;  %v4848_v5 = vadd.f32 %v4847_v54, %v4846_v20  ;;  %v15729_v54 = vld [vmem:[#allocation16_spill] sm:$0xff] }
 0x31f   : > { %v4944_v28 = vadd.f32 %v4943_v37, %v4942_v4  ;;  %v3456_v37 = vadd.f32 %v3421_v34, %v15728_v61 }
 0x320   : > { %v4751_v26 = vpop.f32.mrf.mxu0 }
 0x321   : > { %v13039_v30 = vadd.f32 %v4751_v26, %v4393_v39  ;;  %v4946_v13 = vadd.f32 %v4945_v25, %v4944_v28 }
 0x323   : > { %v3702_v60 = vpop.f32.mrf.mxu2  ;;  %v4893_v6 = vmul.f32 %v13039_v30, %v13039_v30  ;;  %v4849_v46 = vsel %vm1373_vm10, %v13039_v30, 0.0  ;;  %v4948_v17 = vadd.f32 %v4947_v29, %v4946_v13  ;;  %v4361_v4 = vpop.f32.mrf.mxu3 }
 0x324   : > { %v3740_v62 = vadd.f32 %v3702_v60, %v3454_v43  ;;  %v4850_v32 = vadd.f32 %v4849_v46, %v4848_v5  ;;  %v3423_v40 = vpop.f32.mrf.mxu1 }
 0x325   : > { %v4951_v1 = vsel %vm1373_vm10, %v4893_v6, 0.0  ;;  %v4950_v8 = vadd.f32 %v4949_v35, %v4948_v17  ;;  %v3457_v6 = vadd.f32 %v3423_v40, %v15729_v54 }
 0x326   : > { %v4394_v33 = vadd.f32 %v4356_v44, %v3740_v62 }
 0x327   : > { %v4952_v56 = vadd.f32 %v4951_v1, %v4950_v8 }
 0x328   : > { %v4754_v7 = vpop.f32.mrf.mxu0 }
 0x329   : > { %v13056_v16 = vadd.f32 %v4754_v7, %v4394_v33 }
 0x32b   : > { %v3704_v39 = vpop.f32.mrf.mxu2  ;;  %v4851_v63 = vsel %vm1373_vm10, %v13056_v16, 0.0  ;;  %v4894_v21 = vmul.f32 %v13056_v16, %v13056_v16 }
 0x32c   : > { %v3741_v44 = vadd.f32 %v3704_v39, %v3455_v18  ;;  %v4852_v43 = vadd.f32 %v4851_v63, %v4850_v32  ;;  %v4363_v18 = vpop.f32.mrf.mxu3 }
 0x32d   : > { %v4953_v42 = vsel %vm1373_vm10, %v4894_v21, 0.0 }
 0x32e   : > { %v4395_v9 = vadd.f32 %v4358_v41, %v3741_v44  ;;  %v4954_v26 = vadd.f32 %v4953_v42, %v4952_v56 }
 0x330   : > { %v4756_v12 = vpop.f32.mrf.mxu0 }
 0x331   : > { %v13064_v50 = vadd.f32 %v4756_v12, %v4395_v9 }
 0x333   : > { %v3707_v60 = vpop.f32.mrf.mxu2  ;;  %v4853_v62 = vsel %vm1373_vm10, %v13064_v50, 0.0  ;;  %v4895_v25 = vmul.f32 %v13064_v50, %v13064_v50 }
 0x334   : > { %v3742_v14 = vadd.f32 %v3707_v60, %v3456_v37  ;;  %v4854_v57 = vadd.f32 %v4853_v62, %v4852_v43 }
 0x335   : > { %v4955_v28 = vsel %vm1373_vm10, %v4895_v25, 0.0 }
 0x336   : > { %v4396_v10 = vadd.f32 %v4361_v4, %v3742_v14  ;;  %v4956_v29 = vadd.f32 %v4955_v28, %v4954_v26 }
 0x338   : > { %v4759_v33 = vpop.f32.mrf.mxu0 }
 0x339   : > { %v13072_v13 = vadd.f32 %v4759_v33, %v4396_v10 }
 0x33b   : > { %v3709_v20 = vpop.f32.mrf.mxu2  ;;  %v4855_v46 = vsel %vm1373_vm10, %v13072_v13, 0.0  ;;  %v4896_v19 = vmul.f32 %v13072_v13, %v13072_v13 }
 0x33c   : > { %v3743_v35 = vadd.f32 %v3709_v20, %v3457_v6  ;;  %v4856_v17 = vadd.f32 %v4855_v46, %v4854_v57 }
 0x33d   : > { %v4957_v5 = vsel %vm1373_vm10, %v4896_v19, 0.0 }
 0x33e   : > { %v4397_v41 = vadd.f32 %v4363_v18, %v3743_v35  ;;  %v4958_v7 = vadd.f32 %v4957_v5, %v4956_v29  ;;  %v15730_v18 = vld [vmem:[#allocation17_spill] sm:$0xff]  ;;  %v15731_v5 = vld [vmem:[#allocation18_spill] sm:$0xff] }
 0x340   : > { %v4761_v1 = vpop.f32.mrf.mxu0 }
 0x341   : > { %v13079_v39 = vadd.f32 %v4761_v1, %v4397_v41 }
 0x343   : > { %v4857_v8 = vsel %vm1373_vm10, %v13079_v39, 0.0  ;;  %v4897_v32 = vmul.f32 %v13079_v39, %v13079_v39 }
 0x344   : > { %v4858_v44 = vadd.f32 %v4857_v8, %v4856_v17 }
 0x345   : > { %v4959_v34 = vsel %vm1373_vm10, %v4897_v32, 0.0  ;;  %v15733_v32 = vld [vmem:[#allocation20_spill] sm:$0xff] }
 0x346   : > { %v4859_v63 = vrot.slane %v4858_v44, 4  ;;  %v4960_v21 = vadd.f32 %v4959_v34, %v4958_v7  ;;  %v15732_v7 = vld [vmem:[#allocation19_spill] sm:$0xff]  ;;  %v15734_v34 = vld [vmem:[#allocation24_spill] sm:$0xff] }
 0x348   : > { %v4860_v56 = vadd.f32 %v4859_v63, %v4858_v44  ;;  %v4961_v43 = vrot.slane %v4960_v21, 4 }
 0x34a   : > { %v4861_v42 = vrot.slane %v4860_v56, 2  ;;  %v4962_v9 = vadd.f32 %v4961_v43, %v4960_v21 }
 0x34c   : > { %v4862_v26 = vadd.f32 %v4861_v42, %v4860_v56  ;;  %v4963_v61 = vrot.slane %v4962_v9, 2 }
 0x34e   : > { %v4863_v37 = vrot.slane %v4862_v26, 1  ;;  %v4964_v12 = vadd.f32 %v4963_v61, %v4962_v9 }
 0x350   : > { %v4864_v60 = vadd.f32 %v4863_v37, %v4862_v26  ;;  %v4965_v4 = vrot.slane %v4964_v12, 1 }
 0x352   : > { %v13086_v14 = vmul.f32 0.00390625, %v4864_v60  ;;  %v4966_v62 = vadd.f32 %v4965_v4, %v4964_v12 }
 0x354   : > { %v4967_v25 = vmul.f32 0.00390625, %v4966_v62  ;;  %v4968_v57 = vmul.f32 %v13086_v14, %v13086_v14  ;;  %v5001_v40 = vsub.f32 %v13072_v13, %v13086_v14  ;;  %v5002_v28 = vsub.f32 %v13079_v39, %v13086_v14  ;;  %v10615_v13 = vld [vmem:[%s15575_s2 + $0x6] sm:$0x3] }
 0x355   : > { %v4998_v6 = vsub.f32 %v13039_v30, %v13086_v14  ;;  %v4999_v33 = vsub.f32 %v13056_v16, %v13086_v14  ;;  %v5000_v20 = vsub.f32 %v13064_v50, %v13086_v14  ;;  %v4971_v17 = vsub.f32 %v15730_v18, %v13086_v14 }
 0x356   : > { %v4969_v10 = vsub.f32 %v4967_v25, %v4968_v57  ;;  %v4972_v41 = vsub.f32 %v15731_v5, %v13086_v14  ;;  %v4973_v1 = vsub.f32 %v15732_v7, %v13086_v14  ;;  %v7138_v39 = vsel %vm1422_vm0, %v10615_v13, 0 }
 0x357   : > { %v4974_v44 = vsub.f32 %v15733_v32, %v13086_v14  ;;  %v4975_v63 = vsub.f32 %v15734_v34, %v13086_v14  ;;  %v4976_v21 = vsub.f32 %v12659_v51, %v13086_v14  ;;  %7147 = vmatpush.bf16.msrb.mxu0 %v7138_v39  ;;  %v4977_v56 = vsub.f32 %v12672_v55, %v13086_v14 }
 0x358   : > { %v4970_v29 = vmax.f32 %v4969_v10, 0.0  ;;  %v4978_v43 = vsub.f32 %v12688_v36, %v13086_v14  ;;  %v4979_v42 = vsub.f32 %v12704_v59, %v13086_v14  ;;  %v4980_v9 = vsub.f32 %v12866_v0, %v13086_v14 }
 0x359   : > { %v4981_v61 = vsub.f32 %v12729_v27, %v13086_v14  ;;  %v4982_v51 = vsub.f32 %v12878_v23, %v13086_v14  ;;  %v4983_v55 = vsub.f32 %v12747_v45, %v13086_v14  ;;  %v4984_v36 = vsub.f32 %v12908_v15, %v13086_v14 }
 0x35a   : > { %v5003_v54 = vadd.f32 1e-05, %v4970_v29  ;;  %v4985_v59 = vsub.f32 %v12763_v31, %v13086_v14  ;;  %v4986_v0 = vsub.f32 %v12927_v22, %v13086_v14  ;;  %v4987_v27 = vsub.f32 %v12773_v11, %v13086_v14 }
 0x35b   : > { %v4988_v23 = vsub.f32 %v12944_v52, %v13086_v14  ;;  %v4989_v45 = vsub.f32 %v15720_v53, %v13086_v14  ;;  %v4990_v15 = vsub.f32 %v12970_v47, %v13086_v14  ;;  %v4991_v31 = vsub.f32 %v15724_v24, %v13086_v14 }
 0x35c   : > { %10987 = vrsqrt.f32 %v5003_v54  ;;  %vm5010_vm4 = vweird.f32 %v5003_v54  ;;  %v4992_v22 = vsub.f32 %v12984_v48, %v13086_v14  ;;  %v4993_v11 = vsub.f32 %v12997_v38, %v13086_v14 }
 0x35d   : > { %v4994_v52 = vsub.f32 %v13007_v58, %v13086_v14  ;;  %v4995_v60 = vsub.f32 %v13016_v49, %v13086_v14  ;;  %v4996_v39 = vsub.f32 %v13024_v3, %v13086_v14 }
 0x362   : > { %v10988_v35 = vpop.eup %10987 }
 0x363   : > { %v5005_v46 = vmul.f32 %v10988_v35, %v5003_v54  ;;  %vm5011_vm2 = vweird.f32 %v10988_v35 }
 0x364   : > { %vm5012_vm11 = vmor %vm5010_vm4, %vm5011_vm2 }
 0x365   : > { %v5006_v19 = vmul.f32 %v10988_v35, %v5005_v46 }
 0x367   : > { %v5007_v8 = vmul.f32 0.5, %v5006_v19 }
 0x369   : > { %v5008_v26 = vsub.f32 1.5, %v5007_v8  ;;  %v4997_v8 = vsub.f32 %v13031_v2, %v13086_v14 }
 0x36b   : > { %v5009_v37 = vmul.f32 %v10988_v35, %v5008_v26 }
 0x36d   : > { %v5013_v12 = vsel %vm5012_vm11, %v10988_v35, %v5009_v37 }
 0x36e   : > { %v5044_v53 = vmul.f32 %v5013_v12, %v5001_v40  ;;  %v5045_v4 = vmul.f32 %v5013_v12, %v5002_v28  ;;  %v5014_v62 = vmul.f32 %v5013_v12, %v4971_v17  ;;  %v5015_v47 = vmul.f32 %v5013_v12, %v4972_v41 }
 0x36f   : > { %v13154_v25 = vmul.f32 %v5013_v12, %v4973_v1  ;;  %v13156_v24 = vmul.f32 %v5013_v12, %v4974_v44  ;;  %v13158_v57 = vmul.f32 %v5013_v12, %v4975_v63  ;;  %v13160_v48 = vmul.f32 %v5013_v12, %v4976_v21 }
 0x370   : > { %v5076_v10 = vmax.f32 %v5044_v53, 0.0  ;;  %v5077_v38 = vmax.f32 %v5045_v4, 0.0  ;;  %v13162_v29 = vmul.f32 %v5013_v12, %v4977_v56  ;;  %v13164_v58 = vmul.f32 %v5013_v12, %v4978_v43 }
 0x371   : > { %v13166_v54 = vmul.f32 %v5013_v12, %v4979_v42  ;;  %v13168_v49 = vmul.f32 %v5013_v12, %v4980_v9  ;;  %v13170_v40 = vmul.f32 %v5013_v12, %v4981_v61  ;;  %v13172_v28 = vmul.f32 %v5013_v12, %v4982_v51  ;;  %v5540_v9 = vld [vmem:[#allocation3 + $0xc8] sm:$0x1] }
 0x372   : > { %v13174_v35 = vpack.c.bf16 %v5076_v10, %v5076_v10  ;;  %v5109_v46 = vpack.c.bf16 %v5077_v38, %v5077_v38  ;;  %v13176_v19 = vmul.f32 %v5013_v12, %v4983_v55  ;;  %v13178_v13 = vmul.f32 %v5013_v12, %v4984_v36 }
 0x373   : > { %v13180_v18 = vmul.f32 %v5013_v12, %v4985_v59  ;;  %v13182_v17 = vmul.f32 %v5013_v12, %v4986_v0  ;;  %v13184_v5 = vmul.f32 %v5013_v12, %v4987_v27  ;;  %v13186_v41 = vmul.f32 %v5013_v12, %v4988_v23 }
 0x374   : > { %v5366_v7 = vshrl.u32 %v13174_v35, 16  ;;  %v5374_v1 = vshrl.u32 %v5109_v46, 16  ;;  %v13193_v32 = vmul.f32 %v5013_v12, %v4989_v45  ;;  %v13195_v44 = vmul.f32 %v5013_v12, %v4990_v15 }
 0x375   : > { %v13197_v34 = vmul.f32 %v5013_v12, %v4991_v31  ;;  %v13199_v63 = vmul.f32 %v5013_v12, %v4992_v22  ;;  %v5377_v43 = vshll.u32 %v5109_v46, 16  ;;  %v13203_v42 = vmul.f32 %v5013_v12, %v4993_v11 }
 0x376   : > { %v5368_v21 = vrot.slane %v5366_v7, 7  ;;  %v5376_v56 = vrot.slane %v5374_v1, 7  ;;  %v13205_v3 = vmul.f32 %v5013_v12, %v4994_v52  ;;  %v13207_v26 = vmul.f32 %v5013_v12, %v4995_v60 }
 0x377   : > { %v13209_v2 = vmul.f32 %v5013_v12, %v4996_v39  ;;  %v13211_v61 = vmul.f32 %v5013_v12, %v4997_v8  ;;  %v13216_v59 = vmul.f32 %v5013_v12, %v4998_v6  ;;  %v13221_v0 = vmul.f32 %v5013_v12, %v4999_v33  ;;  %v5782_v39 = vld [vmem:[%s15575_s2] sm:$0x3] }
 0x378   : > { %v5372_v51 = vrot.slane %v5368_v21, 4  ;;  %v5379_v55 = vor.u32 %v5377_v43, %v5376_v56  ;;  %v5381_v36 = vrot.slane %v5376_v56, 4  ;;  %v13226_v37 = vmul.f32 %v5013_v12, %v5000_v20  ;;  %v5431_v12 = vld [vmem:[#allocation3 + $0xc] sm:$0xf] }
 0x379   : > { %v5046_v27 = vmax.f32 %v5014_v62, 0.0  ;;  %v5047_v30 = vmax.f32 %v5015_v47, 0.0  ;;  %v5369_v50 = vshll.u32 %v13174_v35, 16  ;;  %v5536_v62 = vld [vmem:[#allocation3 + $0xc0] sm:$0xf]  ;;  %v10484_v47 = vrot.slane %v5377_v43, 11 }
 0x37a   : > { %v5380_v45 = vsel %vm11155_vm6, %v5372_v51, %v5379_v55  ;;  %v5541_v31 = vsel %vm11173_vm8, %v5381_v36, %v5540_v9  ;;  %v5048_v43 = vmax.f32 %v13154_v25, 0.0  ;;  %v5049_v51 = vmax.f32 %v13156_v24, 0.0 }
 0x37b   : > { %5539 = vst.msk [vmem:[#allocation3 + $0xc4] sm:$0xf] %vm560_vm3, %v5380_v45  ;;  %v5078_v6 = vpack.c.bf16 %v5046_v27, %v5046_v27  ;;  %v13233_v16 = vpack.c.bf16 %v5047_v30, %v5047_v30  ;;  %v5371_v60 = vor.u32 %v5369_v50, %v5368_v21  ;;  %v6502_v55 = vsel %vm1422_vm0, %v5782_v39, 0  ;;  %v5435_v45 = vld [vmem:[#allocation3 + $0x14] sm:$0x1] }
 0x37c   : > { %5542 = vst [vmem:[#allocation3 + $0xc8] sm:$0x1] %v5541_v31  ;;  %6511 = vmatpush.bf16.msrb.mxu2 %v6502_v55  ;;  %v13255_v27 = vpack.c.bf16 %v5048_v43, %v5048_v43  ;;  %v13257_v31 = vpack.c.bf16 %v5049_v51, %v5049_v51  ;;  %v5050_v25 = vmax.f32 %v13158_v57, 0.0  ;;  %v5053_v50 = vmax.f32 %v13164_v58, 0.0 }
 0x37d   : > { %v5111_v33 = vshrl.u32 %v5078_v6, 16  ;;  %v5119_v22 = vshrl.u32 %v13233_v16, 16  ;;  %v5114_v20 = vshll.u32 %v5078_v6, 16  ;;  %v5122_v52 = vshll.u32 %v13233_v16, 16 }
 0x37e   : > { %v5537_v9 = vsel %vm11167_vm7, %v5371_v60, %v5536_v62  ;;  %v5051_v6 = vmax.f32 %v13160_v48, 0.0  ;;  %v5128_v48 = vshrl.u32 %v13255_v27, 16  ;;  %v5060_v58 = vmax.f32 %v13180_v18, 0.0 }
 0x37f   : > { %v5113_v14 = vrot.slane %v5111_v33, 7  ;;  %v5121_v11 = vrot.slane %v5119_v22, 7  ;;  %5538 = vst [vmem:[#allocation3 + $0xc0] sm:$0xf] %v5537_v9  ;;  %v5052_v22 = vmax.f32 %v13162_v29, 0.0  ;;  %v5058_v29 = vmax.f32 %v13176_v19, 0.0 }
 0x380   : > { %v5131_v60 = vshll.u32 %v13255_v27, 16  ;;  %v5064_v19 = vmax.f32 %v13193_v32, 0.0  ;;  %v5139_v18 = vshll.u32 %v13257_v31, 16  ;;  %v5065_v62 = vmax.f32 %v13195_v44, 0.0 }
 0x381   : > { %v5116_v53 = vor.u32 %v5114_v20, %v5113_v14  ;;  %v5117_v4 = vrot.slane %v5113_v14, 4  ;;  %v5124_v10 = vor.u32 %v5122_v52, %v5121_v11  ;;  %v5126_v36 = vrot.slane %v5121_v11, 4 }
 0x382   : > { %v5054_v14 = vmax.f32 %v13166_v54, 0.0  ;;  %v5055_v20 = vmax.f32 %v13168_v49, 0.0  ;;  %v5057_v11 = vmax.f32 %v13172_v28, 0.0  ;;  %v5136_v54 = vshrl.u32 %v13257_v31, 16 }
 0x383   : > { %v5732_v38 = vld [vmem:[#allocation3 + $0xc8] sm:$0x1]  ;;  %v5432_v1 = vsel %vm11167_vm7, %v5116_v53, %v5431_v12  ;;  %v5125_v21 = vsel %vm11155_vm6, %v5117_v4, %v5124_v10  ;;  %v5056_v12 = vmax.f32 %v13170_v40, 0.0  ;;  %v5436_v57 = vsel %vm11173_vm8, %v5126_v36, %v5435_v45  ;;  %v5438_v53 = vld [vmem:[#allocation3 + $0x18] sm:$0xf] }
 0x384   : > { %v5733_v56 = vsel %vm11225_vm9, %v10484_v47, %v5732_v38  ;;  %5433 = vst [vmem:[#allocation3 + $0xc] sm:$0xf] %v5432_v1  ;;  %v5061_v49 = vmax.f32 %v13182_v17, 0.0  ;;  %v5062_v40 = vmax.f32 %v13184_v5, 0.0  ;;  %v5130_v28 = vrot.slane %v5128_v48, 7 }
 0x385   : > { %5734 = vst [vmem:[#allocation3 + $0xc8] sm:$0x1] %v5733_v56  ;;  %v5063_v4 = vmax.f32 %v13186_v41, 0.0  ;;  %v5066_v17 = vmax.f32 %v13197_v34, 0.0  ;;  %v5067_v10 = vmax.f32 %v13199_v63, 0.0  ;;  %v5068_v38 = vmax.f32 %v13203_v42, 0.0 }
 0x386   : > { %5434 = vst.msk [vmem:[#allocation3 + $0x10] sm:$0xf] %vm560_vm3, %v5125_v21  ;;  %v5133_v47 = vor.u32 %v5131_v60, %v5130_v28  ;;  %v5134_v5 = vrot.slane %v5130_v28, 4  ;;  %v5069_v1 = vmax.f32 %v13205_v3, 0.0  ;;  %v5070_v32 = vmax.f32 %v13207_v26, 0.0 }
 0x387   : > { %5437 = vst [vmem:[#allocation3 + $0x14] sm:$0x1] %v5436_v57  ;;  %v5071_v39 = vmax.f32 %v13209_v2, 0.0  ;;  %v5072_v44 = vmax.f32 %v13211_v61, 0.0  ;;  %v5073_v63 = vmax.f32 %v13216_v59, 0.0  ;;  %v5074_v42 = vmax.f32 %v13221_v0, 0.0 }
 0x388   : > { %v5439_v34 = vsel %vm11167_vm7, %v5133_v47, %v5438_v53  ;;  %v5075_v3 = vmax.f32 %v13226_v37, 0.0  ;;  %v13306_v26 = vrot.slane %v5122_v52, 11  ;;  %v13308_v2 = vpack.c.bf16 %v5050_v25, %v5050_v25 }
 0x389   : > { %5440 = vst [vmem:[#allocation3 + $0x18] sm:$0xf] %v5439_v34  ;;  %v13310_v61 = vpack.c.bf16 %v5051_v6, %v5051_v6  ;;  %v13312_v43 = vpack.c.bf16 %v5052_v22, %v5052_v22  ;;  %v13316_v59 = vpack.c.bf16 %v5053_v50, %v5053_v50  ;;  %v13318_v0 = vpack.c.bf16 %v5054_v14, %v5054_v14 }
 0x38a   : > { %15739 = vst [vmem:[#allocation22_spill] sm:$0xff] %v13308_v2  ;;  %v13320_v37 = vpack.c.bf16 %v5055_v20, %v5055_v20  ;;  %v13322_v9 = vpack.c.bf16 %v5056_v12, %v5056_v12  ;;  %v13324_v16 = vpack.c.bf16 %v5057_v11, %v5057_v11  ;;  %v13326_v52 = vpack.c.bf16 %v5058_v29, %v5058_v29 }
 0x38b   : > { %v5591_v30 = vld [vmem:[#allocation3 + $0xc] sm:$0x1]  ;;  %15740 = vst [vmem:[#allocation21_spill] sm:$0xff] %v13310_v61  ;;  %v13330_v55 = vpack.c.bf16 %v5060_v58, %v5060_v58  ;;  %v13332_v36 = vpack.c.bf16 %v5061_v49, %v5061_v49  ;;  %v13334_v45 = vpack.c.bf16 %v5062_v40, %v5062_v40  ;;  %v13338_v25 = vpack.c.bf16 %v5064_v19, %v5064_v19 }
 0x38c   : > { %v5592_v24 = vsel %vm11173_vm8, %v5111_v33, %v5591_v30  ;;  %v5059_v33 = vmax.f32 %v13178_v13, 0.0  ;;  %v13283_v13 = vrot.slane %v5136_v54, 7  ;;  %15741 = vst [vmem:[#allocation23_spill] sm:$0xff] %v13312_v43  ;;  %v13336_v30 = vpack.c.bf16 %v5063_v4, %v5063_v4  ;;  %v10598_v49 = vld [vmem:[%s15575_s2 + $0x4] sm:$0x3] }
 0x38d   : > { %5593 = vst [vmem:[#allocation3 + $0xc] sm:$0x1] %v5592_v24  ;;  %v13340_v6 = vpack.c.bf16 %v5065_v62, %v5065_v62  ;;  %v13342_v22 = vpack.c.bf16 %v5066_v17, %v5066_v17  ;;  %v13344_v24 = vpack.c.bf16 %v5067_v10, %v5067_v10  ;;  %v13346_v50 = vpack.c.bf16 %v5068_v38, %v5068_v38 }
 0x38e   : > { %v5141_v41 = vor.u32 %v5139_v18, %v13283_v13  ;;  %15742 = vst [vmem:[#allocation10_spill] sm:$0xff] %v13316_v59  ;;  %v13328_v51 = vpack.c.bf16 %v5059_v33, %v5059_v33  ;;  %v13348_v14 = vpack.c.bf16 %v5069_v1, %v5069_v1  ;;  %v13350_v20 = vpack.c.bf16 %v5070_v32, %v5070_v32 }
 0x38f   : > { %15743 = vst [vmem:[#allocation26_spill] sm:$0xff] %v13318_v0  ;;  %v13352_v12 = vpack.c.bf16 %v5071_v39, %v5071_v39  ;;  %v13354_v11 = vpack.c.bf16 %v5072_v44, %v5072_v44  ;;  %v13356_v57 = vpack.c.bf16 %v5073_v63, %v5073_v63  ;;  %v13358_v29 = vpack.c.bf16 %v5074_v42, %v5074_v42 }
 0x390   : > { %v5142_v21 = vsel %vm11155_vm6, %v5134_v5, %v5141_v41  ;;  %15744 = vst [vmem:[#allocation27_spill] sm:$0xff] %v13320_v37  ;;  %v13360_v33 = vpack.c.bf16 %v5075_v3, %v5075_v3  ;;  %v5594_v58 = vld [vmem:[#allocation3 + $0x18] sm:$0x1]  ;;  %v15601_v54 = vshrl.u32 %v13308_v2, 16  ;;  %v5153_v53 = vshrl.u32 %v13310_v61, 16 }
 0x391   : > { %5441 = vst.msk [vmem:[#allocation3 + $0x1c] sm:$0xf] %vm560_vm3, %v5142_v21  ;;  %v5595_v40 = vsel %vm11173_vm8, %v5128_v48, %v5594_v58  ;;  %v15597_v19 = vshrl.u32 %v13312_v43, 16  ;;  %v5170_v17 = vshrl.u32 %v13316_v59, 16  ;;  %v5143_v27 = vrot.slane %v13283_v13, 4 }
 0x392   : > { %15745 = vst [vmem:[#allocation11_spill] sm:$0xff] %v13324_v16  ;;  %v15598_v48 = vshrl.u32 %v13318_v0, 16  ;;  %v6852_v10 = vsel %vm1422_vm0, %v10598_v49, 0  ;;  %v5187_v38 = vshrl.u32 %v13320_v37, 16  ;;  %v15599_v41 = vshrl.u32 %v13322_v9, 16 }
 0x393   : > { %15746 = vst [vmem:[#allocation25_spill] sm:$0xff] %v13328_v51  ;;  %6861 = vmatpush.bf16.msrb.mxu3 %v6852_v10  ;;  %v5204_v39 = vshrl.u32 %v13324_v16, 16  ;;  %v15600_v13 = vshrl.u32 %v13326_v52, 16  ;;  %v5221_v34 = vshrl.u32 %v13328_v51, 16  ;;  %v15602_v42 = vshrl.u32 %v13330_v55, 16 }
 0x394   : > { %v10945_v56 = vld [vmem:[#allocation3 + $0xc] sm:$0xff]  ;;  %15747 = vst [vmem:[#allocation28_spill] sm:$0xff] %v13332_v36  ;;  %v5238_v3 = vshrl.u32 %v13332_v36, 16  ;;  %v15603_v58 = vshrl.u32 %v13334_v45, 16  ;;  %v5255_v49 = vshrl.u32 %v13336_v30, 16  ;;  %v5272_v32 = vshrl.u32 %v13340_v6, 16 }
 0x395   : > { %10680 = vmatmul.msk.bf16.vlgmr.msrb.gmra.mxu0 %vm1373_vm10, %v10945_v56  ;;  %15748 = vst [vmem:[#allocation31_spill] sm:$0xff] %v13334_v45  ;;  %v5442_v56 = vld [vmem:[#allocation3 + $0x20] sm:$0x1]  ;;  %v5289_v1 = vshrl.u32 %v13344_v24, 16  ;;  %v5306_v62 = vshrl.u32 %v13348_v14, 16  ;;  %v5323_v60 = vshrl.u32 %v13352_v12, 16 }
 0x396   : > { %15749 = vst [vmem:[#allocation30_spill] sm:$0xff] %v13336_v30  ;;  %v5636_v10 = vld [vmem:[#allocation3 + $0xc0] sm:$0x1]  ;;  %v5443_v44 = vsel %vm11173_vm8, %v5143_v27, %v5442_v56  ;;  %v10470_v35 = vrot.slane %v5139_v18, 11  ;;  %v13428_v56 = vrot.slane %v5153_v53, 7  ;;  %v13438_v27 = vrot.slane %v15598_v48, 7 }
 0x397   : > { %15750 = vst [vmem:[#allocation29_spill] sm:$0xff] %v13338_v25  ;;  %v5637_v21 = vsel %vm11173_vm8, %v5366_v7, %v5636_v10  ;;  %v13426_v7 = vrot.slane %v15601_v54, 7  ;;  %v13432_v10 = vrot.slane %v15597_v19, 7  ;;  %v13440_v31 = vrot.slane %v5187_v38, 7 }
 0x398   : > { %15751 = vst [vmem:[#allocation12_spill] sm:$0xff] %v13340_v6  ;;  %v5737_v28 = vld [vmem:[#allocation3 + $0x1c] sm:$0xf]  ;;  %v13444_v18 = vrot.slane %v15599_v41, 7  ;;  %v13450_v53 = vrot.slane %v15600_v13, 7  ;;  %v13452_v19 = vrot.slane %v5221_v34, 7 }
 0x399   : > { %15752 = vst [vmem:[#allocation13_spill] sm:$0xff] %v13342_v22  ;;  %v13458_v48 = vrot.slane %v5238_v3, 7  ;;  %v13463_v38 = vrot.slane %v15603_v58, 7  ;;  %v15766_v41 = vshrl.u32 %v13338_v25, 16  ;;  %v13471_v34 = vrot.slane %v5272_v32, 7 }
 0x39a   : > { %15753 = vst [vmem:[#allocation14_spill] sm:$0xff] %v13344_v24  ;;  %v15768_v3 = vshrl.u32 %v13342_v22, 16  ;;  %v15770_v58 = vshrl.u32 %v13346_v50, 16  ;;  %v13491_v32 = vrot.slane %v5323_v60, 7  ;;  %v15775_v25 = vshrl.u32 %v13354_v11, 16 }
 0x39b   : > { %15754 = vst [vmem:[#allocation15_spill] sm:$0xff] %v13346_v50  ;;  %v13469_v13 = vrot.slane %v15766_v41, 7  ;;  %v15773_v41 = vshrl.u32 %v13350_v20, 16 }
 0x39c   : > { %15755 = vst [vmem:[#allocation16_spill] sm:$0xff] %v13348_v14  ;;  %v13477_v47 = vrot.slane %v15768_v3, 7  ;;  %v13483_v4 = vrot.slane %v15770_v58, 7  ;;  %v13495_v45 = vrot.slane %v15775_v25, 7  ;;  %v15776_v58 = vshrl.u32 %v13358_v29, 16 }
 0x39d   : > { %15756 = vst [vmem:[#allocation17_spill] sm:$0xff] %v13350_v20  ;;  %v13489_v63 = vrot.slane %v15773_v41, 7  ;;  %v15778_v25 = vshll.u32 %v13308_v2, 16  ;;  %v5270_v22 = vrot.slane %v13469_v13, 4 }
 0x39e   : > { %15757 = vst [vmem:[#allocation18_spill] sm:$0xff] %v13352_v12  ;;  %v13502_v50 = vrot.slane %v15776_v58, 7 }
 0x39f   : > { %15758 = vst [vmem:[#allocation19_spill] sm:$0xff] %v13354_v11  ;;  %v5151_v11 = vrot.slane %v13426_v7, 4 }
 0x3a0   : > { %15759 = vst [vmem:[#allocation20_spill] sm:$0xff] %v13356_v57 }
 0x3a1   : > { %15760 = vst [vmem:[#allocation24_spill] sm:$0xff] %v13358_v29  ;;  %v15780_v29 = vshll.u32 %v13312_v43, 16  ;;  %v5253_v43 = vrot.slane %v13463_v38, 4 }
 0x3a2   : > { %15761 = vst [vmem:[#allocation4_spill] sm:$0xff] %v13360_v33 }
 0x3a3   : > { %5596 = vst [vmem:[#allocation3 + $0x18] sm:$0x1] %v5595_v40  ;;  %v5340_v40 = vshrl.u32 %v13356_v57, 16 }
 0x3a4   : > { %5740 = vst.msk [vmem:[#allocation3 + $0x4] sm:$0xf] %vm560_vm3, %v5737_v28  ;;  %v5357_v28 = vshrl.u32 %v13360_v33, 16 }
 0x3a5   : > { %5444 = vst [vmem:[#allocation3 + $0x20] sm:$0x1] %v5443_v44  ;;  %v13434_v44 = vrot.slane %v5170_v17, 7  ;;  %v13456_v17 = vrot.slane %v15602_v42, 7  ;;  %v13497_v3 = vrot.slane %v5340_v40, 7  ;;  %v13512_v40 = vor.u32 %v15778_v25, %v13426_v7 }
 0x3a6   : > { %5638 = vst [vmem:[#allocation3 + $0xc0] sm:$0x1] %v5637_v21  ;;  %v13446_v21 = vrot.slane %v5204_v39, 7  ;;  %v13465_v39 = vrot.slane %v5255_v49, 7  ;;  %v13485_v49 = vrot.slane %v5306_v62, 7  ;;  %v13504_v62 = vrot.slane %v5357_v28, 7 }
 0x3a7   : > { %15762 = vst [vmem:[#allocation6_spill] sm:$0xff] %v13456_v17  ;;  %v5160_v28 = vrot.slane %v13428_v56, 4  ;;  %v5177_v60 = vrot.slane %v13434_v44, 4  ;;  %v15782_v7 = vshll.u32 %v13318_v0, 16 }
 0x3a8   : > { %15763 = vst [vmem:[#allocation5_spill] sm:$0xff] %v13458_v48 }
 0x3a9   : > { %15764 = vst [vmem:[#allocation7_spill] sm:$0xff] %v13463_v38  ;;  %v13532_v2 = vor.u32 %v15782_v7, %v13438_v27  ;;  %v15785_v7 = vshll.u32 %v13328_v51, 16  ;;  %v15788_v51 = vshll.u32 %v13340_v6, 16  ;;  %v5304_v38 = vrot.slane %v13483_v4, 4  ;;  %v5445_v6 = vld [vmem:[#allocation3 + $0x24] sm:$0xf] }
 0x3aa   : > { %v5736_v5 = vld [vmem:[#allocation3 + $0x18] sm:$0xf]  ;;  %15765 = vst [vmem:[#allocation32_spill] sm:$0xff] %v13465_v39 }
 0x3ab   : > { %5739 = vst.msk [vmem:[#allocation3] sm:$0xf] %vm560_vm3, %v5736_v5  ;;  %v10946_v5 = vld [vmem:[#allocation3 + $0x18] sm:$0xff]  ;;  %v13473_v54 = vld [vmem:[#allocation3 + $0x4] sm:$0xf]  ;;  %v5226_v0 = vor.u32 %v15785_v7, %v13452_v19  ;;  %v5277_v7 = vor.u32 %v15788_v51, %v13471_v34 }
 0x3ac   : > { %10681 = vmatmul.msk.bf16.gmra.mxu0 %vm1373_vm10, %v10946_v5  ;;  %15767 = vst [vmem:[#allocation33_spill] sm:$0xff] %v13469_v13  ;;  %v13479_v5 = vrot.slane %v5289_v1, 7  ;;  %v5690_v1 = vld [vmem:[#allocation3 + $0x20] sm:$0x1]  ;;  %v15791_v13 = vshll.u32 %v13352_v12, 16 }
 0x3ad   : > { %15769 = vst [vmem:[#allocation34_spill] sm:$0xff] %v13477_v47  ;;  %v5691_v41 = vsel %vm11225_vm9, %v10470_v35, %v5690_v1  ;;  %v13522_v35 = vor.u32 %v15780_v29, %v13432_v10  ;;  %v5168_v1 = vrot.slane %v13432_v10, 4  ;;  %v5202_v10 = vrot.slane %v13444_v18, 4 }
 0x3ae   : > { %15771 = vst [vmem:[#allocation35_spill] sm:$0xff] %v13483_v4  ;;  %v5355_v4 = vrot.slane %v13502_v50, 4 }
 0x3af   : > { %15772 = vst [vmem:[#allocation36_spill] sm:$0xff] %v13485_v49 }
 0x3b0   : > { %15774 = vst [vmem:[#allocation37_spill] sm:$0xff] %v13489_v63 }
 0x3b1   : > { %15777 = vst [vmem:[#allocation38_spill] sm:$0xff] %v13502_v50  ;;  %v5456_v50 = vld [vmem:[#allocation3 + $0x38] sm:$0x1] }
 0x3b2   : > { %v10929_v42 = vld [vmem:[#allocation3] sm:$0xff]  ;;  %5692 = vst [vmem:[#allocation3 + $0x20] sm:$0x1] %v5691_v41  ;;  %v15781_v41 = vshll.u32 %v13316_v59, 16 }
 0x3b3   : > { %10566 = vmatmul.msk.bf16.vlgmr.msrb.gmra.mxu2 %vm1373_vm10, %v10929_v42  ;;  %v15779_v42 = vshll.u32 %v13310_v61, 16  ;;  %v15787_v61 = vshll.u32 %v13336_v30, 16  ;;  %v15790_v30 = vshll.u32 %v13348_v14, 16  ;;  %v15793_v14 = vshll.u32 %v13360_v33, 16 }
 0x3b4   : > { %v5175_v25 = vor.u32 %v15781_v41, %v13434_v44  ;;  %v15784_v41 = vshll.u32 %v13324_v16, 16  ;;  %v5219_v44 = vrot.slane %v13450_v53, 4  ;;  %v5687_v16 = vld [vmem:[#allocation3 + $0x14] sm:$0x1] }
 0x3b5   : > { %v5158_v58 = vor.u32 %v15779_v42, %v13428_v56  ;;  %v5185_v56 = vrot.slane %v13438_v27, 4  ;;  %v15783_v42 = vshll.u32 %v13320_v37, 16  ;;  %v5236_v27 = vrot.slane %v13456_v17, 4 }
 0x3b6   : > { %v5209_v59 = vor.u32 %v15784_v41, %v13446_v21  ;;  %v15786_v37 = vshll.u32 %v13332_v36, 16  ;;  %v5260_v20 = vor.u32 %v15787_v61, %v13465_v39  ;;  %v6593_v41 = vld [vmem:[#allocation3] sm:$0xe]  ;;  %v5287_v17 = vrot.slane %v13477_v47, 4 }
 0x3b7   : > { %v5192_v29 = vor.u32 %v15783_v42, %v13440_v31  ;;  %v15789_v36 = vshll.u32 %v13344_v24, 16  ;;  %v5311_v61 = vor.u32 %v15790_v30, %v13485_v49  ;;  %v5321_v39 = vrot.slane %v13489_v63, 4  ;;  %v5449_v49 = vld [vmem:[#allocation3 + $0x2c] sm:$0x1] }
 0x3b8   : > { %v5243_v42 = vor.u32 %v15786_v37, %v13458_v48  ;;  %v5328_v48 = vor.u32 %v15791_v13, %v13491_v32  ;;  %v5338_v47 = vrot.slane %v13495_v45, 4  ;;  %v15792_v24 = vshll.u32 %v13356_v57, 16  ;;  %v5452_v57 = vld [vmem:[#allocation3 + $0x30] sm:$0xf] }
 0x3b9   : > { %v5294_v37 = vor.u32 %v15789_v36, %v13479_v5  ;;  %v5738_v51 = vld [vmem:[#allocation3 + $0x20] sm:$0x1]  ;;  %v5362_v30 = vor.u32 %v15793_v14, %v13504_v62  ;;  %v10582_v63 = vrot.slane %v6593_v41, 9  ;;  %v5688_v13 = vsel %vm11225_vm9, %v13306_v26, %v5687_v16  ;;  %v5459_v16 = vld [vmem:[#allocation3 + $0x3c] sm:$0xf] }
 0x3ba   : > { %v5345_v36 = vor.u32 %v15792_v24, %v13497_v3  ;;  %5741 = vst.msk [vmem:[#allocation3 + $0x8] sm:$0x1] %vm568_vm5, %v5738_v51  ;;  %v5159_v12 = vsel %vm11155_vm6, %v5151_v11, %v5158_v58  ;;  %v5176_v24 = vsel %vm11155_vm6, %v5168_v1, %v5175_v25  ;;  %v5193_v33 = vsel %vm11155_vm6, %v5185_v56, %v5192_v29  ;;  %v15800_v51 = vld [vmem:[#allocation31_spill] sm:$0xff]  ;;  %v13871_v15 = vld [vmem:[#allocation3 + $0x20] sm:$0x1] }
 0x3bb   : > { %v5210_v14 = vsel %vm11155_vm6, %v5202_v10, %v5209_v59  ;;  %v13593_v41 = vsel %vm11155_vm6, %v5219_v44, %v5226_v0  ;;  %v13597_v26 = vsel %vm11155_vm6, %v5236_v27, %v5243_v42  ;;  %5689 = vst [vmem:[#allocation3 + $0x14] sm:$0x1] %v5688_v13  ;;  %v13601_v11 = vsel %vm11155_vm6, %v5253_v43, %v5260_v20  ;;  %v15799_v42 = vld [vmem:[#allocation6_spill] sm:$0xff] }
 0x3bc   : > { %v13605_v58 = vsel %vm11155_vm6, %v5270_v22, %v5277_v7  ;;  %v13609_v59 = vsel %vm11155_vm6, %v5287_v17, %v5294_v37  ;;  %v13613_v0 = vsel %vm11155_vm6, %v5304_v38, %v5311_v61  ;;  %5448 = vst.msk [vmem:[#allocation3 + $0x28] sm:$0xf] %vm560_vm3, %v5159_v12  ;;  %v13618_v1 = vsel %vm11155_vm6, %v5321_v39, %v5328_v48  ;;  %v5463_v17 = vld [vmem:[#allocation3 + $0x44] sm:$0x1]  ;;  %v5480_v61 = vld [vmem:[#allocation3 + $0x60] sm:$0xf] }
 0x3bd   : > { %v13622_v43 = vsel %vm11155_vm6, %v5338_v47, %v5345_v36  ;;  %v13626_v22 = vsel %vm11155_vm6, %v5355_v4, %v5362_v30  ;;  %v5446_v20 = vsel %vm11167_vm7, %v13512_v40, %v5445_v6  ;;  %5455 = vst.msk [vmem:[#allocation3 + $0x34] sm:$0xf] %vm560_vm3, %v5176_v24  ;;  %v15794_v12 = vshll.u32 %v13322_v9, 16  ;;  %v5466_v47 = vld [vmem:[#allocation3 + $0x48] sm:$0xf] }
 0x3be   : > { %v5450_v38 = vsel %vm11173_vm8, %v5160_v28, %v5449_v49  ;;  %v5453_v23 = vsel %vm11167_vm7, %v13522_v35, %v5452_v57  ;;  %v5457_v4 = vsel %vm11173_vm8, %v5177_v60, %v5456_v50  ;;  %5447 = vst [vmem:[#allocation3 + $0x24] sm:$0xf] %v5446_v20  ;;  %v5216_v6 = vshll.u32 %v13326_v52, 16  ;;  %v5473_v35 = vld [vmem:[#allocation3 + $0x54] sm:$0xf] }
 0x3bf   : > { %v5201_v48 = vor.u32 %v15794_v12, %v13444_v18  ;;  %v5460_v39 = vsel %vm11167_vm7, %v13532_v2, %v5459_v16  ;;  %5451 = vst [vmem:[#allocation3 + $0x2c] sm:$0x1] %v5450_v38  ;;  %v5470_v18 = vld [vmem:[#allocation3 + $0x50] sm:$0x1]  ;;  %v15795_v40 = vrot.slane %v13473_v54, 5  ;;  %v5211_v57 = vrot.slane %v13446_v21, 4 }
 0x3c0   : > { %5454 = vst [vmem:[#allocation3 + $0x30] sm:$0xf] %v5453_v23  ;;  %v5218_v60 = vor.u32 %v5216_v6, %v13450_v53  ;;  %v15797_v25 = vrot.slane %v13440_v31, 4  ;;  %v5233_v56 = vshll.u32 %v13330_v55, 16  ;;  %v5228_v53 = vrot.slane %v13452_v19, 4  ;;  %v15801_v19 = vld [vmem:[#allocation5_spill] sm:$0xff] }
 0x3c1   : > { %v6644_v28 = vsel %vm11800_vm1, %v10582_v63, %v15795_v40  ;;  %v13651_v50 = vld [vmem:[#allocation3 + $0x8] sm:$0x1]  ;;  %5458 = vst [vmem:[#allocation3 + $0x38] sm:$0x1] %v5457_v4  ;;  %v15798_v29 = vmov %v15795_v40  ;;  %v5467_v21 = vsel %vm11167_vm7, %v5201_v48, %v5466_v47  ;;  %v5477_v31 = vld [vmem:[#allocation3 + $0x5c] sm:$0x1]  ;;  %v5471_v37 = vsel %vm11173_vm8, %v5211_v57, %v5470_v18 }
 0x3c2   : > { %v5464_v2 = vsel %vm11173_vm8, %v15797_v25, %v5463_v17  ;;  %v6645_v10 = vrot.slane %v15798_v29, 4  ;;  %v6646_v63 = vrot.slane %v13651_v50, 5  ;;  %5461 = vst [vmem:[#allocation3 + $0x3c] sm:$0xf] %v5460_v39  ;;  %v6755_v44 = vunpack.c.l.b16 %v6644_v28  ;;  %v5484_v24 = vld [vmem:[#allocation3 + $0x68] sm:$0x1] }
 0x3c3   : > { %5462 = vst.msk [vmem:[#allocation3 + $0x40] sm:$0xf] %vm560_vm3, %v5193_v33  ;;  %v5235_v7 = vor.u32 %v5233_v56, %v15799_v42  ;;  %v5250_v36 = vshll.u32 %v15800_v51, 16  ;;  %v5474_v13 = vsel %vm11167_vm7, %v5218_v60, %v5473_v35  ;;  %v5245_v33 = vrot.slane %v15801_v19, 4  ;;  %v15802_v20 = vld [vmem:[#allocation7_spill] sm:$0xff]  ;;  %v15803_v38 = vld [vmem:[#allocation29_spill] sm:$0xff] }
 0x3c4   : > { %v6647_v27 = vsel %vm11800_vm1, %v6645_v10, %v6646_v63  ;;  %5465 = vst [vmem:[#allocation3 + $0x44] sm:$0x1] %v5464_v2  ;;  %v5478_v12 = vsel %vm11173_vm8, %v5228_v53, %v5477_v31  ;;  %v5487_v48 = vld [vmem:[#allocation3 + $0x6c] sm:$0xf]  ;;  %v5267_v23 = vshll.u32 %v15803_v38, 16  ;;  %v15804_v47 = vld [vmem:[#allocation32_spill] sm:$0xff] }
 0x3c5   : > { %v6756_v30 = vunpack.c.l.b16 %v6647_v27  ;;  %5468 = vst [vmem:[#allocation3 + $0x48] sm:$0xf] %v5467_v21  ;;  %v5252_v17 = vor.u32 %v5250_v36, %v15802_v20  ;;  %v5481_v4 = vsel %vm11167_vm7, %v5235_v7, %v5480_v61  ;;  %v5262_v6 = vrot.slane %v15804_v47, 4  ;;  %v15805_v39 = vld [vmem:[#allocation33_spill] sm:$0xff]  ;;  %v5494_v28 = vld [vmem:[#allocation3 + $0x78] sm:$0xf] }
 0x3c6   : > { %5469 = vst.msk [vmem:[#allocation3 + $0x4c] sm:$0xf] %vm560_vm3, %v5210_v14  ;;  %v5491_v14 = vld [vmem:[#allocation3 + $0x74] sm:$0x1]  ;;  %v5269_v18 = vor.u32 %v5267_v23, %v15805_v39  ;;  %v5485_v40 = vsel %vm11173_vm8, %v5245_v33, %v5484_v24  ;;  %v15806_v57 = vld [vmem:[#allocation13_spill] sm:$0xff]  ;;  %v5279_v25 = vrot.slane %v13471_v34, 4 }
 0x3c7   : > { %v6787_v16 = vpack.c.b16 %v6756_v30, %v6755_v44  ;;  %5472 = vst [vmem:[#allocation3 + $0x50] sm:$0x1] %v5471_v37  ;;  %v5284_v35 = vshll.u32 %v15806_v57, 16  ;;  %v5488_v60 = vsel %vm11167_vm7, %v5252_v17, %v5487_v48  ;;  %v15807_v2 = vld [vmem:[#allocation34_spill] sm:$0xff]  ;;  %v5492_v29 = vsel %vm11173_vm8, %v5262_v6, %v5491_v14  ;;  %v5501_v10 = vld [vmem:[#allocation3 + $0x84] sm:$0xf] }
 0x3c8   : > { %5475 = vst [vmem:[#allocation3 + $0x54] sm:$0xf] %v5474_v13  ;;  %v15808_v63 = vld [vmem:[#allocation15_spill] sm:$0xff]  ;;  %v5495_v44 = vsel %vm11167_vm7, %v5269_v18, %v5494_v28  ;;  %v5296_v53 = vrot.slane %v13479_v5, 4  ;;  %v5505_v34 = vld [vmem:[#allocation3 + $0x8c] sm:$0x1] }
 0x3c9   : > { %10599 = vmatmul.msk.bf16.vlgmr.msrb.gmra.mxu3 %vm1373_vm10, %v6787_v16  ;;  %5476 = vst.msk [vmem:[#allocation3 + $0x58] sm:$0xf] %vm560_vm3, %v13593_v41  ;;  %v5498_v41 = vld [vmem:[#allocation3 + $0x80] sm:$0x1]  ;;  %v5286_v56 = vor.u32 %v5284_v35, %v15807_v2  ;;  %v5301_v21 = vshll.u32 %v15808_v63, 16  ;;  %v15811_v36 = vld [vmem:[#allocation36_spill] sm:$0xff] }
 0x3ca   : > { %5479 = vst [vmem:[#allocation3 + $0x5c] sm:$0x1] %v5478_v12  ;;  %v5499_v27 = vsel %vm11173_vm8, %v5279_v25, %v5498_v41  ;;  %v5508_v42 = vld [vmem:[#allocation3 + $0x90] sm:$0xf]  ;;  %v15810_v7 = vld [vmem:[#allocation17_spill] sm:$0xff]  ;;  %v5313_v30 = vrot.slane %v15811_v36, 4  ;;  %v5506_v19 = vsel %vm11173_vm8, %v5296_v53, %v5505_v34 }
 0x3cb   : > { %5482 = vst [vmem:[#allocation3 + $0x60] sm:$0xf] %v5481_v4  ;;  %v5318_v37 = vshll.u32 %v15810_v7, 16  ;;  %v5502_v61 = vsel %vm11167_vm7, %v5286_v56, %v5501_v10  ;;  %v5512_v5 = vld [vmem:[#allocation3 + $0x98] sm:$0x1]  ;;  %v15813_v24 = vld [vmem:[#allocation19_spill] sm:$0xff] }
 0x3cc   : > { %5483 = vst.msk [vmem:[#allocation3 + $0x64] sm:$0xf] %vm560_vm3, %v13597_v26  ;;  %v15809_v26 = vld [vmem:[#allocation35_spill] sm:$0xff]  ;;  %v5515_v33 = vld [vmem:[#allocation3 + $0x9c] sm:$0xf]  ;;  %v5335_v16 = vshll.u32 %v15813_v24, 16  ;;  %v5513_v48 = vsel %vm11173_vm8, %v5313_v30, %v5512_v5 }
 0x3cd   : > { %5486 = vst [vmem:[#allocation3 + $0x68] sm:$0x1] %v5485_v40  ;;  %v5303_v31 = vor.u32 %v5301_v21, %v15809_v26  ;;  %v5330_v17 = vrot.slane %v13491_v32, 4  ;;  %v5522_v23 = vld [vmem:[#allocation3 + $0xa8] sm:$0xf]  ;;  %v15814_v4 = vld [vmem:[#allocation24_spill] sm:$0xff] }
 0x3ce   : > { %5489 = vst [vmem:[#allocation3 + $0x6c] sm:$0xf] %v5488_v60  ;;  %v5337_v12 = vor.u32 %v5335_v16, %v13495_v45  ;;  %v5352_v47 = vshll.u32 %v15814_v4, 16  ;;  %v5526_v14 = vld [vmem:[#allocation3 + $0xb0] sm:$0x1]  ;;  %v15815_v39 = vld [vmem:[#allocation21_spill] sm:$0xff] }
 0x3cf   : > { %5490 = vst.msk [vmem:[#allocation3 + $0x70] sm:$0xf] %vm560_vm3, %v13601_v11  ;;  %v15812_v11 = vld [vmem:[#allocation37_spill] sm:$0xff]  ;;  %v5509_v20 = vsel %vm11167_vm7, %v5303_v31, %v5508_v42  ;;  %v15816_v32 = vshll.u32 %v15815_v39, 16  ;;  %v5529_v45 = vld [vmem:[#allocation3 + $0xb4] sm:$0xf] }
 0x3d0   : > { %5493 = vst [vmem:[#allocation3 + $0x74] sm:$0x1] %v5492_v29  ;;  %v5320_v13 = vor.u32 %v5318_v37, %v15812_v11  ;;  %v15817_v40 = vld [vmem:[#allocation10_spill] sm:$0xff]  ;;  %v15819_v60 = vld [vmem:[#allocation27_spill] sm:$0xff]  ;;  %v5533_v10 = vld [vmem:[#allocation3 + $0xbc] sm:$0x1]  ;;  %v5523_v42 = vsel %vm11167_vm7, %v5337_v12, %v5522_v23 }
 0x3d1   : > { %5496 = vst [vmem:[#allocation3 + $0x78] sm:$0xf] %v5495_v44  ;;  %v13730_v18 = vrot.slane %v15816_v32, 11  ;;  %v15818_v28 = vshll.u32 %v15817_v40, 16  ;;  %v15820_v25 = vshll.u32 %v15819_v60, 16  ;;  %v15821_v2 = vld [vmem:[#allocation38_spill] sm:$0xff] }
 0x3d2   : > { %5497 = vst.msk [vmem:[#allocation3 + $0x7c] sm:$0xf] %vm560_vm3, %v13605_v58  ;;  %v5519_v58 = vld [vmem:[#allocation3 + $0xa4] sm:$0x1]  ;;  %v5516_v6 = vsel %vm11167_vm7, %v5320_v13, %v5515_v33  ;;  %v5354_v56 = vor.u32 %v5352_v47, %v15821_v2  ;;  %v15826_v26 = vld [vmem:[#allocation28_spill] sm:$0xff]  ;;  %v15828_v37 = vld [vmem:[#allocation30_spill] sm:$0xff] }
 0x3d3   : > { %5500 = vst [vmem:[#allocation3 + $0x80] sm:$0x1] %v5499_v27  ;;  %v13737_v35 = vrot.slane %v15818_v28, 11  ;;  %v13741_v41 = vrot.slane %v15820_v25, 11  ;;  %v5520_v29 = vsel %vm11173_vm8, %v5330_v17, %v5519_v58  ;;  %v15827_v31 = vshll.u32 %v15826_v26, 16  ;;  %v10930_v32 = vld [vmem:[#allocation3 + $0xc] sm:$0xff] }
 0x3d4   : > { %5503 = vst [vmem:[#allocation3 + $0x84] sm:$0xf] %v5502_v61  ;;  %v15829_v61 = vshll.u32 %v15828_v37, 16  ;;  %v5364_v30 = vrot.slane %v13504_v62, 4  ;;  %v5597_v5 = vld [vmem:[#allocation3 + $0x24] sm:$0x1]  ;;  %10567 = vmatmul.msk.bf16.gmra.mxu2 %vm1373_vm10, %v10930_v32 }
 0x3d5   : > { %5504 = vst.msk [vmem:[#allocation3 + $0x88] sm:$0xf] %vm560_vm3, %v13609_v59  ;;  %v5347_v59 = vrot.slane %v13497_v3, 4  ;;  %v15822_v3 = vld [vmem:[#allocation11_spill] sm:$0xff]  ;;  %v13756_v27 = vrot.slane %v15827_v31, 11  ;;  %v5809_v33 = vshll.u32 %v13473_v54, 16 }
 0x3d6   : > { %5507 = vst [vmem:[#allocation3 + $0x8c] sm:$0x1] %v5506_v19  ;;  %v15823_v21 = vshll.u32 %v15822_v3, 16  ;;  %v13762_v36 = vrot.slane %v15829_v61, 11  ;;  %v5600_v13 = vld [vmem:[#allocation3 + $0x30] sm:$0x1]  ;;  %v5534_v47 = vsel %vm11173_vm8, %v5364_v30, %v5533_v10 }
 0x3d7   : > { %5510 = vst [vmem:[#allocation3 + $0x90] sm:$0xf] %v5509_v20  ;;  %v5527_v11 = vsel %vm11173_vm8, %v5347_v59, %v5526_v14  ;;  %v5750_v19 = vld [vmem:[#allocation3] sm:$0xf]  ;;  %v5813_v16 = vshrl.u32 %v13473_v54, 16  ;;  %v5530_v20 = vsel %vm11167_vm7, %v5354_v56, %v5529_v45  ;;  %v5811_v12 = vrot.slane %v5809_v33, 5 }
 0x3d8   : > { %5511 = vst.msk [vmem:[#allocation3 + $0x94] sm:$0xf] %vm560_vm3, %v13613_v0  ;;  %v13748_v44 = vrot.slane %v15823_v21, 11  ;;  %v15824_v0 = vld [vmem:[#allocation25_spill] sm:$0xff]  ;;  %v5603_v17 = vld [vmem:[#allocation3 + $0x3c] sm:$0x1] }
 0x3d9   : > { %5514 = vst [vmem:[#allocation3 + $0x98] sm:$0x1] %v5513_v48  ;;  %v15825_v53 = vshll.u32 %v15824_v0, 16  ;;  %v5800_v62 = vshrl.u32 %v5750_v19, 16  ;;  %v5803_v58 = vshll.u32 %v5750_v19, 16  ;;  %v5815_v48 = vrot.slane %v5813_v16, 4 }
 0x3da   : > { %5517 = vst [vmem:[#allocation3 + $0x9c] sm:$0xf] %v5516_v6  ;;  %v6594_v23 = vld [vmem:[#allocation3 + $0xc] sm:$0xe]  ;;  %v5609_v6 = vld [vmem:[#allocation3 + $0x54] sm:$0x1] }
 0x3db   : > { %v13752_v34 = vrot.slane %v15825_v53, 11  ;;  %5518 = vst.msk [vmem:[#allocation3 + $0xa0] sm:$0xf] %vm560_vm3, %v13618_v1  ;;  %v5606_v1 = vld [vmem:[#allocation3 + $0x48] sm:$0x1]  ;;  %v5802_v14 = vrot.slane %v5800_v62, 4  ;;  %v5816_v40 = vor.u32 %v5815_v48, %v5811_v12 }
 0x3dc   : > { %5521 = vst [vmem:[#allocation3 + $0xa4] sm:$0x1] %v5520_v29  ;;  %v5612_v54 = vld [vmem:[#allocation3 + $0x60] sm:$0x1]  ;;  %v5805_v46 = vrot.slane %v5803_v58, 5  ;;  %v5819_v39 = vshll.u32 %v13651_v50, 16 }
 0x3dd   : > { %5524 = vst [vmem:[#allocation3 + $0xa8] sm:$0xf] %v5523_v42  ;;  %v15830_v59 = vld [vmem:[#allocation22_spill] sm:$0xff]  ;;  %v10696_v28 = vld [vmem:[%s15575_s2 + $0x8] sm:$0x3]  ;;  %v10583_v42 = vrot.slane %v6594_v23, 9 }
 0x3de   : > { %5525 = vst.msk [vmem:[#allocation3 + $0xac] sm:$0xf] %vm560_vm3, %v13622_v43  ;;  %v15831_v45 = vshrl.u32 %v15830_v59, 16  ;;  %v13785_v60 = vld [vmem:[#allocation3 + $0x10] sm:$0xf]  ;;  %v5806_v29 = vor.u32 %v5805_v46, %v5802_v14  ;;  %v5821_v10 = vrot.slane %v5819_v39, 5 }
 0x3df   : > { %5528 = vst [vmem:[#allocation3 + $0xb0] sm:$0x1] %v5527_v11  ;;  %v15832_v25 = vld [vmem:[#allocation23_spill] sm:$0xff]  ;;  %v5615_v56 = vld [vmem:[#allocation3 + $0x6c] sm:$0x1]  ;;  %v7792_v3 = vsel %vm1422_vm0, %v10696_v28, 0 }
 0x3e0   : > { %5531 = vst [vmem:[#allocation3 + $0xb4] sm:$0xf] %v5530_v20  ;;  %v5598_v43 = vsel %vm11173_vm8, %v15831_v45, %v5597_v5  ;;  %v15833_v2 = vshrl.u32 %v15832_v25, 16  ;;  %v15834_v21 = vld [vmem:[#allocation26_spill] sm:$0xff]  ;;  %v5618_v26 = vld [vmem:[#allocation3 + $0x78] sm:$0x1]  ;;  %7801 = vmatpush.bf16.msrb.mxu1 %v7792_v3 }
 0x3e1   : > { %5532 = vst.msk [vmem:[#allocation3 + $0xb8] sm:$0xf] %vm560_vm3, %v13626_v22  ;;  %v15835_v0 = vshrl.u32 %v15834_v21, 16  ;;  %v5817_v22 = vrot.slane %v5816_v40, 4  ;;  %v13799_v31 = vld [vmem:[#allocation3 + $0x14] sm:$0x1] }
 0x3e2   : > { %v5601_v50 = vsel %vm11173_vm8, %v15833_v2, %v5600_v13  ;;  %5535 = vst [vmem:[#allocation3 + $0xbc] sm:$0x1] %v5534_v47  ;;  %v15836_v37 = vshrl.u32 %v13322_v9, 16  ;;  %v5621_v30 = vld [vmem:[#allocation3 + $0x84] sm:$0x1]  ;;  %v5807_v5 = vrot.slane %v5806_v29, 4 }
 0x3e3   : > { %v5604_v53 = vsel %vm11173_vm8, %v15835_v0, %v5603_v17  ;;  %5599 = vst [vmem:[#allocation3 + $0x24] sm:$0x1] %v5598_v43  ;;  %v6650_v11 = vrot.slane %v13785_v60, 5  ;;  %v15837_v13 = vshrl.u32 %v13326_v52, 16  ;;  %v15838_v33 = vshrl.u32 %v13330_v55, 16  ;;  %v15844_v21 = vld [vmem:[#allocation12_spill] sm:$0xff] }
 0x3e4   : > { %v5607_v61 = vsel %vm11173_vm8, %v15836_v37, %v5606_v1  ;;  %5602 = vst [vmem:[#allocation3 + $0x30] sm:$0x1] %v5601_v50  ;;  %v5624_v20 = vld [vmem:[#allocation3 + $0x90] sm:$0x1]  ;;  %v5822_v17 = vsel %vm11287_vm13, %v5817_v22, %v5821_v10  ;;  %v6653_v62 = vrot.slane %v13799_v31, 5  ;;  %v15840_v58 = vshrl.u32 %v15800_v51, 16 }
 0x3e5   : > { %v5610_v19 = vsel %vm11173_vm8, %v15837_v13, %v5609_v6  ;;  %v5613_v16 = vsel %vm11173_vm8, %v15838_v33, %v5612_v54  ;;  %5605 = vst [vmem:[#allocation3 + $0x3c] sm:$0x1] %v5604_v53  ;;  %v5812_v1 = vsel %vm11287_vm13, %v5807_v5, %v5811_v12  ;;  %v6651_v55 = vsel %vm11800_vm1, %v10583_v42, %v6650_v11  ;;  %v5752_v48 = vld [vmem:[#allocation3 + $0xc] sm:$0xf]  ;;  %v5627_v47 = vld [vmem:[#allocation3 + $0x9c] sm:$0x1] }
 0x3e6   : > { %v5616_v52 = vsel %vm11173_vm8, %v15840_v58, %v5615_v56  ;;  %v5833_v23 = vshll.u32 %v13785_v60, 16  ;;  %5608 = vst [vmem:[#allocation3 + $0x48] sm:$0x1] %v5607_v61  ;;  %v6185_v6 = vunpack.c.l.b16 %v5812_v1  ;;  %v6186_v54 = vunpack.c.l.b16 %v5822_v17  ;;  %v5630_v43 = vld [vmem:[#allocation3 + $0xa8] sm:$0x1]  ;;  %v15851_v1 = vld [vmem:[#allocation16_spill] sm:$0xff] }
 0x3e7   : > { %v6652_v14 = vrot.slane %v6650_v11, 4  ;;  %v5824_v46 = vshrl.u32 %v5752_v48, 16  ;;  %5611 = vst [vmem:[#allocation3 + $0x54] sm:$0x1] %v5610_v19  ;;  %v15841_v51 = vshrl.u32 %v15803_v38, 16  ;;  %v15842_v12 = vshrl.u32 %v15806_v57, 16 }
 0x3e8   : > { %v15843_v59 = vshrl.u32 %v15808_v63, 16  ;;  %v5827_v40 = vshll.u32 %v5752_v48, 16  ;;  %5614 = vst [vmem:[#allocation3 + $0x60] sm:$0x1] %v5613_v16  ;;  %v5633_v28 = vld [vmem:[#allocation3 + $0xb4] sm:$0x1]  ;;  %v6217_v2 = vpack.c.b16 %v6186_v54, %v6185_v6  ;;  %v6757_v50 = vunpack.c.l.b16 %v6651_v55 }
 0x3e9   : > { %v5619_v39 = vsel %vm11173_vm8, %v15841_v51, %v5618_v26  ;;  %v5622_v32 = vsel %vm11173_vm8, %v15842_v12, %v5621_v30  ;;  %v5693_v25 = vld [vmem:[#allocation3 + $0x2c] sm:$0x1]  ;;  %v6654_v38 = vsel %vm11800_vm1, %v6652_v14, %v6653_v62  ;;  %v5826_v56 = vrot.slane %v5824_v46, 4  ;;  %5617 = vst [vmem:[#allocation3 + $0x6c] sm:$0x1] %v5616_v52  ;;  %v10931_v51 = vld [vmem:[#allocation3 + $0x18] sm:$0xff] }
 0x3ea   : > { %v5625_v45 = vsel %vm11173_vm8, %v15843_v59, %v5624_v20  ;;  %v5696_v57 = vld [vmem:[#allocation3 + $0x38] sm:$0x1]  ;;  %v6758_v29 = vunpack.c.l.b16 %v6654_v38  ;;  %v5829_v10 = vrot.slane %v5827_v40, 5  ;;  %v13840_v3 = vrot.slane %v5833_v23, 5  ;;  %5620 = vst [vmem:[#allocation3 + $0x78] sm:$0x1] %v5619_v39  ;;  %10486 = vmatmul.msk.bf16.vlgmr.msra.gmra.mxu1 %vm1373_vm10, %v6217_v2  ;;  %10568 = vmatmul.msk.bf16.gmra.mxu2 %vm1373_vm10, %v10931_v51 }
 0x3eb   : > { %v5837_v63 = vshrl.u32 %v13785_v60, 16  ;;  %v15845_v0 = vshll.u32 %v15844_v21, 16  ;;  %v15846_v26 = vshrl.u32 %v15810_v7, 16  ;;  %v15847_v42 = vshrl.u32 %v15813_v24, 16  ;;  %v5699_v61 = vld [vmem:[#allocation3 + $0x44] sm:$0x1] }
 0x3ec   : > { %v10947_v30 = vld [vmem:[#allocation3 + $0x24] sm:$0xff]  ;;  %5623 = vst [vmem:[#allocation3 + $0x84] sm:$0x1] %v5622_v32  ;;  %v6788_v60 = vpack.c.b16 %v6758_v29, %v6757_v50  ;;  %v5830_v5 = vor.u32 %v5829_v10, %v5826_v56  ;;  %v5843_v13 = vshll.u32 %v13799_v31, 16  ;;  %v13857_v19 = vld [vmem:[#allocation3 + $0x1c] sm:$0xf]  ;;  %v5694_v31 = vsel %vm11225_vm9, %v13730_v18, %v5693_v25 }
 0x3ed   : > { %v13845_v53 = vrot.slane %v15845_v0, 11  ;;  %v5628_v22 = vsel %vm11173_vm8, %v15846_v26, %v5627_v47  ;;  %v5631_v37 = vsel %vm11173_vm8, %v15847_v42, %v5630_v43  ;;  %v5839_v11 = vrot.slane %v5837_v63, 4  ;;  %5626 = vst [vmem:[#allocation3 + $0x90] sm:$0x1] %v5625_v45  ;;  %v5702_v33 = vld [vmem:[#allocation3 + $0x50] sm:$0x1]  ;;  %10682 = vmatmul.msk.bf16.gmra.mxu0 %vm1373_vm10, %v10947_v30 }
 0x3ee   : > { %v15848_v7 = vshrl.u32 %v15814_v4, 16  ;;  %v5705_v16 = vld [vmem:[#allocation3 + $0x5c] sm:$0x1]  ;;  %v15849_v20 = vld [vmem:[#allocation14_spill] sm:$0xff]  ;;  %5629 = vst [vmem:[#allocation3 + $0x9c] sm:$0x1] %v5628_v22  ;;  %10600 = vmatmul.msk.bf16.gmra.mxu3 %vm1373_vm10, %v6788_v60  ;;  %v5697_v23 = vsel %vm11225_vm9, %v13737_v35, %v5696_v57  ;;  %v5700_v54 = vsel %vm11225_vm9, %v13741_v41, %v5699_v61  ;;  %v5703_v35 = vsel %vm11225_vm9, %v13748_v44, %v5702_v33 }
 0x3ef   : > { %v15850_v17 = vshll.u32 %v15849_v20, 16  ;;  %v5708_v58 = vld [vmem:[#allocation3 + $0x68] sm:$0x1]  ;;  %v5831_v52 = vrot.slane %v5830_v5, 4  ;;  %v5840_v4 = vor.u32 %v5839_v11, %v13840_v3  ;;  %v15852_v55 = vshll.u32 %v15851_v1, 16  ;;  %v15855_v38 = vld [vmem:[#allocation20_spill] sm:$0xff] }
 0x3f0   : > { %v5634_v24 = vsel %vm11173_vm8, %v15848_v7, %v5633_v28  ;;  %5632 = vst [vmem:[#allocation3 + $0xa8] sm:$0x1] %v5631_v37  ;;  %v5711_v47 = vld [vmem:[#allocation3 + $0x74] sm:$0x1]  ;;  %v6657_v6 = vrot.slane %v13857_v19, 5  ;;  %v5845_v46 = vrot.slane %v5843_v13, 5  ;;  %v5706_v45 = vsel %vm11225_vm9, %v13752_v34, %v5705_v16 }
 0x3f1   : > { %v10479_v62 = vrot.slane %v15850_v17, 11  ;;  %v10480_v48 = vrot.slane %v15852_v55, 11  ;;  %v5754_v18 = vld [vmem:[#allocation3 + $0x18] sm:$0xf]  ;;  %5635 = vst [vmem:[#allocation3 + $0xb4] sm:$0x1] %v5634_v24  ;;  %v5836_v41 = vsel %vm11287_vm13, %v5831_v52, %v13840_v3  ;;  %v5709_v34 = vsel %vm11225_vm9, %v13756_v27, %v5708_v58 }
 0x3f2   : > { %v5714_v14 = vld [vmem:[#allocation3 + $0x80] sm:$0x1]  ;;  %v6595_v39 = vld [vmem:[#allocation3 + $0x18] sm:$0xe]  ;;  %v15853_v12 = vld [vmem:[#allocation18_spill] sm:$0xff]  ;;  %v6660_v40 = vrot.slane %v13871_v15, 5  ;;  %v5712_v29 = vsel %vm11225_vm9, %v13762_v36, %v5711_v47  ;;  %v6187_v22 = vunpack.c.l.b16 %v5836_v41 }
 0x3f3   : > { %v15854_v32 = vshll.u32 %v15853_v12, 16  ;;  %5695 = vst [vmem:[#allocation3 + $0x2c] sm:$0x1] %v5694_v31  ;;  %v5717_v43 = vld [vmem:[#allocation3 + $0x8c] sm:$0x1]  ;;  %v5841_v28 = vrot.slane %v5840_v4, 4  ;;  %v5715_v21 = vsel %vm11225_vm9, %v13845_v53, %v5714_v14 }
 0x3f4   : > { %5698 = vst [vmem:[#allocation3 + $0x38] sm:$0x1] %v5697_v23  ;;  %v5848_v25 = vshrl.u32 %v5754_v18, 16  ;;  %v5851_v2 = vshll.u32 %v5754_v18, 16  ;;  %v15856_v50 = vshll.u32 %v15855_v38, 16  ;;  %v10584_v56 = vrot.slane %v6595_v39, 9 }
 0x3f5   : > { %v10481_v59 = vrot.slane %v15854_v32, 11  ;;  %5701 = vst [vmem:[#allocation3 + $0x44] sm:$0x1] %v5700_v54  ;;  %v6659_v57 = vrot.slane %v6657_v6, 4  ;;  %v5720_v10 = vld [vmem:[#allocation3 + $0x98] sm:$0x1]  ;;  %v5846_v63 = vsel %vm11287_vm13, %v5841_v28, %v5845_v46  ;;  %v5718_v27 = vsel %vm11225_vm9, %v10479_v62, %v5717_v43 }
 0x3f6   : > { %v10482_v44 = vrot.slane %v15856_v50, 11  ;;  %5704 = vst [vmem:[#allocation3 + $0x50] sm:$0x1] %v5703_v35  ;;  %v5723_v3 = vld [vmem:[#allocation3 + $0xa4] sm:$0x1]  ;;  %v5850_v36 = vrot.slane %v5848_v25, 4  ;;  %v5721_v53 = vsel %vm11225_vm9, %v10480_v48, %v5720_v10  ;;  %v6188_v13 = vunpack.c.l.b16 %v5846_v63 }
 0x3f7   : > { %5707 = vst [vmem:[#allocation3 + $0x5c] sm:$0x1] %v5706_v45  ;;  %v5726_v0 = vld [vmem:[#allocation3 + $0xb0] sm:$0x1]  ;;  %v5729_v26 = vld [vmem:[#allocation3 + $0xbc] sm:$0x1]  ;;  %v6661_v42 = vsel %vm11800_vm1, %v6659_v57, %v6660_v40  ;;  %v6658_v7 = vsel %vm11800_vm1, %v10584_v56, %v6657_v6  ;;  %v5724_v24 = vsel %vm11225_vm9, %v10481_v59, %v5723_v3 }
 0x3f8   : > { %5710 = vst [vmem:[#allocation3 + $0x68] sm:$0x1] %v5709_v34  ;;  %v5853_v37 = vrot.slane %v5851_v2, 5  ;;  %v5857_v61 = vshll.u32 %v13857_v19, 16  ;;  %v5861_v30 = vshrl.u32 %v13857_v19, 16  ;;  %v15857_v60 = vld [vmem:[#allocation4_spill] sm:$0xff]  ;;  %v6760_v33 = vunpack.c.l.b16 %v6661_v42 }
 0x3f9   : > { %v15858_v5 = vshll.u32 %v15857_v60, 16  ;;  %5713 = vst [vmem:[#allocation3 + $0x74] sm:$0x1] %v5712_v29  ;;  %v5727_v19 = vsel %vm11225_vm9, %v10482_v44, %v5726_v0  ;;  %v6218_v20 = vpack.c.b16 %v6188_v13, %v6187_v22  ;;  %v6759_v17 = vunpack.c.l.b16 %v6658_v7  ;;  %v5743_v52 = vld [vmem:[#allocation3 + $0xb4] sm:$0xf]  ;;  %v10932_v14 = vld [vmem:[#allocation3 + $0x24] sm:$0xff] }
 0x3fa   : > { %5716 = vst [vmem:[#allocation3 + $0x80] sm:$0x1] %v5715_v21  ;;  %v5854_v62 = vor.u32 %v5853_v37, %v5850_v36  ;;  %v5859_v31 = vrot.slane %v5857_v61, 5  ;;  %v5863_v58 = vrot.slane %v5861_v30, 4  ;;  %v10948_v4 = vld [vmem:[#allocation3 + $0x30] sm:$0xff]  ;;  %v5867_v55 = vshll.u32 %v13871_v15, 16  ;;  %10569 = vmatmul.msk.bf16.gmra.mxu2 %vm1373_vm10, %v10932_v14 }
 0x3fb   : > { %v10483_v11 = vrot.slane %v15858_v5, 11  ;;  %5719 = vst [vmem:[#allocation3 + $0x8c] sm:$0x1] %v5718_v27  ;;  %10487 = vmatmul.msk.bf16.gmra.mxu1 %vm1373_vm10, %v6218_v20  ;;  %v6789_v1 = vpack.c.b16 %v6760_v33, %v6759_v17  ;;  %v5757_v48 = vld [vmem:[#allocation3 + $0x28] sm:$0xf]  ;;  %v10949_v3 = vld [vmem:[#allocation3 + $0x3c] sm:$0xff] }
 0x3fc   : > { %5722 = vst [vmem:[#allocation3 + $0x98] sm:$0x1] %v5721_v53  ;;  %v5855_v8 = vrot.slane %v5854_v62, 4  ;;  %v5864_v23 = vor.u32 %v5863_v58, %v5859_v31  ;;  %v5786_v47 = vld [vmem:[#allocation3 + $0x2c] sm:$0x1]  ;;  %v6664_v6 = vrot.slane %v5757_v48, 5 }
 0x3fd   : > { %v5730_v16 = vsel %vm11225_vm9, %v10483_v11, %v5729_v26  ;;  %5725 = vst [vmem:[#allocation3 + $0xa4] sm:$0x1] %v5724_v24  ;;  %10683 = vmatmul.msk.bf16.gmra.mxu0 %vm1373_vm10, %v10948_v4  ;;  %v5756_v18 = vld [vmem:[#allocation3 + $0x24] sm:$0xf]  ;;  %v5869_v54 = vrot.slane %v5867_v55, 5  ;;  %v6667_v51 = vrot.slane %v5786_v47, 5 }
 0x3fe   : > { %5728 = vst [vmem:[#allocation3 + $0xb0] sm:$0x1] %v5727_v19  ;;  %10601 = vmatmul.msk.bf16.gmra.mxu3 %vm1373_vm10, %v6789_v1  ;;  %v6596_v46 = vld [vmem:[#allocation3 + $0x24] sm:$0xe]  ;;  %v5860_v15 = vsel %vm11287_vm13, %v5855_v8, %v5859_v31  ;;  %v5865_v39 = vrot.slane %v5864_v23, 4  ;;  %v5872_v12 = vshrl.u32 %v5756_v18, 16 }
 0x3ff   : > { %5731 = vst [vmem:[#allocation3 + $0xbc] sm:$0x1] %v5730_v16  ;;  %v5875_v32 = vshll.u32 %v5756_v18, 16  ;;  %v10585_v59 = vrot.slane %v6596_v46, 9  ;;  %v6666_v35 = vrot.slane %v6664_v6, 4  ;;  %v6189_v43 = vunpack.c.l.b16 %v5860_v15  ;;  %v10933_v61 = vld [vmem:[#allocation3 + $0x30] sm:$0xff] }
 0x400   : > { %5747 = vst.msk [vmem:[#allocation3 + $0xcc] sm:$0xf] %vm560_vm3, %v5743_v52  ;;  %v5870_v45 = vsel %vm11287_vm13, %v5865_v39, %v5869_v54  ;;  %v5874_v41 = vrot.slane %v5872_v12, 4  ;;  %v5881_v25 = vshll.u32 %v5757_v48, 16  ;;  %v5885_v2 = vshrl.u32 %v5757_v48, 16 }
 0x401   : > { %v6668_v40 = vsel %vm11800_vm1, %v6666_v35, %v6667_v51  ;;  %v5877_v28 = vrot.slane %v5875_v32, 5  ;;  %v6190_v38 = vunpack.c.l.b16 %v5870_v45  ;;  %v6665_v50 = vsel %vm11800_vm1, %v10585_v59, %v6664_v6  ;;  %v5759_v27 = vld [vmem:[#allocation3 + $0x34] sm:$0xf]  ;;  %v5787_v22 = vld [vmem:[#allocation3 + $0x38] sm:$0x1]  ;;  %v10934_v32 = vld [vmem:[#allocation3 + $0x3c] sm:$0xff] }
 0x402   : > { %v6762_v44 = vunpack.c.l.b16 %v6668_v40  ;;  %v6761_v56 = vunpack.c.l.b16 %v6665_v50  ;;  %v5883_v29 = vrot.slane %v5881_v25, 5  ;;  %v5887_v10 = vrot.slane %v5885_v2, 4  ;;  %v5758_v36 = vld [vmem:[#allocation3 + $0x30] sm:$0xf]  ;;  %v5761_v54 = vld [vmem:[#allocation3 + $0x40] sm:$0xf] }
 0x403   : > { %v6219_v34 = vpack.c.b16 %v6190_v38, %v6189_v43  ;;  %v5878_v57 = vor.u32 %v5877_v28, %v5874_v41  ;;  %v5891_v21 = vshll.u32 %v5786_v47, 16  ;;  %v6671_v42 = vrot.slane %v5759_v27, 5  ;;  %v6597_v30 = vld [vmem:[#allocation3 + $0x30] sm:$0xe]  ;;  %v10950_v47 = vld [vmem:[#allocation3 + $0x48] sm:$0xff] }
 0x404   : > { %v6790_v63 = vpack.c.b16 %v6762_v44, %v6761_v56  ;;  %v5888_v26 = vor.u32 %v5887_v10, %v5883_v29  ;;  %v6674_v60 = vrot.slane %v5787_v22, 5  ;;  %v5896_v53 = vshrl.u32 %v5758_v36, 16  ;;  %v5788_v51 = vld [vmem:[#allocation3 + $0x44] sm:$0x1]  ;;  %v5760_v39 = vld [vmem:[#allocation3 + $0x3c] sm:$0xf] }
 0x405   : > { %v5879_v0 = vrot.slane %v5878_v57, 4  ;;  %v5893_v37 = vrot.slane %v5891_v21, 5  ;;  %v5899_v13 = vshll.u32 %v5758_v36, 16  ;;  %v10586_v7 = vrot.slane %v6597_v30, 9  ;;  %v6598_v59 = vld [vmem:[#allocation3 + $0x3c] sm:$0xe] }
 0x406   : > { %v5889_v11 = vrot.slane %v5888_v26, 4  ;;  %v6673_v24 = vrot.slane %v6671_v42, 4  ;;  %v5898_v20 = vrot.slane %v5896_v53, 4  ;;  %v5905_v62 = vshll.u32 %v5759_v27, 16  ;;  %v9253_v9 = vld [vmem:[#allocation3 + $0x18] sm:$0xe] }
 0x407   : > { %v5884_v5 = vsel %vm11287_vm13, %v5879_v0, %v5883_v29  ;;  %v5901_v17 = vrot.slane %v5899_v13, 5  ;;  %v5909_v31 = vshrl.u32 %v5759_v27, 16  ;;  %v6672_v52 = vsel %vm11800_vm1, %v10586_v7, %v6671_v42  ;;  %v10935_v13 = vld [vmem:[#allocation3 + $0x48] sm:$0xff] }
 0x408   : > { %v5894_v33 = vsel %vm11287_vm13, %v5889_v11, %v5893_v37  ;;  %v6191_v19 = vunpack.c.l.b16 %v5884_v5  ;;  %v6675_v16 = vsel %vm11800_vm1, %v6673_v24, %v6674_v60  ;;  %v6763_v55 = vunpack.c.l.b16 %v6672_v52  ;;  %v5763_v37 = vld [vmem:[#allocation3 + $0x4c] sm:$0xf]  ;;  %v5789_v60 = vld [vmem:[#allocation3 + $0x50] sm:$0x1]  ;;  %v5762_v11 = vld [vmem:[#allocation3 + $0x48] sm:$0xf] }
 0x409   : > { %v6192_v58 = vunpack.c.l.b16 %v5894_v33  ;;  %v6764_v4 = vunpack.c.l.b16 %v6675_v16  ;;  %v5902_v48 = vor.u32 %v5901_v17, %v5898_v20  ;;  %v5907_v8 = vrot.slane %v5905_v62, 5  ;;  %v6599_v7 = vld [vmem:[#allocation3 + $0x48] sm:$0xe] }
 0x40a   : > { %10570 = vmatmul.msk.bf16.gmra.mxu2 %vm1373_vm10, %v10933_v61  ;;  %v5911_v23 = vrot.slane %v5909_v31, 4  ;;  %v5915_v18 = vshll.u32 %v5787_v22, 16  ;;  %v6678_v15 = vrot.slane %v5761_v54, 5  ;;  %v6681_v35 = vrot.slane %v5788_v51, 5  ;;  %v10951_v22 = vld [vmem:[#allocation3 + $0x54] sm:$0xff] }
 0x40b   : > { %10488 = vmatmul.msk.bf16.gmra.mxu1 %vm1373_vm10, %v6219_v34  ;;  %v6220_v1 = vpack.c.b16 %v6192_v58, %v6191_v19  ;;  %v6791_v6 = vpack.c.b16 %v6764_v4, %v6763_v55  ;;  %v5903_v14 = vrot.slane %v5902_v48, 4  ;;  %v5920_v40 = vshrl.u32 %v5760_v39, 16 }
 0x40c   : > { %v5912_v46 = vor.u32 %v5911_v23, %v5907_v8  ;;  %v5917_v12 = vrot.slane %v5915_v18, 5  ;;  %v5923_v41 = vshll.u32 %v5760_v39, 16  ;;  %v10587_v28 = vrot.slane %v6598_v59, 9 }
 0x40d   : > { %10684 = vmatmul.msk.bf16.gmra.mxu0 %vm1373_vm10, %v10949_v3  ;;  %v5908_v45 = vsel %vm11287_vm13, %v5903_v14, %v5907_v8  ;;  %v6680_v25 = vrot.slane %v6678_v15, 4  ;;  %v5922_v44 = vrot.slane %v5920_v40, 4  ;;  %v5929_v56 = vshll.u32 %v5761_v54, 16 }
 0x40e   : > { %10602 = vmatmul.msk.bf16.gmra.mxu3 %vm1373_vm10, %v6790_v63  ;;  %v5913_v43 = vrot.slane %v5912_v46, 4  ;;  %v6193_v38 = vunpack.c.l.b16 %v5908_v45  ;;  %v5925_v34 = vrot.slane %v5923_v41, 5  ;;  %v5933_v57 = vshrl.u32 %v5761_v54, 16  ;;  %v10936_v41 = vld [vmem:[#allocation3 + $0x54] sm:$0xff] }
 0x40f   : > { %v6682_v50 = vsel %vm11800_vm1, %v6680_v25, %v6681_v35  ;;  %v6679_v10 = vsel %vm11800_vm1, %v10587_v28, %v6678_v15  ;;  %v5931_v0 = vrot.slane %v5929_v56, 5  ;;  %v5939_v36 = vshll.u32 %v5788_v51, 16  ;;  %v10952_v51 = vld [vmem:[#allocation3 + $0x60] sm:$0xff]  ;;  %v5790_v35 = vld [vmem:[#allocation3 + $0x5c] sm:$0x1] }
 0x410   : > { %v5918_v2 = vsel %vm11287_vm13, %v5913_v43, %v5917_v12  ;;  %v6766_v3 = vunpack.c.l.b16 %v6682_v50  ;;  %v6765_v21 = vunpack.c.l.b16 %v6679_v10  ;;  %v5926_v27 = vor.u32 %v5925_v34, %v5922_v44  ;;  %v5765_v12 = vld [vmem:[#allocation3 + $0x58] sm:$0xf]  ;;  %v5764_v43 = vld [vmem:[#allocation3 + $0x54] sm:$0xf] }
 0x411   : > { %v6194_v29 = vunpack.c.l.b16 %v5918_v2  ;;  %v5935_v26 = vrot.slane %v5933_v57, 4  ;;  %v6685_v5 = vrot.slane %v5763_v37, 5  ;;  %v5941_v53 = vrot.slane %v5939_v36, 5  ;;  %v6600_v28 = vld [vmem:[#allocation3 + $0x54] sm:$0xe] }
 0x412   : > { %v6792_v42 = vpack.c.b16 %v6766_v3, %v6765_v21  ;;  %v5927_v61 = vrot.slane %v5926_v27, 4  ;;  %v6688_v24 = vrot.slane %v5789_v60, 5  ;;  %v5944_v16 = vshrl.u32 %v5762_v11, 16  ;;  %v13982_v50 = vpop.f32.mrf.mxu0 }
 0x413   : > { %v6221_v63 = vpack.c.b16 %v6194_v29, %v6193_v38  ;;  %v5936_v30 = vor.u32 %v5935_v26, %v5931_v0  ;;  %v5947_v20 = vshll.u32 %v5762_v11, 16  ;;  %v10588_v17 = vrot.slane %v6599_v7, 9  ;;  %v5767_v7 = vld [vmem:[#allocation3 + $0x64] sm:$0xf] }
 0x414   : > { %v5932_v33 = vsel %vm11287_vm13, %v5927_v61, %v5931_v0  ;;  %v6687_v62 = vrot.slane %v6685_v5, 4  ;;  %v5946_v4 = vrot.slane %v5944_v16, 4  ;;  %v5953_v55 = vshll.u32 %v5763_v37, 16 }
 0x415   : > { %v5937_v19 = vrot.slane %v5936_v30, 4  ;;  %v6195_v58 = vunpack.c.l.b16 %v5932_v33  ;;  %v5957_v48 = vshrl.u32 %v5763_v37, 16  ;;  %v6686_v23 = vsel %vm11800_vm1, %v10588_v17, %v6685_v5  ;;  %v10953_v5 = vld [vmem:[#allocation3 + $0x6c] sm:$0xff] }
 0x416   : > { %v6689_v52 = vsel %vm11800_vm1, %v6687_v62, %v6688_v24  ;;  %v6767_v18 = vunpack.c.l.b16 %v6686_v23  ;;  %v5955_v14 = vrot.slane %v5953_v55, 5  ;;  %v5963_v39 = vshll.u32 %v5789_v60, 16  ;;  %v10937_v62 = vld [vmem:[#allocation3 + $0x60] sm:$0xff] }
 0x417   : > { %v5942_v31 = vsel %vm11287_vm13, %v5937_v19, %v5941_v53  ;;  %v5959_v46 = vrot.slane %v5957_v48, 4  ;;  %v6692_v45 = vrot.slane %v5765_v12, 5  ;;  %v6695_v25 = vrot.slane %v5790_v35, 5  ;;  %v5791_v19 = vld [vmem:[#allocation3 + $0x68] sm:$0x1] }
 0x418   : > { %v6196_v8 = vunpack.c.l.b16 %v5942_v31  ;;  %v5965_v40 = vrot.slane %v5963_v39, 5  ;;  %v5968_v44 = vshrl.u32 %v5764_v43, 16  ;;  %v5971_v34 = vshll.u32 %v5764_v43, 16  ;;  %v6601_v31 = vld [vmem:[#allocation3 + $0x60] sm:$0xe] }
 0x419   : > { %v5960_v59 = vor.u32 %v5959_v46, %v5955_v14  ;;  %v10589_v56 = vrot.slane %v6600_v28, 9  ;;  %v6694_v57 = vrot.slane %v6692_v45, 4  ;;  %v5977_v27 = vshll.u32 %v5765_v12, 16 }
 0x41a   : > { %10571 = vmatmul.msk.bf16.gmra.mxu2 %vm1373_vm10, %v10934_v32  ;;  %v5973_v21 = vrot.slane %v5971_v34, 5  ;;  %v5981_v0 = vshrl.u32 %v5765_v12, 16  ;;  %v5987_v53 = vshll.u32 %v5790_v35, 16  ;;  %v6699_v16 = vrot.slane %v5767_v7, 5 }
 0x41b   : > { %10489 = vmatmul.msk.bf16.gmra.mxu1 %vm1373_vm10, %v6220_v1  ;;  %v5949_v1 = vrot.slane %v5947_v20, 5  ;;  %v5961_v38 = vrot.slane %v5960_v59, 4  ;;  %v6696_v3 = vsel %vm11800_vm1, %v6694_v57, %v6695_v25  ;;  %v5979_v30 = vrot.slane %v5977_v27, 5  ;;  %v5766_v20 = vld [vmem:[#allocation3 + $0x60] sm:$0xf] }
 0x41c   : > { %v5983_v60 = vrot.slane %v5981_v0, 4  ;;  %v5989_v17 = vrot.slane %v5987_v53, 5  ;;  %v5992_v55 = vshrl.u32 %v5766_v20, 16  ;;  %v5995_v48 = vshll.u32 %v5766_v20, 16  ;;  %v5792_v57 = vld [vmem:[#allocation3 + $0x74] sm:$0x1] }
 0x41d   : > { %10685 = vmatmul.msk.bf16.gmra.mxu0 %vm1373_vm10, %v10950_v47  ;;  %v6768_v47 = vunpack.c.l.b16 %v6689_v52  ;;  %v5950_v54 = vor.u32 %v5949_v1, %v5946_v4  ;;  %v5966_v29 = vsel %vm11287_vm13, %v5961_v38, %v5965_v40  ;;  %v6702_v52 = vrot.slane %v5791_v19, 5  ;;  %v5769_v38 = vld [vmem:[#allocation3 + $0x70] sm:$0xf]  ;;  %v6602_v27 = vld [vmem:[#allocation3 + $0x6c] sm:$0xe] }
 0x41e   : > { %10603 = vmatmul.msk.bf16.gmra.mxu3 %vm1373_vm10, %v6791_v6  ;;  %v6222_v6 = vpack.c.b16 %v6196_v8, %v6195_v58  ;;  %v6198_v26 = vunpack.c.l.b16 %v5966_v29  ;;  %v5984_v33 = vor.u32 %v5983_v60, %v5979_v30  ;;  %v10590_v8 = vrot.slane %v6601_v31, 9 }
 0x41f   : > { %v6793_v15 = vpack.c.b16 %v6768_v47, %v6767_v18  ;;  %v5951_v32 = vrot.slane %v5950_v54, 4  ;;  %v6701_v23 = vrot.slane %v6699_v16, 4  ;;  %v5997_v46 = vrot.slane %v5995_v48, 5 }
 0x420   : > { %v5985_v1 = vrot.slane %v5984_v33, 4  ;;  %v6700_v12 = vsel %vm11800_vm1, %v10590_v8, %v6699_v16  ;;  %v6706_v29 = vrot.slane %v5769_v38, 5  ;;  %v6709_v0 = vrot.slane %v5792_v57, 5 }
 0x421   : > { %v5956_v2 = vsel %vm11287_vm13, %v5951_v32, %v5955_v14  ;;  %v6703_v18 = vsel %vm11800_vm1, %v6701_v23, %v6702_v52  ;;  %v5994_v14 = vrot.slane %v5992_v55, 4  ;;  %v6771_v35 = vunpack.c.l.b16 %v6700_v12  ;;  %v5770_v12 = vld [vmem:[#allocation3 + $0x78] sm:$0xf] }
 0x422   : > { %v6197_v10 = vunpack.c.l.b16 %v5956_v2  ;;  %v5990_v47 = vsel %vm11287_vm13, %v5985_v1, %v5989_v17  ;;  %v6772_v32 = vunpack.c.l.b16 %v6703_v18  ;;  %v6011_v2 = vshll.u32 %v5791_v19, 16 }
 0x423   : > { %v6200_v39 = vunpack.c.l.b16 %v5990_v47  ;;  %v6029_v33 = vshrl.u32 %v5769_v38, 16  ;;  %v10955_v47 = vld [vmem:[#allocation3 + $0x84] sm:$0xff]  ;;  %v6035_v18 = vshll.u32 %v5792_v57, 16 }
 0x424   : > { %v6223_v36 = vpack.c.b16 %v6198_v26, %v6197_v10  ;;  %v6795_v25 = vpack.c.b16 %v6772_v32, %v6771_v35  ;;  %v5768_v10 = vld [vmem:[#allocation3 + $0x6c] sm:$0xf]  ;;  %v10939_v35 = vld [vmem:[#allocation3 + $0x78] sm:$0xff] }
 0x425   : > { %v6031_v8 = vrot.slane %v6029_v33, 4 }
 0x42a   : > { %10572 = vmatmul.msk.bf16.gmra.mxu2 %vm1373_vm10, %v10935_v13  ;;  %v13991_v13 = vpop.f32.mrf.mxu0 }
 0x42b   : > { %10490 = vmatmul.msk.bf16.gmra.mxu1 %vm1373_vm10, %v6221_v63  ;;  %v5970_v63 = vrot.slane %v5968_v44, 4 }
 0x42d   : > { %10686 = vmatmul.msk.bf16.gmra.mxu0 %vm1373_vm10, %v10951_v22  ;;  %v6693_v22 = vsel %vm11800_vm1, %v10589_v56, %v6692_v45  ;;  %v5974_v61 = vor.u32 %v5973_v21, %v5970_v63  ;;  %v5998_v45 = vor.u32 %v5997_v46, %v5994_v14  ;;  %v10938_v21 = vld [vmem:[#allocation3 + $0x6c] sm:$0xff]  ;;  %v5771_v14 = vld [vmem:[#allocation3 + $0x7c] sm:$0xf] }
 0x42e   : > { %10604 = vmatmul.msk.bf16.gmra.mxu3 %vm1373_vm10, %v6792_v42  ;;  %v6770_v42 = vunpack.c.l.b16 %v6696_v3  ;;  %v6769_v37 = vunpack.c.l.b16 %v6693_v22  ;;  %v6013_v3 = vrot.slane %v6011_v2, 5 }
 0x42f   : > { %v5975_v24 = vrot.slane %v5974_v61, 4  ;;  %v5999_v34 = vrot.slane %v5998_v45, 4  ;;  %v6708_v61 = vrot.slane %v6706_v29, 4  ;;  %v6603_v45 = vld [vmem:[#allocation3 + $0x78] sm:$0xe] }
 0x430   : > { %v6794_v11 = vpack.c.b16 %v6770_v42, %v6769_v37  ;;  %v6016_v42 = vshrl.u32 %v5768_v10, 16  ;;  %v10591_v37 = vrot.slane %v6602_v27, 9  ;;  %v10592_v57 = vrot.slane %v6603_v45, 9 }
 0x431   : > { %v5980_v4 = vsel %vm11287_vm13, %v5975_v24, %v5979_v30  ;;  %v6025_v24 = vshll.u32 %v5769_v38, 16 }
 0x432   : > { %v14004_v54 = vpop.f32.mrf.mxu0  ;;  %v6018_v53 = vrot.slane %v6016_v42, 4  ;;  %v6707_v20 = vsel %vm11800_vm1, %v10591_v37, %v6706_v29 }
 0x433   : > { %v6027_v48 = vrot.slane %v6025_v24, 5 }
 0x436   : > { %v13995_v58 = vpop.f32.mrf.mxu2 }
 0x43a   : > { %10573 = vmatmul.msk.bf16.gmra.mxu2 %vm1373_vm10, %v10936_v41  ;;  %v10954_v41 = vld [vmem:[#allocation3 + $0x78] sm:$0xff]  ;;  %v14011_v63 = vpop.f32.mrf.mxu0 }
 0x43b   : > { %10491 = vmatmul.msk.bf16.gmra.mxu1 %vm1373_vm10, %v6222_v6  ;;  %v6199_v6 = vunpack.c.l.b16 %v5980_v4  ;;  %v6773_v4 = vunpack.c.l.b16 %v6707_v20  ;;  %v10956_v20 = vld [vmem:[#allocation3 + $0x90] sm:$0xff] }
 0x43d   : > { %10687 = vmatmul.msk.bf16.gmra.mxu0 %vm1373_vm10, %v10952_v51  ;;  %v6001_v51 = vshll.u32 %v5767_v7, 16  ;;  %v6224_v59 = vpack.c.b16 %v6200_v39, %v6199_v6  ;;  %v6713_v39 = vrot.slane %v5771_v14, 5 }
 0x43e   : > { %10605 = vmatmul.msk.bf16.gmra.mxu3 %vm1373_vm10, %v6793_v15  ;;  %v6005_v15 = vshrl.u32 %v5767_v7, 16  ;;  %v6515_v28 = vpop.f32.mrf.mxu2 }
 0x43f   : > { %v6003_v43 = vrot.slane %v6001_v51, 5  ;;  %v6032_v51 = vor.u32 %v6031_v8, %v6027_v48  ;;  %v6715_v29 = vrot.slane %v6713_v39, 4  ;;  %v5772_v8 = vld [vmem:[#allocation3 + $0x84] sm:$0xf] }
 0x440   : > { %v6007_v40 = vrot.slane %v6005_v15, 4  ;;  %v5793_v15 = vld [vmem:[#allocation3 + $0x80] sm:$0x1] }
 0x441   : > { %v6004_v26 = vsel %vm11287_vm13, %v5999_v34, %v6003_v43  ;;  %v6033_v2 = vrot.slane %v6032_v51, 4  ;;  %v6043_v34 = vshll.u32 %v5770_v12, 16 }
 0x442   : > { %v6008_v56 = vor.u32 %v6007_v40, %v6003_v43  ;;  %v6201_v60 = vunpack.c.l.b16 %v6004_v26  ;;  %v6049_v26 = vshll.u32 %v5771_v14, 16 }
 0x444   : > { %v6009_v22 = vrot.slane %v6008_v56, 4  ;;  %v6051_v33 = vrot.slane %v6049_v26, 5 }
 0x446   : > { %v6014_v30 = vsel %vm11287_vm13, %v6009_v22, %v6013_v3  ;;  %v6053_v22 = vshrl.u32 %v5771_v14, 16  ;;  %v6604_v14 = vld [vmem:[#allocation3 + $0x84] sm:$0xe] }
 0x447   : > { %v6202_v19 = vunpack.c.l.b16 %v6014_v30 }
 0x449   : > { %v6225_v52 = vpack.c.b16 %v6202_v19, %v6201_v60  ;;  %v6055_v19 = vrot.slane %v6053_v22, 4 }
 0x44a   : > { %10574 = vmatmul.msk.bf16.gmra.mxu2 %vm1373_vm10, %v10937_v62 }
 0x44b   : > { %10492 = vmatmul.msk.bf16.gmra.mxu1 %vm1373_vm10, %v6223_v36  ;;  %v6019_v36 = vshll.u32 %v5768_v10, 16 }
 0x44c   : > { %v6863_v44 = vpop.f32.mrf.mxu3 }
 0x44d   : > { %10688 = vmatmul.msk.bf16.gmra.mxu0 %vm1373_vm10, %v10953_v5  ;;  %v6021_v7 = vrot.slane %v6019_v36, 5  ;;  %v6714_v36 = vsel %vm11800_vm1, %v10592_v57, %v6713_v39 }
 0x44e   : > { %10606 = vmatmul.msk.bf16.gmra.mxu3 %vm1373_vm10, %v6794_v11  ;;  %v6710_v11 = vsel %vm11800_vm1, %v6708_v61, %v6709_v0  ;;  %v6045_v0 = vrot.slane %v6043_v34, 5 }
 0x44f   : > { %v6774_v62 = vunpack.c.l.b16 %v6710_v11  ;;  %v6022_v55 = vor.u32 %v6021_v7, %v6018_v53  ;;  %v6775_v53 = vunpack.c.l.b16 %v6714_v36 }
 0x451   : > { %v6796_v6 = vpack.c.b16 %v6774_v62, %v6773_v4  ;;  %v6059_v62 = vshll.u32 %v5793_v15, 16  ;;  %v6056_v4 = vor.u32 %v6055_v19, %v6051_v33 }
 0x454   : > { %v6865_v16 = vpop.f32.mrf.mxu3 }
 0x457   : > { %v6518_v5 = vpop.f32.mrf.mxu2 }
 0x45a   : > { %10575 = vmatmul.msk.bf16.gmra.mxu2 %vm1373_vm10, %v10938_v21 }
 0x45b   : > { %10493 = vmatmul.msk.bf16.gmra.mxu1 %vm1373_vm10, %v6224_v59  ;;  %v6037_v59 = vrot.slane %v6035_v18, 5  ;;  %v10940_v18 = vld [vmem:[#allocation3 + $0x84] sm:$0xff] }
 0x45d   : > { %10689 = vmatmul.msk.bf16.gmra.mxu0 %vm1373_vm10, %v10954_v41  ;;  %v6716_v41 = vrot.slane %v5793_v15, 5  ;;  %v6038_v10 = vsel %vm11287_vm13, %v6033_v2, %v6037_v59  ;;  %v6064_v59 = vshrl.u32 %v5772_v8, 16 }
 0x45e   : > { %10607 = vmatmul.msk.bf16.gmra.mxu3 %vm1373_vm10, %v6795_v25  ;;  %v6204_v42 = vunpack.c.l.b16 %v6038_v10 }
 0x45f   : > { %v6520_v46 = vpop.f32.mrf.mxu2  ;;  %v6717_v21 = vsel %vm11800_vm1, %v6715_v29, %v6716_v41 }
 0x460   : > { %v6776_v61 = vunpack.c.l.b16 %v6717_v21 }
 0x467   : > { %v6293_v17 = vpop.f32.mrf.mxu1 }
 0x468   : > { %v6514_v31 = vadd.f32 %v13995_v58, %v6293_v17  ;;  %v6023_v58 = vrot.slane %v6022_v55, 4  ;;  %v6797_v17 = vpack.c.b16 %v6776_v61, %v6775_v53  ;;  %v5794_v55 = vld [vmem:[#allocation3 + $0x8c] sm:$0x1] }
 0x469   : > { %v6723_v39 = vrot.slane %v5794_v55, 5 }
 0x46a   : > { %v14023_v1 = vpop.f32.mrf.mxu0  ;;  %v14025_v23 = vadd.f32 %v6863_v44, %v6514_v31  ;;  %v6028_v25 = vsel %vm11287_vm13, %v6023_v58, %v6027_v48  ;;  %10576 = vmatmul.msk.bf16.gmra.mxu2 %vm1373_vm10, %v10939_v35  ;;  %v6040_v44 = vshrl.u32 %v5770_v12, 16  ;;  %v5773_v31 = vld [vmem:[#allocation3 + $0x88] sm:$0xf]  ;;  %v6057_v12 = vrot.slane %v6056_v4, 4 }
 0x46b   : > { %10494 = vmatmul.msk.bf16.gmra.mxu1 %vm1373_vm10, %v6225_v52  ;;  %v6720_v48 = vrot.slane %v5773_v31, 5  ;;  %v6067_v35 = vshll.u32 %v5772_v8, 16  ;;  %v6073_v57 = vshll.u32 %v5773_v31, 16  ;;  %v6077_v29 = vshrl.u32 %v5773_v31, 16  ;;  %v5774_v31 = vld [vmem:[#allocation3 + $0x90] sm:$0xf] }
 0x46c   : > { %v6042_v27 = vrot.slane %v6040_v44, 4  ;;  %v6066_v44 = vrot.slane %v6064_v59, 4  ;;  %v6605_v8 = vld [vmem:[#allocation3 + $0x90] sm:$0xe] }
 0x46d   : > { %10690 = vmatmul.msk.bf16.gmra.mxu0 %vm1373_vm10, %v10955_v47  ;;  %v6523_v3 = vpop.f32.mrf.mxu2  ;;  %v6069_v34 = vrot.slane %v6067_v35, 5  ;;  %v6075_v61 = vrot.slane %v6073_v57, 5 }
 0x46e   : > { %10608 = vmatmul.msk.bf16.gmra.mxu3 %vm1373_vm10, %v6796_v6  ;;  %v6046_v24 = vor.u32 %v6045_v0, %v6042_v27  ;;  %v6061_v6 = vrot.slane %v6059_v62, 5 }
 0x46f   : > { %v6295_v32 = vpop.f32.mrf.mxu1 }
 0x470   : > { %v6516_v43 = vadd.f32 %v6515_v28, %v6295_v32  ;;  %v6203_v28 = vunpack.c.l.b16 %v6028_v25  ;;  %v6062_v41 = vsel %vm11287_vm13, %v6057_v12, %v6061_v6  ;;  %v10594_v12 = vrot.slane %v6605_v8, 9  ;;  %v6606_v8 = vld [vmem:[#allocation3 + $0x9c] sm:$0xe] }
 0x471   : > { %v6868_v40 = vpop.f32.mrf.mxu3  ;;  %v6206_v10 = vunpack.c.l.b16 %v6062_v41 }
 0x472   : > { %v14032_v38 = vpop.f32.mrf.mxu0  ;;  %v14035_v56 = vadd.f32 %v6865_v16, %v6516_v43  ;;  %v6226_v60 = vpack.c.b16 %v6204_v42, %v6203_v28  ;;  %v10593_v43 = vrot.slane %v6604_v14, 9 }
 0x474   : > { %v6721_v28 = vsel %vm11800_vm1, %v10593_v43, %v6720_v48 }
 0x475   : > { %v6525_v52 = vpop.f32.mrf.mxu2  ;;  %v6777_v42 = vunpack.c.l.b16 %v6721_v28 }
 0x478   : > { %v6298_v37 = vpop.f32.mrf.mxu1 }
 0x479   : > { %v6519_v30 = vadd.f32 %v6518_v5, %v6298_v37  ;;  %v6870_v11 = vpop.f32.mrf.mxu3  ;;  %v6047_v5 = vrot.slane %v6046_v24, 4  ;;  %v6070_v37 = vor.u32 %v6069_v34, %v6066_v44  ;;  %v6083_v24 = vshll.u32 %v5794_v55, 16 }
 0x47a   : > { %v14043_v7 = vpop.f32.mrf.mxu0  ;;  %10577 = vmatmul.msk.bf16.gmra.mxu2 %vm1373_vm10, %v10940_v18 }
 0x47b   : > { %v14045_v16 = vadd.f32 %v6868_v40, %v6519_v30  ;;  %10495 = vmatmul.msk.bf16.gmra.mxu1 %vm1373_vm10, %v6226_v60  ;;  %v6052_v15 = vsel %vm11287_vm13, %v6047_v5, %v6051_v33  ;;  %v6722_v40 = vrot.slane %v6720_v48, 4  ;;  %v6079_v30 = vrot.slane %v6077_v29, 4  ;;  %v5775_v33 = vld [vmem:[#allocation3 + $0x94] sm:$0xf] }
 0x47c   : > { %v6727_v62 = vrot.slane %v5775_v33, 5  ;;  %v6085_v4 = vrot.slane %v6083_v24, 5  ;;  %v10941_v48 = vld [vmem:[#allocation3 + $0x90] sm:$0xff]  ;;  %v6101_v44 = vshrl.u32 %v5775_v33, 16  ;;  %v5777_v24 = vld [vmem:[#allocation3 + $0xa0] sm:$0xf] }
 0x47d   : > { %10691 = vmatmul.msk.bf16.gmra.mxu0 %vm1373_vm10, %v10956_v20  ;;  %v6528_v25 = vpop.f32.mrf.mxu2  ;;  %v6724_v2 = vsel %vm11800_vm1, %v6722_v40, %v6723_v39  ;;  %v6080_v20 = vor.u32 %v6079_v30, %v6075_v61  ;;  %v6091_v39 = vshll.u32 %v5774_v31, 16  ;;  %v10958_v30 = vld [vmem:[#allocation3 + $0xa8] sm:$0xff] }
 0x47e   : > { %10609 = vmatmul.msk.bf16.gmra.mxu3 %vm1373_vm10, %v6797_v17  ;;  %v6778_v27 = vunpack.c.l.b16 %v6724_v2  ;;  %v5795_v17 = vld [vmem:[#allocation3 + $0x98] sm:$0x1]  ;;  %v6729_v59 = vrot.slane %v6727_v62, 4  ;;  %v6097_v2 = vshll.u32 %v5775_v33, 16  ;;  %v6728_v57 = vsel %vm11800_vm1, %v10594_v12, %v6727_v62 }
 0x47f   : > { %v6730_v18 = vrot.slane %v5795_v17, 5  ;;  %v6081_v14 = vrot.slane %v6080_v20, 4  ;;  %v5796_v20 = vld [vmem:[#allocation3 + $0xa4] sm:$0x1]  ;;  %v6734_v62 = vrot.slane %v5777_v24, 5  ;;  %v10595_v12 = vrot.slane %v6606_v8, 9 }
 0x480   : > { %v6300_v47 = vpop.f32.mrf.mxu1  ;;  %v6798_v53 = vpack.c.b16 %v6778_v27, %v6777_v42  ;;  %v6103_v42 = vrot.slane %v6101_v44, 4  ;;  %v6121_v44 = vshll.u32 %v5777_v24, 16  ;;  %v6607_v8 = vld [vmem:[#allocation3 + $0xa8] sm:$0xe] }
 0x481   : > { %v6521_v58 = vadd.f32 %v6520_v46, %v6300_v47  ;;  %v6873_v51 = vpop.f32.mrf.mxu3  ;;  %v6205_v46 = vunpack.c.l.b16 %v6052_v15  ;;  %v6086_v35 = vsel %vm11287_vm13, %v6081_v14, %v6085_v4  ;;  %v6731_v40 = vsel %vm11800_vm1, %v6729_v59, %v6730_v18 }
 0x482   : > { %v14052_v32 = vpop.f32.mrf.mxu0  ;;  %v6208_v34 = vunpack.c.l.b16 %v6086_v35  ;;  %v6737_v18 = vrot.slane %v5796_v20, 5  ;;  %v6736_v59 = vrot.slane %v6734_v62, 4 }
 0x483   : > { %v14055_v45 = vadd.f32 %v6870_v11, %v6521_v58  ;;  %v6227_v26 = vpack.c.b16 %v6206_v10, %v6205_v46  ;;  %v10957_v11 = vld [vmem:[#allocation3 + $0x9c] sm:$0xff]  ;;  %v6093_v46 = vrot.slane %v6091_v39, 5  ;;  %v6780_v10 = vunpack.c.l.b16 %v6731_v40 }
 0x485   : > { %v6530_v19 = vpop.f32.mrf.mxu2 }
 0x488   : > { %v6303_v21 = vpop.f32.mrf.mxu1 }
 0x489   : > { %v6524_v0 = vadd.f32 %v6523_v3, %v6303_v21  ;;  %v6875_v22 = vpop.f32.mrf.mxu3  ;;  %v6071_v3 = vrot.slane %v6070_v37, 4 }
 0x48a   : > { %v14063_v36 = vpop.f32.mrf.mxu0  ;;  %10578 = vmatmul.msk.bf16.gmra.mxu2 %vm1373_vm10, %v10941_v48  ;;  %v10942_v48 = vld [vmem:[#allocation3 + $0x9c] sm:$0xff] }
 0x48b   : > { %v14065_v60 = vadd.f32 %v6873_v51, %v6524_v0  ;;  %10496 = vmatmul.msk.bf16.gmra.mxu1 %vm1373_vm10, %v6227_v26  ;;  %v6076_v55 = vsel %vm11287_vm13, %v6071_v3, %v6075_v61  ;;  %v6088_v51 = vshrl.u32 %v5774_v31, 16  ;;  %v6779_v0 = vunpack.c.l.b16 %v6728_v57  ;;  %v5776_v31 = vld [vmem:[#allocation3 + $0x9c] sm:$0xf] }
 0x48c   : > { %v6112_v14 = vshrl.u32 %v5776_v31, 16 }
 0x48d   : > { %10692 = vmatmul.msk.bf16.gmra.mxu0 %vm1373_vm10, %v10957_v11  ;;  %v6533_v43 = vpop.f32.mrf.mxu2  ;;  %v6090_v41 = vrot.slane %v6088_v51, 4  ;;  %v6799_v11 = vpack.c.b16 %v6780_v10, %v6779_v0  ;;  %v6115_v51 = vshll.u32 %v5776_v31, 16  ;;  %v6131_v31 = vshll.u32 %v5796_v20, 16 }
 0x48e   : > { %10610 = vmatmul.msk.bf16.gmra.mxu3 %vm1373_vm10, %v6798_v53  ;;  %v6107_v53 = vshll.u32 %v5795_v17, 16 }
 0x48f   : > { %v6094_v26 = vor.u32 %v6093_v46, %v6090_v41  ;;  %v6738_v41 = vsel %vm11800_vm1, %v6736_v59, %v6737_v18  ;;  %v6114_v46 = vrot.slane %v6112_v14, 4  ;;  %v10943_v18 = vld [vmem:[#allocation3 + $0xa8] sm:$0xff] }
 0x490   : > { %v6305_v5 = vpop.f32.mrf.mxu1  ;;  %v6109_v4 = vrot.slane %v6107_v53, 5 }
 0x491   : > { %v6526_v47 = vadd.f32 %v6525_v52, %v6305_v5  ;;  %v6878_v6 = vpop.f32.mrf.mxu3  ;;  %v6207_v52 = vunpack.c.l.b16 %v6076_v55 }
 0x492   : > { %v14072_v58 = vpop.f32.mrf.mxu0 }
 0x493   : > { %v14075_v15 = vadd.f32 %v6875_v22, %v6526_v47  ;;  %v6228_v21 = vpack.c.b16 %v6208_v34, %v6207_v52  ;;  %v6099_v22 = vrot.slane %v6097_v2, 5  ;;  %v6117_v2 = vrot.slane %v6115_v51, 5 }
 0x494   : > { %v6125_v34 = vshrl.u32 %v5777_v24, 16  ;;  %v14110_v24 = vld [vmem:[#allocation3 + $0xb0] sm:$0x1] }
 0x495   : > { %v14089_v33 = vpop.f32.mrf.mxu2  ;;  %v6104_v3 = vor.u32 %v6103_v42, %v6099_v22  ;;  %v6118_v42 = vor.u32 %v6117_v2, %v6114_v46 }
 0x497   : > { %v6105_v55 = vrot.slane %v6104_v3, 4 }
 0x498   : > { %v6308_v29 = vpop.f32.mrf.mxu1 }
 0x499   : > { %v6529_v28 = vadd.f32 %v6528_v25, %v6308_v29  ;;  %v6880_v27 = vpop.f32.mrf.mxu3  ;;  %v6095_v25 = vrot.slane %v6094_v26, 4  ;;  %v6110_v35 = vsel %vm11287_vm13, %v6105_v55, %v6109_v4  ;;  %v6735_v29 = vsel %vm11800_vm1, %v10595_v12, %v6734_v62  ;;  %v5779_v26 = vld [vmem:[#allocation3 + $0xac] sm:$0xf]  ;;  %v8599_v12 = vld [vmem:[#allocation3 + $0x18] sm:$0xf] }
 0x49a   : > { %v14086_v61 = vpop.f32.mrf.mxu0  ;;  %10579 = vmatmul.msk.bf16.gmra.mxu2 %vm1373_vm10, %v10942_v48  ;;  %v6210_v57 = vunpack.c.l.b16 %v6110_v35  ;;  %v6741_v62 = vrot.slane %v5779_v26, 5  ;;  %v6119_v4 = vrot.slane %v6118_v42, 4  ;;  %v6133_v55 = vrot.slane %v6131_v31, 5  ;;  %v6608_v31 = vld [vmem:[#allocation3 + $0xb4] sm:$0xe] }
 0x49b   : > { %v14083_v37 = vadd.f32 %v6878_v6, %v6529_v28  ;;  %10497 = vmatmul.msk.bf16.gmra.mxu1 %vm1373_vm10, %v6228_v21  ;;  %15859 = vst [vmem:[#allocation9_spill] sm:$0xff] %v14086_v61  ;;  %v6100_v17 = vsel %vm11287_vm13, %v6095_v25, %v6099_v22  ;;  %v6782_v28 = vunpack.c.l.b16 %v6738_v41  ;;  %v6781_v22 = vunpack.c.l.b16 %v6735_v29  ;;  %v10959_v25 = vld [vmem:[#allocation3 + $0xb4] sm:$0xff] }
 0x49c   : > { %v6209_v52 = vunpack.c.l.b16 %v6100_v17  ;;  %v6743_v14 = vrot.slane %v6741_v62, 4  ;;  %v10827_v29 = vld [vmem:[%s15575_s2 + $0xe] sm:$0x3] }
 0x49d   : > { %10693 = vmatmul.msk.bf16.gmra.mxu0 %vm1373_vm10, %v10958_v30  ;;  %v6123_v30 = vrot.slane %v6121_v44, 5  ;;  %v6800_v3 = vpack.c.b16 %v6782_v28, %v6781_v22  ;;  %v6145_v44 = vshll.u32 %v5779_v26, 16  ;;  %v9130_v22 = vsel %vm1422_vm0, %v10827_v29, 0  ;;  %v8601_v29 = vld [vmem:[#allocation3 + $0x20] sm:$0x1] }
 0x49e   : > { %10611 = vmatmul.msk.bf16.gmra.mxu3 %vm1373_vm10, %v6799_v11  ;;  %v6127_v11 = vrot.slane %v6125_v34, 4  ;;  %9139 = vmatpush.bf16.msra.mxu0 %v9130_v22 }
 0x49f   : > { %v6124_v41 = vsel %vm11287_vm13, %v6119_v4, %v6123_v30 }
 0x4a0   : > { %v6310_v5 = vpop.f32.mrf.mxu1  ;;  %v6128_v48 = vor.u32 %v6127_v11, %v6123_v30  ;;  %v6211_v42 = vunpack.c.l.b16 %v6124_v41  ;;  %v10960_v41 = vld [vmem:[#allocation3 + $0xc0] sm:$0xff] }
 0x4a1   : > { %v6531_v47 = vadd.f32 %v6530_v19, %v6310_v5  ;;  %v6883_v6 = vpop.f32.mrf.mxu3  ;;  %v14101_v19 = vpop.f32.mrf.mxu2  ;;  %v5778_v5 = vld [vmem:[#allocation3 + $0xa8] sm:$0xf] }
 0x4a2   : > { %v14099_v40 = vpop.f32.mrf.mxu0  ;;  %v6136_v20 = vshrl.u32 %v5778_v5, 16  ;;  %v6139_v51 = vshll.u32 %v5778_v5, 16  ;;  %v6129_v46 = vrot.slane %v6128_v48, 4 }
 0x4a3   : > { %v14095_v39 = vadd.f32 %v6880_v27, %v6531_v47  ;;  %15860 = vst [vmem:[#allocation6_spill] sm:$0xff] %v14099_v40  ;;  %v6229_v27 = vpack.c.b16 %v6210_v57, %v6209_v52  ;;  %v6744_v47 = vrot.slane %v14110_v24, 5  ;;  %v10596_v52 = vrot.slane %v6607_v8, 9 }
 0x4a4   : > { %v6149_v57 = vshrl.u32 %v5779_v26, 16  ;;  %v6134_v28 = vsel %vm11287_vm13, %v6129_v46, %v6133_v55  ;;  %v8600_v26 = vld [vmem:[#allocation3 + $0x1c] sm:$0xf]  ;;  %v6155_v46 = vshll.u32 %v14110_v24, 16 }
 0x4a5   : > { %v6745_v2 = vsel %vm11800_vm1, %v6743_v14, %v6744_v47  ;;  %v6212_v5 = vunpack.c.l.b16 %v6134_v28  ;;  %v8657_v55 = vshll.u32 %v8600_v26, 16  ;;  %v8661_v14 = vshrl.u32 %v8600_v26, 16 }
 0x4a6   : > { %v6784_v11 = vunpack.c.l.b16 %v6745_v2  ;;  %v6151_v4 = vrot.slane %v6149_v57, 4  ;;  %v8667_v26 = vshll.u32 %v8601_v29, 16  ;;  %v8602_v29 = vld [vmem:[#allocation3 + $0x24] sm:$0xf] }
 0x4a7   : > { %v8663_v22 = vrot.slane %v8661_v14, 4 }
 0x4a8   : > { %v6313_v10 = vpop.f32.mrf.mxu1 }
 0x4a9   : > { %v6534_v21 = vadd.f32 %v6533_v43, %v6313_v10  ;;  %v6885_v0 = vpop.f32.mrf.mxu3  ;;  %v14113_v43 = vpop.f32.mrf.mxu2  ;;  %v8651_v10 = vshll.u32 %v8599_v12, 16 }
 0x4aa   : > { %10580 = vmatmul.msk.bf16.gmra.mxu2 %vm1373_vm10, %v10943_v18 }
 0x4ab   : > { %v14107_v53 = vadd.f32 %v6883_v6, %v6534_v21  ;;  %10498 = vmatmul.msk.bf16.gmra.mxu1 %vm1373_vm10, %v6229_v27  ;;  %v14117_v6 = vpop.f32.mrf.mxu0  ;;  %v6138_v21 = vrot.slane %v6136_v20, 4  ;;  %v6141_v27 = vrot.slane %v6139_v51, 5  ;;  %v8653_v8 = vrot.slane %v8651_v10, 5  ;;  %v10729_v10 = vld [vmem:[%s15575_s2 + $0xa] sm:$0x3] }
 0x4ac   : > { %15861 = vst [vmem:[#allocation31_spill] sm:$0xff] %v14117_v6  ;;  %v8190_v24 = vsel %vm1422_vm0, %v10729_v10, 0 }
 0x4ad   : > { %10694 = vmatmul.msk.bf16.gmra.mxu0 %vm1373_vm10, %v10959_v25  ;;  %v14137_v25 = vrot.slane %v6145_v44, 5  ;;  %8199 = vmatpush.bf16.msra.mxu2 %v8190_v24  ;;  %v10746_v24 = vld [vmem:[%s15575_s2 + $0xc] sm:$0x3] }
 0x4ae   : > { %10612 = vmatmul.msk.bf16.gmra.mxu3 %vm1373_vm10, %v6800_v3  ;;  %v14139_v3 = vld [vmem:[#allocation3 + $0xb8] sm:$0xf] }
 0x4af   : > { %v6152_v57 = vor.u32 %v6151_v4, %v14137_v25 }
 0x4b0   : > { %v6315_v17 = vpop.f32.mrf.mxu1 }
 0x4b1   : > { %v6536_v59 = vadd.f32 %v14089_v33, %v6315_v17  ;;  %v6888_v35 = vpop.f32.mrf.mxu3  ;;  %v8648_v33 = vshrl.u32 %v8599_v12, 16  ;;  %v14133_v30 = vpop.f32.mrf.mxu2  ;;  %v6142_v17 = vor.u32 %v6141_v27, %v6138_v21  ;;  %v14153_v21 = vld [vmem:[#allocation3 + $0xbc] sm:$0x1]  ;;  %v8659_v27 = vrot.slane %v8657_v55, 5 }
 0x4b2   : > { %v6153_v4 = vrot.slane %v6152_v57, 4 }
 0x4b3   : > { %v14125_v34 = vadd.f32 %v6885_v0, %v6536_v59  ;;  %v6742_v0 = vsel %vm11800_vm1, %v10596_v52, %v6741_v62  ;;  %v8650_v48 = vrot.slane %v8648_v33, 4  ;;  %v6230_v62 = vpack.c.b16 %v6212_v5, %v6211_v42  ;;  %v14142_v51 = vpop.f32.mrf.mxu0  ;;  %v14164_v5 = vld [vmem:[#allocation3 + $0x10] sm:$0xf] }
 0x4b4   : > { %v6783_v18 = vunpack.c.l.b16 %v6742_v0  ;;  %15862 = vst [vmem:[#allocation5_spill] sm:$0xff] %v14142_v51  ;;  %v10597_v59 = vrot.slane %v6608_v31, 9  ;;  %v6748_v52 = vrot.slane %v14139_v3, 5  ;;  %v6143_v28 = vrot.slane %v6142_v17, 4  ;;  %v10944_v17 = vld [vmem:[#allocation3 + $0xb4] sm:$0xff] }
 0x4b5   : > { %v8654_v33 = vor.u32 %v8653_v8, %v8650_v48  ;;  %v6157_v0 = vrot.slane %v6155_v46, 5  ;;  %v6751_v48 = vrot.slane %v14153_v21, 5  ;;  %v6169_v46 = vshll.u32 %v14139_v3, 16 }
 0x4b6   : > { %v6801_v44 = vpack.c.b16 %v6784_v11, %v6783_v18  ;;  %v14161_v42 = vsel %vm11800_vm1, %v10597_v59, %v6748_v52  ;;  %v6148_v18 = vsel %vm11287_vm13, %v6143_v28, %v14137_v25  ;;  %v6750_v55 = vrot.slane %v6748_v52, 4 }
 0x4b7   : > { %v8655_v8 = vrot.slane %v8654_v33, 4  ;;  %v6785_v14 = vunpack.c.l.b16 %v14161_v42  ;;  %v7981_v57 = vrot.slane %v14164_v5, 5  ;;  %v6158_v25 = vsel %vm11287_vm13, %v6153_v4, %v6157_v0  ;;  %v7915_v0 = vld [vmem:[#allocation3 + $0xc] sm:$0xe] }
 0x4b8   : > { %v6318_v47 = vpop.f32.mrf.mxu1  ;;  %v8669_v52 = vrot.slane %v8667_v26, 5  ;;  %v8476_v26 = vsel %vm1422_vm0, %v10746_v24, 0  ;;  %v10713_v24 = vrot.slane %v7915_v0, 9  ;;  %v8604_v0 = vld [vmem:[#allocation3 + $0x2c] sm:$0x1] }
 0x4b9   : > { %v6539_v20 = vadd.f32 %v14101_v19, %v6318_v47  ;;  %v6890_v12 = vpop.f32.mrf.mxu3  ;;  %v5780_v19 = vld [vmem:[#allocation3 + $0xb4] sm:$0xf]  ;;  %8485 = vmatpush.bf16.msra.mxu3 %v8476_v26 }
 0x4ba   : > { %v6160_v11 = vshrl.u32 %v5780_v19, 16  ;;  %v6163_v31 = vshll.u32 %v5780_v19, 16  ;;  %10581 = vmatmul.msk.bf16.gmra.mxu2 %vm1373_vm10, %v10944_v17  ;;  %v7983_v17 = vrot.slane %v7981_v57, 4 }
 0x4bb   : > { %v14146_v2 = vadd.f32 %v6888_v35, %v6539_v20  ;;  %10499 = vmatmul.msk.bf16.gmra.mxu1 %vm1373_vm10, %v6230_v62  ;;  %v14157_v35 = vpop.f32.mrf.mxu2  ;;  %v8664_v20 = vor.u32 %v8663_v22, %v8659_v27  ;;  %v14171_v62 = vld [vmem:[#allocation3 + $0x14] sm:$0x1]  ;;  %v14182_v28 = vpop.f32.mrf.mxu0 }
 0x4bc   : > { %v6162_v33 = vrot.slane %v6160_v11, 4  ;;  %v6165_v19 = vrot.slane %v6163_v31, 5  ;;  %15864 = vst [vmem:[#allocation29_spill] sm:$0xff] %v14182_v28  ;;  %v7984_v22 = vrot.slane %v14171_v62, 5  ;;  %v8675_v11 = vshll.u32 %v8602_v29, 16 }
 0x4bd   : > { %10695 = vmatmul.msk.bf16.gmra.mxu0 %vm1373_vm10, %v10960_v41  ;;  %v8665_v42 = vrot.slane %v8664_v20, 4  ;;  %v6213_v31 = vunpack.c.l.b16 %v6148_v18  ;;  %v6179_v20 = vshll.u32 %v14153_v21, 16  ;;  %v6214_v28 = vunpack.c.l.b16 %v6158_v25 }
 0x4be   : > { %10613 = vmatmul.msk.bf16.gmra.mxu3 %vm1373_vm10, %v6801_v44  ;;  %v6173_v44 = vshrl.u32 %v14139_v3, 16  ;;  %v8660_v3 = vsel %vm11287_vm13, %v8655_v8, %v8659_v27  ;;  %v8603_v27 = vld [vmem:[#allocation3 + $0x28] sm:$0xf]  ;;  %v7985_v18 = vsel %vm11800_vm1, %v7983_v17, %v7984_v22  ;;  %v7982_v22 = vsel %vm11800_vm1, %v10713_v24, %v7981_v57  ;;  %v14220_v24 = vld [vmem:[#allocation3 + $0x1c] sm:$0xf] }
 0x4bf   : > { %v9033_v51 = vunpack.c.l.b16 %v8660_v3  ;;  %v8685_v40 = vshrl.u32 %v8603_v27, 16  ;;  %v6181_v21 = vrot.slane %v6179_v20, 5  ;;  %v8093_v57 = vunpack.c.l.b16 %v7982_v22 }
 0x4c0   : > { %v6320_v47 = vpop.f32.mrf.mxu1  ;;  %v7988_v22 = vrot.slane %v14220_v24, 5 }
 0x4c1   : > { %v6541_v59 = vadd.f32 %v14113_v43, %v6320_v47  ;;  %v6893_v41 = vpop.f32.mrf.mxu3  ;;  %v6752_v43 = vsel %vm11800_vm1, %v6750_v55, %v6751_v48  ;;  %v6171_v47 = vrot.slane %v6169_v46, 5  ;;  %v6175_v48 = vrot.slane %v6173_v44, 4 }
 0x4c2   : > { %v6786_v8 = vunpack.c.l.b16 %v6752_v43  ;;  %v8670_v55 = vsel %vm11287_vm13, %v8665_v42, %v8669_v52  ;;  %v8677_v46 = vrot.slane %v8675_v11, 5  ;;  %v8681_v44 = vshll.u32 %v8603_v27, 16 }
 0x4c3   : > { %v14180_v10 = vadd.f32 %v6890_v12, %v6541_v59  ;;  %v8672_v12 = vshrl.u32 %v8602_v29, 16  ;;  %v14193_v4 = vpop.f32.mrf.mxu2  ;;  %v6166_v59 = vor.u32 %v6165_v19, %v6162_v33  ;;  %v6231_v43 = vpack.c.b16 %v6214_v28, %v6213_v31 }
 0x4c4   : > { %v9034_v61 = vunpack.c.l.b16 %v8670_v55  ;;  %v6176_v52 = vor.u32 %v6175_v48, %v6171_v47  ;;  %v6802_v33 = vpack.c.b16 %v6786_v8, %v6785_v14  ;;  %v8094_v42 = vunpack.c.l.b16 %v7985_v18  ;;  %v7261_v14 = vld [vmem:[#allocation3 + $0xc] sm:$0xf] }
 0x4c5   : > { %15863 = vst [vmem:[#allocation7_spill] sm:$0xff] %v14180_v10  ;;  %v8674_v6 = vrot.slane %v8672_v12, 4  ;;  %v6167_v19 = vrot.slane %v6166_v59, 4  ;;  %v8683_v12 = vrot.slane %v8681_v44, 5  ;;  %v8687_v11 = vrot.slane %v8685_v40, 4 }
 0x4c6   : > { %v9065_v3 = vpack.c.b16 %v9034_v61, %v9033_v51  ;;  %v6177_v61 = vrot.slane %v6176_v52, 4  ;;  %v8691_v48 = vshll.u32 %v8604_v0, 16  ;;  %v7310_v17 = vshrl.u32 %v7261_v14, 16  ;;  %v7916_v0 = vld [vmem:[#allocation3 + $0x18] sm:$0xe] }
 0x4c7   : > { %v8678_v28 = vor.u32 %v8677_v46, %v8674_v6  ;;  %v6172_v6 = vsel %vm11287_vm13, %v6167_v19, %v6171_v47  ;;  %v7313_v27 = vshll.u32 %v7261_v14, 16  ;;  %v8125_v55 = vpack.c.b16 %v8094_v42, %v8093_v57 }
 0x4c8   : > { %v6323_v29 = vpop.f32.mrf.mxu1  ;;  %v6182_v40 = vsel %vm11287_vm13, %v6177_v61, %v6181_v21  ;;  %v8688_v20 = vor.u32 %v8687_v11, %v8683_v12  ;;  %v7319_v46 = vshll.u32 %v14164_v5, 16  ;;  %v7323_v44 = vshrl.u32 %v14164_v5, 16  ;;  %v8606_v61 = vld [vmem:[#allocation3 + $0x34] sm:$0xf] }
 0x4c9   : > { %v6544_v26 = vadd.f32 %v14133_v30, %v6323_v29  ;;  %v6895_v10 = vpop.f32.mrf.mxu3  ;;  %v10860_v30 = vld [vmem:[%s15575_s2 + $0x10] sm:$0x3]  ;;  %v8679_v59 = vrot.slane %v8678_v28, 4  ;;  %v6215_v47 = vunpack.c.l.b16 %v6172_v6  ;;  %v8693_v52 = vrot.slane %v8691_v48, 5 }
 0x4ca   : > { %v9528_v31 = vsel %vm1422_vm0, %v10860_v30, 0  ;;  %10730 = vmatmul.msk.bf16.vlgmr.msra.gmra.mxu2 %vm1373_vm10, %v8125_v55  ;;  %v7312_v21 = vrot.slane %v7310_v17, 4  ;;  %v8689_v42 = vrot.slane %v8688_v20, 4  ;;  %v7321_v11 = vrot.slane %v7319_v46, 5 }
 0x4cb   : > { %v14201_v25 = vadd.f32 %v6893_v41, %v6544_v26  ;;  %10500 = vmatmul.msk.bf16.gmra.mxu1 %vm1373_vm10, %v6231_v43  ;;  %v14210_v41 = vpop.f32.mrf.mxu0  ;;  %v14213_v51 = vpop.f32.mrf.mxu2  ;;  %v8605_v26 = vld [vmem:[#allocation3 + $0x30] sm:$0xf]  ;;  %v6216_v43 = vunpack.c.l.b16 %v6182_v40  ;;  %v7325_v14 = vrot.slane %v7323_v44, 4  ;;  %v7329_v48 = vshll.u32 %v14171_v62, 16 }
 0x4cc   : > { %15865 = vst [vmem:[#allocation32_spill] sm:$0xff] %v14210_v41  ;;  %9537 = vmatpush.bf16.msra.mxu1 %v9528_v31  ;;  %v8696_v5 = vshrl.u32 %v8605_v26, 16  ;;  %v8699_v30 = vshll.u32 %v8605_v26, 16  ;;  %v8694_v57 = vsel %vm11287_vm13, %v8689_v42, %v8693_v52  ;;  %v10714_v17 = vrot.slane %v7916_v0, 9  ;;  %v8607_v42 = vld [vmem:[#allocation3 + $0x38] sm:$0x1] }
 0x4cd   : > { %10828 = vmatmul.msk.bf16.vlgmr.msra.gmra.mxu0 %vm1373_vm10, %v9065_v3  ;;  %v7315_v3 = vrot.slane %v7313_v27, 5  ;;  %v7990_v27 = vrot.slane %v7988_v22, 4  ;;  %v8705_v20 = vshll.u32 %v8606_v61, 16  ;;  %v9036_v26 = vunpack.c.l.b16 %v8694_v57  ;;  %v10961_v0 = vld [vmem:[#allocation3 + $0x18] sm:$0xff] }
 0x4ce   : > { %10614 = vmatmul.msk.bf16.gmra.mxu3 %vm1373_vm10, %v6802_v33  ;;  %v14226_v33 = vld [vmem:[#allocation3 + $0x20] sm:$0x1]  ;;  %v8698_v55 = vrot.slane %v8696_v5, 4  ;;  %v7331_v62 = vrot.slane %v7329_v48, 5  ;;  %v8715_v57 = vshll.u32 %v8607_v42, 16 }
 0x4cf   : > { %v7991_v31 = vrot.slane %v14226_v33, 5  ;;  %v7316_v40 = vor.u32 %v7315_v3, %v7312_v21 }
 0x4d0   : > { %v6325_v8 = vpop.f32.mrf.mxu1 }
 0x4d1   : > { %v6546_v18 = vadd.f32 %v14157_v35, %v6325_v8  ;;  %v6898_v29 = vpop.f32.mrf.mxu3  ;;  %v8684_v35 = vsel %vm11287_vm13, %v8679_v59, %v8683_v12  ;;  %v8701_v59 = vrot.slane %v8699_v30, 5  ;;  %v7317_v3 = vrot.slane %v7316_v40, 4 }
 0x4d2   : > { %v9035_v12 = vunpack.c.l.b16 %v8684_v35  ;;  %v7989_v35 = vsel %vm11800_vm1, %v10714_v17, %v7988_v22  ;;  %v8707_v30 = vrot.slane %v8705_v20, 5 }
 0x4d3   : > { %v14228_v19 = vadd.f32 %v6895_v10, %v6546_v18  ;;  %v14233_v28 = vpop.f32.mrf.mxu2  ;;  %v6232_v10 = vpack.c.b16 %v6216_v43, %v6215_v47  ;;  %v14239_v6 = vpop.f32.mrf.mxu0  ;;  %v8709_v18 = vshrl.u32 %v8606_v61, 16  ;;  %v7326_v47 = vor.u32 %v7325_v14, %v7321_v11  ;;  %v7264_v14 = vld [vmem:[#allocation3 + $0x18] sm:$0xf] }
 0x4d4   : > { %15866 = vst [vmem:[#allocation33_spill] sm:$0xff] %v14239_v6  ;;  %v7992_v43 = vsel %vm11800_vm1, %v7990_v27, %v7991_v31  ;;  %v9066_v21 = vpack.c.b16 %v9036_v26, %v9035_v12  ;;  %v7322_v48 = vsel %vm11287_vm13, %v7317_v3, %v7321_v11  ;;  %v7334_v12 = vshrl.u32 %v7264_v14, 16  ;;  %v14265_v3 = vld [vmem:[#allocation3 + $0x2c] sm:$0x1] }
 0x4d5   : > { %v8096_v5 = vunpack.c.l.b16 %v7992_v43  ;;  %v8711_v61 = vrot.slane %v8709_v18, 4  ;;  %v7337_v40 = vshll.u32 %v7264_v14, 16  ;;  %v7343_v26 = vshll.u32 %v14220_v24, 16 }
 0x4d6   : > { %v7347_v11 = vshrl.u32 %v14220_v24, 16  ;;  %v7695_v43 = vunpack.c.l.b16 %v7322_v48 }
 0x4d8   : > { %v6328_v8 = vpop.f32.mrf.mxu1  ;;  %v7349_v48 = vrot.slane %v7347_v11, 4 }
 0x4d9   : > { %v6549_v46 = vadd.f32 %v14193_v4, %v6328_v8  ;;  %v6900_v44 = vpop.f32.mrf.mxu3  ;;  %v8702_v4 = vor.u32 %v8701_v59, %v8698_v55  ;;  %v8712_v55 = vor.u32 %v8711_v61, %v8707_v30  ;;  %v14257_v59 = vld [vmem:[#allocation3 + $0x28] sm:$0xf] }
 0x4db   : > { %v14244_v52 = vadd.f32 %v6898_v29, %v6549_v46  ;;  %10501 = vmatmul.msk.bf16.gmra.mxu1 %vm1373_vm10, %v6232_v10  ;;  %v14250_v31 = vpop.f32.mrf.mxu2  ;;  %v7327_v29 = vrot.slane %v7326_v47, 4  ;;  %v8095_v10 = vunpack.c.l.b16 %v7989_v35  ;;  %v8703_v8 = vrot.slane %v8702_v4, 4  ;;  %v14259_v20 = vpop.f32.mrf.mxu0  ;;  %v8608_v47 = vld [vmem:[#allocation3 + $0x3c] sm:$0xf]  ;;  %v7917_v35 = vld [vmem:[#allocation3 + $0x24] sm:$0xe] }
 0x4dc   : > { %15868 = vst [vmem:[#allocation34_spill] sm:$0xff] %v14259_v20  ;;  %v5744_v4 = vld [vmem:[#allocation3 + $0xb8] sm:$0xf]  ;;  %v8713_v24 = vrot.slane %v8712_v55, 4  ;;  %v8720_v14 = vshrl.u32 %v8608_v47, 16 }
 0x4dd   : > { %15867 = vst [vmem:[#allocation13_spill] sm:$0xff] %v14244_v52  ;;  %10829 = vmatmul.msk.bf16.gmra.mxu0 %vm1373_vm10, %v9066_v21  ;;  %v7332_v22 = vsel %vm11287_vm13, %v7327_v29, %v7331_v62  ;;  %v8126_v27 = vpack.c.b16 %v8096_v5, %v8095_v10  ;;  %v8717_v21 = vrot.slane %v8715_v57, 5  ;;  %v7339_v5 = vrot.slane %v7337_v40, 5 }
 0x4de   : > { %10811 = vmatmul.msk.bf16.vlgmr.msra.gmra.mxu3 %vm1373_vm10, %v10961_v0  ;;  %v7696_v62 = vunpack.c.l.b16 %v7332_v22  ;;  %v7336_v0 = vrot.slane %v7334_v12, 4  ;;  %v8708_v61 = vsel %vm11287_vm13, %v8703_v8, %v8707_v30  ;;  %v8723_v29 = vshll.u32 %v8608_v47, 16  ;;  %5748 = vst.msk [vmem:[#allocation3 + $0xd0] sm:$0xf] %vm560_vm3, %v5744_v4  ;;  %v8609_v22 = vld [vmem:[#allocation3 + $0x40] sm:$0xf] }
 0x4df   : > { %10731 = vmatmul.msk.bf16.gmra.mxu2 %vm1373_vm10, %v8126_v27  ;;  %v7345_v57 = vrot.slane %v7343_v26, 5  ;;  %v8718_v40 = vsel %vm11287_vm13, %v8713_v24, %v8717_v21  ;;  %v9037_v27 = vunpack.c.l.b16 %v8708_v61  ;;  %v10715_v8 = vrot.slane %v7917_v35, 9  ;;  %v10962_v35 = vld [vmem:[#allocation3 + $0x24] sm:$0xff] }
 0x4e0   : > { %v6330_v17 = vpop.f32.mrf.mxu1  ;;  %v7727_v12 = vpack.c.b16 %v7696_v62, %v7695_v43  ;;  %v7340_v30 = vor.u32 %v7339_v5, %v7336_v0  ;;  %v8722_v47 = vrot.slane %v8720_v14, 4  ;;  %v8725_v4 = vrot.slane %v8723_v29, 5 }
 0x4e1   : > { %v6551_v18 = vadd.f32 %v14213_v51, %v6330_v17  ;;  %v6903_v46 = vpop.f32.mrf.mxu3  ;;  %v7995_v51 = vrot.slane %v14257_v59, 5  ;;  %v7353_v17 = vshll.u32 %v14226_v33, 16  ;;  %v8729_v20 = vshll.u32 %v8609_v22, 16 }
 0x4e2   : > { %v8733_v6 = vshrl.u32 %v8609_v22, 16  ;;  %v9038_v41 = vunpack.c.l.b16 %v8718_v40  ;;  %v7341_v5 = vrot.slane %v7340_v30, 4  ;;  %v8726_v14 = vor.u32 %v8725_v4, %v8722_v47  ;;  %v7267_v22 = vld [vmem:[#allocation3 + $0x24] sm:$0xf] }
 0x4e3   : > { %v14267_v42 = vadd.f32 %v6900_v44, %v6551_v18  ;;  %v14273_v10 = vpop.f32.mrf.mxu2  ;;  %v7998_v44 = vrot.slane %v14265_v3, 5  ;;  %v7997_v55 = vrot.slane %v7995_v51, 4  ;;  %v7355_v62 = vrot.slane %v7353_v17, 5  ;;  %v14282_v21 = vpop.f32.mrf.mxu0 }
 0x4e4   : > { %15870 = vst [vmem:[#allocation35_spill] sm:$0xff] %v14282_v21  ;;  %v9067_v0 = vpack.c.b16 %v9038_v41, %v9037_v27  ;;  %v7996_v61 = vsel %vm11800_vm1, %v10715_v8, %v7995_v51  ;;  %v8731_v29 = vrot.slane %v8729_v20, 5  ;;  %v7346_v51 = vsel %vm11287_vm13, %v7341_v5, %v7345_v57 }
 0x4e5   : > { %15869 = vst [vmem:[#allocation15_spill] sm:$0xff] %v14267_v42  ;;  %v7350_v42 = vor.u32 %v7349_v48, %v7345_v57  ;;  %v7999_v43 = vsel %vm11800_vm1, %v7997_v55, %v7998_v44  ;;  %v8735_v48 = vrot.slane %v8733_v6, 4  ;;  %v5745_v44 = vld [vmem:[#allocation3 + $0xbc] sm:$0x1]  ;;  %v8097_v41 = vunpack.c.l.b16 %v7996_v61 }
 0x4e6   : > { %v8098_v24 = vunpack.c.l.b16 %v7999_v43  ;;  %5749 = vst.msk [vmem:[#allocation3 + $0xd4] sm:$0x1] %vm568_vm5, %v5745_v44  ;;  %v7358_v6 = vshrl.u32 %v7267_v22, 16  ;;  %v7361_v17 = vshll.u32 %v7267_v22, 16  ;;  %v8727_v8 = vrot.slane %v8726_v14, 4 }
 0x4e7   : > { %v8736_v55 = vor.u32 %v8735_v48, %v8731_v29  ;;  %v7367_v4 = vshll.u32 %v14257_v59, 16  ;;  %v8611_v43 = vld [vmem:[#allocation3 + $0x48] sm:$0xf]  ;;  %v7697_v57 = vunpack.c.l.b16 %v7346_v51  ;;  %v7918_v48 = vld [vmem:[#allocation3 + $0x30] sm:$0xe] }
 0x4e8   : > { %v6333_v18 = vpop.f32.mrf.mxu1  ;;  %v8127_v30 = vpack.c.b16 %v8098_v24, %v8097_v41  ;;  %v7360_v61 = vrot.slane %v7358_v6, 4  ;;  %v8747_v22 = vshll.u32 %v8611_v43, 16  ;;  %v8612_v51 = vld [vmem:[#allocation3 + $0x4c] sm:$0xf] }
 0x4e9   : > { %v6554_v26 = vadd.f32 %v14233_v28, %v6333_v18  ;;  %v6905_v11 = vpop.f32.mrf.mxu3  ;;  %v8610_v28 = vld [vmem:[#allocation3 + $0x44] sm:$0x1]  ;;  %v14298_v18 = vld [vmem:[#allocation3 + $0x34] sm:$0xf]  ;;  %v8737_v14 = vrot.slane %v8736_v55, 4  ;;  %v7369_v41 = vrot.slane %v7367_v4, 5 }
 0x4ea   : > { %v8002_v24 = vrot.slane %v14298_v18, 5  ;;  %v8757_v21 = vshrl.u32 %v8612_v51, 16 }
 0x4eb   : > { %v14284_v33 = vadd.f32 %v6903_v46, %v6554_v26  ;;  %10697 = vmatmul.msk.bf16.vlgmr.msrb.gmra.mxu1 %vm1373_vm10, %v7727_v12  ;;  %v14290_v40 = vpop.f32.mrf.mxu2  ;;  %v7351_v46 = vrot.slane %v7350_v42, 4  ;;  %v8739_v12 = vshll.u32 %v8610_v28, 16  ;;  %v7371_v26 = vshrl.u32 %v14257_v59, 16  ;;  %v14311_v44 = vpop.f32.mrf.mxu0 }
 0x4ec   : > { %v7363_v28 = vrot.slane %v7361_v17, 5  ;;  %v8744_v59 = vshrl.u32 %v8611_v43, 16  ;;  %15873 = vst [vmem:[#allocation37_spill] sm:$0xff] %v14311_v44  ;;  %v7377_v17 = vshll.u32 %v14265_v3, 16  ;;  %v8749_v43 = vrot.slane %v8747_v22, 5 }
 0x4ed   : > { %15871 = vst [vmem:[#allocation17_spill] sm:$0xff] %v14284_v33  ;;  %10830 = vmatmul.msk.bf16.gmra.mxu0 %vm1373_vm10, %v9067_v0  ;;  %v7356_v20 = vsel %vm11287_vm13, %v7351_v46, %v7355_v62  ;;  %v8741_v62 = vrot.slane %v8739_v12, 5  ;;  %v14304_v0 = vld [vmem:[#allocation3 + $0x38] sm:$0x1]  ;;  %v7373_v12 = vrot.slane %v7371_v26, 4  ;;  %v8753_v44 = vshll.u32 %v8612_v51, 16 }
 0x4ee   : > { %10812 = vmatmul.msk.bf16.gmra.mxu3 %vm1373_vm10, %v10962_v35  ;;  %v7698_v35 = vunpack.c.l.b16 %v7356_v20 }
 0x4ef   : > { %10732 = vmatmul.msk.bf16.gmra.mxu2 %vm1373_vm10, %v8127_v30  ;;  %v8742_v6 = vsel %vm11287_vm13, %v8737_v14, %v8741_v62  ;;  %v10716_v30 = vrot.slane %v7918_v48, 9  ;;  %v7374_v33 = vor.u32 %v7373_v12, %v7369_v41  ;;  %v7270_v14 = vld [vmem:[#allocation3 + $0x30] sm:$0xf]  ;;  %v8755_v22 = vrot.slane %v8753_v44, 5 }
 0x4f0   : > { %v6335_v27 = vpop.f32.mrf.mxu1  ;;  %v7728_v20 = vpack.c.b16 %v7698_v35, %v7697_v57  ;;  %v7379_v35 = vrot.slane %v7377_v17, 5  ;;  %v10963_v48 = vld [vmem:[#allocation3 + $0x30] sm:$0xff]  ;;  %v8759_v12 = vrot.slane %v8757_v21, 4 }
 0x4f1   : > { %v6556_v42 = vadd.f32 %v14250_v31, %v6335_v27  ;;  %v6908_v47 = vpop.f32.mrf.mxu3  ;;  %v8732_v31 = vsel %vm11287_vm13, %v8727_v8, %v8731_v29  ;;  %v7364_v27 = vor.u32 %v7363_v28, %v7360_v61  ;;  %v8004_v8 = vrot.slane %v8002_v24, 4 }
 0x4f2   : > { %v9039_v29 = vunpack.c.l.b16 %v8732_v31  ;;  %v8003_v28 = vsel %vm11800_vm1, %v10716_v30, %v8002_v24  ;;  %v8613_v31 = vld [vmem:[#allocation3 + $0x50] sm:$0x1]  ;;  %v8760_v30 = vor.u32 %v8759_v12, %v8755_v22 }
 0x4f3   : > { %v14306_v5 = vadd.f32 %v6905_v11, %v6556_v42  ;;  %v14313_v46 = vpop.f32.mrf.mxu2  ;;  %v8005_v11 = vrot.slane %v14304_v0, 5  ;;  %v8746_v42 = vrot.slane %v8744_v59, 4  ;;  %v7365_v61 = vrot.slane %v7364_v27, 4  ;;  %v14331_v17 = vpop.f32.mrf.mxu0 }
 0x4f4   : > { %v8099_v51 = vunpack.c.l.b16 %v8003_v28  ;;  %15875 = vst [vmem:[#allocation24_spill] sm:$0xff] %v14331_v17 }
 0x4f5   : > { %15872 = vst [vmem:[#allocation36_spill] sm:$0xff] %v14306_v5  ;;  %v9040_v5 = vunpack.c.l.b16 %v8742_v6  ;;  %v8006_v57 = vsel %vm11800_vm1, %v8004_v8, %v8005_v11  ;;  %v8750_v59 = vor.u32 %v8749_v43, %v8746_v42  ;;  %v7385_v6 = vshll.u32 %v7270_v14, 16  ;;  %v14337_v8 = vld [vmem:[#allocation3 + $0x40] sm:$0xf] }
 0x4f6   : > { %v7370_v24 = vsel %vm11287_vm13, %v7365_v61, %v7369_v41  ;;  %v7391_v42 = vshll.u32 %v14298_v18, 16  ;;  %v7395_v43 = vshrl.u32 %v14298_v18, 16 }
 0x4f7   : > { %v9068_v3 = vpack.c.b16 %v9040_v5, %v9039_v29  ;;  %v8763_v5 = vshll.u32 %v8613_v31, 16  ;;  %v8751_v27 = vrot.slane %v8750_v59, 4  ;;  %v7387_v61 = vrot.slane %v7385_v6, 5 }
 0x4f8   : > { %v6338_v55 = vpop.f32.mrf.mxu1 }
 0x4f9   : > { %v6559_v4 = vadd.f32 %v14273_v10, %v6338_v55  ;;  %v6910_v26 = vpop.f32.mrf.mxu3  ;;  %v8100_v10 = vunpack.c.l.b16 %v8006_v57  ;;  %v7699_v57 = vunpack.c.l.b16 %v7370_v24  ;;  %v8765_v41 = vrot.slane %v8763_v5, 5 }
 0x4fb   : > { %v14322_v62 = vadd.f32 %v6908_v47, %v6559_v4  ;;  %10698 = vmatmul.msk.bf16.gmra.mxu1 %vm1373_vm10, %v7728_v20  ;;  %v14328_v11 = vpop.f32.mrf.mxu2  ;;  %v7375_v47 = vrot.slane %v7374_v33, 4  ;;  %v7382_v20 = vshrl.u32 %v7270_v14, 16  ;;  %v8128_v44 = vpack.c.b16 %v8100_v10, %v8099_v51  ;;  %v8614_v4 = vld [vmem:[#allocation3 + $0x54] sm:$0xf]  ;;  %v7919_v10 = vld [vmem:[#allocation3 + $0x3c] sm:$0xe] }
 0x4fc   : > { %v8009_v14 = vrot.slane %v14337_v8, 5  ;;  %v8768_v18 = vshrl.u32 %v8614_v4, 16  ;;  %v8771_v59 = vshll.u32 %v8614_v4, 16  ;;  %v7397_v51 = vrot.slane %v7395_v43, 4 }
 0x4fd   : > { %15874 = vst [vmem:[#allocation19_spill] sm:$0xff] %v14322_v62  ;;  %10831 = vmatmul.msk.bf16.gmra.mxu0 %vm1373_vm10, %v9068_v3  ;;  %v7380_v21 = vsel %vm11287_vm13, %v7375_v47, %v7379_v35  ;;  %v7384_v3 = vrot.slane %v7382_v20, 4  ;;  %v14343_v35 = vld [vmem:[#allocation3 + $0x44] sm:$0x1]  ;;  %v7393_v47 = vrot.slane %v7391_v42, 5  ;;  %v14356_v42 = vpop.f32.mrf.mxu0 }
 0x4fe   : > { %10813 = vmatmul.msk.bf16.gmra.mxu3 %vm1373_vm10, %v10963_v48  ;;  %v7700_v31 = vunpack.c.l.b16 %v7380_v21  ;;  %v8761_v48 = vrot.slane %v8760_v30, 4  ;;  %v8012_v5 = vrot.slane %v14343_v35, 5  ;;  %v8615_v20 = vld [vmem:[#allocation3 + $0x58] sm:$0xf]  ;;  %v7401_v21 = vshll.u32 %v14304_v0, 16  ;;  %15877 = vst [vmem:[#allocation10_spill] sm:$0xff] %v14356_v42 }
 0x4ff   : > { %10733 = vmatmul.msk.bf16.gmra.mxu2 %vm1373_vm10, %v8128_v44  ;;  %v7388_v24 = vor.u32 %v7387_v61, %v7384_v3  ;;  %v8011_v44 = vrot.slane %v8009_v14, 4  ;;  %v8770_v30 = vrot.slane %v8768_v18, 4  ;;  %v8777_v4 = vshll.u32 %v8615_v20, 16  ;;  %v10964_v18 = vld [vmem:[#allocation3 + $0x3c] sm:$0xff] }
 0x500   : > { %v6340_v29 = vpop.f32.mrf.mxu1  ;;  %v7729_v6 = vpack.c.b16 %v7700_v31, %v7699_v57  ;;  %v8781_v17 = vshrl.u32 %v8615_v20, 16  ;;  %v7398_v31 = vor.u32 %v7397_v51, %v7393_v47  ;;  %v7273_v51 = vld [vmem:[#allocation3 + $0x3c] sm:$0xf] }
 0x501   : > { %v6561_v33 = vadd.f32 %v14290_v40, %v6340_v29  ;;  %v6913_v55 = vpop.f32.mrf.mxu3  ;;  %v8756_v40 = vsel %vm11287_vm13, %v8751_v27, %v8755_v22  ;;  %v10717_v22 = vrot.slane %v7919_v10, 9  ;;  %v7389_v3 = vrot.slane %v7388_v24, 4  ;;  %v8616_v10 = vld [vmem:[#allocation3 + $0x5c] sm:$0x1] }
 0x502   : > { %v9041_v29 = vunpack.c.l.b16 %v8756_v40  ;;  %v7403_v40 = vrot.slane %v7401_v21, 5  ;;  %v8779_v20 = vrot.slane %v8777_v4, 5  ;;  %v8787_v24 = vshll.u32 %v8616_v10, 16 }
 0x503   : > { %v14345_v28 = vadd.f32 %v6910_v26, %v6561_v33  ;;  %v14350_v12 = vpop.f32.mrf.mxu2  ;;  %v8766_v26 = vsel %vm11287_vm13, %v8761_v48, %v8765_v41  ;;  %v8773_v33 = vrot.slane %v8771_v59, 5  ;;  %v8013_v41 = vsel %vm11800_vm1, %v8011_v44, %v8012_v5 }
 0x504   : > { %v9042_v57 = vunpack.c.l.b16 %v8766_v26  ;;  %v8010_v48 = vsel %vm11800_vm1, %v10717_v22, %v8009_v14  ;;  %v8102_v59 = vunpack.c.l.b16 %v8013_v41  ;;  %v8783_v26 = vrot.slane %v8781_v17, 4  ;;  %v8617_v41 = vld [vmem:[#allocation3 + $0x60] sm:$0xf] }
 0x505   : > { %15876 = vst [vmem:[#allocation21_spill] sm:$0xff] %v14345_v28  ;;  %v7406_v21 = vshrl.u32 %v7273_v51, 16  ;;  %v7409_v22 = vshll.u32 %v7273_v51, 16  ;;  %v8792_v51 = vshrl.u32 %v8617_v41, 16 }
 0x506   : > { %v9069_v0 = vpack.c.b16 %v9042_v57, %v9041_v29  ;;  %v7394_v29 = vsel %vm11287_vm13, %v7389_v3, %v7393_v47  ;;  %v7415_v57 = vshll.u32 %v14337_v8, 16 }
 0x507   : > { %v7701_v47 = vunpack.c.l.b16 %v7394_v29 }
 0x508   : > { %v6343_v27 = vpop.f32.mrf.mxu1 }
 0x509   : > { %v6564_v43 = vadd.f32 %v14313_v46, %v6343_v27  ;;  %v6915_v28 = vpop.f32.mrf.mxu3  ;;  %v8774_v46 = vor.u32 %v8773_v33, %v8770_v30  ;;  %v8784_v30 = vor.u32 %v8783_v26, %v8779_v20  ;;  %v14374_v33 = vld [vmem:[#allocation3 + $0x4c] sm:$0xf]  ;;  %v7920_v26 = vld [vmem:[#allocation3 + $0x48] sm:$0xe] }
 0x50b   : > { %v14361_v61 = vadd.f32 %v6913_v55, %v6564_v43  ;;  %10699 = vmatmul.msk.bf16.gmra.mxu1 %vm1373_vm10, %v7729_v6  ;;  %v14367_v5 = vpop.f32.mrf.mxu2  ;;  %v7399_v55 = vrot.slane %v7398_v31, 4  ;;  %v8101_v6 = vunpack.c.l.b16 %v8010_v48  ;;  %v8775_v27 = vrot.slane %v8774_v46, 4  ;;  %v14382_v48 = vpop.f32.mrf.mxu0 }
 0x50c   : > { %v7419_v31 = vshrl.u32 %v14337_v8, 16  ;;  %15879 = vst [vmem:[#allocation38_spill] sm:$0xff] %v14382_v48  ;;  %v8785_v8 = vrot.slane %v8784_v30, 4  ;;  %v8794_v48 = vrot.slane %v8792_v51, 4 }
 0x50d   : > { %15878 = vst [vmem:[#allocation27_spill] sm:$0xff] %v14361_v61  ;;  %10832 = vmatmul.msk.bf16.gmra.mxu0 %vm1373_vm10, %v9069_v0  ;;  %v7404_v14 = vsel %vm11287_vm13, %v7399_v55, %v7403_v40  ;;  %v8129_v17 = vpack.c.b16 %v8102_v59, %v8101_v6  ;;  %v8789_v0 = vrot.slane %v8787_v24, 5  ;;  %v14380_v40 = vld [vmem:[#allocation3 + $0x50] sm:$0x1]  ;;  %v7411_v59 = vrot.slane %v7409_v22, 5 }
 0x50e   : > { %10814 = vmatmul.msk.bf16.gmra.mxu3 %vm1373_vm10, %v10964_v18  ;;  %v7702_v3 = vunpack.c.l.b16 %v7404_v14  ;;  %v7408_v18 = vrot.slane %v7406_v21, 4  ;;  %v8780_v46 = vsel %vm11287_vm13, %v8775_v27, %v8779_v20  ;;  %v8795_v55 = vshll.u32 %v8617_v41, 16 }
 0x50f   : > { %10734 = vmatmul.msk.bf16.gmra.mxu2 %vm1373_vm10, %v8129_v17  ;;  %v7417_v24 = vrot.slane %v7415_v57, 5  ;;  %v7421_v29 = vrot.slane %v7419_v31, 4  ;;  %v8019_v14 = vrot.slane %v14380_v40, 5  ;;  %v8790_v21 = vsel %vm11287_vm13, %v8785_v8, %v8789_v0  ;;  %v7276_v8 = vld [vmem:[#allocation3 + $0x48] sm:$0xf] }
 0x510   : > { %v6345_v44 = vpop.f32.mrf.mxu1  ;;  %v7425_v22 = vshll.u32 %v14343_v35, 16  ;;  %v9043_v17 = vunpack.c.l.b16 %v8780_v46  ;;  %v10718_v20 = vrot.slane %v7920_v26, 9  ;;  %v8797_v41 = vrot.slane %v8795_v55, 5  ;;  %v8619_v46 = vld [vmem:[#allocation3 + $0x68] sm:$0x1] }
 0x511   : > { %v6566_v4 = vadd.f32 %v14328_v11, %v6345_v44  ;;  %v6918_v43 = vpop.f32.mrf.mxu3  ;;  %v8016_v11 = vrot.slane %v14374_v33, 5  ;;  %v8618_v44 = vld [vmem:[#allocation3 + $0x64] sm:$0xf]  ;;  %v9044_v61 = vunpack.c.l.b16 %v8790_v21  ;;  %v7422_v62 = vor.u32 %v7421_v29, %v7417_v24  ;;  %v10965_v26 = vld [vmem:[#allocation3 + $0x48] sm:$0xff] }
 0x512   : > { %v8801_v42 = vshll.u32 %v8618_v44, 16  ;;  %v8798_v51 = vor.u32 %v8797_v41, %v8794_v48  ;;  %v7430_v21 = vshrl.u32 %v7276_v8, 16 }
 0x513   : > { %v14384_v10 = vadd.f32 %v6915_v28, %v6566_v4  ;;  %v14389_v6 = vpop.f32.mrf.mxu2  ;;  %v7730_v28 = vpack.c.b16 %v7702_v3, %v7701_v47  ;;  %v7412_v4 = vor.u32 %v7411_v59, %v7408_v18  ;;  %v8018_v27 = vrot.slane %v8016_v11, 4 }
 0x514   : > { %v7427_v3 = vrot.slane %v7425_v22, 5  ;;  %v9070_v35 = vpack.c.b16 %v9044_v61, %v9043_v17  ;;  %v8017_v59 = vsel %vm11800_vm1, %v10718_v20, %v8016_v11  ;;  %v8803_v55 = vrot.slane %v8801_v42, 5  ;;  %v14413_v20 = vld [vmem:[#allocation3 + $0x58] sm:$0xf] }
 0x515   : > { %15880 = vst [vmem:[#allocation11_spill] sm:$0xff] %v14384_v10  ;;  %v8805_v10 = vshrl.u32 %v8618_v44, 16  ;;  %v8020_v47 = vsel %vm11800_vm1, %v8018_v27, %v8019_v14  ;;  %v7413_v18 = vrot.slane %v7412_v4, 4  ;;  %v14403_v44 = vpop.f32.mrf.mxu0  ;;  %v7423_v14 = vrot.slane %v7422_v62, 4  ;;  %v8620_v27 = vld [vmem:[#allocation3 + $0x6c] sm:$0xf] }
 0x516   : > { %15882 = vst [vmem:[#allocation28_spill] sm:$0xff] %v14403_v44  ;;  %v8103_v61 = vunpack.c.l.b16 %v8017_v59  ;;  %v8799_v22 = vrot.slane %v8798_v51, 4  ;;  %v7433_v4 = vshll.u32 %v7276_v8, 16  ;;  %v8023_v59 = vrot.slane %v14413_v20, 5 }
 0x517   : > { %v8807_v29 = vrot.slane %v8805_v10, 4  ;;  %v7418_v11 = vsel %vm11287_vm13, %v7413_v18, %v7417_v24  ;;  %v7428_v48 = vsel %vm11287_vm13, %v7423_v14, %v7427_v3  ;;  %v7432_v24 = vrot.slane %v7430_v21, 4  ;;  %v7921_v18 = vld [vmem:[#allocation3 + $0x54] sm:$0xe] }
 0x518   : > { %v6348_v30 = vpop.f32.mrf.mxu1  ;;  %v7703_v41 = vunpack.c.l.b16 %v7418_v11  ;;  %v8819_v8 = vshll.u32 %v8620_v27, 16  ;;  %v7439_v51 = vshll.u32 %v14374_v33, 16  ;;  %v7443_v14 = vshrl.u32 %v14374_v33, 16 }
 0x519   : > { %v6569_v57 = vadd.f32 %v14350_v12, %v6348_v30  ;;  %v6920_v31 = vpop.f32.mrf.mxu3  ;;  %v8104_v12 = vunpack.c.l.b16 %v8020_v47  ;;  %v8808_v17 = vor.u32 %v8807_v29, %v8803_v55  ;;  %v10719_v11 = vrot.slane %v7921_v18, 9 }
 0x51b   : > { %v14398_v0 = vadd.f32 %v6918_v43, %v6569_v57  ;;  %10700 = vmatmul.msk.bf16.gmra.mxu1 %vm1373_vm10, %v7730_v28  ;;  %v14406_v43 = vpop.f32.mrf.mxu2  ;;  %v8811_v28 = vshll.u32 %v8619_v46, 16  ;;  %v8130_v10 = vpack.c.b16 %v8104_v12, %v8103_v61  ;;  %v7704_v57 = vunpack.c.l.b16 %v7428_v48 }
 0x51c   : > { %v8816_v46 = vshrl.u32 %v8620_v27, 16  ;;  %v7435_v12 = vrot.slane %v7433_v4, 5  ;;  %v7441_v27 = vrot.slane %v7439_v51, 5 }
 0x51d   : > { %15881 = vst [vmem:[#allocation25_spill] sm:$0xff] %v14398_v0  ;;  %10833 = vmatmul.msk.bf16.gmra.mxu0 %vm1373_vm10, %v9070_v35  ;;  %v8813_v47 = vrot.slane %v8811_v28, 5  ;;  %v14417_v35 = vld [vmem:[#allocation3 + $0x5c] sm:$0x1]  ;;  %v7731_v28 = vpack.c.b16 %v7704_v57, %v7703_v41  ;;  %v14431_v48 = vpop.f32.mrf.mxu0  ;;  %v7445_v41 = vrot.slane %v7443_v14, 4 }
 0x51e   : > { %10815 = vmatmul.msk.bf16.gmra.mxu3 %vm1373_vm10, %v10965_v26  ;;  %v8804_v26 = vsel %vm11287_vm13, %v8799_v22, %v8803_v55  ;;  %v8026_v61 = vrot.slane %v14417_v35, 5  ;;  %15884 = vst [vmem:[#allocation22_spill] sm:$0xff] %v14431_v48  ;;  %v8025_v55 = vrot.slane %v8023_v59, 4  ;;  %v8821_v22 = vrot.slane %v8819_v8, 5  ;;  %v8622_v8 = vld [vmem:[#allocation3 + $0x74] sm:$0x1] }
 0x51f   : > { %10735 = vmatmul.msk.bf16.gmra.mxu2 %vm1373_vm10, %v8130_v10  ;;  %v8818_v10 = vrot.slane %v8816_v46, 4  ;;  %v7436_v4 = vor.u32 %v7435_v12, %v7432_v24  ;;  %v8024_v24 = vsel %vm11800_vm1, %v10719_v11, %v8023_v59 }
 0x520   : > { %v6350_v42 = vpop.f32.mrf.mxu1  ;;  %v8027_v57 = vsel %vm11800_vm1, %v8025_v55, %v8026_v61 }
 0x521   : > { %v6571_v62 = vadd.f32 %v14367_v5, %v6350_v42  ;;  %v6923_v30 = vpop.f32.mrf.mxu3  ;;  %v8809_v5 = vrot.slane %v8808_v17, 4  ;;  %v9045_v42 = vunpack.c.l.b16 %v8804_v26  ;;  %v8822_v26 = vor.u32 %v8821_v22, %v8818_v10 }
 0x522   : > { %v7437_v12 = vrot.slane %v7436_v4, 4  ;;  %v8106_v51 = vunpack.c.l.b16 %v8027_v57  ;;  %v7463_v57 = vshll.u32 %v14413_v20, 16 }
 0x523   : > { %v14419_v3 = vadd.f32 %v6920_v31, %v6571_v62  ;;  %v14425_v29 = vpop.f32.mrf.mxu2  ;;  %v8621_v31 = vld [vmem:[#allocation3 + $0x70] sm:$0xf]  ;;  %v8814_v21 = vsel %vm11287_vm13, %v8809_v5, %v8813_v47  ;;  %v7449_v47 = vshll.u32 %v14380_v40, 16  ;;  %v7279_v5 = vld [vmem:[#allocation3 + $0x54] sm:$0xf]  ;;  %v7446_v40 = vor.u32 %v7445_v41, %v7441_v27 }
 0x524   : > { %v8825_v62 = vshll.u32 %v8621_v31, 16  ;;  %v8829_v44 = vshrl.u32 %v8621_v31, 16  ;;  %v9046_v0 = vunpack.c.l.b16 %v8814_v21  ;;  %v7457_v21 = vshll.u32 %v7279_v5, 16 }
 0x525   : > { %15883 = vst [vmem:[#allocation30_spill] sm:$0xff] %v14419_v3  ;;  %v7451_v59 = vrot.slane %v7449_v47, 5  ;;  %v8823_v11 = vrot.slane %v8822_v26, 4  ;;  %v7442_v10 = vsel %vm11287_vm13, %v7437_v12, %v7441_v27  ;;  %v14452_v4 = vpop.f32.mrf.mxu0  ;;  %v7447_v41 = vrot.slane %v7446_v40, 4  ;;  %v7922_v12 = vld [vmem:[#allocation3 + $0x60] sm:$0xe] }
 0x526   : > { %v9071_v46 = vpack.c.b16 %v9046_v0, %v9045_v42  ;;  %v8827_v14 = vrot.slane %v8825_v62, 5  ;;  %v8831_v31 = vrot.slane %v8829_v44, 4  ;;  %v8835_v0 = vshll.u32 %v8622_v8, 16  ;;  %v14446_v42 = vld [vmem:[#allocation3 + $0x64] sm:$0xf]  ;;  %15886 = vst [vmem:[#allocation26_spill] sm:$0xff] %v14452_v4 }
 0x527   : > { %v7467_v47 = vshrl.u32 %v14413_v20, 16  ;;  %v7459_v27 = vrot.slane %v7457_v21, 5  ;;  %v8030_v26 = vrot.slane %v14446_v42, 5  ;;  %v14468_v21 = vrot.slane %v7463_v57, 5 }
 0x528   : > { %v6353_v17 = vpop.f32.mrf.mxu1  ;;  %v8832_v22 = vor.u32 %v8831_v31, %v8827_v14  ;;  %v8624_v31 = vld [vmem:[#allocation3 + $0x7c] sm:$0xf] }
 0x529   : > { %v6574_v33 = vadd.f32 %v14389_v6, %v6353_v17  ;;  %v6925_v3 = vpop.f32.mrf.mxu3  ;;  %v10966_v6 = vld [vmem:[#allocation3 + $0x54] sm:$0xff]  ;;  %v14450_v17 = vld [vmem:[#allocation3 + $0x68] sm:$0x1]  ;;  %v8853_v57 = vshrl.u32 %v8624_v31, 16 }
 0x52a   : > { %v8033_v20 = vrot.slane %v14450_v17, 5 }
 0x52b   : > { %v14437_v18 = vadd.f32 %v6923_v30, %v6574_v33  ;;  %10701 = vmatmul.msk.bf16.gmra.mxu1 %vm1373_vm10, %v7731_v28  ;;  %v14443_v61 = vpop.f32.mrf.mxu2  ;;  %v8105_v30 = vunpack.c.l.b16 %v8024_v24  ;;  %v7454_v28 = vshrl.u32 %v7279_v5, 16  ;;  %v8837_v24 = vrot.slane %v8835_v0, 5 }
 0x52c   : > { %v7705_v0 = vunpack.c.l.b16 %v7442_v10 }
 0x52d   : > { %15885 = vst [vmem:[#allocation23_spill] sm:$0xff] %v14437_v18  ;;  %10834 = vmatmul.msk.bf16.gmra.mxu0 %vm1373_vm10, %v9071_v46  ;;  %v8131_v44 = vpack.c.b16 %v8106_v51, %v8105_v30  ;;  %v8623_v46 = vld [vmem:[#allocation3 + $0x78] sm:$0xf]  ;;  %v7456_v8 = vrot.slane %v7454_v28, 4  ;;  %v8833_v51 = vrot.slane %v8832_v22, 4  ;;  %v14479_v52 = vpop.f32.mrf.mxu0 }
 0x52e   : > { %10816 = vmatmul.msk.bf16.gmra.mxu3 %vm1373_vm10, %v10966_v6  ;;  %v7452_v6 = vsel %vm11287_vm13, %v7447_v41, %v7451_v59  ;;  %v8840_v40 = vshrl.u32 %v8623_v46, 16  ;;  %v8843_v30 = vshll.u32 %v8623_v46, 16  ;;  %v8849_v41 = vshll.u32 %v8624_v31, 16  ;;  %15888 = vst [vmem:[#allocation12_spill] sm:$0xff] %v14479_v52 }
 0x52f   : > { %10736 = vmatmul.msk.bf16.gmra.mxu2 %vm1373_vm10, %v8131_v44  ;;  %v8838_v59 = vsel %vm11287_vm13, %v8833_v51, %v8837_v24  ;;  %v7460_v44 = vor.u32 %v7459_v27, %v7456_v8  ;;  %v7706_v22 = vunpack.c.l.b16 %v7452_v6  ;;  %v8645_v8 = vld [vmem:[#allocation3 + $0xd0] sm:$0xf]  ;;  %v9268_v27 = vld [vmem:[#allocation3 + $0xcc] sm:$0xe]  ;;  %v8625_v51 = vld [vmem:[#allocation3 + $0x80] sm:$0x1] }
 0x530   : > { %v6355_v55 = vpop.f32.mrf.mxu1  ;;  %v8842_v46 = vrot.slane %v8840_v40, 4  ;;  %v9048_v18 = vunpack.c.l.b16 %v8838_v59  ;;  %v8851_v31 = vrot.slane %v8849_v41, 5  ;;  %v7282_v40 = vld [vmem:[#allocation3 + $0x60] sm:$0xf]  ;;  %v8855_v59 = vrot.slane %v8853_v57, 4 }
 0x531   : > { %v6576_v62 = vadd.f32 %v14406_v43, %v6355_v55  ;;  %v6928_v33 = vpop.f32.mrf.mxu3  ;;  %v8828_v43 = vsel %vm11287_vm13, %v8823_v11, %v8827_v14  ;;  %v7473_v55 = vshll.u32 %v14417_v35, 16  ;;  %v10720_v14 = vrot.slane %v7922_v12, 9 }
 0x532   : > { %v8032_v11 = vrot.slane %v8030_v26, 4  ;;  %v7732_v48 = vpack.c.b16 %v7706_v22, %v7705_v0  ;;  %v7461_v12 = vrot.slane %v7460_v44, 4  ;;  %v10967_v0 = vld [vmem:[#allocation3 + $0x60] sm:$0xff]  ;;  %v10859_v44 = vrot.slane %v9268_v27, 9  ;;  %v14495_v27 = vld [vmem:[#allocation3 + $0x70] sm:$0xf] }
 0x533   : > { %v14459_v5 = vadd.f32 %v6925_v3, %v6576_v62  ;;  %v14466_v28 = vpop.f32.mrf.mxu2  ;;  %v7469_v3 = vrot.slane %v7467_v47, 4  ;;  %v9047_v62 = vunpack.c.l.b16 %v8828_v43  ;;  %v7475_v6 = vrot.slane %v7473_v55, 5 }
 0x534   : > { %v8034_v10 = vsel %vm11800_vm1, %v8032_v11, %v8033_v20  ;;  %v8031_v43 = vsel %vm11800_vm1, %v10720_v14, %v8030_v26  ;;  %v9424_v55 = vrot.slane %v8645_v8, 5  ;;  %v8856_v8 = vor.u32 %v8855_v59, %v8851_v31  ;;  %v14503_v59 = vld [vmem:[#allocation3 + $0x74] sm:$0x1] }
 0x535   : > { %15887 = vst [vmem:[#allocation8_spill] sm:$0xff] %v14459_v5  ;;  %v8845_v5 = vrot.slane %v8843_v30, 5  ;;  %v7470_v24 = vor.u32 %v7469_v3, %v14468_v21  ;;  %v8646_v30 = vld [vmem:[#allocation3 + $0xd4] sm:$0x1]  ;;  %v8107_v11 = vunpack.c.l.b16 %v8031_v43 }
 0x536   : > { %v9426_v22 = vrot.slane %v9424_v55, 4 }
 0x537   : > { %v8846_v3 = vor.u32 %v8845_v5, %v8842_v46  ;;  %v7471_v14 = vrot.slane %v7470_v24, 4  ;;  %v7466_v5 = vsel %vm11287_vm13, %v7461_v12, %v14468_v21  ;;  %v7491_v21 = vshrl.u32 %v14446_v42, 16  ;;  %v8626_v12 = vld [vmem:[#allocation3 + $0x84] sm:$0xf] }
 0x538   : > { %v6358_v4 = vpop.f32.mrf.mxu1 }
 0x539   : > { %v6579_v47 = vadd.f32 %v14425_v29, %v6358_v4  ;;  %v6930_v35 = vpop.f32.mrf.mxu3  ;;  %v9072_v29 = vpack.c.b16 %v9048_v18, %v9047_v62  ;;  %v8108_v4 = vunpack.c.l.b16 %v8034_v10  ;;  %v9425_v18 = vsel %vm11800_vm1, %v10859_v44, %v9424_v55 }
 0x53a   : > { %v9427_v62 = vrot.slane %v8646_v30, 5  ;;  %v7476_v41 = vsel %vm11287_vm13, %v7471_v14, %v7475_v6  ;;  %v7481_v10 = vshll.u32 %v7282_v40, 16  ;;  %v9461_v46 = vunpack.c.l.b16 %v9425_v18  ;;  %v7923_v18 = vld [vmem:[#allocation3 + $0x6c] sm:$0xe] }
 0x53b   : > { %v14481_v20 = vadd.f32 %v6928_v33, %v6579_v47  ;;  %10702 = vmatmul.msk.bf16.gmra.mxu1 %vm1373_vm10, %v7732_v48  ;;  %v14485_v26 = vpop.f32.mrf.mxu2  ;;  %v8859_v33 = vshll.u32 %v8625_v51, 16  ;;  %v7478_v48 = vshrl.u32 %v7282_v40, 16  ;;  %v8132_v47 = vpack.c.b16 %v8108_v4, %v8107_v11 }
 0x53c   : > { %v8847_v24 = vrot.slane %v8846_v3, 4  ;;  %v9428_v43 = vsel %vm11800_vm1, %v9426_v22, %v9427_v62  ;;  %v7487_v30 = vshll.u32 %v14446_v42, 16  ;;  %v7707_v40 = vunpack.c.l.b16 %v7466_v5  ;;  %v14512_v5 = vpop.f32.mrf.mxu0 }
 0x53d   : > { %10835 = vmatmul.msk.bf16.gmra.mxu0 %vm1373_vm10, %v9072_v29  ;;  %v9462_v6 = vunpack.c.l.b16 %v9428_v43  ;;  %v8861_v4 = vrot.slane %v8859_v33, 5  ;;  %v7480_v3 = vrot.slane %v7478_v48, 4  ;;  %v7483_v55 = vrot.slane %v7481_v10, 5  ;;  %15891 = vst [vmem:[#allocation18_spill] sm:$0xff] %v14512_v5  ;;  %v8627_v10 = vld [vmem:[#allocation3 + $0x88] sm:$0xf] }
 0x53e   : > { %10817 = vmatmul.msk.bf16.gmra.mxu3 %vm1373_vm10, %v10967_v0  ;;  %v7708_v0 = vunpack.c.l.b16 %v7476_v41  ;;  %v8852_v42 = vsel %vm11287_vm13, %v8847_v24, %v8851_v31  ;;  %v8857_v11 = vrot.slane %v8856_v8, 4  ;;  %v8864_v22 = vshrl.u32 %v8626_v12, 16 }
 0x53f   : > { %10737 = vmatmul.msk.bf16.gmra.mxu2 %vm1373_vm10, %v8132_v47  ;;  %v14508_v14 = vpack.c.b16 %v9462_v6, %v9461_v46  ;;  %v8867_v62 = vshll.u32 %v8626_v12, 16  ;;  %v7489_v48 = vrot.slane %v7487_v30, 5  ;;  %v7493_v41 = vrot.slane %v7491_v21, 4 }
 0x540   : > { %v6360_v57 = vpop.f32.mrf.mxu1  ;;  %v8862_v46 = vsel %vm11287_vm13, %v8857_v11, %v8861_v4  ;;  %v7497_v47 = vshll.u32 %v14450_v17, 16  ;;  %v9049_v31 = vunpack.c.l.b16 %v8852_v42  ;;  %v7484_v24 = vor.u32 %v7483_v55, %v7480_v3  ;;  %v8628_v42 = vld [vmem:[#allocation3 + $0x8c] sm:$0x1] }
 0x541   : > { %v6581_v51 = vadd.f32 %v14443_v61, %v6360_v57  ;;  %v6933_v29 = vpop.f32.mrf.mxu3  ;;  %v8037_v61 = vrot.slane %v14495_v27, 5  ;;  %15890 = vst [vmem:[#allocation16_spill] sm:$0xff] %v14508_v14  ;;  %v7733_v57 = vpack.c.b16 %v7708_v0, %v7707_v40  ;;  %v10721_v8 = vrot.slane %v7923_v18, 9  ;;  %v10968_v11 = vld [vmem:[#allocation3 + $0x6c] sm:$0xff] }
 0x542   : > { %v8866_v12 = vrot.slane %v8864_v22, 4  ;;  %v8869_v6 = vrot.slane %v8867_v62, 5  ;;  %v8873_v14 = vshll.u32 %v8627_v10, 16  ;;  %v8877_v5 = vshrl.u32 %v8627_v10, 16 }
 0x543   : > { %v14505_v44 = vadd.f32 %v6930_v35, %v6581_v51  ;;  %v14514_v33 = vpop.f32.mrf.mxu2  ;;  %v8040_v35 = vrot.slane %v14503_v59, 5  ;;  %v8039_v43 = vrot.slane %v8037_v61, 4  ;;  %v7494_v52 = vor.u32 %v7493_v41, %v7489_v48  ;;  %v7285_v41 = vld [vmem:[#allocation3 + $0x6c] sm:$0xf] }
 0x544   : > { %v7499_v0 = vrot.slane %v7497_v47, 5  ;;  %v7485_v3 = vrot.slane %v7484_v24, 4  ;;  %v8038_v55 = vsel %vm11800_vm1, %v10721_v8, %v8037_v61  ;;  %v8875_v22 = vrot.slane %v8873_v14, 5 }
 0x545   : > { %15889 = vst [vmem:[#allocation14_spill] sm:$0xff] %v14505_v44  ;;  %v9050_v44 = vunpack.c.l.b16 %v8862_v46  ;;  %v8041_v40 = vsel %vm11800_vm1, %v8039_v43, %v8040_v35  ;;  %v8879_v62 = vrot.slane %v8877_v5, 4  ;;  %v8109_v10 = vunpack.c.l.b16 %v8038_v55  ;;  %v14538_v43 = vld [vmem:[#allocation3 + $0x7c] sm:$0xf] }
 0x546   : > { %v8110_v18 = vunpack.c.l.b16 %v8041_v40  ;;  %v7490_v61 = vsel %vm11287_vm13, %v7485_v3, %v7489_v48  ;;  %v7502_v14 = vshrl.u32 %v7285_v41, 16  ;;  %v7505_v5 = vshll.u32 %v7285_v41, 16 }
 0x547   : > { %v9073_v17 = vpack.c.b16 %v9050_v44, %v9049_v31  ;;  %v8883_v44 = vshll.u32 %v8628_v42, 16  ;;  %v8880_v8 = vor.u32 %v8879_v62, %v8875_v22  ;;  %v7709_v48 = vunpack.c.l.b16 %v7490_v61  ;;  %v8630_v61 = vld [vmem:[#allocation3 + $0x94] sm:$0xf] }
 0x548   : > { %v6363_v51 = vpop.f32.mrf.mxu1  ;;  %v8133_v31 = vpack.c.b16 %v8110_v18, %v8109_v10  ;;  %v7504_v55 = vrot.slane %v7502_v14, 4  ;;  %v7507_v42 = vrot.slane %v7505_v5, 5  ;;  %v7521_v14 = vshll.u32 %v14503_v59, 16 }
 0x549   : > { %v6584_v30 = vadd.f32 %v14466_v28, %v6363_v51  ;;  %v6935_v21 = vpop.f32.mrf.mxu3  ;;  %v8870_v28 = vor.u32 %v8869_v6, %v8866_v12  ;;  %v7511_v12 = vshll.u32 %v14495_v27, 16  ;;  %v7515_v6 = vshrl.u32 %v14495_v27, 16 }
 0x54a   : > { %v8881_v18 = vrot.slane %v8880_v8, 4  ;;  %v7523_v59 = vrot.slane %v7521_v14, 5 }
 0x54b   : > { %v14523_v4 = vadd.f32 %v6933_v29, %v6584_v30  ;;  %10703 = vmatmul.msk.bf16.gmra.mxu1 %vm1373_vm10, %v7733_v57  ;;  %v14529_v35 = vpop.f32.mrf.mxu2  ;;  %v7495_v29 = vrot.slane %v7494_v52, 4  ;;  %v14532_v57 = vpop.f32.mrf.mxu0  ;;  %v8871_v24 = vrot.slane %v8870_v28, 4  ;;  %v8629_v30 = vld [vmem:[#allocation3 + $0x90] sm:$0xf]  ;;  %v7924_v28 = vld [vmem:[#allocation3 + $0x78] sm:$0xe] }
 0x54c   : > { %15892 = vst [vmem:[#allocation20_spill] sm:$0xff] %v14532_v57  ;;  %v8888_v27 = vshrl.u32 %v8629_v30, 16  ;;  %v8891_v62 = vshll.u32 %v8629_v30, 16  ;;  %v7517_v10 = vrot.slane %v7515_v6, 4  ;;  %v8897_v30 = vshll.u32 %v8630_v61, 16 }
 0x54d   : > { %10836 = vmatmul.msk.bf16.gmra.mxu0 %vm1373_vm10, %v9073_v17  ;;  %v7500_v46 = vsel %vm11287_vm13, %v7495_v29, %v7499_v0  ;;  %v8885_v0 = vrot.slane %v8883_v44, 5  ;;  %v14544_v17 = vld [vmem:[#allocation3 + $0x80] sm:$0x1]  ;;  %v7513_v29 = vrot.slane %v7511_v12, 5 }
 0x54e   : > { %10818 = vmatmul.msk.bf16.gmra.mxu3 %vm1373_vm10, %v10968_v11  ;;  %v7710_v40 = vunpack.c.l.b16 %v7500_v46  ;;  %v8044_v11 = vrot.slane %v14538_v43, 5  ;;  %v8047_v44 = vrot.slane %v14544_v17, 5  ;;  %v8890_v8 = vrot.slane %v8888_v27, 4  ;;  %v7288_v27 = vld [vmem:[#allocation3 + $0x78] sm:$0xf] }
 0x54f   : > { %10738 = vmatmul.msk.bf16.gmra.mxu2 %vm1373_vm10, %v8133_v31  ;;  %v8886_v46 = vsel %vm11287_vm13, %v8881_v18, %v8885_v0 }
 0x550   : > { %v6365_v47 = vpop.f32.mrf.mxu1  ;;  %v8046_v31 = vrot.slane %v8044_v11, 4 }
 0x551   : > { %v6586_v52 = vadd.f32 %v14485_v26, %v6365_v47  ;;  %v6938_v51 = vpop.f32.mrf.mxu3  ;;  %v8876_v26 = vsel %vm11287_vm13, %v8871_v24, %v8875_v22  ;;  %v7508_v47 = vor.u32 %v7507_v42, %v7504_v55  ;;  %v10722_v22 = vrot.slane %v7924_v28, 9  ;;  %v8631_v28 = vld [vmem:[#allocation3 + $0x98] sm:$0x1] }
 0x552   : > { %v9051_v5 = vunpack.c.l.b16 %v8876_v26  ;;  %v8048_v0 = vsel %vm11800_vm1, %v8046_v31, %v8047_v44 }
 0x553   : > { %v14546_v3 = vadd.f32 %v6935_v21, %v6586_v52  ;;  %v14551_v41 = vpop.f32.mrf.mxu2  ;;  %v7734_v21 = vpack.c.b16 %v7710_v40, %v7709_v48  ;;  %v8893_v52 = vrot.slane %v8891_v62, 5  ;;  %v14557_v12 = vpop.f32.mrf.mxu0  ;;  %v9052_v48 = vunpack.c.l.b16 %v8886_v46  ;;  %v10969_v62 = vld [vmem:[#allocation3 + $0x78] sm:$0xff] }
 0x554   : > { %15894 = vst [vmem:[#allocation39_spill] sm:$0xff] %v14557_v12  ;;  %v7518_v40 = vor.u32 %v7517_v10, %v7513_v29  ;;  %v7509_v42 = vrot.slane %v7508_v47, 4  ;;  %v8045_v18 = vsel %vm11800_vm1, %v10722_v22, %v8044_v11  ;;  %v8899_v46 = vrot.slane %v8897_v30, 5 }
 0x555   : > { %15893 = vst [vmem:[#allocation4_spill] sm:$0xff] %v14546_v3  ;;  %v8901_v3 = vshrl.u32 %v8630_v61, 16  ;;  %v9074_v55 = vpack.c.b16 %v9052_v48, %v9051_v5  ;;  %v8894_v61 = vor.u32 %v8893_v52, %v8890_v8  ;;  %v7526_v5 = vshrl.u32 %v7288_v27, 16  ;;  %v14575_v52 = vld [vmem:[#allocation3 + $0x88] sm:$0xf] }
 0x556   : > { %v7519_v44 = vrot.slane %v7518_v40, 4  ;;  %v7529_v47 = vshll.u32 %v7288_v27, 16  ;;  %v7514_v11 = vsel %vm11287_vm13, %v7509_v42, %v7513_v29  ;;  %v7535_v48 = vshll.u32 %v14538_v43, 16 }
 0x557   : > { %v8903_v10 = vrot.slane %v8901_v3, 4  ;;  %v8895_v3 = vrot.slane %v8894_v61, 4  ;;  %v7539_v40 = vshrl.u32 %v14538_v43, 16  ;;  %v7528_v42 = vrot.slane %v7526_v5, 4 }
 0x558   : > { %v6368_v24 = vpop.f32.mrf.mxu1  ;;  %v7524_v31 = vsel %vm11287_vm13, %v7519_v44, %v7523_v59  ;;  %v14581_v59 = vld [vmem:[#allocation3 + $0x8c] sm:$0x1] }
 0x559   : > { %v6589_v6 = vadd.f32 %v14514_v33, %v6368_v24  ;;  %v6940_v57 = vpop.f32.mrf.mxu3  ;;  %v8112_v33 = vunpack.c.l.b16 %v8048_v0  ;;  %v8904_v8 = vor.u32 %v8903_v10, %v8899_v46  ;;  %v8632_v0 = vld [vmem:[#allocation3 + $0x9c] sm:$0xf]  ;;  %v8900_v43 = vsel %vm11287_vm13, %v8895_v3, %v8899_v46 }
 0x55a   : > { %v8912_v10 = vshrl.u32 %v8632_v0, 16  ;;  %v8915_v44 = vshll.u32 %v8632_v0, 16  ;;  %v7541_v5 = vrot.slane %v7539_v40, 4  ;;  %v9053_v46 = vunpack.c.l.b16 %v8900_v43  ;;  %v7291_v43 = vld [vmem:[#allocation3 + $0x84] sm:$0xf] }
 0x55b   : > { %v14562_v26 = vadd.f32 %v6938_v51, %v6589_v6  ;;  %10704 = vmatmul.msk.bf16.gmra.mxu1 %vm1373_vm10, %v7734_v21  ;;  %v14568_v14 = vpop.f32.mrf.mxu2  ;;  %v8111_v51 = vunpack.c.l.b16 %v8045_v18  ;;  %v8907_v21 = vshll.u32 %v8631_v28, 16  ;;  %v7531_v18 = vrot.slane %v7529_v47, 5  ;;  %v14583_v28 = vpop.f32.mrf.mxu0 }
 0x55c   : > { %15896 = vst [vmem:[#allocation41_spill] sm:$0xff] %v14583_v28  ;;  %v8905_v61 = vrot.slane %v8904_v8, 4  ;;  %v8054_v47 = vrot.slane %v14581_v59, 5  ;;  %v7545_v3 = vshll.u32 %v14544_v17, 16 }
 0x55d   : > { %15895 = vst [vmem:[#allocation40_spill] sm:$0xff] %v14562_v26  ;;  %10837 = vmatmul.msk.bf16.gmra.mxu0 %vm1373_vm10, %v9074_v55  ;;  %v8134_v24 = vpack.c.b16 %v8112_v33, %v8111_v51  ;;  %v7711_v55 = vunpack.c.l.b16 %v7514_v11  ;;  %v8909_v29 = vrot.slane %v8907_v21, 5  ;;  %v8051_v33 = vrot.slane %v14575_v52, 5  ;;  %v8633_v11 = vld [vmem:[#allocation3 + $0xa0] sm:$0xf] }
 0x55e   : > { %10819 = vmatmul.msk.bf16.gmra.mxu3 %vm1373_vm10, %v10969_v62  ;;  %v7712_v62 = vunpack.c.l.b16 %v7524_v31  ;;  %v7537_v21 = vrot.slane %v7535_v48, 5  ;;  %v7532_v31 = vor.u32 %v7531_v18, %v7528_v42  ;;  %v8917_v48 = vrot.slane %v8915_v44, 5 }
 0x55f   : > { %10739 = vmatmul.msk.bf16.gmra.mxu2 %vm1373_vm10, %v8134_v24  ;;  %v8053_v8 = vrot.slane %v8051_v33, 4  ;;  %v8921_v40 = vshll.u32 %v8633_v11, 16  ;;  %v8925_v28 = vshrl.u32 %v8633_v11, 16  ;;  %v7547_v18 = vrot.slane %v7545_v3, 5 }
 0x560   : > { %v6370_v22 = vpop.f32.mrf.mxu1  ;;  %v7533_v42 = vrot.slane %v7532_v31, 4 }
 0x561   : > { %v6591_v30 = vadd.f32 %v14529_v35, %v6370_v22  ;;  %v8487_v6 = vpop.f32.mrf.mxu3  ;;  %v7925_v35 = vld [vmem:[#allocation3 + $0x84] sm:$0xe]  ;;  %v7735_v22 = vpack.c.b16 %v7712_v62, %v7711_v55  ;;  %v7542_v62 = vor.u32 %v7541_v5, %v7537_v21  ;;  %v8923_v11 = vrot.slane %v8921_v40, 5 }
 0x562   : > { %v10723_v24 = vrot.slane %v7925_v35, 9  ;;  %v8634_v35 = vld [vmem:[#allocation3 + $0xa4] sm:$0x1]  ;;  %v8927_v5 = vrot.slane %v8925_v28, 4  ;;  %v7230_v28 = vadd.f32 %v13991_v13, %v14035_v56  ;;  %v7559_v13 = vshll.u32 %v14575_v52, 16 }
 0x563   : > { %v14585_v27 = vadd.f32 %v6940_v57, %v6591_v30  ;;  %v14590_v51 = vpop.f32.mrf.mxu2  ;;  %v8910_v57 = vsel %vm11287_vm13, %v8905_v61, %v8909_v29  ;;  %v7229_v30 = vadd.f32 %v13982_v50, %v14025_v23  ;;  %v8055_v29 = vsel %vm11800_vm1, %v8053_v8, %v8054_v47  ;;  %v10970_v61 = vld [vmem:[#allocation3 + $0x84] sm:$0xff]  ;;  %v14622_v56 = vld [vmem:[#allocation3 + $0x98] sm:$0x1] }
 0x564   : > { %v9054_v55 = vunpack.c.l.b16 %v8910_v57  ;;  %v8052_v50 = vsel %vm11800_vm1, %v10723_v24, %v8051_v33  ;;  %v14604_v57 = vpop.f32.mrf.mxu0  ;;  %v7543_v33 = vrot.slane %v7542_v62, 4  ;;  %v7550_v24 = vshrl.u32 %v7291_v43, 16  ;;  %v8635_v62 = vld [vmem:[#allocation3 + $0xa8] sm:$0xf] }
 0x565   : > { %15897 = vst [vmem:[#allocation42_spill] sm:$0xff] %v14585_v27  ;;  %v8914_v27 = vrot.slane %v8912_v10, 4  ;;  %v8114_v10 = vunpack.c.l.b16 %v8055_v29  ;;  %v8928_v8 = vor.u32 %v8927_v5, %v8923_v11 }
 0x566   : > { %v9075_v17 = vpack.c.b16 %v9054_v55, %v9053_v46  ;;  %v7552_v29 = vrot.slane %v7550_v24, 4  ;;  %v14636_v24 = vrot.slane %v7559_v13, 5 }
 0x567   : > { %v8918_v44 = vor.u32 %v8917_v48, %v8914_v27  ;;  %v7553_v27 = vshll.u32 %v7291_v43, 16 }
 0x568   : > { %v7803_v0 = vpop.f32.mrf.mxu1 }
 0x569   : > { %v7883_v26 = vadd.f32 %v7803_v0, %v7229_v30  ;;  %v8489_v12 = vpop.f32.mrf.mxu3  ;;  %v8919_v3 = vrot.slane %v8918_v44, 4  ;;  %v14618_v0 = vld [vmem:[#allocation3 + $0x94] sm:$0xf]  ;;  %v8939_v44 = vshll.u32 %v8635_v62, 16 }
 0x56b   : > { %v8281_v23 = vadd.f32 %v14551_v41, %v7883_v26  ;;  %10705 = vmatmul.msk.bf16.gmra.mxu1 %vm1373_vm10, %v7735_v22  ;;  %v14609_v31 = vpop.f32.mrf.mxu2  ;;  %v8113_v41 = vunpack.c.l.b16 %v8052_v50  ;;  %v7538_v26 = vsel %vm11287_vm13, %v7533_v42, %v7537_v21  ;;  %v8931_v22 = vshll.u32 %v8634_v35, 16 }
 0x56c   : > { %v7713_v55 = vunpack.c.l.b16 %v7538_v26  ;;  %v7555_v42 = vrot.slane %v7553_v27, 5  ;;  %v8058_v35 = vrot.slane %v14618_v0, 5  ;;  %v8924_v43 = vsel %vm11287_vm13, %v8919_v3, %v8923_v11 }
 0x56d   : > { %v14606_v47 = vadd.f32 %v8487_v6, %v8281_v23  ;;  %10838 = vmatmul.msk.bf16.gmra.mxu0 %vm1373_vm10, %v9075_v17  ;;  %v7548_v6 = vsel %vm11287_vm13, %v7543_v33, %v7547_v18  ;;  %v8135_v46 = vpack.c.b16 %v8114_v10, %v8113_v41  ;;  %v8933_v21 = vrot.slane %v8931_v22, 5  ;;  %v7926_v18 = vld [vmem:[#allocation3 + $0x90] sm:$0xe] }
 0x56e   : > { %10820 = vmatmul.msk.bf16.gmra.mxu3 %vm1373_vm10, %v10970_v61  ;;  %v7714_v23 = vunpack.c.l.b16 %v7548_v6  ;;  %v7563_v17 = vshrl.u32 %v14575_v52, 16  ;;  %v8929_v61 = vrot.slane %v8928_v8, 4  ;;  %v8936_v10 = vshrl.u32 %v8635_v62, 16 }
 0x56f   : > { %10740 = vmatmul.msk.bf16.gmra.mxu2 %vm1373_vm10, %v8135_v46  ;;  %v8061_v26 = vrot.slane %v14622_v56, 5  ;;  %v7556_v22 = vor.u32 %v7555_v42, %v7552_v29  ;;  %v10724_v27 = vrot.slane %v7926_v18, 9  ;;  %v7231_v11 = vadd.f32 %v14004_v54, %v14045_v16  ;;  %v7294_v18 = vld [vmem:[#allocation3 + $0x90] sm:$0xf] }
 0x570   : > { %v7805_v30 = vpop.f32.mrf.mxu1  ;;  %v7736_v33 = vpack.c.b16 %v7714_v23, %v7713_v55  ;;  %v8934_v52 = vsel %vm11287_vm13, %v8929_v61, %v8933_v21  ;;  %v8060_v6 = vrot.slane %v8058_v35, 4  ;;  %v8938_v3 = vrot.slane %v8936_v10, 4 }
 0x571   : > { %v7884_v48 = vadd.f32 %v7805_v30, %v7230_v28  ;;  %v8492_v40 = vpop.f32.mrf.mxu3  ;;  %v14638_v28 = vpop.f32.mrf.mxu0  ;;  %v7565_v30 = vrot.slane %v7563_v17, 4  ;;  %v8941_v8 = vrot.slane %v8939_v44, 5  ;;  %v9056_v21 = vunpack.c.l.b16 %v8934_v52  ;;  %v8637_v17 = vld [vmem:[#allocation3 + $0xb0] sm:$0x1] }
 0x572   : > { %v7569_v29 = vshll.u32 %v14581_v59, 16  ;;  %v8062_v42 = vsel %vm11800_vm1, %v8060_v6, %v8061_v26  ;;  %v8059_v23 = vsel %vm11800_vm1, %v10724_v27, %v8058_v35  ;;  %v7574_v35 = vshrl.u32 %v7294_v18, 16 }
 0x573   : > { %v8282_v50 = vadd.f32 %v14568_v14, %v7884_v48  ;;  %v14631_v41 = vpop.f32.mrf.mxu2  ;;  %v8636_v14 = vld [vmem:[#allocation3 + $0xac] sm:$0xf]  ;;  %v7566_v16 = vor.u32 %v7565_v30, %v14636_v24  ;;  %v8116_v61 = vunpack.c.l.b16 %v8062_v42  ;;  %v8942_v10 = vor.u32 %v8941_v8, %v8938_v3  ;;  %v14658_v8 = vld [vmem:[#allocation3 + $0xa0] sm:$0xf] }
 0x574   : > { %v8945_v48 = vshll.u32 %v8636_v14, 16  ;;  %v8949_v55 = vshrl.u32 %v8636_v14, 16  ;;  %v7571_v26 = vrot.slane %v7569_v29, 5  ;;  %v8115_v52 = vunpack.c.l.b16 %v8059_v23  ;;  %v8638_v29 = vld [vmem:[#allocation3 + $0xb4] sm:$0xf] }
 0x575   : > { %v14629_v5 = vadd.f32 %v8489_v12, %v8282_v50  ;;  %v9055_v12 = vunpack.c.l.b16 %v8924_v43  ;;  %v10971_v43 = vld [vmem:[#allocation3 + $0x90] sm:$0xff]  ;;  %v7577_v27 = vshll.u32 %v7294_v18, 16  ;;  %v7567_v30 = vrot.slane %v7566_v16, 4 }
 0x576   : > { %v8947_v44 = vrot.slane %v8945_v48, 5  ;;  %v8951_v59 = vrot.slane %v8949_v55, 4  ;;  %v7587_v23 = vshrl.u32 %v14618_v0, 16 }
 0x577   : > { %v9076_v54 = vpack.c.b16 %v9056_v21, %v9055_v12  ;;  %v7232_v12 = vadd.f32 %v14011_v63, %v14055_v45  ;;  %v7572_v21 = vsel %vm11287_vm13, %v7567_v30, %v7571_v26  ;;  %v7576_v45 = vrot.slane %v7574_v35, 4 }
 0x578   : > { %v7808_v46 = vpop.f32.mrf.mxu1  ;;  %v8952_v3 = vor.u32 %v8951_v59, %v8947_v44  ;;  %v7579_v42 = vrot.slane %v7577_v27, 5  ;;  %v7716_v26 = vunpack.c.l.b16 %v7572_v21 }
 0x579   : > { %v7885_v62 = vadd.f32 %v7808_v46, %v7231_v11  ;;  %v8494_v50 = vpop.f32.mrf.mxu3  ;;  %v8955_v11 = vshll.u32 %v8637_v17, 16  ;;  %v8136_v46 = vpack.c.b16 %v8116_v61, %v8115_v52  ;;  %v7927_v17 = vld [vmem:[#allocation3 + $0x9c] sm:$0xe]  ;;  %v8960_v61 = vshrl.u32 %v8638_v29, 16 }
 0x57a   : > { %v7580_v35 = vor.u32 %v7579_v42, %v7576_v45  ;;  %v7593_v42 = vshll.u32 %v14622_v56, 16 }
 0x57b   : > { %v8283_v13 = vadd.f32 %v14590_v51, %v7885_v62  ;;  %10706 = vmatmul.msk.bf16.gmra.mxu1 %vm1373_vm10, %v7736_v33  ;;  %v7557_v51 = vrot.slane %v7556_v22, 4  ;;  %v14653_v33 = vpop.f32.mrf.mxu2  ;;  %v14660_v22 = vpop.f32.mrf.mxu0  ;;  %v8957_v63 = vrot.slane %v8955_v11, 5 }
 0x57c   : > { %v7581_v45 = vrot.slane %v7580_v35, 4  ;;  %v7234_v35 = vadd.f32 %v14032_v38, %v14075_v15  ;;  %v7607_v38 = vshll.u32 %v14658_v8, 16  ;;  %v7611_v15 = vshrl.u32 %v14658_v8, 16 }
 0x57d   : > { %v14650_v14 = vadd.f32 %v8492_v40, %v8283_v13  ;;  %10839 = vmatmul.msk.bf16.gmra.mxu0 %vm1373_vm10, %v9076_v54  ;;  %v8943_v40 = vrot.slane %v8942_v10, 4  ;;  %v7562_v62 = vsel %vm11287_vm13, %v7557_v51, %v14636_v24  ;;  %v7583_v13 = vshll.u32 %v14618_v0, 16  ;;  %v14669_v54 = vld [vmem:[#allocation3 + $0xa4] sm:$0x1] }
 0x57e   : > { %10821 = vmatmul.msk.bf16.gmra.mxu3 %vm1373_vm10, %v10971_v43  ;;  %v8065_v24 = vrot.slane %v14658_v8, 5  ;;  %v8953_v43 = vrot.slane %v8952_v3, 4  ;;  %v8963_v10 = vshll.u32 %v8638_v29, 16  ;;  %v7715_v51 = vunpack.c.l.b16 %v7562_v62 }
 0x57f   : > { %10741 = vmatmul.msk.bf16.gmra.mxu2 %vm1373_vm10, %v8136_v46  ;;  %v8948_v18 = vsel %vm11287_vm13, %v8943_v40, %v8947_v44  ;;  %v8068_v11 = vrot.slane %v14669_v54, 5  ;;  %v7585_v27 = vrot.slane %v7583_v13, 5  ;;  %v7233_v44 = vadd.f32 %v14023_v1, %v14065_v60 }
 0x580   : > { %v7810_v6 = vpop.f32.mrf.mxu1  ;;  %v8958_v0 = vsel %vm11287_vm13, %v8953_v43, %v8957_v63  ;;  %v9057_v30 = vunpack.c.l.b16 %v8948_v18  ;;  %v8962_v40 = vrot.slane %v8960_v61, 4  ;;  %v8965_v3 = vrot.slane %v8963_v10, 5  ;;  %v8640_v18 = vld [vmem:[#allocation3 + $0xbc] sm:$0x1] }
 0x581   : > { %v7886_v48 = vadd.f32 %v7810_v6, %v7232_v12  ;;  %v8497_v55 = vpop.f32.mrf.mxu3  ;;  %v10725_v12 = vrot.slane %v7927_v17, 9  ;;  %v7589_v6 = vrot.slane %v7587_v23, 4  ;;  %v7737_v29 = vpack.c.b16 %v7716_v26, %v7715_v51  ;;  %v10972_v43 = vld [vmem:[#allocation3 + $0x9c] sm:$0xff] }
 0x582   : > { %v8966_v10 = vor.u32 %v8965_v3, %v8962_v40  ;;  %v14704_v40 = vld [vmem:[#allocation3 + $0xac] sm:$0xf] }
 0x583   : > { %v8284_v16 = vadd.f32 %v14609_v31, %v7886_v48  ;;  %v14678_v52 = vpop.f32.mrf.mxu2  ;;  %v8639_v31 = vld [vmem:[#allocation3 + $0xb8] sm:$0xf]  ;;  %v14688_v13 = vpop.f32.mrf.mxu0  ;;  %v7590_v23 = vor.u32 %v7589_v6, %v7585_v27  ;;  %v8066_v17 = vsel %vm11800_vm1, %v10725_v12, %v8065_v24 }
 0x584   : > { %v8969_v48 = vshll.u32 %v8639_v31, 16  ;;  %v8973_v62 = vshrl.u32 %v8639_v31, 16 }
 0x585   : > { %v14676_v59 = vadd.f32 %v8494_v50, %v8284_v16  ;;  %v8067_v50 = vrot.slane %v8065_v24, 4  ;;  %v8117_v24 = vunpack.c.l.b16 %v8066_v17 }
 0x586   : > { %v8971_v51 = vrot.slane %v8969_v48, 5  ;;  %v8975_v26 = vrot.slane %v8973_v62, 4 }
 0x587   : > { %15898 = vst [vmem:[#allocation43_spill] sm:$0xff] %v14676_v59  ;;  %v9058_v59 = vunpack.c.l.b16 %v8958_v0  ;;  %v8069_v63 = vsel %vm11800_vm1, %v8067_v50, %v8068_v11  ;;  %v7297_v11 = vld [vmem:[#allocation3 + $0x9c] sm:$0xf]  ;;  %v8979_v0 = vshll.u32 %v8640_v18, 16  ;;  %v8967_v50 = vrot.slane %v8966_v10, 4 }
 0x588   : > { %v7813_v46 = vpop.f32.mrf.mxu1  ;;  %v8118_v61 = vunpack.c.l.b16 %v8069_v63  ;;  %v7598_v12 = vshrl.u32 %v7297_v11, 16  ;;  %v14711_v63 = vld [vmem:[#allocation3 + $0xb0] sm:$0x1] }
 0x589   : > { %v7887_v21 = vadd.f32 %v7813_v46, %v7233_v44  ;;  %v8499_v16 = vpop.f32.mrf.mxu3  ;;  %v9077_v60 = vpack.c.b16 %v9058_v59, %v9057_v30  ;;  %v7595_v59 = vrot.slane %v7593_v42, 5  ;;  %v7601_v44 = vshll.u32 %v7297_v11, 16 }
 0x58a   : > { %v8137_v6 = vpack.c.b16 %v8118_v61, %v8117_v24  ;;  %v8976_v46 = vor.u32 %v8975_v26, %v8971_v51  ;;  %v7600_v42 = vrot.slane %v7598_v12, 4  ;;  %v8972_v17 = vsel %vm11287_vm13, %v8967_v50, %v8971_v51 }
 0x58b   : > { %v8285_v1 = vadd.f32 %v14631_v41, %v7887_v21  ;;  %10707 = vmatmul.msk.bf16.gmra.mxu1 %vm1373_vm10, %v7737_v29  ;;  %v14697_v56 = vpop.f32.mrf.mxu2  ;;  %v7586_v41 = vsel %vm11287_vm13, %v7581_v45, %v7585_v27  ;;  %v8641_v21 = vld [vmem:[#allocation3 + $0xc0] sm:$0xf]  ;;  %v8981_v29 = vrot.slane %v8979_v0, 5  ;;  %v14717_v10 = vpop.f32.mrf.mxu0  ;;  %v7609_v51 = vrot.slane %v7607_v38, 5 }
 0x58c   : > { %v7717_v62 = vunpack.c.l.b16 %v7586_v41  ;;  %v8977_v18 = vrot.slane %v8976_v46, 4  ;;  %v8987_v61 = vshll.u32 %v8641_v21, 16  ;;  %v8075_v41 = vrot.slane %v14711_v63, 5 }
 0x58d   : > { %v14694_v31 = vadd.f32 %v8497_v55, %v8285_v1  ;;  %10840 = vmatmul.msk.bf16.gmra.mxu0 %vm1373_vm10, %v9077_v60  ;;  %v7591_v55 = vrot.slane %v7590_v23, 4  ;;  %v7603_v1 = vrot.slane %v7601_v44, 5  ;;  %v7928_v60 = vld [vmem:[#allocation3 + $0xa8] sm:$0xe]  ;;  %v8072_v23 = vrot.slane %v14704_v40, 5 }
 0x58e   : > { %10822 = vmatmul.msk.bf16.gmra.mxu3 %vm1373_vm10, %v10972_v43  ;;  %v8984_v43 = vshrl.u32 %v8641_v21, 16  ;;  %v8982_v24 = vsel %vm11287_vm13, %v8977_v18, %v8981_v29  ;;  %v7613_v0 = vrot.slane %v7611_v15, 4  ;;  %v7235_v12 = vadd.f32 %v14043_v7, %v14083_v37 }
 0x58f   : > { %v7596_v27 = vsel %vm11287_vm13, %v7591_v55, %v7595_v59  ;;  %10742 = vmatmul.msk.bf16.gmra.mxu2 %vm1373_vm10, %v8137_v6  ;;  %v14725_v59 = vld [vmem:[#allocation3 + $0xc4] sm:$0xf]  ;;  %v7604_v44 = vor.u32 %v7603_v1, %v7600_v42  ;;  %v8989_v50 = vrot.slane %v8987_v61, 5  ;;  %v9060_v29 = vunpack.c.l.b16 %v8982_v24 }
 0x590   : > { %v7815_v30 = vpop.f32.mrf.mxu1  ;;  %v7718_v8 = vunpack.c.l.b16 %v7596_v27  ;;  %v8986_v6 = vrot.slane %v8984_v43, 4  ;;  %v8997_v46 = vshrl.u32 %v14725_v59, 16  ;;  %v7614_v15 = vor.u32 %v7613_v0, %v7609_v51 }
 0x591   : > { %v7888_v3 = vadd.f32 %v7815_v30, %v7234_v35  ;;  %v8502_v48 = vpop.f32.mrf.mxu3  ;;  %v10726_v35 = vrot.slane %v7928_v60, 9  ;;  %v8074_v30 = vrot.slane %v8072_v23, 4  ;;  %v7605_v42 = vrot.slane %v7604_v44, 4  ;;  %v14739_v60 = vld [vmem:[#allocation3 + $0xc8] sm:$0x1] }
 0x592   : > { %v7738_v21 = vpack.c.b16 %v7718_v8, %v7717_v62  ;;  %v8990_v18 = vor.u32 %v8989_v50, %v8986_v6  ;;  %v8999_v61 = vrot.slane %v8997_v46, 4  ;;  %v9003_v24 = vshll.u32 %v14739_v60, 16  ;;  %v14756_v6 = vld [vmem:[#allocation3 + $0xb8] sm:$0xf] }
 0x593   : > { %v8286_v45 = vadd.f32 %v14653_v33, %v7888_v3  ;;  %v14721_v11 = vpop.f32.mrf.mxu2  ;;  %v7617_v33 = vshll.u32 %v14669_v54, 16  ;;  %v8993_v54 = vshll.u32 %v14725_v59, 16  ;;  %v8076_v38 = vsel %vm11800_vm1, %v8074_v30, %v8075_v41  ;;  %v14748_v0 = vpop.f32.mrf.mxu0 }
 0x594   : > { %v8073_v1 = vsel %vm11800_vm1, %v10726_v35, %v8072_v23  ;;  %v8120_v62 = vunpack.c.l.b16 %v8076_v38  ;;  %v7300_v23 = vld [vmem:[#allocation3 + $0xa8] sm:$0xf]  ;;  %v7236_v35 = vadd.f32 %v14052_v32, %v14095_v39  ;;  %v8991_v30 = vrot.slane %v8990_v18, 4  ;;  %v14761_v38 = vld [vmem:[#allocation3 + $0xbc] sm:$0x1] }
 0x595   : > { %v14719_v26 = vadd.f32 %v8499_v16, %v8286_v45  ;;  %v9059_v16 = vunpack.c.l.b16 %v8972_v17  ;;  %v7619_v45 = vrot.slane %v7617_v33, 5  ;;  %v10973_v17 = vld [vmem:[#allocation3 + $0xa8] sm:$0xff]  ;;  %v8995_v43 = vrot.slane %v8993_v54, 5 }
 0x596   : > { %v8119_v41 = vunpack.c.l.b16 %v8073_v1  ;;  %v7622_v46 = vshrl.u32 %v7300_v23, 16  ;;  %v9005_v32 = vrot.slane %v9003_v24, 5  ;;  %v7631_v39 = vshll.u32 %v14704_v40, 16  ;;  %v7929_v1 = vld [vmem:[#allocation3 + $0xb4] sm:$0xe] }
 0x597   : > { %v9078_v37 = vpack.c.b16 %v9060_v29, %v9059_v16 }
 0x598   : > { %v7818_v55 = vpop.f32.mrf.mxu1  ;;  %v8138_v44 = vpack.c.b16 %v8120_v62, %v8119_v41 }
 0x599   : > { %v7889_v3 = vadd.f32 %v7818_v55, %v7235_v12  ;;  %v8504_v27 = vpop.f32.mrf.mxu3  ;;  %v9000_v55 = vor.u32 %v8999_v61, %v8995_v43  ;;  %v7624_v61 = vrot.slane %v7622_v46, 4 }
 0x59b   : > { %v8287_v7 = vadd.f32 %v14678_v52, %v7889_v3  ;;  %10708 = vmatmul.msk.bf16.gmra.mxu1 %vm1373_vm10, %v7738_v21  ;;  %v14744_v33 = vpop.f32.mrf.mxu2  ;;  %v7615_v52 = vrot.slane %v7614_v15, 4  ;;  %v7625_v3 = vshll.u32 %v7300_v23, 16  ;;  %v8644_v21 = vld [vmem:[#allocation3 + $0xcc] sm:$0xf]  ;;  %v7633_v23 = vrot.slane %v7631_v39, 5 }
 0x59c   : > { %v9011_v62 = vshll.u32 %v8644_v21, 16 }
 0x59d   : > { %v14741_v8 = vadd.f32 %v8502_v48, %v8287_v7  ;;  %10841 = vmatmul.msk.bf16.gmra.mxu0 %vm1373_vm10, %v9078_v37  ;;  %v7610_v48 = vsel %vm11287_vm13, %v7605_v42, %v7609_v51  ;;  %v7620_v16 = vsel %vm11287_vm13, %v7615_v52, %v7619_v45  ;;  %v7635_v51 = vshrl.u32 %v14704_v40, 16 }
 0x59e   : > { %10823 = vmatmul.msk.bf16.gmra.mxu3 %vm1373_vm10, %v10973_v17  ;;  %v7719_v29 = vunpack.c.l.b16 %v7610_v48  ;;  %v7720_v45 = vunpack.c.l.b16 %v7620_v16  ;;  %v8079_v7 = vrot.slane %v14756_v6, 5  ;;  %v8996_v37 = vsel %vm11287_vm13, %v8991_v30, %v8995_v43 }
 0x59f   : > { %10743 = vmatmul.msk.bf16.gmra.mxu2 %vm1373_vm10, %v8138_v44  ;;  %v9001_v42 = vrot.slane %v9000_v55, 4  ;;  %v9008_v17 = vshrl.u32 %v8644_v21, 16  ;;  %v7627_v52 = vrot.slane %v7625_v3, 5  ;;  %v8082_v40 = vrot.slane %v14761_v38, 5  ;;  %v11017_v55 = vld [vmem:[#allocation3 + $0xd0] sm:$0xf]  ;;  %v14776_v3 = vpop.f32.mrf.mxu0 }
 0x5a0   : > { %v7820_v12 = vpop.f32.mrf.mxu1  ;;  %v7739_v41 = vpack.c.b16 %v7720_v45, %v7719_v29  ;;  %v7237_v43 = vadd.f32 %v14063_v36, %v14107_v53  ;;  %v9061_v48 = vunpack.c.l.b16 %v8996_v37  ;;  %v8081_v16 = vrot.slane %v8079_v7, 4 }
 0x5a1   : > { %v7890_v50 = vadd.f32 %v7820_v12, %v7236_v35  ;;  %v8507_v54 = vpop.f32.mrf.mxu3  ;;  %v7637_v35 = vrot.slane %v7635_v51, 4  ;;  %v10727_v12 = vrot.slane %v7929_v1, 9  ;;  %v9010_v44 = vrot.slane %v9008_v17, 4 }
 0x5a2   : > { %v9013_v30 = vrot.slane %v9011_v62, 5  ;;  %v9021_v46 = vshrl.u32 %v11017_v55, 16  ;;  %v8083_v39 = vsel %vm11800_vm1, %v8081_v16, %v8082_v40  ;;  %v7641_v36 = vshll.u32 %v14711_v63, 16  ;;  %v11018_v40 = vld [vmem:[#allocation3 + $0xd4] sm:$0x1] }
 0x5a3   : > { %v8288_v15 = vadd.f32 %v14697_v56, %v7890_v50  ;;  %v14770_v24 = vpop.f32.mrf.mxu2  ;;  %v9006_v56 = vsel %vm11287_vm13, %v9001_v42, %v9005_v32  ;;  %v9017_v50 = vshll.u32 %v11017_v55, 16  ;;  %v7628_v32 = vor.u32 %v7627_v52, %v7624_v61  ;;  %v10974_v42 = vld [vmem:[#allocation3 + $0xb4] sm:$0xff] }
 0x5a4   : > { %v7638_v45 = vor.u32 %v7637_v35, %v7633_v23  ;;  %v8080_v37 = vsel %vm11800_vm1, %v10727_v12, %v8079_v7  ;;  %v8122_v1 = vunpack.c.l.b16 %v8083_v39  ;;  %v9014_v17 = vor.u32 %v9013_v30, %v9010_v44  ;;  %v7303_v35 = vld [vmem:[#allocation3 + $0xb4] sm:$0xf]  ;;  %v14793_v44 = vld [vmem:[#allocation3 + $0xc4] sm:$0xf] }
 0x5a5   : > { %v14767_v18 = vadd.f32 %v8504_v27, %v8288_v15  ;;  %v9062_v15 = vunpack.c.l.b16 %v9006_v56  ;;  %v9019_v62 = vrot.slane %v9017_v50, 5  ;;  %v9023_v56 = vrot.slane %v9021_v46, 4 }
 0x5a6   : > { %v7629_v52 = vrot.slane %v7628_v32, 4  ;;  %v7643_v63 = vrot.slane %v7641_v36, 5  ;;  %v7238_v7 = vadd.f32 %v14072_v58, %v14125_v34  ;;  %v7646_v46 = vshrl.u32 %v7303_v35, 16 }
 0x5a7   : > { %v9079_v51 = vpack.c.b16 %v9062_v15, %v9061_v48  ;;  %v7639_v48 = vrot.slane %v7638_v45, 4  ;;  %v7649_v34 = vshll.u32 %v7303_v35, 16  ;;  %v14800_v15 = vld [vmem:[#allocation3 + $0xc8] sm:$0x1]  ;;  %v14802_v32 = vpop.f32.mrf.mxu0  ;;  %v8086_v36 = vrot.slane %v14793_v44, 5 }
 0x5a8   : > { %v7823_v27 = vpop.f32.mrf.mxu1  ;;  %v7634_v50 = vsel %vm11287_vm13, %v7629_v52, %v7633_v23  ;;  %v7930_v45 = vld [vmem:[#allocation3 + $0xc0] sm:$0xe] }
 0x5a9   : > { %v7891_v21 = vadd.f32 %v7823_v27, %v7237_v43  ;;  %v8509_v29 = vpop.f32.mrf.mxu3  ;;  %v9024_v27 = vor.u32 %v9023_v56, %v9019_v62  ;;  %v7651_v52 = vrot.slane %v7649_v34, 5  ;;  %v8088_v35 = vrot.slane %v8086_v36, 4 }
 0x5aa   : > { %v7665_v34 = vshll.u32 %v14761_v38, 16 }
 0x5ab   : > { %v8289_v53 = vadd.f32 %v14721_v11, %v7891_v21  ;;  %10709 = vmatmul.msk.bf16.gmra.mxu1 %vm1373_vm10, %v7739_v41  ;;  %v8121_v11 = vunpack.c.l.b16 %v8080_v37  ;;  %v9027_v41 = vshll.u32 %v11018_v40, 16  ;;  %v14791_v12 = vpop.f32.mrf.mxu2  ;;  %v7644_v21 = vsel %vm11287_vm13, %v7639_v48, %v7643_v63 }
 0x5ac   : > { %v7659_v63 = vshrl.u32 %v14756_v6, 16 }
 0x5ad   : > { %v14785_v61 = vadd.f32 %v8507_v54, %v8289_v53  ;;  %10842 = vmatmul.msk.bf16.gmra.mxu0 %vm1373_vm10, %v9079_v51  ;;  %v8139_v16 = vpack.c.b16 %v8122_v1, %v8121_v11  ;;  %v9015_v54 = vrot.slane %v9014_v17, 4  ;;  %v9029_v58 = vrot.slane %v9027_v41, 5  ;;  %v15899_v11 = vld [vmem:[#allocation9_spill] sm:$0xff] }
 0x5ae   : > { %10824 = vmatmul.msk.bf16.gmra.mxu3 %vm1373_vm10, %v10974_v42  ;;  %v7721_v53 = vunpack.c.l.b16 %v7634_v50  ;;  %v9025_v51 = vrot.slane %v9024_v27, 4  ;;  %v7722_v42 = vunpack.c.l.b16 %v7644_v21  ;;  %v7648_v1 = vrot.slane %v7646_v46, 4 }
 0x5af   : > { %10744 = vmatmul.msk.bf16.gmra.mxu2 %vm1373_vm10, %v8139_v16  ;;  %v9020_v23 = vsel %vm11287_vm13, %v9015_v54, %v9019_v62  ;;  %v8089_v17 = vrot.slane %v14800_v15, 5  ;;  %v7239_v40 = vadd.f32 %v15899_v11, %v14146_v2  ;;  %v10728_v41 = vrot.slane %v7930_v45, 9 }
 0x5b0   : > { %v7825_v43 = vpop.f32.mrf.mxu1  ;;  %v9030_v56 = vsel %vm11287_vm13, %v9025_v51, %v9029_v58  ;;  %v9063_v62 = vunpack.c.l.b16 %v9020_v23  ;;  %v7661_v46 = vrot.slane %v7659_v63, 4  ;;  %v10975_v58 = vld [vmem:[#allocation3 + $0xc0] sm:$0xff] }
 0x5b1   : > { %v7892_v30 = vadd.f32 %v7825_v43, %v7238_v7  ;;  %v8512_v55 = vpop.f32.mrf.mxu3  ;;  %v7740_v43 = vpack.c.b16 %v7722_v42, %v7721_v53  ;;  %v9064_v16 = vunpack.c.l.b16 %v9030_v56  ;;  %v8090_v54 = vsel %vm11800_vm1, %v8088_v35, %v8089_v17  ;;  %v14824_v53 = vpop.f32.mrf.mxu0  ;;  %v15900_v42 = vld [vmem:[#allocation7_spill] sm:$0xff]  ;;  %v7306_v56 = vld [vmem:[#allocation3 + $0xc0] sm:$0xf] }
 0x5b2   : > { %v8087_v21 = vsel %vm11800_vm1, %v10728_v41, %v8086_v36 }
 0x5b3   : > { %v8290_v39 = vadd.f32 %v14744_v33, %v7892_v30  ;;  %v7655_v33 = vshll.u32 %v14756_v6, 16  ;;  %v8231_v27 = vpop.f32.mrf.mxu2  ;;  %v7652_v30 = vor.u32 %v7651_v52, %v7648_v1  ;;  %v9080_v2 = vpack.c.b16 %v9064_v16, %v9063_v62  ;;  %v15901_v1 = vld [vmem:[#allocation6_spill] sm:$0xff] }
 0x5b4   : > { %v8123_v45 = vunpack.c.l.b16 %v8087_v21  ;;  %v7240_v17 = vadd.f32 %v15901_v1, %v15900_v42  ;;  %v7667_v52 = vrot.slane %v7665_v34, 5  ;;  %v7673_v62 = vshll.u32 %v7306_v56, 16 }
 0x5b5   : > { %v14808_v37 = vadd.f32 %v8509_v29, %v8290_v39  ;;  %v7657_v50 = vrot.slane %v7655_v33, 5  ;;  %v8124_v39 = vunpack.c.l.b16 %v8090_v54  ;;  %v7653_v51 = vrot.slane %v7652_v30, 4 }
 0x5b6   : > { %v7675_v54 = vrot.slane %v7673_v62, 5  ;;  %v7679_v30 = vshll.u32 %v14793_v44, 16  ;;  %v7689_v42 = vshll.u32 %v14800_v15, 16 }
 0x5b7   : > { %v8140_v33 = vpack.c.b16 %v8124_v39, %v8123_v45  ;;  %v10976_v45 = vld [vmem:[#allocation3 + $0xcc] sm:$0xff] }
 0x5b8   : > { %v7828_v29 = vpop.f32.mrf.mxu1 }
 0x5b9   : > { %v7893_v7 = vadd.f32 %v7828_v29, %v7239_v40  ;;  %v8514_v48 = vpop.f32.mrf.mxu3  ;;  %v7670_v40 = vshrl.u32 %v7306_v56, 16  ;;  %v15903_v56 = vld [vmem:[#allocation5_spill] sm:$0xff] }
 0x5bb   : > { %v8291_v6 = vadd.f32 %v14770_v24, %v7893_v7  ;;  %10710 = vmatmul.msk.bf16.gmra.mxu1 %vm1373_vm10, %v7740_v43  ;;  %v7662_v24 = vor.u32 %v7661_v46, %v7657_v50  ;;  %v8233_v29 = vpop.f32.mrf.mxu2  ;;  %v7672_v16 = vrot.slane %v7670_v40, 4  ;;  %v15902_v46 = vld [vmem:[#allocation31_spill] sm:$0xff] }
 0x5bd   : > { %v14826_v23 = vadd.f32 %v8512_v55, %v8291_v6  ;;  %10843 = vmatmul.msk.bf16.gmra.mxu0 %vm1373_vm10, %v9080_v2  ;;  %v7658_v55 = vsel %vm11287_vm13, %v7653_v51, %v7657_v50  ;;  %v7663_v11 = vrot.slane %v7662_v24, 4  ;;  %v7683_v50 = vshrl.u32 %v14793_v44, 16 }
 0x5be   : > { %10825 = vmatmul.msk.bf16.gmra.mxu3 %vm1373_vm10, %v10975_v58  ;;  %v7723_v43 = vunpack.c.l.b16 %v7658_v55  ;;  %v7241_v6 = vadd.f32 %v15902_v46, %v14201_v25  ;;  %v7676_v39 = vor.u32 %v7675_v54, %v7672_v16  ;;  %v7681_v51 = vrot.slane %v7679_v30, 5 }
 0x5bf   : > { %10745 = vmatmul.msk.bf16.gmra.mxu2 %vm1373_vm10, %v8140_v33  ;;  %v7668_v35 = vsel %vm11287_vm13, %v7663_v11, %v7667_v52  ;;  %v7685_v24 = vrot.slane %v7683_v50, 4  ;;  %v7691_v33 = vrot.slane %v7689_v42, 5 }
 0x5c0   : > { %v7830_v36 = vpop.f32.mrf.mxu1  ;;  %v7724_v2 = vunpack.c.l.b16 %v7668_v35  ;;  %v7677_v25 = vrot.slane %v7676_v39, 4  ;;  %v15905_v35 = vld [vmem:[#allocation29_spill] sm:$0xff]  ;;  %v15907_v39 = vld [vmem:[#allocation32_spill] sm:$0xff] }
 0x5c1   : > { %v7894_v38 = vadd.f32 %v7830_v36, %v7240_v17  ;;  %v8517_v63 = vpop.f32.mrf.mxu3  ;;  %v7686_v17 = vor.u32 %v7685_v24, %v7681_v51  ;;  %v7242_v36 = vadd.f32 %v15903_v56, %v14228_v19 }
 0x5c3   : > { %v8292_v41 = vadd.f32 %v14791_v12, %v7894_v38  ;;  %v7741_v12 = vpack.c.b16 %v7724_v2, %v7723_v43  ;;  %v8236_v44 = vpop.f32.mrf.mxu2  ;;  %v7687_v11 = vrot.slane %v7686_v17, 4  ;;  %v11019_v2 = vld [vmem:[#allocation3 + $0x1c] sm:$0xf] }
 0x5c5   : > { %v14838_v7 = vadd.f32 %v8514_v48, %v8292_v41  ;;  %v7692_v15 = vsel %vm11287_vm13, %v7687_v11, %v7691_v33  ;;  %v15904_v41 = vld [vmem:[#allocation13_spill] sm:$0xff] }
 0x5c6   : > { %v7243_v43 = vadd.f32 %v15905_v35, %v15904_v41  ;;  %v7726_v16 = vunpack.c.l.b16 %v7692_v15 }
 0x5c8   : > { %v7833_v21 = vpop.f32.mrf.mxu1 }
 0x5c9   : > { %v7895_v58 = vadd.f32 %v7833_v21, %v7241_v6  ;;  %v8519_v34 = vpop.f32.mrf.mxu3 }
 0x5cb   : > { %v8293_v48 = vadd.f32 %v8231_v27, %v7895_v58  ;;  %10711 = vmatmul.msk.bf16.gmra.mxu1 %vm1373_vm10, %v7741_v12  ;;  %v7682_v27 = vsel %vm11287_vm13, %v7677_v25, %v7681_v51  ;;  %v8238_v54 = vpop.f32.mrf.mxu2  ;;  %v11020_v58 = vld [vmem:[#allocation3 + $0x20] sm:$0x1] }
 0x5cc   : > { %v7725_v62 = vunpack.c.l.b16 %v7682_v27  ;;  %v9322_v12 = vrot.slane %v11020_v58, 5 }
 0x5cd   : > { %v14846_v1 = vadd.f32 %v8517_v63, %v8293_v48  ;;  %v10844_v48 = vrot.slane %v9253_v9, 9 }
 0x5ce   : > { %10826 = vmatmul.msk.bf16.gmra.mxu3 %vm1373_vm10, %v10976_v45  ;;  %v7742_v50 = vpack.c.b16 %v7726_v16, %v7725_v62 }
 0x5d0   : > { %v7835_v52 = vpop.f32.mrf.mxu1 }
 0x5d1   : > { %v7896_v38 = vadd.f32 %v7835_v52, %v7242_v36  ;;  %v8522_v55 = vpop.f32.mrf.mxu3 }
 0x5d3   : > { %v8294_v40 = vadd.f32 %v8233_v29, %v7896_v38  ;;  %v9319_v29 = vrot.slane %v11019_v2, 5  ;;  %v8241_v25 = vpop.f32.mrf.mxu2  ;;  %v15908_v38 = vld [vmem:[#allocation17_spill] sm:$0xff]  ;;  %v15911_v2 = vld [vmem:[#allocation34_spill] sm:$0xff] }
 0x5d5   : > { %v14855_v63 = vadd.f32 %v8519_v34, %v8294_v40  ;;  %v15906_v34 = vld [vmem:[#allocation15_spill] sm:$0xff]  ;;  %v9321_v45 = vrot.slane %v9319_v29, 4  ;;  %v9320_v36 = vsel %vm11800_vm1, %v10844_v48, %v9319_v29 }
 0x5d6   : > { %v7244_v51 = vadd.f32 %v15907_v39, %v15906_v34  ;;  %v9431_v11 = vunpack.c.l.b16 %v9320_v36 }
 0x5d8   : > { %v7838_v19 = vpop.f32.mrf.mxu1 }
 0x5d9   : > { %v7897_v30 = vadd.f32 %v7838_v19, %v7243_v43  ;;  %v8524_v46 = vpop.f32.mrf.mxu3  ;;  %v11021_v43 = vld [vmem:[#allocation3 + $0x28] sm:$0xf] }
 0x5da   : > { %v9326_v16 = vrot.slane %v11021_v43, 5  ;;  %v15914_v43 = vld [vmem:[#allocation21_spill] sm:$0xff] }
 0x5db   : > { %v8295_v6 = vadd.f32 %v8236_v44, %v7897_v30  ;;  %10712 = vmatmul.msk.bf16.gmra.mxu1 %vm1373_vm10, %v7742_v50  ;;  %v9323_v44 = vsel %vm11800_vm1, %v9321_v45, %v9322_v12  ;;  %v8243_v35 = vpop.f32.mrf.mxu2  ;;  %v11022_v50 = vld [vmem:[#allocation3 + $0x2c] sm:$0x1] }
 0x5dc   : > { %v9432_v33 = vunpack.c.l.b16 %v9323_v44  ;;  %v9328_v12 = vrot.slane %v9326_v16, 4  ;;  %v15913_v44 = vld [vmem:[#allocation35_spill] sm:$0xff] }
 0x5dd   : > { %v14860_v21 = vadd.f32 %v8522_v55, %v8295_v6  ;;  %v15909_v55 = vld [vmem:[#allocation33_spill] sm:$0xff]  ;;  %v15910_v6 = vld [vmem:[#allocation36_spill] sm:$0xff] }
 0x5de   : > { %v7245_v27 = vadd.f32 %v15909_v55, %v15908_v38  ;;  %v9463_v62 = vpack.c.b16 %v9432_v33, %v9431_v11  ;;  %v7246_v29 = vadd.f32 %v15911_v2, %v15910_v6  ;;  %v11023_v11 = vld [vmem:[#allocation3 + $0x34] sm:$0xf] }
 0x5e0   : > { %v7840_v24 = vpop.f32.mrf.mxu1 }
 0x5e1   : > { %v7898_v42 = vadd.f32 %v7840_v24, %v7244_v51  ;;  %v8527_v56 = vpop.f32.mrf.mxu3 }
 0x5e3   : > { %v8296_v17 = vadd.f32 %v8238_v54, %v7898_v42  ;;  %v9254_v54 = vld [vmem:[#allocation3 + $0x24] sm:$0xe]  ;;  %v8246_v42 = vpop.f32.mrf.mxu2 }
 0x5e4   : > { %v10845_v58 = vrot.slane %v9254_v54, 9 }
 0x5e5   : > { %v14868_v52 = vadd.f32 %v8524_v46, %v8296_v17  ;;  %v9329_v46 = vrot.slane %v11022_v50, 5 }
 0x5e6   : > { %v9327_v24 = vsel %vm11800_vm1, %v10845_v58, %v9326_v16  ;;  %v15915_v16 = vld [vmem:[#allocation37_spill] sm:$0xff] }
 0x5e7   : > { %v9330_v39 = vsel %vm11800_vm1, %v9328_v12, %v9329_v46  ;;  %v7248_v54 = vadd.f32 %v15915_v16, %v15914_v43 }
 0x5e8   : > { %v7843_v40 = vpop.f32.mrf.mxu1  ;;  %v9434_v45 = vunpack.c.l.b16 %v9330_v39 }
 0x5e9   : > { %v7899_v15 = vadd.f32 %v7843_v40, %v7245_v27  ;;  %v8529_v30 = vpop.f32.mrf.mxu3  ;;  %v9333_v40 = vrot.slane %v11023_v11, 5  ;;  %v9256_v11 = vld [vmem:[#allocation3 + $0x3c] sm:$0xe] }
 0x5eb   : > { %v8297_v41 = vadd.f32 %v8241_v25, %v7899_v15  ;;  %10861 = vmatmul.msk.bf16.vlgmr.msra.gmra.mxu1 %vm1373_vm10, %v9463_v62  ;;  %v15912_v25 = vld [vmem:[#allocation19_spill] sm:$0xff]  ;;  %v9335_v6 = vrot.slane %v9333_v40, 4 }
 0x5ec   : > { %v7247_v17 = vadd.f32 %v15913_v44, %v15912_v25  ;;  %v9255_v62 = vld [vmem:[#allocation3 + $0x30] sm:$0xe] }
 0x5ed   : > { %v14873_v19 = vadd.f32 %v8527_v56, %v8297_v41  ;;  %v9433_v56 = vunpack.c.l.b16 %v9327_v24  ;;  %v11024_v41 = vld [vmem:[#allocation3 + $0x38] sm:$0x1]  ;;  %v10846_v46 = vrot.slane %v9255_v62, 9 }
 0x5ee   : > { %v15917_v24 = vld [vmem:[#allocation24_spill] sm:$0xff] }
 0x5ef   : > { %v9464_v55 = vpack.c.b16 %v9434_v45, %v9433_v56  ;;  %v9334_v12 = vsel %vm11800_vm1, %v10846_v46, %v9333_v40  ;;  %v11026_v40 = vld [vmem:[#allocation3 + $0x44] sm:$0x1] }
 0x5f0   : > { %v7845_v9 = vpop.f32.mrf.mxu1  ;;  %v9343_v62 = vrot.slane %v11026_v40, 5 }
 0x5f1   : > { %v7900_v34 = vadd.f32 %v7845_v9, %v7246_v29  ;;  %v8532_v33 = vpop.f32.mrf.mxu3 }
 0x5f3   : > { %v8298_v51 = vadd.f32 %v8243_v35, %v7900_v34  ;;  %v9336_v35 = vrot.slane %v11024_v41, 5  ;;  %v15918_v41 = vld [vmem:[#allocation11_spill] sm:$0xff] }
 0x5f5   : > { %v14881_v48 = vadd.f32 %v8529_v30, %v8298_v51  ;;  %v8248_v30 = vpop.f32.mrf.mxu2  ;;  %v9337_v9 = vsel %vm11800_vm1, %v9335_v6, %v9336_v35  ;;  %v15916_v51 = vld [vmem:[#allocation27_spill] sm:$0xff]  ;;  %v15919_v35 = vld [vmem:[#allocation10_spill] sm:$0xff] }
 0x5f6   : > { %v9436_v39 = vunpack.c.l.b16 %v9337_v9  ;;  %v7249_v45 = vadd.f32 %v15917_v24, %v15916_v51  ;;  %v7250_v43 = vadd.f32 %v15919_v35, %v15918_v41  ;;  %v15921_v9 = vld [vmem:[#allocation38_spill] sm:$0xff] }
 0x5f8   : > { %v7848_v36 = vpop.f32.mrf.mxu1 }
 0x5f9   : > { %v7901_v38 = vadd.f32 %v7848_v36, %v7247_v17  ;;  %v8534_v29 = vpop.f32.mrf.mxu3 }
 0x5fb   : > { %v8299_v27 = vadd.f32 %v8246_v42, %v7901_v38  ;;  %10862 = vmatmul.msk.bf16.gmra.mxu1 %vm1373_vm10, %v9464_v55  ;;  %v9435_v42 = vunpack.c.l.b16 %v9334_v12  ;;  %v11025_v38 = vld [vmem:[#allocation3 + $0x40] sm:$0xf] }
 0x5fc   : > { %v9340_v55 = vrot.slane %v11025_v38, 5 }
 0x5fd   : > { %v14886_v15 = vadd.f32 %v8532_v33, %v8299_v27  ;;  %v9465_v17 = vpack.c.b16 %v9436_v39, %v9435_v42  ;;  %v8251_v56 = vpop.f32.mrf.mxu2 }
 0x600   : > { %v7850_v50 = vpop.f32.mrf.mxu1 }
 0x601   : > { %v7902_v2 = vadd.f32 %v7850_v50, %v7248_v54  ;;  %v8537_v33 = vpop.f32.mrf.mxu3  ;;  %v10847_v54 = vrot.slane %v9256_v11, 9 }
 0x603   : > { %v8300_v58 = vadd.f32 %v8248_v30, %v7902_v2  ;;  %v9342_v30 = vrot.slane %v9340_v55, 4  ;;  %v9341_v6 = vsel %vm11800_vm1, %v10847_v54, %v9340_v55 }
 0x604   : > { %v9437_v12 = vunpack.c.l.b16 %v9341_v6 }
 0x605   : > { %v14894_v34 = vadd.f32 %v8534_v29, %v8300_v58  ;;  %v9344_v46 = vsel %vm11800_vm1, %v9342_v30, %v9343_v62  ;;  %v15920_v29 = vld [vmem:[#allocation25_spill] sm:$0xff] }
 0x606   : > { %v9438_v2 = vunpack.c.l.b16 %v9344_v46  ;;  %v7251_v58 = vadd.f32 %v15921_v9, %v15920_v29  ;;  %v11029_v29 = vld [vmem:[#allocation3 + $0x58] sm:$0xf] }
 0x607   : > { %v9354_v9 = vrot.slane %v11029_v29, 5  ;;  %v15929_v29 = vld [vmem:[#allocation14_spill] sm:$0xff] }
 0x608   : > { %v7853_v25 = vpop.f32.mrf.mxu1  ;;  %v9466_v24 = vpack.c.b16 %v9438_v2, %v9437_v12  ;;  %v11030_v12 = vld [vmem:[#allocation3 + $0x5c] sm:$0x1] }
 0x609   : > { %v7903_v44 = vadd.f32 %v7853_v25, %v7249_v45  ;;  %v11027_v45 = vld [vmem:[#allocation3 + $0x4c] sm:$0xf]  ;;  %v9257_v25 = vld [vmem:[#allocation3 + $0x48] sm:$0xe] }
 0x60a   : > { %v9347_v42 = vrot.slane %v11027_v45, 5  ;;  %v10848_v55 = vrot.slane %v9257_v25, 9  ;;  %v15927_v45 = vld [vmem:[#allocation26_spill] sm:$0xff] }
 0x60b   : > { %v8301_v36 = vadd.f32 %v8251_v56, %v7903_v44  ;;  %10863 = vmatmul.msk.bf16.gmra.mxu1 %vm1373_vm10, %v9465_v17  ;;  %v11028_v44 = vld [vmem:[#allocation3 + $0x50] sm:$0x1]  ;;  %v15922_v56 = vld [vmem:[#allocation30_spill] sm:$0xff] }
 0x60c   : > { %v9350_v17 = vrot.slane %v11028_v44, 5  ;;  %v9349_v11 = vrot.slane %v9347_v42, 4  ;;  %v9348_v41 = vsel %vm11800_vm1, %v10848_v55, %v9347_v42  ;;  %v15928_v55 = vld [vmem:[#allocation12_spill] sm:$0xff] }
 0x60d   : > { %v14899_v27 = vadd.f32 %v8537_v33, %v8301_v36  ;;  %v15923_v36 = vld [vmem:[#allocation28_spill] sm:$0xff]  ;;  %v9439_v30 = vunpack.c.l.b16 %v9348_v41 }
 0x60e   : > { %v7252_v33 = vadd.f32 %v15923_v36, %v15922_v56  ;;  %v9351_v62 = vsel %vm11800_vm1, %v9349_v11, %v9350_v17  ;;  %v9356_v17 = vrot.slane %v9354_v9, 4  ;;  %v7255_v11 = vadd.f32 %v15928_v55, %v14481_v20 }
 0x60f   : > { %v9440_v35 = vunpack.c.l.b16 %v9351_v62 }
 0x610   : > { %v7855_v16 = vpop.f32.mrf.mxu1 }
 0x611   : > { %v14903_v50 = vadd.f32 %v7855_v16, %v7250_v43  ;;  %v15924_v43 = vld [vmem:[#allocation23_spill] sm:$0xff]  ;;  %v15925_v16 = vld [vmem:[#allocation22_spill] sm:$0xff]  ;;  %v9467_v2 = vpack.c.b16 %v9440_v35, %v9439_v30  ;;  %v9259_v30 = vld [vmem:[#allocation3 + $0x60] sm:$0xe] }
 0x612   : > { %v7253_v54 = vadd.f32 %v15925_v16, %v15924_v43  ;;  %v11031_v16 = vld [vmem:[#allocation3 + $0x64] sm:$0xf] }
 0x618   : > { %v7858_v39 = vpop.f32.mrf.mxu1 }
 0x619   : > { %v14911_v51 = vadd.f32 %v7858_v39, %v7251_v58  ;;  %v9258_v58 = vld [vmem:[#allocation3 + $0x54] sm:$0xe]  ;;  %v9357_v39 = vrot.slane %v11030_v12, 5 }
 0x61a   : > { %v10849_v44 = vrot.slane %v9258_v58, 9  ;;  %v15930_v58 = vld [vmem:[#allocation18_spill] sm:$0xff] }
 0x61b   : > { %10864 = vmatmul.msk.bf16.gmra.mxu1 %vm1373_vm10, %v9466_v24  ;;  %v15926_v24 = vld [vmem:[#allocation8_spill] sm:$0xff]  ;;  %v9358_v36 = vsel %vm11800_vm1, %v9356_v17, %v9357_v39  ;;  %v7256_v12 = vadd.f32 %v15930_v58, %v15929_v29  ;;  %v10850_v39 = vrot.slane %v9259_v30, 9 }
 0x61c   : > { %v7254_v25 = vadd.f32 %v15927_v45, %v15926_v24  ;;  %v15932_v30 = vld [vmem:[#allocation4_spill] sm:$0xff] }
 0x620   : > { %v7860_v38 = vpop.f32.mrf.mxu1 }
 0x621   : > { %v14916_v40 = vadd.f32 %v7860_v38, %v7252_v33  ;;  %v9355_v33 = vsel %vm11800_vm1, %v10849_v44, %v9354_v9  ;;  %v9442_v38 = vunpack.c.l.b16 %v9358_v36  ;;  %v15931_v44 = vld [vmem:[#allocation20_spill] sm:$0xff] }
 0x622   : > { %v9441_v62 = vunpack.c.l.b16 %v9355_v33  ;;  %v7257_v17 = vadd.f32 %v15931_v44, %v14523_v4 }
 0x624   : > { %v9468_v43 = vpack.c.b16 %v9442_v38, %v9441_v62 }
 0x628   : > { %v7863_v46 = vpop.f32.mrf.mxu1 }
 0x629   : > { %v14924_v6 = vadd.f32 %v7863_v46, %v7253_v54  ;;  %v9361_v54 = vrot.slane %v11031_v16, 5  ;;  %v11032_v46 = vld [vmem:[#allocation3 + $0x68] sm:$0x1] }
 0x62b   : > { %10865 = vmatmul.msk.bf16.gmra.mxu1 %vm1373_vm10, %v9467_v2  ;;  %v9364_v2 = vrot.slane %v11032_v46, 5  ;;  %v9363_v24 = vrot.slane %v9361_v54, 4  ;;  %v15933_v46 = vld [vmem:[#allocation39_spill] sm:$0xff] }
 0x62d   : > { %v9365_v20 = vsel %vm11800_vm1, %v9363_v24, %v9364_v2  ;;  %v7258_v2 = vadd.f32 %v15933_v46, %v15932_v30  ;;  %v15934_v24 = vld [vmem:[#allocation40_spill] sm:$0xff] }
 0x630   : > { %v7865_v42 = vpop.f32.mrf.mxu1 }
 0x631   : > { %v14929_v56 = vadd.f32 %v7865_v42, %v7254_v25  ;;  %v9362_v25 = vsel %vm11800_vm1, %v10850_v39, %v9361_v54  ;;  %v9444_v42 = vunpack.c.l.b16 %v9365_v20  ;;  %v15935_v20 = vld [vmem:[#allocation41_spill] sm:$0xff] }
 0x632   : > { %v9443_v36 = vunpack.c.l.b16 %v9362_v25  ;;  %v7259_v25 = vadd.f32 %v15935_v20, %v15934_v24 }
 0x634   : > { %v9469_v55 = vpack.c.b16 %v9444_v42, %v9443_v36 }
 0x638   : > { %v7868_v41 = vpop.f32.mrf.mxu1 }
 0x639   : > { %v14937_v35 = vadd.f32 %v7868_v41, %v7255_v11  ;;  %v11033_v11 = vld [vmem:[#allocation3 + $0x70] sm:$0xf]  ;;  %v9260_v41 = vld [vmem:[#allocation3 + $0x6c] sm:$0xe] }
 0x63a   : > { %v9368_v62 = vrot.slane %v11033_v11, 5  ;;  %v10851_v29 = vrot.slane %v9260_v41, 9  ;;  %v9261_v11 = vld [vmem:[#allocation3 + $0x78] sm:$0xe]  ;;  %v11036_v41 = vld [vmem:[#allocation3 + $0x80] sm:$0x1] }
 0x63b   : > { %10866 = vmatmul.msk.bf16.gmra.mxu1 %vm1373_vm10, %v9468_v43  ;;  %v11034_v43 = vld [vmem:[#allocation3 + $0x74] sm:$0x1]  ;;  %v10852_v46 = vrot.slane %v9261_v11, 9 }
 0x63c   : > { %v9371_v16 = vrot.slane %v11034_v43, 5  ;;  %v9370_v58 = vrot.slane %v9368_v62, 4  ;;  %v9378_v43 = vrot.slane %v11036_v41, 5 }
 0x63e   : > { %v9372_v4 = vsel %vm11800_vm1, %v9370_v58, %v9371_v16  ;;  %v15936_v16 = vld [vmem:[#allocation42_spill] sm:$0xff] }
 0x63f   : > { %v9446_v39 = vunpack.c.l.b16 %v9372_v4  ;;  %v7260_v30 = vadd.f32 %v14604_v57, %v15936_v16 }
 0x640   : > { %v7870_v9 = vpop.f32.mrf.mxu1 }
 0x641   : > { %v14942_v45 = vadd.f32 %v7870_v9, %v7256_v12  ;;  %v9369_v9 = vsel %vm11800_vm1, %v10851_v29, %v9368_v62 }
 0x642   : > { %v9445_v42 = vunpack.c.l.b16 %v9369_v9  ;;  %v9221_v9 = vadd.f32 %v14638_v28, %v14606_v47 }
 0x644   : > { %v9470_v36 = vpack.c.b16 %v9446_v39, %v9445_v42 }
 0x648   : > { %v7873_v33 = vpop.f32.mrf.mxu1 }
 0x649   : > { %v14950_v38 = vadd.f32 %v7873_v33, %v7257_v17  ;;  %v11035_v33 = vld [vmem:[#allocation3 + $0x7c] sm:$0xf] }
 0x64b   : > { %10867 = vmatmul.msk.bf16.gmra.mxu1 %vm1373_vm10, %v9469_v55  ;;  %v9375_v55 = vrot.slane %v11035_v33, 5  ;;  %v11038_v33 = vld [vmem:[#allocation3 + $0x8c] sm:$0x1] }
 0x64c   : > { %v9385_v11 = vrot.slane %v11038_v33, 5 }
 0x64d   : > { %v9376_v58 = vsel %vm11800_vm1, %v10852_v46, %v9375_v55 }
 0x64e   : > { %v9447_v39 = vunpack.c.l.b16 %v9376_v58 }
 0x650   : > { %v7875_v54 = vpop.f32.mrf.mxu1 }
 0x651   : > { %v14955_v12 = vadd.f32 %v7875_v54, %v7258_v2  ;;  %v9377_v2 = vrot.slane %v9375_v55, 4  ;;  %v9222_v55 = vadd.f32 %v14660_v22, %v14629_v5 }
 0x653   : > { %v9379_v29 = vsel %vm11800_vm1, %v9377_v2, %v9378_v43  ;;  %v9223_v2 = vadd.f32 %v14688_v13, %v14650_v14 }
 0x654   : > { %v9448_v4 = vunpack.c.l.b16 %v9379_v29 }
 0x656   : > { %v9471_v57 = vpack.c.b16 %v9448_v4, %v9447_v39  ;;  %v11039_v4 = vld [vmem:[#allocation3 + $0x94] sm:$0xf]  ;;  %v9263_v39 = vld [vmem:[#allocation3 + $0x90] sm:$0xe] }
 0x657   : > { %v10854_v33 = vrot.slane %v9263_v39, 9 }
 0x658   : > { %v7878_v44 = vpop.f32.mrf.mxu1 }
 0x659   : > { %v14963_v17 = vadd.f32 %v7878_v44, %v7259_v25  ;;  %v11037_v25 = vld [vmem:[#allocation3 + $0x88] sm:$0xf]  ;;  %v14979_v44 = vpop.f32.mrf.mxu0 }
 0x65a   : > { %v9382_v42 = vrot.slane %v11037_v25, 5  ;;  %v15937_v25 = vld [vmem:[#allocation43_spill] sm:$0xff] }
 0x65b   : > { %10868 = vmatmul.msk.bf16.gmra.mxu1 %vm1373_vm10, %v9470_v36  ;;  %v9262_v36 = vld [vmem:[#allocation3 + $0x84] sm:$0xe] }
 0x65c   : > { %v10853_v43 = vrot.slane %v9262_v36, 9  ;;  %v9384_v47 = vrot.slane %v9382_v42, 4 }
 0x65e   : > { %v9386_v16 = vsel %vm11800_vm1, %v9384_v47, %v9385_v11  ;;  %v9225_v47 = vadd.f32 %v14748_v0, %v14694_v31 }
 0x660   : > { %v7880_v62 = vpop.f32.mrf.mxu1 }
 0x661   : > { %v14968_v54 = vadd.f32 %v7880_v62, %v7260_v30  ;;  %v9383_v30 = vsel %vm11800_vm1, %v10853_v43, %v9382_v42  ;;  %v9450_v62 = vunpack.c.l.b16 %v9386_v16  ;;  %v14989_v46 = vpop.f32.mrf.mxu0  ;;  %v9224_v42 = vadd.f32 %v14717_v10, %v15937_v25 }
 0x662   : > { %v9449_v29 = vunpack.c.l.b16 %v9383_v30 }
 0x664   : > { %v9472_v22 = vpack.c.b16 %v9450_v62, %v9449_v29  ;;  %v11041_v29 = vld [vmem:[#allocation3 + $0xa0] sm:$0xf] }
 0x668   : > { %v9539_v24 = vpop.f32.mrf.mxu1 }
 0x669   : > { %v14976_v20 = vadd.f32 %v9539_v24, %v9221_v9  ;;  %v9389_v9 = vrot.slane %v11039_v4, 5  ;;  %v11040_v24 = vld [vmem:[#allocation3 + $0x98] sm:$0x1]  ;;  %v11042_v4 = vld [vmem:[#allocation3 + $0xa4] sm:$0x1] }
 0x66a   : > { %v9399_v39 = vrot.slane %v11042_v4, 5 }
 0x66b   : > { %10869 = vmatmul.msk.bf16.gmra.mxu1 %vm1373_vm10, %v9471_v57  ;;  %v9392_v57 = vrot.slane %v11040_v24, 5  ;;  %v9391_v11 = vrot.slane %v9389_v9, 4 }
 0x66d   : > { %v9393_v13 = vsel %vm11800_vm1, %v9391_v11, %v9392_v57  ;;  %v9227_v11 = vadd.f32 %v14802_v32, %v14741_v8 }
 0x66e   : > { %v9452_v43 = vunpack.c.l.b16 %v9393_v13 }
 0x670   : > { %v9541_v41 = vpop.f32.mrf.mxu1 }
 0x671   : > { %v14983_v28 = vadd.f32 %v9541_v41, %v9222_v55  ;;  %v14998_v55 = vpop.f32.mrf.mxu0  ;;  %v9390_v41 = vsel %vm11800_vm1, %v10854_v33, %v9389_v9  ;;  %v9226_v9 = vadd.f32 %v14776_v3, %v14719_v26  ;;  %v11043_v3 = vld [vmem:[#allocation3 + $0xac] sm:$0xf] }
 0x672   : > { %v9451_v16 = vunpack.c.l.b16 %v9390_v41 }
 0x674   : > { %v9473_v62 = vpack.c.b16 %v9452_v43, %v9451_v16  ;;  %v9265_v16 = vld [vmem:[#allocation3 + $0xa8] sm:$0xe] }
 0x675   : > { %v10856_v4 = vrot.slane %v9265_v16, 9 }
 0x678   : > { %v9544_v58 = vpop.f32.mrf.mxu1 }
 0x679   : > { %v14993_v5 = vadd.f32 %v9544_v58, %v9223_v2  ;;  %v15010_v2 = vpop.f32.mrf.mxu0  ;;  %v9396_v58 = vrot.slane %v11041_v29, 5 }
 0x67b   : > { %10870 = vmatmul.msk.bf16.gmra.mxu1 %vm1373_vm10, %v9472_v22  ;;  %v9264_v22 = vld [vmem:[#allocation3 + $0x9c] sm:$0xe]  ;;  %v9398_v31 = vrot.slane %v9396_v58, 4 }
 0x67c   : > { %v10855_v57 = vrot.slane %v9264_v22, 9 }
 0x67d   : > { %v9400_v25 = vsel %vm11800_vm1, %v9398_v31, %v9399_v39 }
 0x67e   : > { %v9454_v33 = vunpack.c.l.b16 %v9400_v25 }
 0x680   : > { %v9546_v36 = vpop.f32.mrf.mxu1 }
 0x681   : > { %v15000_v14 = vadd.f32 %v9546_v36, %v9224_v42  ;;  %v9397_v42 = vsel %vm11800_vm1, %v10855_v57, %v9396_v58  ;;  %v9171_v36 = vpop.f32.mrf.mxu0  ;;  %v9228_v58 = vadd.f32 %v14824_v53, %v14767_v18  ;;  %v9229_v57 = vadd.f32 %v14979_v44, %v14785_v61  ;;  %v11045_v53 = vld [vmem:[#allocation3 + $0xb8] sm:$0xf] }
 0x682   : > { %v9453_v13 = vunpack.c.l.b16 %v9397_v42 }
 0x684   : > { %v9474_v26 = vpack.c.b16 %v9454_v33, %v9453_v13  ;;  %v9266_v13 = vld [vmem:[#allocation3 + $0xb4] sm:$0xe] }
 0x685   : > { %v10857_v16 = vrot.slane %v9266_v13, 9 }
 0x688   : > { %v9549_v30 = vpop.f32.mrf.mxu1 }
 0x689   : > { %v15008_v10 = vadd.f32 %v9549_v30, %v9225_v47  ;;  %v9403_v47 = vrot.slane %v11043_v3, 5  ;;  %v11044_v30 = vld [vmem:[#allocation3 + $0xb0] sm:$0x1]  ;;  %v9173_v29 = vpop.f32.mrf.mxu0  ;;  %v9230_v3 = vadd.f32 %v14989_v46, %v14808_v37  ;;  %v9417_v46 = vrot.slane %v14725_v59, 5 }
 0x68b   : > { %10871 = vmatmul.msk.bf16.gmra.mxu1 %vm1373_vm10, %v9473_v62  ;;  %v9406_v62 = vrot.slane %v11044_v30, 5  ;;  %v9405_v39 = vrot.slane %v9403_v47, 4 }
 0x68d   : > { %v9407_v32 = vsel %vm11800_vm1, %v9405_v39, %v9406_v62 }
 0x690   : > { %v9551_v24 = vpop.f32.mrf.mxu1 }
 0x691   : > { %v15015_v0 = vadd.f32 %v9551_v24, %v9226_v9  ;;  %v9404_v9 = vsel %vm11800_vm1, %v10856_v4, %v9403_v47  ;;  %v9456_v24 = vunpack.c.l.b16 %v9407_v32  ;;  %v9176_v42 = vpop.f32.mrf.mxu0  ;;  %v9231_v4 = vadd.f32 %v14998_v55, %v14826_v23 }
 0x692   : > { %v9455_v31 = vunpack.c.l.b16 %v9404_v9  ;;  %v9235_v49 = vadd.f32 %v9176_v42, %v14860_v21 }
 0x694   : > { %v9475_v18 = vpack.c.b16 %v9456_v24, %v9455_v31  ;;  %v9420_v31 = vrot.slane %v14739_v60, 5 }
 0x698   : > { %v9554_v41 = vpop.f32.mrf.mxu1 }
 0x699   : > { %v15023_v43 = vadd.f32 %v9554_v41, %v9227_v11  ;;  %v9410_v11 = vrot.slane %v11045_v53, 5  ;;  %v11046_v41 = vld [vmem:[#allocation3 + $0xbc] sm:$0x1]  ;;  %v9178_v62 = vpop.f32.mrf.mxu0 }
 0x69b   : > { %10872 = vmatmul.msk.bf16.gmra.mxu1 %vm1373_vm10, %v9474_v26  ;;  %v9413_v26 = vrot.slane %v11046_v41, 5  ;;  %v9412_v30 = vrot.slane %v9410_v11, 4 }
 0x69d   : > { %v9414_v44 = vsel %vm11800_vm1, %v9412_v30, %v9413_v26  ;;  %v9233_v26 = vadd.f32 %v9171_v36, %v14846_v1  ;;  %v15944_v1 = vld [vmem:[#allocation16_spill] sm:$0xff]  ;;  %v9236_v36 = vadd.f32 %v9178_v62, %v14868_v52 }
 0x6a0   : > { %v9556_v22 = vpop.f32.mrf.mxu1 }
 0x6a1   : > { %v15028_v8 = vadd.f32 %v9556_v22, %v9228_v58  ;;  %v9411_v58 = vsel %vm11800_vm1, %v10857_v16, %v9410_v11  ;;  %v9458_v22 = vunpack.c.l.b16 %v9414_v44  ;;  %v9181_v24 = vpop.f32.mrf.mxu0  ;;  %v9419_v11 = vrot.slane %v9417_v46, 4 }
 0x6a2   : > { %v9457_v39 = vunpack.c.l.b16 %v9411_v58 }
 0x6a3   : > { %15938 = vst [vmem:[#allocation9_spill] sm:$0xff] %v15028_v8  ;;  %v9421_v55 = vsel %vm11800_vm1, %v9419_v11, %v9420_v31 }
 0x6a4   : > { %v9476_v37 = vpack.c.b16 %v9458_v22, %v9457_v39  ;;  %v9460_v41 = vunpack.c.l.b16 %v9421_v55 }
 0x6a8   : > { %v9559_v25 = vpop.f32.mrf.mxu1 }
 0x6a9   : > { %v15036_v33 = vadd.f32 %v9559_v25, %v9229_v57  ;;  %v9267_v57 = vld [vmem:[#allocation3 + $0xc0] sm:$0xe]  ;;  %v9232_v25 = vadd.f32 %v15010_v2, %v14838_v7  ;;  %v9183_v59 = vpop.f32.mrf.mxu0  ;;  %v9234_v2 = vadd.f32 %v9173_v29, %v14855_v63  ;;  %v9237_v29 = vadd.f32 %v9181_v24, %v14873_v19 }
 0x6aa   : > { %v10858_v53 = vrot.slane %v9267_v57, 9  ;;  %v9238_v21 = vadd.f32 %v9183_v59, %v14881_v48 }
 0x6ab   : > { %10873 = vmatmul.msk.bf16.gmra.mxu1 %vm1373_vm10, %v9475_v18 }
 0x6ac   : > { %v9418_v13 = vsel %vm11800_vm1, %v10858_v53, %v9417_v46 }
 0x6b0   : > { %v9561_v47 = vpop.f32.mrf.mxu1 }
 0x6b1   : > { %v15041_v61 = vadd.f32 %v9561_v47, %v9230_v3  ;;  %v9459_v3 = vunpack.c.l.b16 %v9418_v13  ;;  %v9186_v30 = vpop.f32.mrf.mxu0 }
 0x6b2   : > { %v9239_v52 = vadd.f32 %v9186_v30, %v14886_v15 }
 0x6b3   : > { %15939 = vst [vmem:[#allocation7_spill] sm:$0xff] %v15041_v61  ;;  %v9477_v7 = vpack.c.b16 %v9460_v41, %v9459_v3  ;;  %v9722_v3 = vmul.f32 %v14983_v28, %v14983_v28 }
 0x6b5   : > { %v9754_v30 = vsel %vm1373_vm10, %v9722_v3, 0.0 }
 0x6b8   : > { %v9564_v32 = vpop.f32.mrf.mxu1 }
 0x6b9   : > { %v15049_v9 = vadd.f32 %v9564_v32, %v9231_v4  ;;  %v9188_v4 = vpop.f32.mrf.mxu0 }
 0x6ba   : > { %v9240_v24 = vadd.f32 %v9188_v4, %v14894_v34  ;;  %v9721_v34 = vmul.f32 %v14976_v20, %v14976_v20 }
 0x6bb   : > { %15940 = vst [vmem:[#allocation6_spill] sm:$0xff] %v15049_v9  ;;  %10874 = vmatmul.msk.bf16.gmra.mxu1 %vm1373_vm10, %v9476_v37 }
 0x6c0   : > { %v9566_v18 = vpop.f32.mrf.mxu1 }
 0x6c1   : > { %v15056_v23 = vadd.f32 %v9566_v18, %v9232_v25  ;;  %v9191_v37 = vpop.f32.mrf.mxu0  ;;  %v15084_v25 = vpop.f32.mrf.mxu2 }
 0x6c2   : > { %v9241_v63 = vadd.f32 %v9191_v37, %v14899_v27  ;;  %v15086_v18 = vpop.f32.mrf.mxu3 }
 0x6c3   : > { %15941 = vst [vmem:[#allocation31_spill] sm:$0xff] %v15056_v23 }
 0x6c8   : > { %v9569_v60 = vpop.f32.mrf.mxu1 }
 0x6c9   : > { %v15063_v47 = vadd.f32 %v9569_v60, %v9233_v26  ;;  %v15091_v27 = vpop.f32.mrf.mxu0  ;;  %v15093_v19 = vpop.f32.mrf.mxu2  ;;  %v9652_v60 = vsel %vm1373_vm10, %v14983_v28, 0.0 }
 0x6ca   : > { %v15096_v11 = vpop.f32.mrf.mxu3 }
 0x6cb   : > { %15942 = vst [vmem:[#allocation5_spill] sm:$0xff] %v15063_v47  ;;  %10875 = vmatmul.msk.bf16.gmra.mxu1 %vm1373_vm10, %v9477_v7  ;;  %v9723_v7 = vmul.f32 %v14993_v5, %v14993_v5 }
 0x6cd   : > { %v9756_v37 = vsel %vm1373_vm10, %v9723_v7, 0.0 }
 0x6d0   : > { %v9571_v16 = vpop.f32.mrf.mxu1 }
 0x6d1   : > { %v15067_v44 = vadd.f32 %v9571_v16, %v9234_v2  ;;  %v15100_v13 = vpop.f32.mrf.mxu0  ;;  %v15102_v41 = vpop.f32.mrf.mxu2  ;;  %v9651_v16 = vsel %vm1373_vm10, %v14976_v20, 0.0 }
 0x6d2   : > { %v15106_v26 = vpop.f32.mrf.mxu3 }
 0x6d3   : > { %15943 = vst [vmem:[#allocation13_spill] sm:$0xff] %v15067_v44 }
 0x6d8   : > { %v9574_v58 = vpop.f32.mrf.mxu1 }
 0x6d9   : > { %v15070_v22 = vadd.f32 %v9574_v58, %v9235_v49  ;;  %v15116_v2 = vpop.f32.mrf.mxu0  ;;  %v9654_v49 = vsel %vm1373_vm10, %v14993_v5, 0.0  ;;  %v9724_v58 = vmul.f32 %v15000_v14, %v15000_v14  ;;  %v15125_v4 = vpop.f32.mrf.mxu2 }
 0x6db   : > { %10876 = vmatmul.msk.bf16.gmra.mxu1 %vm1373_vm10, %v15944_v1  ;;  %v9653_v1 = vadd.f32 %v9652_v60, %v9651_v16  ;;  %v9727_v60 = vmul.f32 %v15023_v43, %v15023_v43 }
 0x6e0   : > { %v9576_v39 = vpop.f32.mrf.mxu1 }
 0x6e1   : > { %v15075_v32 = vadd.f32 %v9576_v39, %v9236_v36  ;;  %v9753_v39 = vsel %vm1373_vm10, %v9721_v34, 0.0  ;;  %v9660_v34 = vsel %vm1373_vm10, %v15015_v0, 0.0 }
 0x6e8   : > { %v9579_v46 = vpop.f32.mrf.mxu1 }
 0x6e9   : > { %v15079_v57 = vadd.f32 %v9579_v46, %v9237_v29  ;;  %v9725_v29 = vmul.f32 %v15008_v10, %v15008_v10  ;;  %v9755_v46 = vadd.f32 %v9754_v30, %v9753_v39 }
 0x6eb   : > { %v9760_v3 = vsel %vm1373_vm10, %v9725_v29, 0.0  ;;  %v9764_v29 = vsel %vm1373_vm10, %v9727_v60, 0.0 }
 0x6f0   : > { %v9581_v42 = vpop.f32.mrf.mxu1 }
 0x6f1   : > { %v15082_v31 = vadd.f32 %v9581_v42, %v9238_v21  ;;  %v9655_v21 = vadd.f32 %v9654_v49, %v9653_v1  ;;  %v9758_v42 = vsel %vm1373_vm10, %v9724_v58, 0.0  ;;  %v9662_v49 = vsel %vm1373_vm10, %v15023_v43, 0.0  ;;  %v15152_v1 = vpop.f32.mrf.mxu0 }
 0x6f2   : > { %v9728_v58 = vmul.f32 %v15028_v8, %v15028_v8 }
 0x6f8   : > { %v9584_v62 = vpop.f32.mrf.mxu1 }
 0x6f9   : > { %v15089_v53 = vadd.f32 %v9584_v62, %v9239_v52  ;;  %v9658_v52 = vsel %vm1373_vm10, %v15008_v10, 0.0  ;;  %v9726_v62 = vmul.f32 %v15015_v0, %v15015_v0 }
 0x6fb   : > { %v9762_v30 = vsel %vm1373_vm10, %v9726_v62, 0.0 }
 0x700   : > { %v9586_v48 = vpop.f32.mrf.mxu1 }
 0x701   : > { %v15098_v55 = vadd.f32 %v9586_v48, %v9240_v24  ;;  %v15140_v24 = vpop.f32.mrf.mxu3  ;;  %v9757_v48 = vadd.f32 %v9756_v37, %v9755_v46  ;;  %v9664_v46 = vsel %vm1373_vm10, %v15028_v8, 0.0  ;;  %v9731_v8 = vmul.f32 %v15049_v9, %v15049_v9 }
 0x703   : > { %v9759_v7 = vadd.f32 %v9758_v42, %v9757_v48  ;;  %v8263_v42 = vpop.f32.mrf.mxu2  ;;  %v9766_v48 = vsel %vm1373_vm10, %v9728_v58, 0.0 }
 0x705   : > { %v9761_v39 = vadd.f32 %v9760_v3, %v9759_v7  ;;  %v9730_v3 = vmul.f32 %v15041_v61, %v15041_v61 }
 0x708   : > { %v9589_v59 = vpop.f32.mrf.mxu1 }
 0x709   : > { %v15104_v15 = vadd.f32 %v9589_v59, %v9241_v63  ;;  %v9656_v63 = vsel %vm1373_vm10, %v15000_v14, 0.0 }
 0x70a   : > { %v9657_v59 = vadd.f32 %v9656_v63, %v9655_v21  ;;  %v9729_v21 = vmul.f32 %v15036_v33, %v15036_v33 }
 0x70c   : > { %v9659_v16 = vadd.f32 %v9658_v52, %v9657_v59  ;;  %v9763_v52 = vadd.f32 %v9762_v30, %v9761_v39  ;;  %v9666_v59 = vsel %vm1373_vm10, %v15036_v33, 0.0  ;;  %v9768_v60 = vsel %vm1373_vm10, %v9729_v21, 0.0  ;;  %v15171_v30 = vpop.f32.mrf.mxu3 }
 0x70d   : > { %v9770_v39 = vsel %vm1373_vm10, %v9730_v3, 0.0 }
 0x70e   : > { %v9661_v37 = vadd.f32 %v9660_v34, %v9659_v16  ;;  %v9765_v34 = vadd.f32 %v9764_v29, %v9763_v52  ;;  %v9668_v16 = vsel %vm1373_vm10, %v15041_v61, 0.0  ;;  %v9732_v29 = vmul.f32 %v15056_v23, %v15056_v23 }
 0x70f   : > { %v9672_v61 = vsel %vm1373_vm10, %v15056_v23, 0.0 }
 0x710   : > { %v15127_v36 = vpop.f32.mrf.mxu1  ;;  %v9663_v62 = vadd.f32 %v9662_v49, %v9661_v37  ;;  %v9767_v49 = vadd.f32 %v9766_v48, %v9765_v34  ;;  %v9670_v37 = vsel %vm1373_vm10, %v15049_v9, 0.0  ;;  %v9733_v48 = vmul.f32 %v15063_v47, %v15063_v47 }
 0x712   : > { %v9665_v7 = vadd.f32 %v9664_v46, %v9663_v62  ;;  %v9769_v46 = vadd.f32 %v9768_v60, %v9767_v49  ;;  %v9772_v62 = vsel %vm1373_vm10, %v9731_v8, 0.0  ;;  %v9674_v60 = vsel %vm1373_vm10, %v15063_v47, 0.0  ;;  %v8266_v49 = vpop.f32.mrf.mxu2 }
 0x713   : > { %v8302_v8 = vadd.f32 %v15084_v25, %v14903_v50  ;;  %v9776_v9 = vsel %vm1373_vm10, %v9733_v48, 0.0  ;;  %v8304_v47 = vadd.f32 %v15102_v41, %v14916_v40  ;;  %v9736_v25 = vmul.f32 %v15075_v32, %v15075_v32 }
 0x714   : > { %v9667_v58 = vadd.f32 %v9666_v59, %v9665_v7  ;;  %v15185_v59 = vpop.f32.mrf.mxu0  ;;  %v9771_v3 = vadd.f32 %v9770_v39, %v9769_v46  ;;  %v9774_v7 = vsel %vm1373_vm10, %v9732_v29, 0.0  ;;  %v9676_v39 = vsel %vm1373_vm10, %v15067_v44, 0.0  ;;  %v8552_v48 = vpop.f32.mrf.mxu3 }
 0x715   : > { %v8303_v29 = vadd.f32 %v15093_v19, %v14911_v51  ;;  %v8305_v51 = vadd.f32 %v15125_v4, %v14924_v6  ;;  %v9680_v40 = vsel %vm1373_vm10, %v15075_v32, 0.0  ;;  %v9737_v19 = vmul.f32 %v15079_v57, %v15079_v57 }
 0x716   : > { %v9669_v21 = vadd.f32 %v9668_v16, %v9667_v58  ;;  %v9734_v16 = vmul.f32 %v15067_v44, %v15067_v44  ;;  %v9773_v58 = vadd.f32 %v9772_v62, %v9771_v3  ;;  %v8588_v62 = vadd.f32 %v15086_v18, %v8302_v8 }
 0x717   : > { %v8589_v41 = vadd.f32 %v15096_v11, %v8303_v29  ;;  %v8590_v18 = vadd.f32 %v15106_v26, %v8304_v47  ;;  %v9738_v6 = vmul.f32 %v15082_v31, %v15082_v31  ;;  %v8306_v8 = vadd.f32 %v8263_v42, %v14929_v56 }
 0x718   : > { %v15154_v63 = vpop.f32.mrf.mxu1  ;;  %v9671_v34 = vadd.f32 %v9670_v37, %v9669_v21  ;;  %v9735_v37 = vmul.f32 %v15070_v22, %v15070_v22  ;;  %v9775_v46 = vadd.f32 %v9774_v7, %v9773_v58  ;;  %v9778_v50 = vsel %vm1373_vm10, %v9734_v16, 0.0 }
 0x719   : > { %v9682_v16 = vsel %vm1373_vm10, %v15079_v57, 0.0  ;;  %v8591_v11 = vadd.f32 %v15140_v24, %v8305_v51  ;;  %v9784_v29 = vsel %vm1373_vm10, %v9737_v19, 0.0  ;;  %v9684_v47 = vsel %vm1373_vm10, %v15082_v31, 0.0 }
 0x71a   : > { %v9673_v23 = vadd.f32 %v9672_v61, %v9671_v34  ;;  %v9678_v61 = vsel %vm1373_vm10, %v15070_v22, 0.0  ;;  %v9777_v3 = vadd.f32 %v9776_v9, %v9775_v46  ;;  %v9782_v9 = vsel %vm1373_vm10, %v9736_v25, 0.0 }
 0x71b   : > { %v9739_v26 = vmul.f32 %v15089_v53, %v15089_v53  ;;  %v8307_v46 = vadd.f32 %v8266_v49, %v14937_v35  ;;  %v9686_v24 = vsel %vm1373_vm10, %v15089_v53, 0.0  ;;  %v9740_v42 = vmul.f32 %v15098_v55, %v15098_v55 }
 0x71c   : > { %v9675_v21 = vadd.f32 %v9674_v60, %v9673_v23  ;;  %v9780_v23 = vsel %vm1373_vm10, %v9735_v37, 0.0  ;;  %v9779_v7 = vadd.f32 %v9778_v50, %v9777_v3  ;;  %v9206_v4 = vpop.f32.mrf.mxu0  ;;  %v9242_v37 = vadd.f32 %v15091_v27, %v8588_v62 }
 0x71d   : > { %v9786_v27 = vsel %vm1373_vm10, %v9738_v6, 0.0  ;;  %v9243_v25 = vadd.f32 %v15100_v13, %v8589_v41  ;;  %v8592_v62 = vadd.f32 %v15171_v30, %v8306_v8  ;;  %v9741_v49 = vmul.f32 %v15104_v15, %v15104_v15  ;;  %v8554_v13 = vpop.f32.mrf.mxu3 }
 0x71e   : > { %v9677_v34 = vadd.f32 %v9676_v39, %v9675_v21  ;;  %v9781_v58 = vadd.f32 %v9780_v23, %v9779_v7  ;;  %v8268_v21 = vpop.f32.mrf.mxu2  ;;  %v15233_v56 = vadd.f32 %v15127_v36, %v9242_v37  ;;  %v9788_v36 = vsel %vm1373_vm10, %v9739_v26, 0.0 }
 0x71f   : > { %v9688_v51 = vsel %vm1373_vm10, %v15098_v55, 0.0  ;;  %v15248_v23 = vadd.f32 %v15154_v63, %v9243_v25  ;;  %v8593_v19 = vadd.f32 %v8552_v48, %v8307_v46  ;;  %v9245_v63 = vadd.f32 %v15152_v1, %v8591_v11 }
 0x720   : > { %v15178_v52 = vpop.f32.mrf.mxu1  ;;  %v9679_v60 = vadd.f32 %v9678_v61, %v9677_v34  ;;  %v9783_v50 = vadd.f32 %v9782_v9, %v9781_v58  ;;  %v9742_v7 = vmul.f32 %v15233_v56, %v15233_v56  ;;  %v9690_v9 = vsel %vm1373_vm10, %v15104_v15, 0.0 }
 0x721   : > { %v9692_v48 = vsel %vm1373_vm10, %v15233_v56, 0.0  ;;  %v9694_v11 = vsel %vm1373_vm10, %v15248_v23, 0.0 }
 0x722   : > { %v9681_v39 = vadd.f32 %v9680_v40, %v9679_v60  ;;  %v9785_v3 = vadd.f32 %v9784_v29, %v9783_v50  ;;  %v9244_v40 = vadd.f32 %v15116_v2, %v8590_v18  ;;  %v9790_v60 = vsel %vm1373_vm10, %v9740_v42, 0.0 }
 0x723   : > { %v9792_v2 = vsel %vm1373_vm10, %v9741_v49, 0.0  ;;  %v9743_v18 = vmul.f32 %v15248_v23, %v15248_v23  ;;  %v9794_v1 = vsel %vm1373_vm10, %v9742_v7, 0.0  ;;  %v9247_v50 = vadd.f32 %v9206_v4, %v8593_v19 }
 0x724   : > { %v9683_v61 = vadd.f32 %v9682_v16, %v9681_v39  ;;  %v9787_v41 = vadd.f32 %v9786_v27, %v9785_v3  ;;  %v15257_v16 = vadd.f32 %v15178_v52, %v9244_v40  ;;  %v9246_v39 = vadd.f32 %v15185_v59, %v8592_v62  ;;  %v9208_v37 = vpop.f32.mrf.mxu0 }
 0x725   : > { %v8308_v52 = vadd.f32 %v8268_v21, %v14942_v45 }
 0x726   : > { %v9685_v35 = vadd.f32 %v9684_v47, %v9683_v61  ;;  %v9789_v6 = vadd.f32 %v9788_v36, %v9787_v41  ;;  %v9744_v26 = vmul.f32 %v15257_v16, %v15257_v16  ;;  %v9696_v45 = vsel %vm1373_vm10, %v15257_v16, 0.0 }
 0x727   : > { %v8594_v3 = vadd.f32 %v8554_v13, %v8308_v52 }
 0x728   : > { %v9599_v44 = vpop.f32.mrf.mxu1  ;;  %v9687_v30 = vadd.f32 %v9686_v24, %v9685_v35  ;;  %v9791_v29 = vadd.f32 %v9790_v60, %v9789_v6  ;;  %v9796_v24 = vsel %vm1373_vm10, %v9743_v18, 0.0  ;;  %v9798_v35 = vsel %vm1373_vm10, %v9744_v26, 0.0 }
 0x729   : > { %v15265_v58 = vadd.f32 %v9599_v44, %v9245_v63  ;;  %v8271_v44 = vpop.f32.mrf.mxu2  ;;  %v9248_v63 = vadd.f32 %v9208_v37, %v8594_v3 }
 0x72a   : > { %v9689_v8 = vadd.f32 %v9688_v51, %v9687_v30  ;;  %v9793_v61 = vadd.f32 %v9792_v2, %v9791_v29  ;;  %v8309_v7 = vadd.f32 %v8271_v44, %v14950_v38 }
 0x72b   : > { %v9745_v21 = vmul.f32 %v15265_v58, %v15265_v58  ;;  %v9698_v4 = vsel %vm1373_vm10, %v15265_v58, 0.0 }
 0x72c   : > { %v9691_v47 = vadd.f32 %v9690_v9, %v9689_v8  ;;  %v9795_v25 = vadd.f32 %v9794_v1, %v9793_v61  ;;  %v9211_v6 = vpop.f32.mrf.mxu0 }
 0x72d   : > { %v9800_v40 = vsel %vm1373_vm10, %v9745_v21, 0.0 }
 0x72e   : > { %v9693_v27 = vadd.f32 %v9692_v48, %v9691_v47  ;;  %v9797_v36 = vadd.f32 %v9796_v24, %v9795_v25 }
 0x730   : > { %v9601_v34 = vpop.f32.mrf.mxu1  ;;  %v9695_v62 = vadd.f32 %v9694_v11, %v9693_v27  ;;  %v9799_v13 = vadd.f32 %v9798_v35, %v9797_v36 }
 0x731   : > { %v15274_v46 = vadd.f32 %v9601_v34, %v9246_v39  ;;  %v8557_v34 = vpop.f32.mrf.mxu3  ;;  %v8273_v52 = vpop.f32.mrf.mxu2 }
 0x732   : > { %v9697_v51 = vadd.f32 %v9696_v45, %v9695_v62  ;;  %v9801_v8 = vadd.f32 %v9800_v40, %v9799_v13  ;;  %v8595_v1 = vadd.f32 %v8557_v34, %v8309_v7  ;;  %v8310_v27 = vadd.f32 %v8273_v52, %v14955_v12 }
 0x733   : > { %v9746_v49 = vmul.f32 %v15274_v46, %v15274_v46  ;;  %v9700_v19 = vsel %vm1373_vm10, %v15274_v46, 0.0 }
 0x734   : > { %v9699_v30 = vadd.f32 %v9698_v4, %v9697_v51  ;;  %v9213_v21 = vpop.f32.mrf.mxu0 }
 0x735   : > { %v9802_v60 = vsel %vm1373_vm10, %v9746_v49, 0.0 }
 0x736   : > { %v9701_v2 = vadd.f32 %v9700_v19, %v9699_v30  ;;  %v9803_v29 = vadd.f32 %v9802_v60, %v9801_v8 }
 0x738   : > { %v9604_v59 = vpop.f32.mrf.mxu1 }
 0x739   : > { %v15281_v42 = vadd.f32 %v9604_v59, %v9247_v50  ;;  %v8559_v44 = vpop.f32.mrf.mxu3  ;;  %v9249_v59 = vadd.f32 %v9211_v6, %v8595_v1  ;;  %v8276_v35 = vpop.f32.mrf.mxu2 }
 0x73a   : > { %v8596_v25 = vadd.f32 %v8559_v44, %v8310_v27  ;;  %v8311_v36 = vadd.f32 %v8276_v35, %v14963_v17 }
 0x73b   : > { %v9747_v41 = vmul.f32 %v15281_v42, %v15281_v42  ;;  %v9702_v9 = vsel %vm1373_vm10, %v15281_v42, 0.0 }
 0x73c   : > { %v9703_v47 = vadd.f32 %v9702_v9, %v9701_v2  ;;  %v9250_v12 = vadd.f32 %v9213_v21, %v8596_v25  ;;  %v9216_v7 = vpop.f32.mrf.mxu0 }
 0x73d   : > { %v9804_v18 = vsel %vm1373_vm10, %v9747_v41, 0.0 }
 0x73e   : > { %v9805_v26 = vadd.f32 %v9804_v18, %v9803_v29 }
 0x740   : > { %v9606_v48 = vpop.f32.mrf.mxu1 }
 0x741   : > { %v15298_v39 = vadd.f32 %v9606_v48, %v9248_v63  ;;  %v8562_v51 = vpop.f32.mrf.mxu3  ;;  %v8278_v63 = vpop.f32.mrf.mxu2 }
 0x742   : > { %v8597_v41 = vadd.f32 %v8562_v51, %v8311_v36  ;;  %v8312_v17 = vadd.f32 %v8278_v63, %v14968_v54 }
 0x743   : > { %v9704_v38 = vsel %vm1373_vm10, %v15298_v39, 0.0  ;;  %v9748_v11 = vmul.f32 %v15298_v39, %v15298_v39 }
 0x744   : > { %v9705_v37 = vadd.f32 %v9704_v38, %v9703_v47  ;;  %v9251_v8 = vadd.f32 %v9216_v7, %v8597_v41 }
 0x745   : > { %v9806_v50 = vsel %vm1373_vm10, %v9748_v11, 0.0  ;;  %v9218_v11 = vpop.f32.mrf.mxu0 }
 0x746   : > { %v9807_v61 = vadd.f32 %v9806_v50, %v9805_v26 }
 0x748   : > { %v9609_v24 = vpop.f32.mrf.mxu1 }
 0x749   : > { %v15306_v45 = vadd.f32 %v9609_v24, %v9249_v59  ;;  %v8564_v18 = vpop.f32.mrf.mxu3 }
 0x74a   : > { %v8598_v52 = vadd.f32 %v8564_v18, %v8312_v17 }
 0x74b   : > { %v9706_v62 = vsel %vm1373_vm10, %v15306_v45, 0.0  ;;  %v9749_v3 = vmul.f32 %v15306_v45, %v15306_v45 }
 0x74c   : > { %v9707_v4 = vadd.f32 %v9706_v62, %v9705_v37  ;;  %v9252_v37 = vadd.f32 %v9218_v11, %v8598_v52 }
 0x74d   : > { %v9808_v49 = vsel %vm1373_vm10, %v9749_v3, 0.0 }
 0x74e   : > { %v9809_v34 = vadd.f32 %v9808_v49, %v9807_v61 }
 0x750   : > { %v9611_v40 = vpop.f32.mrf.mxu1 }
 0x751   : > { %v15314_v19 = vadd.f32 %v9611_v40, %v9250_v12 }
 0x753   : > { %v9708_v13 = vsel %vm1373_vm10, %v15314_v19, 0.0  ;;  %v9750_v30 = vmul.f32 %v15314_v19, %v15314_v19 }
 0x754   : > { %v9709_v60 = vadd.f32 %v9708_v13, %v9707_v4 }
 0x755   : > { %v9810_v9 = vsel %vm1373_vm10, %v9750_v30, 0.0 }
 0x756   : > { %v9811_v6 = vadd.f32 %v9810_v9, %v9809_v34 }
 0x758   : > { %v9614_v2 = vpop.f32.mrf.mxu1 }
 0x759   : > { %v15322_v48 = vadd.f32 %v9614_v2, %v9251_v8 }
 0x75b   : > { %v9710_v29 = vsel %vm1373_vm10, %v15322_v48, 0.0  ;;  %v9751_v47 = vmul.f32 %v15322_v48, %v15322_v48 }
 0x75c   : > { %v9711_v1 = vadd.f32 %v9710_v29, %v9709_v60 }
 0x75d   : > { %v9812_v38 = vsel %vm1373_vm10, %v9751_v47, 0.0 }
 0x75e   : > { %v9813_v26 = vadd.f32 %v9812_v38, %v9811_v6 }
 0x760   : > { %v9616_v50 = vpop.f32.mrf.mxu1 }
 0x761   : > { %v15329_v54 = vadd.f32 %v9616_v50, %v9252_v37 }
 0x763   : > { %v9712_v44 = vsel %vm1373_vm10, %v15329_v54, 0.0  ;;  %v9752_v61 = vmul.f32 %v15329_v54, %v15329_v54 }
 0x764   : > { %v9713_v27 = vadd.f32 %v9712_v44, %v9711_v1 }
 0x765   : > { %v9814_v59 = vsel %vm1373_vm10, %v9752_v61, 0.0 }
 0x766   : > { %v9714_v24 = vrot.slane %v9713_v27, 4  ;;  %v9815_v21 = vadd.f32 %v9814_v59, %v9813_v26 }
 0x768   : > { %v9715_v25 = vadd.f32 %v9714_v24, %v9713_v27  ;;  %v9816_v62 = vrot.slane %v9815_v21, 4 }
 0x76a   : > { %v9716_v3 = vrot.slane %v9715_v25, 2  ;;  %v9817_v35 = vadd.f32 %v9816_v62, %v9815_v21  ;;  %v15950_v62 = vld [vmem:[#allocation13_spill] sm:$0xff] }
 0x76c   : > { %v9717_v4 = vadd.f32 %v9716_v3, %v9715_v25  ;;  %v9818_v49 = vrot.slane %v9817_v35, 2 }
 0x76e   : > { %v9718_v34 = vrot.slane %v9717_v4, 1  ;;  %v9819_v36 = vadd.f32 %v9818_v49, %v9817_v35 }
 0x770   : > { %v9719_v12 = vadd.f32 %v9718_v34, %v9717_v4  ;;  %v9820_v51 = vrot.slane %v9819_v36, 1 }
 0x772   : > { %v15336_v40 = vmul.f32 0.00390625, %v9719_v12  ;;  %v9821_v41 = vadd.f32 %v9820_v51, %v9819_v36 }
 0x774   : > { %v9822_v13 = vmul.f32 0.00390625, %v9821_v41  ;;  %v9823_v30 = vmul.f32 %v15336_v40, %v15336_v40  ;;  %v9852_v9 = vsub.f32 %v15281_v42, %v15336_v40  ;;  %v9853_v63 = vsub.f32 %v15298_v39, %v15336_v40 }
 0x775   : > { %v9854_v6 = vsub.f32 %v15306_v45, %v15336_v40  ;;  %v9855_v17 = vsub.f32 %v15314_v19, %v15336_v40  ;;  %v9856_v8 = vsub.f32 %v15322_v48, %v15336_v40  ;;  %v9857_v2 = vsub.f32 %v15329_v54, %v15336_v40  ;;  %v11050_v48 = vld [vmem:[%s11131_s21 + $0x18] sm:$0xff]  ;;  %v11052_v54 = vld [vmem:[%s11131_s21 + $0x28] sm:$0xff] }
 0x776   : > { %v9824_v7 = vsub.f32 %v9822_v13, %v9823_v30  ;;  %v9826_v1 = vsub.f32 %v14976_v20, %v15336_v40  ;;  %v9827_v38 = vsub.f32 %v14983_v28, %v15336_v40  ;;  %v9828_v11 = vsub.f32 %v14993_v5, %v15336_v40  ;;  %v15945_v20 = vld [vmem:[#allocation9_spill] sm:$0xff]  ;;  %v15946_v5 = vld [vmem:[#allocation7_spill] sm:$0xff] }
 0x777   : > { %v9829_v26 = vsub.f32 %v15000_v14, %v15336_v40  ;;  %v9830_v37 = vsub.f32 %v15008_v10, %v15336_v40  ;;  %v9831_v50 = vsub.f32 %v15015_v0, %v15336_v40  ;;  %v9832_v44 = vsub.f32 %v15023_v43, %v15336_v40  ;;  %v15947_v14 = vld [vmem:[#allocation6_spill] sm:$0xff]  ;;  %v15948_v10 = vld [vmem:[#allocation31_spill] sm:$0xff]  ;;  %v15949_v0 = vld [vmem:[#allocation5_spill] sm:$0xff] }
 0x778   : > { %v9825_v60 = vmax.f32 %v9824_v7, 0.0  ;;  %v9833_v27 = vsub.f32 %v15945_v20, %v15336_v40  ;;  %v9834_v28 = vsub.f32 %v15036_v33, %v15336_v40  ;;  %v9835_v59 = vsub.f32 %v15946_v5, %v15336_v40 }
 0x779   : > { %v9836_v24 = vsub.f32 %v15947_v14, %v15336_v40  ;;  %v9837_v21 = vsub.f32 %v15948_v10, %v15336_v40  ;;  %v9838_v25 = vsub.f32 %v15949_v0, %v15336_v40  ;;  %v9839_v3 = vsub.f32 %v15950_v62, %v15336_v40  ;;  %v11051_v10 = vld [vmem:[%s11131_s21 + $0x20] sm:$0xff] }
 0x77a   : > { %v9858_v18 = vadd.f32 1e-05, %v9825_v60  ;;  %v9840_v33 = vsub.f32 %v15070_v22, %v15336_v40  ;;  %v9841_v35 = vsub.f32 %v15075_v32, %v15336_v40  ;;  %v9842_v4 = vsub.f32 %v15079_v57, %v15336_v40  ;;  %v11055_v62 = vld [vmem:[%s11131_s21 + $0x40] sm:$0xff] }
 0x77b   : > { %v9843_v49 = vsub.f32 %v15082_v31, %v15336_v40  ;;  %v9844_v34 = vsub.f32 %v15089_v53, %v15336_v40  ;;  %v9845_v12 = vsub.f32 %v15098_v55, %v15336_v40  ;;  %v9846_v22 = vsub.f32 %v15104_v15, %v15336_v40 }
 0x77c   : > { %10989 = vrsqrt.f32 %v9858_v18  ;;  %vm9865_vm3 = vweird.f32 %v9858_v18  ;;  %v9847_v32 = vsub.f32 %v15233_v56, %v15336_v40  ;;  %v9848_v57 = vsub.f32 %v15248_v23, %v15336_v40 }
 0x77d   : > { %v9849_v31 = vsub.f32 %v15257_v16, %v15336_v40  ;;  %v9850_v53 = vsub.f32 %v15265_v58, %v15336_v40  ;;  %v9851_v51 = vsub.f32 %v15274_v46, %v15336_v40 }
 0x782   : > { %v10990_v52 = vpop.eup %10989 }
 0x783   : > { %v9860_v29 = vmul.f32 %v10990_v52, %v9858_v18  ;;  %vm9866_vm0 = vweird.f32 %v10990_v52 }
 0x784   : > { %vm9867_vm5 = vmor %vm9865_vm3, %vm9866_vm0 }
 0x785   : > { %v9861_v47 = vmul.f32 %v10990_v52, %v9860_v29 }
 0x787   : > { %v9862_v61 = vmul.f32 0.5, %v9861_v47 }
 0x789   : > { %v9863_v43 = vsub.f32 1.5, %v9862_v61 }
 0x78b   : > { %v9864_v36 = vmul.f32 %v10990_v52, %v9863_v43 }
 0x78d   : > { %v9868_v55 = vsel %vm9867_vm5, %v10990_v52, %v9864_v36 }
 0x78e   : > { %v9869_v41 = vmul.f32 %v9868_v55, %v9826_v1  ;;  %v9870_v13 = vmul.f32 %v9868_v55, %v9827_v38  ;;  %v9871_v15 = vmul.f32 %v9868_v55, %v9828_v11  ;;  %v9872_v30 = vmul.f32 %v9868_v55, %v9829_v26 }
 0x78f   : > { %v9873_v7 = vmul.f32 %v9868_v55, %v9830_v37  ;;  %v9874_v56 = vmul.f32 %v9868_v55, %v9831_v50  ;;  %v9875_v60 = vmul.f32 %v9868_v55, %v9832_v44  ;;  %v9876_v18 = vmul.f32 %v9868_v55, %v9833_v27 }
 0x790   : > { %v9877_v23 = vmul.f32 %v9868_v55, %v9834_v28  ;;  %v9878_v29 = vmul.f32 %v9868_v55, %v9835_v59  ;;  %v9879_v47 = vmul.f32 %v9868_v55, %v9836_v24  ;;  %v9880_v61 = vmul.f32 %v9868_v55, %v9837_v21  ;;  %v11048_v59 = vld [vmem:[%s11131_s21 + $0x8] sm:$0xff] }
 0x791   : > { %v9881_v16 = vmul.f32 %v9868_v55, %v9838_v25  ;;  %v9882_v20 = vmul.f32 %v9868_v55, %v9839_v3  ;;  %v9883_v58 = vmul.f32 %v9868_v55, %v9840_v33  ;;  %v9884_v5 = vmul.f32 %v9868_v55, %v9841_v35  ;;  %v11054_v25 = vld [vmem:[%s11131_s21 + $0x38] sm:$0xff]  ;;  %v11056_v33 = vld [vmem:[%s11131_s21 + $0x48] sm:$0xff] }
 0x792   : > { %v9885_v14 = vmul.f32 %v9868_v55, %v9842_v4  ;;  %v15404_v46 = vmul.f32 %v9868_v55, %v9843_v49  ;;  %v15406_v52 = vmul.f32 %v9868_v55, %v9844_v34  ;;  %v15408_v1 = vmul.f32 %v9868_v55, %v9845_v12  ;;  %v11057_v4 = vld [vmem:[%s11131_s21 + $0x50] sm:$0xff]  ;;  %v11058_v34 = vld [vmem:[%s11131_s21 + $0x58] sm:$0xff]  ;;  %v11059_v12 = vld [vmem:[%s11131_s21 + $0x60] sm:$0xff] }
 0x793   : > { %v15410_v38 = vmul.f32 %v9868_v55, %v9846_v22  ;;  %v15412_v11 = vmul.f32 %v9868_v55, %v9847_v32  ;;  %v15414_v26 = vmul.f32 %v9868_v55, %v9848_v57  ;;  %v15416_v37 = vmul.f32 %v9868_v55, %v9849_v31  ;;  %v11060_v32 = vld [vmem:[%s11131_s21 + $0x68] sm:$0xff]  ;;  %v11061_v31 = vld [vmem:[%s11131_s21 + $0x70] sm:$0xff] }
 0x794   : > { %v15418_v50 = vmul.f32 %v9868_v55, %v9850_v53  ;;  %v15420_v44 = vmul.f32 %v9868_v55, %v9851_v51  ;;  %v15425_v27 = vmul.f32 %v9868_v55, %v9852_v9  ;;  %v15430_v28 = vmul.f32 %v9868_v55, %v9853_v63  ;;  %v11047_v63 = vld [vmem:[%s11131_s21] sm:$0xff]  ;;  %v11062_v51 = vld [vmem:[%s11131_s21 + $0x78] sm:$0xff] }
 0x795   : > { %v15442_v42 = vmul.f32 %v9868_v55, %v9854_v6  ;;  %v15447_v9 = vmul.f32 %v9868_v55, %v9855_v17  ;;  %v15452_v39 = vmul.f32 %v9868_v55, %v9856_v8  ;;  %v15457_v45 = vmul.f32 %v9868_v55, %v9857_v2  ;;  %v11049_v17 = vld [vmem:[%s11131_s21 + $0x10] sm:$0xff] }
 0x796   : > { %v9901_v6 = vadd.f32 %v11047_v63, %v9869_v41  ;;  %v9902_v19 = vadd.f32 %v11048_v59, %v9870_v13  ;;  %v9903_v24 = vadd.f32 %v11049_v17, %v9871_v15  ;;  %v9904_v8 = vadd.f32 %v11050_v48, %v9872_v30  ;;  %v11053_v2 = vld [vmem:[%s11131_s21 + $0x30] sm:$0xff]  ;;  %v11063_v41 = vld [vmem:[%s11131_s21 + $0x80] sm:$0xff]  ;;  %v11064_v15 = vld [vmem:[%s11131_s21 + $0x88] sm:$0xff] }
 0x797   : > { %v9905_v21 = vadd.f32 %v11051_v10, %v9873_v7  ;;  %v9906_v40 = vadd.f32 %v11052_v54, %v9874_v56  ;;  %v9907_v0 = vadd.f32 %v11053_v2, %v9875_v60  ;;  %v9908_v43 = vadd.f32 %v11054_v25, %v9876_v18  ;;  %v11065_v7 = vld [vmem:[%s11131_s21 + $0x90] sm:$0xff]  ;;  %v11066_v60 = vld [vmem:[%s11131_s21 + $0x98] sm:$0xff]  ;;  %v11076_v63 = vld [vmem:[%s11131_s21 + $0xe8] sm:$0xff] }
 0x798   : > { %9933 = vst.msk [vmem:[%s15437_s6] sm:$0xff] %vm1373_vm10, %v9901_v6  ;;  %v9909_v3 = vadd.f32 %v11055_v62, %v9877_v23  ;;  %v9910_v35 = vadd.f32 %v11056_v33, %v9878_v29  ;;  %v9911_v49 = vadd.f32 %v11057_v4, %v9879_v47  ;;  %v9912_v36 = vadd.f32 %v11058_v34, %v9880_v61  ;;  %v11067_v23 = vld [vmem:[%s11131_s21 + $0xa0] sm:$0xff]  ;;  %v11068_v47 = vld [vmem:[%s11131_s21 + $0xa8] sm:$0xff]  ;;  %v11077_v6 = vld [vmem:[%s11131_s21 + $0xf0] sm:$0xff] }
 0x799   : > { %9934 = vst.msk [vmem:[%s15437_s6 + $0x8] sm:$0xff] %vm1373_vm10, %v9902_v19  ;;  %v9913_v22 = vadd.f32 %v11059_v12, %v9881_v16  ;;  %v9914_v57 = vadd.f32 %v11060_v32, %v9882_v20  ;;  %v9915_v53 = vadd.f32 %v11061_v31, %v9883_v58  ;;  %v9916_v55 = vadd.f32 %v11062_v51, %v9884_v5  ;;  %v11069_v16 = vld [vmem:[%s11131_s21 + $0xb0] sm:$0xff]  ;;  %v11070_v58 = vld [vmem:[%s11131_s21 + $0xb8] sm:$0xff] }
 0x79a   : > { %9935 = vst.msk [vmem:[%s15437_s6 + $0x10] sm:$0xff] %vm1373_vm10, %v9903_v24  ;;  %v9917_v13 = vadd.f32 %v11063_v41, %v9885_v14  ;;  %v9918_v30 = vadd.f32 %v11064_v15, %v15404_v46  ;;  %v9919_v56 = vadd.f32 %v11065_v7, %v15406_v52  ;;  %v9920_v18 = vadd.f32 %v11066_v60, %v15408_v1  ;;  %v11071_v14 = vld [vmem:[%s11131_s21 + $0xc0] sm:$0xff]  ;;  %v11072_v52 = vld [vmem:[%s11131_s21 + $0xc8] sm:$0xff] }
 0x79b   : > { %9936 = vst.msk [vmem:[%s15437_s6 + $0x18] sm:$0xff] %vm1373_vm10, %v9904_v8  ;;  %v9921_v29 = vadd.f32 %v11067_v23, %v15410_v38  ;;  %v9922_v61 = vadd.f32 %v11068_v47, %v15412_v11  ;;  %v9923_v20 = vadd.f32 %v11069_v16, %v15414_v26  ;;  %v9924_v5 = vadd.f32 %v11070_v58, %v15416_v37  ;;  %v11073_v38 = vld [vmem:[%s11131_s21 + $0xd0] sm:$0xff]  ;;  %v11074_v26 = vld [vmem:[%s11131_s21 + $0xd8] sm:$0xff] }
 0x79c   : > { %9937 = vst.msk [vmem:[%s15437_s6 + $0x20] sm:$0xff] %vm1373_vm10, %v9905_v21  ;;  %v9925_v46 = vadd.f32 %v11071_v14, %v15418_v50  ;;  %v9926_v1 = vadd.f32 %v11072_v52, %v15420_v44  ;;  %v9927_v11 = vadd.f32 %v11073_v38, %v15425_v27  ;;  %v9928_v37 = vadd.f32 %v11074_v26, %v15430_v28  ;;  %v11075_v50 = vld [vmem:[%s11131_s21 + $0xe0] sm:$0xff]  ;;  %v11078_v28 = vld [vmem:[%s11131_s21 + $0xf8] sm:$0xff] }
 0x79d   : > { %9938 = vst.msk [vmem:[%s15437_s6 + $0x28] sm:$0xff] %vm1373_vm10, %v9906_v40  ;;  %v9929_v44 = vadd.f32 %v11075_v50, %v15442_v42  ;;  %v9930_v27 = vadd.f32 %v11076_v63, %v15447_v9  ;;  %v9931_v59 = vadd.f32 %v11077_v6, %v15452_v39  ;;  %v9932_v19 = vadd.f32 %v11078_v28, %v15457_v45 }
 0x79e   : > { %9939 = vst.msk [vmem:[%s15437_s6 + $0x30] sm:$0xff] %vm1373_vm10, %v9907_v0 }
 0x79f   : > { %9940 = vst.msk [vmem:[%s15437_s6 + $0x38] sm:$0xff] %vm1373_vm10, %v9908_v43 }
 0x7a0   : > { %9941 = vst.msk [vmem:[%s15437_s6 + $0x40] sm:$0xff] %vm1373_vm10, %v9909_v3 }
 0x7a1   : > { %9942 = vst.msk [vmem:[%s15437_s6 + $0x48] sm:$0xff] %vm1373_vm10, %v9910_v35 }
 0x7a2   : > { %9943 = vst.msk [vmem:[%s15437_s6 + $0x50] sm:$0xff] %vm1373_vm10, %v9911_v49 }
 0x7a3   : > { %9944 = vst.msk [vmem:[%s15437_s6 + $0x58] sm:$0xff] %vm1373_vm10, %v9912_v36 }
 0x7a4   : > { %9945 = vst.msk [vmem:[%s15437_s6 + $0x60] sm:$0xff] %vm1373_vm10, %v9913_v22 }
 0x7a5   : > { %9946 = vst.msk [vmem:[%s15437_s6 + $0x68] sm:$0xff] %vm1373_vm10, %v9914_v57 }
 0x7a6   : > { %9947 = vst.msk [vmem:[%s15437_s6 + $0x70] sm:$0xff] %vm1373_vm10, %v9915_v53 }
 0x7a7   : > { %9948 = vst.msk [vmem:[%s15437_s6 + $0x78] sm:$0xff] %vm1373_vm10, %v9916_v55 }
 0x7a8   : > { %9949 = vst.msk [vmem:[%s15437_s6 + $0x80] sm:$0xff] %vm1373_vm10, %v9917_v13 }
 0x7a9   : > { %9950 = vst.msk [vmem:[%s15437_s6 + $0x88] sm:$0xff] %vm1373_vm10, %v9918_v30 }
 0x7aa   : > { %9951 = vst.msk [vmem:[%s15437_s6 + $0x90] sm:$0xff] %vm1373_vm10, %v9919_v56 }
 0x7ab   : > { %9952 = vst.msk [vmem:[%s15437_s6 + $0x98] sm:$0xff] %vm1373_vm10, %v9920_v18 }
 0x7ac   : > { %9953 = vst.msk [vmem:[%s15437_s6 + $0xa0] sm:$0xff] %vm1373_vm10, %v9921_v29 }
 0x7ad   : > { %9954 = vst.msk [vmem:[%s15437_s6 + $0xa8] sm:$0xff] %vm1373_vm10, %v9922_v61 }
 0x7ae   : > { %9955 = vst.msk [vmem:[%s15437_s6 + $0xb0] sm:$0xff] %vm1373_vm10, %v9923_v20 }
 0x7af   : > { %9956 = vst.msk [vmem:[%s15437_s6 + $0xb8] sm:$0xff] %vm1373_vm10, %v9924_v5 }
 0x7b0   : > { %9957 = vst.msk [vmem:[%s15437_s6 + $0xc0] sm:$0xff] %vm1373_vm10, %v9925_v46 }
 0x7b1   : > { %9958 = vst.msk [vmem:[%s15437_s6 + $0xc8] sm:$0xff] %vm1373_vm10, %v9926_v1 }
 0x7b2   : > { %9959 = vst.msk [vmem:[%s15437_s6 + $0xd0] sm:$0xff] %vm1373_vm10, %v9927_v11 }
 0x7b3   : > { %9960 = vst.msk [vmem:[%s15437_s6 + $0xd8] sm:$0xff] %vm1373_vm10, %v9928_v37 }
 0x7b4   : > { %9961 = vst.msk [vmem:[%s15437_s6 + $0xe0] sm:$0xff] %vm1373_vm10, %v9929_v44 }
 0x7b5   : > { %9962 = vst.msk [vmem:[%s15437_s6 + $0xe8] sm:$0xff] %vm1373_vm10, %v9930_v27 }
 0x7b6   : > { %9963 = vst.msk [vmem:[%s15437_s6 + $0xf0] sm:$0xff] %vm1373_vm10, %v9931_v59 }
 0x7b7   : > { %9964 = vst.msk [vmem:[%s15437_s6 + $0xf8] sm:$0xff] %vm1373_vm10, %v9932_v19 }
 0x7b8 PF: > { %s13_s12 = sadd.s32 1, %s11085_s12  }
 0x7b9   : > { %p10_p4 = scmp.ge.s32.totalorder %s13_s12, 4  }
 0x7bb   :  { %12 = sbr.rel (!%p10_p4) target bundleno = 1 (0x1), region = 86 }

</bundles_post_ra>
